<compile_context>
chip_gen: v5e
topology: v5e:2x2
jax: 0.10.0
libtpu: 0.0.40
codegen_flags: <defaults>
</compile_context>

<pallas_src>
import functools

import jax
import jax.numpy as jnp
import numpy as np
from jax import lax
from jax.experimental import pallas as pl
from jax.experimental.pallas import tpu as pltpu


# ----------------------------------------------------------------------------
# Small static helpers (run at trace time / param-load time only).
# ----------------------------------------------------------------------------
def _round_up(x, m):
    return ((x + m - 1) // m) * m


def _pick_row_block(rows, max_block=512):
    for cand in (512, 256, 128, 64, 32, 16, 8):
        if cand <= max_block and cand <= rows and rows % cand == 0:
            return cand
    return rows


def _pick_time_chunk(T, max_chunk=32):
    for c in range(min(T, max_chunk), 0, -1):
        if T % c == 0:
            return c
    return T


# ----------------------------------------------------------------------------
# Kernel 1: input projection for both directions.
#   gf = x @ W_ih_f^T + (b_ih_f + b_hh_f)   (and same for backward)
# One big row-tiled matmul (M = T*Bp) instead of T tiny per-step matmuls.
# ----------------------------------------------------------------------------
def _proj_kernel(x_ref, wf_ref, wb_ref, bf_ref, bb_ref, gf_ref, gb_ref):
    x = x_ref[...]
    gf_ref[...] = (jnp.dot(x, wf_ref[...], preferred_element_type=jnp.float32)
                   + bf_ref[...]).astype(gf_ref.dtype)
    gb_ref[...] = (jnp.dot(x, wb_ref[...], preferred_element_type=jnp.float32)
                   + bb_ref[...]).astype(gb_ref.dtype)


def input_projection_pallas(x_flat, wih_f_t, wih_b_t, bf, bb):
    rows, nIn = x_flat.shape
    G = wih_f_t.shape[1]  # 4 * Hp (lane-dense, multiple of 128)
    rb = _pick_row_block(rows)
    grid = (rows // rb,)
    gf, gb = pl.pallas_call(
        _proj_kernel,
        out_shape=(jax.ShapeDtypeStruct((rows, G), jnp.float32),
                   jax.ShapeDtypeStruct((rows, G), jnp.float32)),
        grid_spec=pltpu.PrefetchScalarGridSpec(
            num_scalar_prefetch=0,
            grid=grid,
            in_specs=[
                pl.BlockSpec((rb, nIn), lambda r: (r, 0)),
                pl.BlockSpec((nIn, G), lambda r: (0, 0)),
                pl.BlockSpec((nIn, G), lambda r: (0, 0)),
                pl.BlockSpec((1, G), lambda r: (0, 0)),
                pl.BlockSpec((1, G), lambda r: (0, 0)),
            ],
            out_specs=[
                pl.BlockSpec((rb, G), lambda r: (r, 0)),
                pl.BlockSpec((rb, G), lambda r: (r, 0)),
            ],
        ),
        compiler_params=pltpu.CompilerParams(
            dimension_semantics=("parallel",)),
    )(x_flat, wih_f_t, wih_b_t, bf, bb)
    return gf, gb


# ----------------------------------------------------------------------------
# Kernel 2: bidirectional recurrence over time chunks.
# Grid iterates time-chunks ("arbitrary"); inside, a fori_loop runs TC steps.
# Per step only h @ W_hh remains (input projection already folded into gf/gb).
# ----------------------------------------------------------------------------
def _make_bilstm_kernel(TC, Hp):
    def kernel(gf_ref, gb_ref, whf_ref, whb_ref,
               hf_out_ref, hb_out_ref,
               hf_s, cf_s, hb_s, cb_s):
        @pl.when(pl.program_id(0) == 0)
        def _():
            hf_s[...] = jnp.zeros_like(hf_s)
            cf_s[...] = jnp.zeros_like(cf_s)
            hb_s[...] = jnp.zeros_like(hb_s)
            cb_s[...] = jnp.zeros_like(cb_s)

        def cell(gates, c_prev):
            # gate order i, f, g, o; each block Hp wide -> 128-lane aligned
            i = jax.nn.sigmoid(gates[:, 0 * Hp:1 * Hp])
            f = jax.nn.sigmoid(gates[:, 1 * Hp:2 * Hp])
            g = jnp.tanh(gates[:, 2 * Hp:3 * Hp])
            o = jax.nn.sigmoid(gates[:, 3 * Hp:4 * Hp])
            c_new = f * c_prev + i * g
            h_new = o * jnp.tanh(c_new)
            return h_new, c_new

        def step(s, carry):
            hf, cf, hb, cb = carry
            gates_f = gf_ref[s] + jnp.dot(
                hf, whf_ref[...], preferred_element_type=jnp.float32)
            gates_b = gb_ref[TC - 1 - s] + jnp.dot(
                hb, whb_ref[...], preferred_element_type=jnp.float32)
            hf, cf = cell(gates_f, cf)
            hb, cb = cell(gates_b, cb)
            hf_out_ref[s] = hf.astype(hf_out_ref.dtype)
            hb_out_ref[TC - 1 - s] = hb.astype(hb_out_ref.dtype)
            return hf, cf, hb, cb

        carry0 = (hf_s[...], cf_s[...], hb_s[...], cb_s[...])
        hf, cf, hb, cb = lax.fori_loop(0, TC, step, carry0,
                                       unroll=bool(TC <= 16))
        hf_s[...] = hf
        cf_s[...] = cf
        hb_s[...] = hb
        cb_s[...] = cb

    return kernel


def bilstm_recurrent_pallas(gf, gb, whh_f_t, whh_b_t):
    T, Bp, G = gf.shape
    Hp = G // 4
    TC = _pick_time_chunk(T)
    NC = T // TC
    kernel = _make_bilstm_kernel(TC, Hp)

    grid_spec = pltpu.PrefetchScalarGridSpec(
        num_scalar_prefetch=0,
        grid=(NC,),
        in_specs=[
            pl.BlockSpec((TC, Bp, G), lambda c: (c, 0, 0)),           # fwd gates
            pl.BlockSpec((TC, Bp, G), lambda c: (NC - 1 - c, 0, 0)),  # bwd gates
            pl.BlockSpec((Hp, G), lambda c: (0, 0)),                  # W_hh fwd^T
            pl.BlockSpec((Hp, G), lambda c: (0, 0)),                  # W_hh bwd^T
        ],
        out_specs=[
            pl.BlockSpec((TC, Bp, Hp), lambda c: (c, 0, 0)),
            pl.BlockSpec((TC, Bp, Hp), lambda c: (NC - 1 - c, 0, 0)),
        ],
        scratch_shapes=[
            pltpu.VMEM((Bp, Hp), jnp.float32),  # h fwd carry
            pltpu.VMEM((Bp, Hp), jnp.float32),  # c fwd carry
            pltpu.VMEM((Bp, Hp), jnp.float32),  # h bwd carry
            pltpu.VMEM((Bp, Hp), jnp.float32),  # c bwd carry
        ],
    )

    h_fwd, h_bwd = pl.pallas_call(
        kernel,
        out_shape=(jax.ShapeDtypeStruct((T, Bp, Hp), jnp.float32),
                   jax.ShapeDtypeStruct((T, Bp, Hp), jnp.float32)),
        grid_spec=grid_spec,
        compiler_params=pltpu.CompilerParams(
            dimension_semantics=("arbitrary",)),  # carried state across chunks
    )(gf, gb, whh_f_t, whh_b_t)
    return h_fwd, h_bwd


# ----------------------------------------------------------------------------
# Kernel 3: embedding.  out = hf @ W_top + hb @ W_bot + b  (no concat needed).
# ----------------------------------------------------------------------------
def _embed_kernel(hf_ref, hb_ref, wt_ref, wb_ref, b_ref, out_ref):
    out_ref[...] = (
        jnp.dot(hf_ref[...], wt_ref[...], preferred_element_type=jnp.float32)
        + jnp.dot(hb_ref[...], wb_ref[...], preferred_element_type=jnp.float32)
        + b_ref[...]
    ).astype(out_ref.dtype)


def embedding_pallas(hf, hb, w_top, w_bot, b_emb_p):
    rows, Hp = hf.shape
    nOutP = w_top.shape[1]
    rb = _pick_row_block(rows)
    grid = (rows // rb,)
    out = pl.pallas_call(
        _embed_kernel,
        out_shape=jax.ShapeDtypeStruct((rows, nOutP), jnp.float32),
        grid_spec=pltpu.PrefetchScalarGridSpec(
            num_scalar_prefetch=0,
            grid=grid,
            in_specs=[
                pl.BlockSpec((rb, Hp), lambda r: (r, 0)),
                pl.BlockSpec((rb, Hp), lambda r: (r, 0)),
                pl.BlockSpec((Hp, nOutP), lambda r: (0, 0)),
                pl.BlockSpec((Hp, nOutP), lambda r: (0, 0)),
                pl.BlockSpec((1, nOutP), lambda r: (0, 0)),
            ],
            out_specs=pl.BlockSpec((rb, nOutP), lambda r: (r, 0)),
        ),
        compiler_params=pltpu.CompilerParams(
            dimension_semantics=("parallel",)),
    )(hf, hb, w_top, w_bot, b_emb_p)
    return out


# ----------------------------------------------------------------------------
# One-time (host-side) parameter preparation: transpose, gate-blocked padding
# of H -> Hp (mult. of 128), nOut -> nOutP (mult. of 128).  Padded gate columns
# are zero, so padded hidden units stay exactly 0 and results are unchanged.
# ----------------------------------------------------------------------------
def prepare_params(params, nIn, H, nOut):
    Hp = _round_up(H, 128)
    nOutP = _round_up(nOut, 128)

    def pad_gate_rows(w):
        w = np.asarray(w, np.float32)           # (4H, C)
        out = np.zeros((4 * Hp, w.shape[1]), np.float32)
        for k in range(4):
            out[k * Hp:k * Hp + H] = w[k * H:(k + 1) * H]
        return out

    def pad_gate_vec(b):
        b = np.asarray(b, np.float32)           # (4H,)
        out = np.zeros((4 * Hp,), np.float32)
        for k in range(4):
            out[k * Hp:k * Hp + H] = b[k * H:(k + 1) * H]
        return out

    wih_f = pad_gate_rows(params["w_ih_f"])     # (4Hp, nIn)
    wih_b = pad_gate_rows(params["w_ih_b"])
    whh_f = np.pad(pad_gate_rows(params["w_hh_f"]), ((0, 0), (0, Hp - H)))
    whh_b = np.pad(pad_gate_rows(params["w_hh_b"]), ((0, 0), (0, Hp - H)))

    w_emb = np.asarray(params["w_emb"], np.float32)   # (nOut, 2H)
    w_top = np.zeros((Hp, nOutP), np.float32)
    w_bot = np.zeros((Hp, nOutP), np.float32)
    w_top[:H, :nOut] = w_emb[:, :H].T
    w_bot[:H, :nOut] = w_emb[:, H:].T
    b_emb = np.zeros((1, nOutP), np.float32)
    b_emb[0, :nOut] = np.asarray(params["b_emb"], np.float32)

    return {
        "wih_f_t": jnp.asarray(wih_f.T),                    # (nIn, 4Hp)
        "wih_b_t": jnp.asarray(wih_b.T),
        "whh_f_t": jnp.asarray(whh_f.T),                    # (Hp, 4Hp)
        "whh_b_t": jnp.asarray(whh_b.T),
        "bf": jnp.asarray(pad_gate_vec(params["b_f"]).reshape(1, -1)),
        "bb": jnp.asarray(pad_gate_vec(params["b_b"]).reshape(1, -1)),
        "w_top": jnp.asarray(w_top),                        # (Hp, nOutP)
        "w_bot": jnp.asarray(w_bot),
        "b_emb": jnp.asarray(b_emb),                        # (1, nOutP)
    }


# ----------------------------------------------------------------------------
# Module-level forward (glue).  x: (T, B, nIn) float32 -> (T, B, nOut).
# ----------------------------------------------------------------------------
@functools.partial(jax.jit, static_argnames=("nOut",))
def bidirectional_lstm_forward(x, arrays, *, nOut):
    T, B, nIn = x.shape
    Hp = arrays["whh_f_t"].shape[0]
    G = arrays["whh_f_t"].shape[1]          # 4 * Hp
    nOutP = arrays["w_top"].shape[1]
    Bp = _round_up(B, 8)

    # pad batch to a full sublane group; padded rows are independent + discarded
    x_p = jnp.pad(x.astype(jnp.float32), ((0, 0), (0, Bp - B), (0, 0)))
    x_flat = x_p.reshape(T * Bp, nIn)

    # 1) hoisted input projection (both directions), one big matmul each
    gf, gb = input_projection_pallas(x_flat, arrays["wih_f_t"],
                                     arrays["wih_b_t"],
                                     arrays["bf"], arrays["bb"])
    gf = gf.reshape(T, Bp, G)
    gb = gb.reshape(T, Bp, G)

    # 2) serial bidirectional recurrence (chunked time grid, in-kernel loop)
    h_fwd, h_bwd = bilstm_recurrent_pallas(gf, gb, arrays["whh_f_t"],
                                           arrays["whh_b_t"])

    # 3) embedding without concatenating fwd/bwd halves
    out = embedding_pallas(h_fwd.reshape(T * Bp, Hp),
                           h_bwd.reshape(T * Bp, Hp),
                           arrays["w_top"], arrays["w_bot"], arrays["b_emb"])
    out = out.reshape(T, Bp, nOutP)
    return out[:, :B, :nOut]


# ----------------------------------------------------------------------------
# Pure-JAX reference (for verification only), PyTorch-layout params.
# ----------------------------------------------------------------------------
def _lstm_ref(x, w_ih, w_hh, bias, reverse=False):
    H = w_hh.shape[1]
    xs = x[::-1] if reverse else x

    def step(carry, xt):
        h, c = carry
        gates = xt @ w_ih.T + h @ w_hh.T + bias
        i = jax.nn.sigmoid(gates[:, :H])
        f = jax.nn.sigmoid(gates[:, H:2 * H])
        g = jnp.tanh(gates[:, 2 * H:3 * H])
        o = jax.nn.sigmoid(gates[:, 3 * H:])
        c = f * c + i * g
        h = o * jnp.tanh(c)
        return (h, c), h

    B = x.shape[1]
    init = (jnp.zeros((B, H), x.dtype), jnp.zeros((B, H), x.dtype))
    _, hs = jax.lax.scan(step, init, xs)
    return hs[::-1] if reverse else hs


def _reference_forward(x, p):
    hf = _lstm_ref(x, p["w_ih_f"], p["w_hh_f"], p["b_f"], reverse=False)
    hb = _lstm_ref(x, p["w_ih_b"], p["w_hh_b"], p["b_b"], reverse=True)
    rec = jnp.concatenate([hf, hb], axis=-1)
    T, B, H2 = rec.shape
    out = rec.reshape(T * B, H2) @ p["w_emb"].T + p["b_emb"]
    return out.reshape(T, B, -1)


# ----------------------------------------------------------------------------
# Deterministic parameter init (PyTorch-style U(-1/sqrt(H), 1/sqrt(H))).
# ----------------------------------------------------------------------------
def init_params(key, nIn, nHidden, nOut):
    k = 1.0 / np.sqrt(nHidden)
    keys = jax.random.split(key, 10)
    u = lambda kk, shape: jax.random.uniform(kk, shape, jnp.float32, -k, k)
    return {
        "w_ih_f": u(keys[0], (4 * nHidden, nIn)),
        "w_hh_f": u(keys[1], (4 * nHidden, nHidden)),
        "b_f":    u(keys[2], (4 * nHidden,)) + u(keys[3], (4 * nHidden,)),
        "w_ih_b": u(keys[4], (4 * nHidden, nIn)),
        "w_hh_b": u(keys[5], (4 * nHidden, nHidden)),
        "b_b":    u(keys[6], (4 * nHidden,)) + u(keys[7], (4 * nHidden,)),
        "w_emb":  u(keys[8], (nOut, 2 * nHidden)),
        "b_emb":  u(keys[9], (nOut,)),
    }


if __name__ == "__main__":
    T, B, nIn, nHidden, nOut = 8, 2, 16, 32, 10

    key = jax.random.PRNGKey(0)
    pkey, xkey = jax.random.split(key)
    params = init_params(pkey, nIn, nHidden, nOut)
    x = jax.random.normal(xkey, (T, B, nIn), jnp.float32)

    prep = prepare_params(params, nIn, nHidden, nOut)   # one-time host prep
    out = bidirectional_lstm_forward(x, prep, nOut=nOut)
    out = jax.block_until_ready(out)

    ref = jax.block_until_ready(_reference_forward(x, params))
    assert out.shape == (T, B, nOut), out.shape
    np.testing.assert_allclose(np.asarray(out), np.asarray(ref),
                               atol=1e-2, rtol=1e-2)
    print("KERNEL_OK")
</pallas_src>

<mosaic_0001>
module attributes {stable_mosaic.version = 11 : i64} {
  func.func @_embed_kernel(%arg0: i32, %arg1: memref<64x128xf32, #tpu.memory_space<vmem>>, %arg2: memref<64x128xf32, #tpu.memory_space<vmem>>, %arg3: memref<128x128xf32, #tpu.memory_space<vmem>>, %arg4: memref<128x128xf32, #tpu.memory_space<vmem>>, %arg5: memref<1x128xf32, #tpu.memory_space<vmem>>, %arg6: memref<64x128xf32, #tpu.memory_space<vmem>>) attributes {dimension_semantics = [#tpu.dimension_semantics<parallel>], iteration_bounds = array<i64: 1>, scalar_prefetch = 0 : i64, scratch_operands = 0 : i64, tpu.core_type = #tpu.core_type<tc>, window_params = [{transform_indices = @transform_0, window_bounds = array<i64: 64, 128>}, {transform_indices = @transform_1, window_bounds = array<i64: 64, 128>}, {pipeline_mode = #tpu.pipeline_mode<synchronous>, transform_indices = @transform_2, window_bounds = array<i64: 128, 128>}, {pipeline_mode = #tpu.pipeline_mode<synchronous>, transform_indices = @transform_3, window_bounds = array<i64: 128, 128>}, {pipeline_mode = #tpu.pipeline_mode<synchronous>, transform_indices = @transform_4, window_bounds = array<i64: 1, 128>}, {transform_indices = @transform_5, window_bounds = array<i64: 64, 128>}]} {
    %c0 = arith.constant 0 : index
    %c0_0 = arith.constant 0 : index
    %0 = vector.load %arg1[%c0, %c0_0] : memref<64x128xf32, #tpu.memory_space<vmem>>, vector<64x128xf32>
    %c0_1 = arith.constant 0 : index
    %c0_2 = arith.constant 0 : index
    %1 = vector.load %arg3[%c0_1, %c0_2] : memref<128x128xf32, #tpu.memory_space<vmem>>, vector<128x128xf32>
    %cst = arith.constant dense<0.000000e+00> : vector<64x128xf32>
    %2 = tpu.matmul %0, %1, %cst {dimension_numbers = #tpu.dot_dimension_numbers<[1], [0], [0], [1], [0, 0, 1, 1], [], []>} : vector<64x128xf32>, vector<128x128xf32>, vector<64x128xf32> -> vector<64x128xf32>
    %c0_3 = arith.constant 0 : index
    %c0_4 = arith.constant 0 : index
    %3 = vector.load %arg2[%c0_3, %c0_4] : memref<64x128xf32, #tpu.memory_space<vmem>>, vector<64x128xf32>
    %c0_5 = arith.constant 0 : index
    %c0_6 = arith.constant 0 : index
    %4 = vector.load %arg4[%c0_5, %c0_6] : memref<128x128xf32, #tpu.memory_space<vmem>>, vector<128x128xf32>
    %cst_7 = arith.constant dense<0.000000e+00> : vector<64x128xf32>
    %5 = tpu.matmul %3, %4, %cst_7 {dimension_numbers = #tpu.dot_dimension_numbers<[1], [0], [0], [1], [0, 0, 1, 1], [], []>} : vector<64x128xf32>, vector<128x128xf32>, vector<64x128xf32> -> vector<64x128xf32>
    %6 = arith.addf %2, %5 : vector<64x128xf32>
    %c0_8 = arith.constant 0 : index
    %c0_9 = arith.constant 0 : index
    %7 = vector.load %arg5[%c0_8, %c0_9] : memref<1x128xf32, #tpu.memory_space<vmem>>, vector<1x128xf32>
    %8 = vector.broadcast %7 : vector<1x128xf32> to vector<64x128xf32>
    %9 = arith.addf %6, %8 : vector<64x128xf32>
    %c0_10 = arith.constant 0 : index
    %c0_11 = arith.constant 0 : index
    %10 = vector.load %arg6[%c0_10, %c0_11] : memref<64x128xf32, #tpu.memory_space<vmem>>, vector<64x128xf32>
    tpu.vector_store %arg6[%c0_10, %c0_11], %9 {strides = array<i32>} : memref<64x128xf32, #tpu.memory_space<vmem>>, vector<64x128xf32>,
    return
  }
  func.func @transform_0(%arg0: i32) -> (i32, i32) {
    %c0_i32 = arith.constant 0 : i32
    %c0_i32_0 = arith.constant 0 : i32
    return %arg0, %c0_i32 : i32, i32
  }
  func.func @transform_1(%arg0: i32) -> (i32, i32) {
    %c0_i32 = arith.constant 0 : i32
    %c0_i32_0 = arith.constant 0 : i32
    return %arg0, %c0_i32 : i32, i32
  }
  func.func @transform_2(%arg0: i32) -> (i32, i32) {
    %c0_i32 = arith.constant 0 : i32
    %c0_i32_0 = arith.constant 0 : i32
    %c0_i32_1 = arith.constant 0 : i32
    return %c0_i32, %c0_i32_0 : i32, i32
  }
  func.func @transform_3(%arg0: i32) -> (i32, i32) {
    %c0_i32 = arith.constant 0 : i32
    %c0_i32_0 = arith.constant 0 : i32
    %c0_i32_1 = arith.constant 0 : i32
    return %c0_i32, %c0_i32_0 : i32, i32
  }
  func.func @transform_4(%arg0: i32) -> (i32, i32) {
    %c0_i32 = arith.constant 0 : i32
    %c0_i32_0 = arith.constant 0 : i32
    %c0_i32_1 = arith.constant 0 : i32
    return %c0_i32, %c0_i32_0 : i32, i32
  }
  func.func @transform_5(%arg0: i32) -> (i32, i32) {
    %c0_i32 = arith.constant 0 : i32
    %c0_i32_0 = arith.constant 0 : i32
    return %arg0, %c0_i32 : i32, i32
  }
}

module attributes {stable_mosaic.version = 11 : i64} {
  func.func @_proj_kernel(%arg0: i32, %arg1: memref<64x16xf32, #tpu.memory_space<vmem>>, %arg2: memref<16x512xf32, #tpu.memory_space<vmem>>, %arg3: memref<16x512xf32, #tpu.memory_space<vmem>>, %arg4: memref<1x512xf32, #tpu.memory_space<vmem>>, %arg5: memref<1x512xf32, #tpu.memory_space<vmem>>, %arg6: memref<64x512xf32, #tpu.memory_space<vmem>>, %arg7: memref<64x512xf32, #tpu.memory_space<vmem>>) attributes {dimension_semantics = [#tpu.dimension_semantics<parallel>], iteration_bounds = array<i64: 1>, scalar_prefetch = 0 : i64, scratch_operands = 0 : i64, tpu.core_type = #tpu.core_type<tc>, window_params = [{transform_indices = @transform_0, window_bounds = array<i64: 64, 16>}, {pipeline_mode = #tpu.pipeline_mode<synchronous>, transform_indices = @transform_1, window_bounds = array<i64: 16, 512>}, {pipeline_mode = #tpu.pipeline_mode<synchronous>, transform_indices = @transform_2, window_bounds = array<i64: 16, 512>}, {pipeline_mode = #tpu.pipeline_mode<synchronous>, transform_indices = @transform_3, window_bounds = array<i64: 1, 512>}, {pipeline_mode = #tpu.pipeline_mode<synchronous>, transform_indices = @transform_4, window_bounds = array<i64: 1, 512>}, {transform_indices = @transform_5, window_bounds = array<i64: 64, 512>}, {transform_indices = @transform_6, window_bounds = array<i64: 64, 512>}]} {
    %c0 = arith.constant 0 : index
    %c0_0 = arith.constant 0 : index
    %0 = vector.load %arg1[%c0, %c0_0] : memref<64x16xf32, #tpu.memory_space<vmem>>, vector<64x16xf32>
    %c0_1 = arith.constant 0 : index
    %c0_2 = arith.constant 0 : index
    %1 = vector.load %arg2[%c0_1, %c0_2] : memref<16x512xf32, #tpu.memory_space<vmem>>, vector<16x512xf32>
    %cst = arith.constant dense<0.000000e+00> : vector<64x512xf32>
    %2 = tpu.matmul %0, %1, %cst {dimension_numbers = #tpu.dot_dimension_numbers<[1], [0], [0], [1], [0, 0, 1, 1], [], []>} : vector<64x16xf32>, vector<16x512xf32>, vector<64x512xf32> -> vector<64x512xf32>
    %c0_3 = arith.constant 0 : index
    %c0_4 = arith.constant 0 : index
    %3 = vector.load %arg4[%c0_3, %c0_4] : memref<1x512xf32, #tpu.memory_space<vmem>>, vector<1x512xf32>
    %4 = vector.broadcast %3 : vector<1x512xf32> to vector<64x512xf32>
    %5 = arith.addf %2, %4 : vector<64x512xf32>
    %c0_5 = arith.constant 0 : index
    %c0_6 = arith.constant 0 : index
    %6 = vector.load %arg6[%c0_5, %c0_6] : memref<64x512xf32, #tpu.memory_space<vmem>>, vector<64x512xf32>
    tpu.vector_store %arg6[%c0_5, %c0_6], %5 {strides = array<i32>} : memref<64x512xf32, #tpu.memory_space<vmem>>, vector<64x512xf32>,
    %c0_7 = arith.constant 0 : index
    %c0_8 = arith.constant 0 : index
    %7 = vector.load %arg3[%c0_7, %c0_8] : memref<16x512xf32, #tpu.memory_space<vmem>>, vector<16x512xf32>
    %cst_9 = arith.constant dense<0.000000e+00> : vector<64x512xf32>
    %8 = tpu.matmul %0, %7, %cst_9 {dimension_numbers = #tpu.dot_dimension_numbers<[1], [0], [0], [1], [0, 0, 1, 1], [], []>} : vector<64x16xf32>, vector<16x512xf32>, vector<64x512xf32> -> vector<64x512xf32>
    %c0_10 = arith.constant 0 : index
    %c0_11 = arith.constant 0 : index
    %9 = vector.load %arg5[%c0_10, %c0_11] : memref<1x512xf32, #tpu.memory_space<vmem>>, vector<1x512xf32>
    %10 = vector.broadcast %9 : vector<1x512xf32> to vector<64x512xf32>
    %11 = arith.addf %8, %10 : vector<64x512xf32>
    %c0_12 = arith.constant 0 : index
    %c0_13 = arith.constant 0 : index
    %12 = vector.load %arg7[%c0_12, %c0_13] : memref<64x512xf32, #tpu.memory_space<vmem>>, vector<64x512xf32>
    tpu.vector_store %arg7[%c0_12, %c0_13], %11 {strides = array<i32>} : memref<64x512xf32, #tpu.memory_space<vmem>>, vector<64x512xf32>,
    return
  }
  func.func @transform_0(%arg0: i32) -> (i32, i32) {
    %c0_i32 = arith.constant 0 : i32
    %c0_i32_0 = arith.constant 0 : i32
    return %arg0, %c0_i32 : i32, i32
  }
  func.func @transform_1(%arg0: i32) -> (i32, i32) {
    %c0_i32 = arith.constant 0 : i32
    %c0_i32_0 = arith.constant 0 : i32
    %c0_i32_1 = arith.constant 0 : i32
    return %c0_i32, %c0_i32_0 : i32, i32
  }
  func.func @transform_2(%arg0: i32) -> (i32, i32) {
    %c0_i32 = arith.constant 0 : i32
    %c0_i32_0 = arith.constant 0 : i32
    %c0_i32_1 = arith.constant 0 : i32
    return %c0_i32, %c0_i32_0 : i32, i32
  }
  func.func @transform_3(%arg0: i32) -> (i32, i32) {
    %c0_i32 = arith.constant 0 : i32
    %c0_i32_0 = arith.constant 0 : i32
    %c0_i32_1 = arith.constant 0 : i32
    return %c0_i32, %c0_i32_0 : i32, i32
  }
  func.func @transform_4(%arg0: i32) -> (i32, i32) {
    %c0_i32 = arith.constant 0 : i32
    %c0_i32_0 = arith.constant 0 : i32
    %c0_i32_1 = arith.constant 0 : i32
    return %c0_i32, %c0_i32_0 : i32, i32
  }
  func.func @transform_5(%arg0: i32) -> (i32, i32) {
    %c0_i32 = arith.constant 0 : i32
    %c0_i32_0 = arith.constant 0 : i32
    return %arg0, %c0_i32 : i32, i32
  }
  func.func @transform_6(%arg0: i32) -> (i32, i32) {
    %c0_i32 = arith.constant 0 : i32
    %c0_i32_0 = arith.constant 0 : i32
    return %arg0, %c0_i32 : i32, i32
  }
}

module attributes {stable_mosaic.version = 11 : i64} {
  func.func @kernel(%arg0: i32, %arg1: memref<8x8x512xf32, #tpu.memory_space<vmem>>, %arg2: memref<8x8x512xf32, #tpu.memory_space<vmem>>, %arg3: memref<128x512xf32, #tpu.memory_space<vmem>>, %arg4: memref<128x512xf32, #tpu.memory_space<vmem>>, %arg5: memref<8x8x128xf32, #tpu.memory_space<vmem>>, %arg6: memref<8x8x128xf32, #tpu.memory_space<vmem>>, %arg7: memref<8x128xf32, #tpu.memory_space<vmem>>, %arg8: memref<8x128xf32, #tpu.memory_space<vmem>>, %arg9: memref<8x128xf32, #tpu.memory_space<vmem>>, %arg10: memref<8x128xf32, #tpu.memory_space<vmem>>) attributes {dimension_semantics = [#tpu.dimension_semantics<arbitrary>], iteration_bounds = array<i64: 1>, scalar_prefetch = 0 : i64, scratch_operands = 4 : i64, tpu.core_type = #tpu.core_type<tc>, window_params = [{transform_indices = @transform_0, window_bounds = array<i64: 8, 8, 512>}, {transform_indices = @transform_1, window_bounds = array<i64: 8, 8, 512>}, {pipeline_mode = #tpu.pipeline_mode<synchronous>, transform_indices = @transform_2, window_bounds = array<i64: 128, 512>}, {pipeline_mode = #tpu.pipeline_mode<synchronous>, transform_indices = @transform_3, window_bounds = array<i64: 128, 512>}, {transform_indices = @transform_4, window_bounds = array<i64: 8, 8, 128>}, {transform_indices = @transform_5, window_bounds = array<i64: 8, 8, 128>}]} {
    %c0_i32 = arith.constant 0 : i32
    %0 = arith.cmpi eq, %arg0, %c0_i32 : i32
    %1 = arith.extui %0 : i1 to i32
    %c0_i32_0 = arith.constant 0 : i32
    %2 = arith.cmpi ne, %1, %c0_i32_0 : i32
    scf.if %2 {
      %cst_192 = arith.constant 0.000000e+00 : f32
      %587 = vector.broadcast %cst_192 : f32 to vector<8x128xf32>
      %c0_193 = arith.constant 0 : index
      %c0_194 = arith.constant 0 : index
      %588 = vector.load %arg7[%c0_193, %c0_194] : memref<8x128xf32, #tpu.memory_space<vmem>>, vector<8x128xf32>
      tpu.vector_store %arg7[%c0_193, %c0_194], %587 {strides = array<i32>} : memref<8x128xf32, #tpu.memory_space<vmem>>, vector<8x128xf32>,
      %cst_195 = arith.constant 0.000000e+00 : f32
      %589 = vector.broadcast %cst_195 : f32 to vector<8x128xf32>
      %c0_196 = arith.constant 0 : index
      %c0_197 = arith.constant 0 : index
      %590 = vector.load %arg8[%c0_196, %c0_197] : memref<8x128xf32, #tpu.memory_space<vmem>>, vector<8x128xf32>
      tpu.vector_store %arg8[%c0_196, %c0_197], %589 {strides = array<i32>} : memref<8x128xf32, #tpu.memory_space<vmem>>, vector<8x128xf32>,
      %cst_198 = arith.constant 0.000000e+00 : f32
      %591 = vector.broadcast %cst_198 : f32 to vector<8x128xf32>
      %c0_199 = arith.constant 0 : index
      %c0_200 = arith.constant 0 : index
      %592 = vector.load %arg9[%c0_199, %c0_200] : memref<8x128xf32, #tpu.memory_space<vmem>>, vector<8x128xf32>
      tpu.vector_store %arg9[%c0_199, %c0_200], %591 {strides = array<i32>} : memref<8x128xf32, #tpu.memory_space<vmem>>, vector<8x128xf32>,
      %cst_201 = arith.constant 0.000000e+00 : f32
      %593 = vector.broadcast %cst_201 : f32 to vector<8x128xf32>
      %c0_202 = arith.constant 0 : index
      %c0_203 = arith.constant 0 : index
      %594 = vector.load %arg10[%c0_202, %c0_203] : memref<8x128xf32, #tpu.memory_space<vmem>>, vector<8x128xf32>
      tpu.vector_store %arg10[%c0_202, %c0_203], %593 {strides = array<i32>} : memref<8x128xf32, #tpu.memory_space<vmem>>, vector<8x128xf32>,
    } else {
    }
    %c0 = arith.constant 0 : index
    %c0_1 = arith.constant 0 : index
    %3 = vector.load %arg7[%c0, %c0_1] : memref<8x128xf32, #tpu.memory_space<vmem>>, vector<8x128xf32>
    %c0_2 = arith.constant 0 : index
    %c0_3 = arith.constant 0 : index
    %4 = vector.load %arg8[%c0_2, %c0_3] : memref<8x128xf32, #tpu.memory_space<vmem>>, vector<8x128xf32>
    %c0_4 = arith.constant 0 : index
    %c0_5 = arith.constant 0 : index
    %5 = vector.load %arg9[%c0_4, %c0_5] : memref<8x128xf32, #tpu.memory_space<vmem>>, vector<8x128xf32>
    %c0_6 = arith.constant 0 : index
    %c0_7 = arith.constant 0 : index
    %6 = vector.load %arg10[%c0_6, %c0_7] : memref<8x128xf32, #tpu.memory_space<vmem>>, vector<8x128xf32>
    %c0_i32_8 = arith.constant 0 : i32
    %7 = arith.index_cast %c0_i32_8 : i32 to index
    %c0_9 = arith.constant 0 : index
    %c0_10 = arith.constant 0 : index
    %8 = vector.load %arg1[%7, %c0_9, %c0_10] : memref<8x8x512xf32, #tpu.memory_space<vmem>>, vector<1x8x512xf32>
    %9 = vector.shape_cast %8 : vector<1x8x512xf32> to vector<8x512xf32>
    %c0_11 = arith.constant 0 : index
    %c0_12 = arith.constant 0 : index
    %10 = vector.load %arg3[%c0_11, %c0_12] : memref<128x512xf32, #tpu.memory_space<vmem>>, vector<128x512xf32>
    %cst = arith.constant dense<0.000000e+00> : vector<8x512xf32>
    %11 = tpu.matmul %3, %10, %cst {dimension_numbers = #tpu.dot_dimension_numbers<[1], [0], [0], [1], [0, 0, 1, 1], [], []>} : vector<8x128xf32>, vector<128x512xf32>, vector<8x512xf32> -> vector<8x512xf32>
    %12 = arith.addf %9, %11 : vector<8x512xf32>
    %c7_i32 = arith.constant 7 : i32
    %13 = arith.subi %c7_i32, %c0_i32_8 : i32
    %14 = arith.index_cast %13 : i32 to index
    %c0_13 = arith.constant 0 : index
    %c0_14 = arith.constant 0 : index
    %15 = vector.load %arg2[%14, %c0_13, %c0_14] : memref<8x8x512xf32, #tpu.memory_space<vmem>>, vector<1x8x512xf32>
    %16 = vector.shape_cast %15 : vector<1x8x512xf32> to vector<8x512xf32>
    %c0_15 = arith.constant 0 : index
    %c0_16 = arith.constant 0 : index
    %17 = vector.load %arg4[%c0_15, %c0_16] : memref<128x512xf32, #tpu.memory_space<vmem>>, vector<128x512xf32>
    %cst_17 = arith.constant dense<0.000000e+00> : vector<8x512xf32>
    %18 = tpu.matmul %5, %17, %cst_17 {dimension_numbers = #tpu.dot_dimension_numbers<[1], [0], [0], [1], [0, 0, 1, 1], [], []>} : vector<8x128xf32>, vector<128x512xf32>, vector<8x512xf32> -> vector<8x512xf32>
    %19 = arith.addf %16, %18 : vector<8x512xf32>
    %20 = vector.extract_strided_slice %12 {offsets = [0, 0], sizes = [8, 128], strides = [1, 1]} : vector<8x512xf32> to vector<8x128xf32>
    %21 = arith.negf %20 : vector<8x128xf32>
    %22 = math.exp %21 : vector<8x128xf32>
    %cst_18 = arith.constant 1.000000e+00 : f32
    %23 = vector.broadcast %cst_18 : f32 to vector<8x128xf32>
    %24 = arith.addf %23, %22 : vector<8x128xf32>
    %25 = arith.divf %23, %24 : vector<8x128xf32>
    %26 = vector.extract_strided_slice %12 {offsets = [0, 128], sizes = [8, 128], strides = [1, 1]} : vector<8x512xf32> to vector<8x128xf32>
    %27 = arith.negf %26 : vector<8x128xf32>
    %28 = math.exp %27 : vector<8x128xf32>
    %cst_19 = arith.constant 1.000000e+00 : f32
    %29 = vector.broadcast %cst_19 : f32 to vector<8x128xf32>
    %30 = arith.addf %29, %28 : vector<8x128xf32>
    %31 = arith.divf %29, %30 : vector<8x128xf32>
    %32 = vector.extract_strided_slice %12 {offsets = [0, 256], sizes = [8, 128], strides = [1, 1]} : vector<8x512xf32> to vector<8x128xf32>
    %33 = math.tanh %32 : vector<8x128xf32>
    %34 = vector.extract_strided_slice %12 {offsets = [0, 384], sizes = [8, 128], strides = [1, 1]} : vector<8x512xf32> to vector<8x128xf32>
    %35 = arith.negf %34 : vector<8x128xf32>
    %36 = math.exp %35 : vector<8x128xf32>
    %cst_20 = arith.constant 1.000000e+00 : f32
    %37 = vector.broadcast %cst_20 : f32 to vector<8x128xf32>
    %38 = arith.addf %37, %36 : vector<8x128xf32>
    %39 = arith.divf %37, %38 : vector<8x128xf32>
    %40 = arith.mulf %31, %4 : vector<8x128xf32>
    %41 = arith.mulf %25, %33 : vector<8x128xf32>
    %42 = arith.addf %40, %41 : vector<8x128xf32>
    %43 = math.tanh %42 : vector<8x128xf32>
    %44 = arith.mulf %39, %43 : vector<8x128xf32>
    %45 = vector.extract_strided_slice %19 {offsets = [0, 0], sizes = [8, 128], strides = [1, 1]} : vector<8x512xf32> to vector<8x128xf32>
    %46 = arith.negf %45 : vector<8x128xf32>
    %47 = math.exp %46 : vector<8x128xf32>
    %cst_21 = arith.constant 1.000000e+00 : f32
    %48 = vector.broadcast %cst_21 : f32 to vector<8x128xf32>
    %49 = arith.addf %48, %47 : vector<8x128xf32>
    %50 = arith.divf %48, %49 : vector<8x128xf32>
    %51 = vector.extract_strided_slice %19 {offsets = [0, 128], sizes = [8, 128], strides = [1, 1]} : vector<8x512xf32> to vector<8x128xf32>
    %52 = arith.negf %51 : vector<8x128xf32>
    %53 = math.exp %52 : vector<8x128xf32>
    %cst_22 = arith.constant 1.000000e+00 : f32
    %54 = vector.broadcast %cst_22 : f32 to vector<8x128xf32>
    %55 = arith.addf %54, %53 : vector<8x128xf32>
    %56 = arith.divf %54, %55 : vector<8x128xf32>
    %57 = vector.extract_strided_slice %19 {offsets = [0, 256], sizes = [8, 128], strides = [1, 1]} : vector<8x512xf32> to vector<8x128xf32>
    %58 = math.tanh %57 : vector<8x128xf32>
    %59 = vector.extract_strided_slice %19 {offsets = [0, 384], sizes = [8, 128], strides = [1, 1]} : vector<8x512xf32> to vector<8x128xf32>
    %60 = arith.negf %59 : vector<8x128xf32>
    %61 = math.exp %60 : vector<8x128xf32>
    %cst_23 = arith.constant 1.000000e+00 : f32
    %62 = vector.broadcast %cst_23 : f32 to vector<8x128xf32>
    %63 = arith.addf %62, %61 : vector<8x128xf32>
    %64 = arith.divf %62, %63 : vector<8x128xf32>
    %65 = arith.mulf %56, %6 : vector<8x128xf32>
    %66 = arith.mulf %50, %58 : vector<8x128xf32>
    %67 = arith.addf %65, %66 : vector<8x128xf32>
    %68 = math.tanh %67 : vector<8x128xf32>
    %69 = arith.mulf %64, %68 : vector<8x128xf32>
    %70 = arith.index_cast %c0_i32_8 : i32 to index
    %c0_24 = arith.constant 0 : index
    %c0_25 = arith.constant 0 : index
    %71 = vector.load %arg5[%70, %c0_24, %c0_25] : memref<8x8x128xf32, #tpu.memory_space<vmem>>, vector<1x8x128xf32>
    %72 = vector.shape_cast %71 : vector<1x8x128xf32> to vector<8x128xf32>
    %73 = vector.shape_cast %44 : vector<8x128xf32> to vector<1x8x128xf32>
    tpu.vector_store %arg5[%70, %c0_24, %c0_25], %73 {strides = array<i32>} : memref<8x8x128xf32, #tpu.memory_space<vmem>>, vector<1x8x128xf32>,
    %c7_i32_26 = arith.constant 7 : i32
    %74 = arith.subi %c7_i32_26, %c0_i32_8 : i32
    %75 = arith.index_cast %74 : i32 to index
    %c0_27 = arith.constant 0 : index
    %c0_28 = arith.constant 0 : index
    %76 = vector.load %arg6[%75, %c0_27, %c0_28] : memref<8x8x128xf32, #tpu.memory_space<vmem>>, vector<1x8x128xf32>
    %77 = vector.shape_cast %76 : vector<1x8x128xf32> to vector<8x128xf32>
    %78 = vector.shape_cast %69 : vector<8x128xf32> to vector<1x8x128xf32>
    tpu.vector_store %arg6[%75, %c0_27, %c0_28], %78 {strides = array<i32>} : memref<8x8x128xf32, #tpu.memory_space<vmem>>, vector<1x8x128xf32>,
    %c1_i32 = arith.constant 1 : i32
    %79 = arith.index_cast %c1_i32 : i32 to index
    %c0_29 = arith.constant 0 : index
    %c0_30 = arith.constant 0 : index
    %80 = vector.load %arg1[%79, %c0_29, %c0_30] : memref<8x8x512xf32, #tpu.memory_space<vmem>>, vector<1x8x512xf32>
    %81 = vector.shape_cast %80 : vector<1x8x512xf32> to vector<8x512xf32>
    %c0_31 = arith.constant 0 : index
    %c0_32 = arith.constant 0 : index
    %82 = vector.load %arg3[%c0_31, %c0_32] : memref<128x512xf32, #tpu.memory_space<vmem>>, vector<128x512xf32>
    %cst_33 = arith.constant dense<0.000000e+00> : vector<8x512xf32>
    %83 = tpu.matmul %44, %82, %cst_33 {dimension_numbers = #tpu.dot_dimension_numbers<[1], [0], [0], [1], [0, 0, 1, 1], [], []>} : vector<8x128xf32>, vector<128x512xf32>, vector<8x512xf32> -> vector<8x512xf32>
    %84 = arith.addf %81, %83 : vector<8x512xf32>
    %c7_i32_34 = arith.constant 7 : i32
    %85 = arith.subi %c7_i32_34, %c1_i32 : i32
    %86 = arith.index_cast %85 : i32 to index
    %c0_35 = arith.constant 0 : index
    %c0_36 = arith.constant 0 : index
    %87 = vector.load %arg2[%86, %c0_35, %c0_36] : memref<8x8x512xf32, #tpu.memory_space<vmem>>, vector<1x8x512xf32>
    %88 = vector.shape_cast %87 : vector<1x8x512xf32> to vector<8x512xf32>
    %c0_37 = arith.constant 0 : index
    %c0_38 = arith.constant 0 : index
    %89 = vector.load %arg4[%c0_37, %c0_38] : memref<128x512xf32, #tpu.memory_space<vmem>>, vector<128x512xf32>
    %cst_39 = arith.constant dense<0.000000e+00> : vector<8x512xf32>
    %90 = tpu.matmul %69, %89, %cst_39 {dimension_numbers = #tpu.dot_dimension_numbers<[1], [0], [0], [1], [0, 0, 1, 1], [], []>} : vector<8x128xf32>, vector<128x512xf32>, vector<8x512xf32> -> vector<8x512xf32>
    %91 = arith.addf %88, %90 : vector<8x512xf32>
    %92 = vector.extract_strided_slice %84 {offsets = [0, 0], sizes = [8, 128], strides = [1, 1]} : vector<8x512xf32> to vector<8x128xf32>
    %93 = arith.negf %92 : vector<8x128xf32>
    %94 = math.exp %93 : vector<8x128xf32>
    %cst_40 = arith.constant 1.000000e+00 : f32
    %95 = vector.broadcast %cst_40 : f32 to vector<8x128xf32>
    %96 = arith.addf %95, %94 : vector<8x128xf32>
    %97 = arith.divf %95, %96 : vector<8x128xf32>
    %98 = vector.extract_strided_slice %84 {offsets = [0, 128], sizes = [8, 128], strides = [1, 1]} : vector<8x512xf32> to vector<8x128xf32>
    %99 = arith.negf %98 : vector<8x128xf32>
    %100 = math.exp %99 : vector<8x128xf32>
    %cst_41 = arith.constant 1.000000e+00 : f32
    %101 = vector.broadcast %cst_41 : f32 to vector<8x128xf32>
    %102 = arith.addf %101, %100 : vector<8x128xf32>
    %103 = arith.divf %101, %102 : vector<8x128xf32>
    %104 = vector.extract_strided_slice %84 {offsets = [0, 256], sizes = [8, 128], strides = [1, 1]} : vector<8x512xf32> to vector<8x128xf32>
    %105 = math.tanh %104 : vector<8x128xf32>
    %106 = vector.extract_strided_slice %84 {offsets = [0, 384], sizes = [8, 128], strides = [1, 1]} : vector<8x512xf32> to vector<8x128xf32>
    %107 = arith.negf %106 : vector<8x128xf32>
    %108 = math.exp %107 : vector<8x128xf32>
    %cst_42 = arith.constant 1.000000e+00 : f32
    %109 = vector.broadcast %cst_42 : f32 to vector<8x128xf32>
    %110 = arith.addf %109, %108 : vector<8x128xf32>
    %111 = arith.divf %109, %110 : vector<8x128xf32>
    %112 = arith.mulf %103, %42 : vector<8x128xf32>
    %113 = arith.mulf %97, %105 : vector<8x128xf32>
    %114 = arith.addf %112, %113 : vector<8x128xf32>
    %115 = math.tanh %114 : vector<8x128xf32>
    %116 = arith.mulf %111, %115 : vector<8x128xf32>
    %117 = vector.extract_strided_slice %91 {offsets = [0, 0], sizes = [8, 128], strides = [1, 1]} : vector<8x512xf32> to vector<8x128xf32>
    %118 = arith.negf %117 : vector<8x128xf32>
    %119 = math.exp %118 : vector<8x128xf32>
    %cst_43 = arith.constant 1.000000e+00 : f32
    %120 = vector.broadcast %cst_43 : f32 to vector<8x128xf32>
    %121 = arith.addf %120, %119 : vector<8x128xf32>
    %122 = arith.divf %120, %121 : vector<8x128xf32>
    %123 = vector.extract_strided_slice %91 {offsets = [0, 128], sizes = [8, 128], strides = [1, 1]} : vector<8x512xf32> to vector<8x128xf32>
    %124 = arith.negf %123 : vector<8x128xf32>
    %125 = math.exp %124 : vector<8x128xf32>
    %cst_44 = arith.constant 1.000000e+00 : f32
    %126 = vector.broadcast %cst_44 : f32 to vector<8x128xf32>
    %127 = arith.addf %126, %125 : vector<8x128xf32>
    %128 = arith.divf %126, %127 : vector<8x128xf32>
    %129 = vector.extract_strided_slice %91 {offsets = [0, 256], sizes = [8, 128], strides = [1, 1]} : vector<8x512xf32> to vector<8x128xf32>
    %130 = math.tanh %129 : vector<8x128xf32>
    %131 = vector.extract_strided_slice %91 {offsets = [0, 384], sizes = [8, 128], strides = [1, 1]} : vector<8x512xf32> to vector<8x128xf32>
    %132 = arith.negf %131 : vector<8x128xf32>
    %133 = math.exp %132 : vector<8x128xf32>
    %cst_45 = arith.constant 1.000000e+00 : f32
    %134 = vector.broadcast %cst_45 : f32 to vector<8x128xf32>
    %135 = arith.addf %134, %133 : vector<8x128xf32>
    %136 = arith.divf %134, %135 : vector<8x128xf32>
    %137 = arith.mulf %128, %67 : vector<8x128xf32>
    %138 = arith.mulf %122, %130 : vector<8x128xf32>
    %139 = arith.addf %137, %138 : vector<8x128xf32>
    %140 = math.tanh %139 : vector<8x128xf32>
    %141 = arith.mulf %136, %140 : vector<8x128xf32>
    %142 = arith.index_cast %c1_i32 : i32 to index
    %c0_46 = arith.constant 0 : index
    %c0_47 = arith.constant 0 : index
    %143 = vector.load %arg5[%142, %c0_46, %c0_47] : memref<8x8x128xf32, #tpu.memory_space<vmem>>, vector<1x8x128xf32>
    %144 = vector.shape_cast %143 : vector<1x8x128xf32> to vector<8x128xf32>
    %145 = vector.shape_cast %116 : vector<8x128xf32> to vector<1x8x128xf32>
    tpu.vector_store %arg5[%142, %c0_46, %c0_47], %145 {strides = array<i32>} : memref<8x8x128xf32, #tpu.memory_space<vmem>>, vector<1x8x128xf32>,
    %c7_i32_48 = arith.constant 7 : i32
    %146 = arith.subi %c7_i32_48, %c1_i32 : i32
    %147 = arith.index_cast %146 : i32 to index
    %c0_49 = arith.constant 0 : index
    %c0_50 = arith.constant 0 : index
    %148 = vector.load %arg6[%147, %c0_49, %c0_50] : memref<8x8x128xf32, #tpu.memory_space<vmem>>, vector<1x8x128xf32>
    %149 = vector.shape_cast %148 : vector<1x8x128xf32> to vector<8x128xf32>
    %150 = vector.shape_cast %141 : vector<8x128xf32> to vector<1x8x128xf32>
    tpu.vector_store %arg6[%147, %c0_49, %c0_50], %150 {strides = array<i32>} : memref<8x8x128xf32, #tpu.memory_space<vmem>>, vector<1x8x128xf32>,
    %c2_i32 = arith.constant 2 : i32
    %151 = arith.index_cast %c2_i32 : i32 to index
    %c0_51 = arith.constant 0 : index
    %c0_52 = arith.constant 0 : index
    %152 = vector.load %arg1[%151, %c0_51, %c0_52] : memref<8x8x512xf32, #tpu.memory_space<vmem>>, vector<1x8x512xf32>
    %153 = vector.shape_cast %152 : vector<1x8x512xf32> to vector<8x512xf32>
    %c0_53 = arith.constant 0 : index
    %c0_54 = arith.constant 0 : index
    %154 = vector.load %arg3[%c0_53, %c0_54] : memref<128x512xf32, #tpu.memory_space<vmem>>, vector<128x512xf32>
    %cst_55 = arith.constant dense<0.000000e+00> : vector<8x512xf32>
    %155 = tpu.matmul %116, %154, %cst_55 {dimension_numbers = #tpu.dot_dimension_numbers<[1], [0], [0], [1], [0, 0, 1, 1], [], []>} : vector<8x128xf32>, vector<128x512xf32>, vector<8x512xf32> -> vector<8x512xf32>
    %156 = arith.addf %153, %155 : vector<8x512xf32>
    %c7_i32_56 = arith.constant 7 : i32
    %157 = arith.subi %c7_i32_56, %c2_i32 : i32
    %158 = arith.index_cast %157 : i32 to index
    %c0_57 = arith.constant 0 : index
    %c0_58 = arith.constant 0 : index
    %159 = vector.load %arg2[%158, %c0_57, %c0_58] : memref<8x8x512xf32, #tpu.memory_space<vmem>>, vector<1x8x512xf32>
    %160 = vector.shape_cast %159 : vector<1x8x512xf32> to vector<8x512xf32>
    %c0_59 = arith.constant 0 : index
    %c0_60 = arith.constant 0 : index
    %161 = vector.load %arg4[%c0_59, %c0_60] : memref<128x512xf32, #tpu.memory_space<vmem>>, vector<128x512xf32>
    %cst_61 = arith.constant dense<0.000000e+00> : vector<8x512xf32>
    %162 = tpu.matmul %141, %161, %cst_61 {dimension_numbers = #tpu.dot_dimension_numbers<[1], [0], [0], [1], [0, 0, 1, 1], [], []>} : vector<8x128xf32>, vector<128x512xf32>, vector<8x512xf32> -> vector<8x512xf32>
    %163 = arith.addf %160, %162 : vector<8x512xf32>
    %164 = vector.extract_strided_slice %156 {offsets = [0, 0], sizes = [8, 128], strides = [1, 1]} : vector<8x512xf32> to vector<8x128xf32>
    %165 = arith.negf %164 : vector<8x128xf32>
    %166 = math.exp %165 : vector<8x128xf32>
    %cst_62 = arith.constant 1.000000e+00 : f32
    %167 = vector.broadcast %cst_62 : f32 to vector<8x128xf32>
    %168 = arith.addf %167, %166 : vector<8x128xf32>
    %169 = arith.divf %167, %168 : vector<8x128xf32>
    %170 = vector.extract_strided_slice %156 {offsets = [0, 128], sizes = [8, 128], strides = [1, 1]} : vector<8x512xf32> to vector<8x128xf32>
    %171 = arith.negf %170 : vector<8x128xf32>
    %172 = math.exp %171 : vector<8x128xf32>
    %cst_63 = arith.constant 1.000000e+00 : f32
    %173 = vector.broadcast %cst_63 : f32 to vector<8x128xf32>
    %174 = arith.addf %173, %172 : vector<8x128xf32>
    %175 = arith.divf %173, %174 : vector<8x128xf32>
    %176 = vector.extract_strided_slice %156 {offsets = [0, 256], sizes = [8, 128], strides = [1, 1]} : vector<8x512xf32> to vector<8x128xf32>
    %177 = math.tanh %176 : vector<8x128xf32>
    %178 = vector.extract_strided_slice %156 {offsets = [0, 384], sizes = [8, 128], strides = [1, 1]} : vector<8x512xf32> to vector<8x128xf32>
    %179 = arith.negf %178 : vector<8x128xf32>
    %180 = math.exp %179 : vector<8x128xf32>
    %cst_64 = arith.constant 1.000000e+00 : f32
    %181 = vector.broadcast %cst_64 : f32 to vector<8x128xf32>
    %182 = arith.addf %181, %180 : vector<8x128xf32>
    %183 = arith.divf %181, %182 : vector<8x128xf32>
    %184 = arith.mulf %175, %114 : vector<8x128xf32>
    %185 = arith.mulf %169, %177 : vector<8x128xf32>
    %186 = arith.addf %184, %185 : vector<8x128xf32>
    %187 = math.tanh %186 : vector<8x128xf32>
    %188 = arith.mulf %183, %187 : vector<8x128xf32>
    %189 = vector.extract_strided_slice %163 {offsets = [0, 0], sizes = [8, 128], strides = [1, 1]} : vector<8x512xf32> to vector<8x128xf32>
    %190 = arith.negf %189 : vector<8x128xf32>
    %191 = math.exp %190 : vector<8x128xf32>
    %cst_65 = arith.constant 1.000000e+00 : f32
    %192 = vector.broadcast %cst_65 : f32 to vector<8x128xf32>
    %193 = arith.addf %192, %191 : vector<8x128xf32>
    %194 = arith.divf %192, %193 : vector<8x128xf32>
    %195 = vector.extract_strided_slice %163 {offsets = [0, 128], sizes = [8, 128], strides = [1, 1]} : vector<8x512xf32> to vector<8x128xf32>
    %196 = arith.negf %195 : vector<8x128xf32>
    %197 = math.exp %196 : vector<8x128xf32>
    %cst_66 = arith.constant 1.000000e+00 : f32
    %198 = vector.broadcast %cst_66 : f32 to vector<8x128xf32>
    %199 = arith.addf %198, %197 : vector<8x128xf32>
    %200 = arith.divf %198, %199 : vector<8x128xf32>
    %201 = vector.extract_strided_slice %163 {offsets = [0, 256], sizes = [8, 128], strides = [1, 1]} : vector<8x512xf32> to vector<8x128xf32>
    %202 = math.tanh %201 : vector<8x128xf32>
    %203 = vector.extract_strided_slice %163 {offsets = [0, 384], sizes = [8, 128], strides = [1, 1]} : vector<8x512xf32> to vector<8x128xf32>
    %204 = arith.negf %203 : vector<8x128xf32>
    %205 = math.exp %204 : vector<8x128xf32>
    %cst_67 = arith.constant 1.000000e+00 : f32
    %206 = vector.broadcast %cst_67 : f32 to vector<8x128xf32>
    %207 = arith.addf %206, %205 : vector<8x128xf32>
    %208 = arith.divf %206, %207 : vector<8x128xf32>
    %209 = arith.mulf %200, %139 : vector<8x128xf32>
    %210 = arith.mulf %194, %202 : vector<8x128xf32>
    %211 = arith.addf %209, %210 : vector<8x128xf32>
    %212 = math.tanh %211 : vector<8x128xf32>
    %213 = arith.mulf %208, %212 : vector<8x128xf32>
    %214 = arith.index_cast %c2_i32 : i32 to index
    %c0_68 = arith.constant 0 : index
    %c0_69 = arith.constant 0 : index
    %215 = vector.load %arg5[%214, %c0_68, %c0_69] : memref<8x8x128xf32, #tpu.memory_space<vmem>>, vector<1x8x128xf32>
    %216 = vector.shape_cast %215 : vector<1x8x128xf32> to vector<8x128xf32>
    %217 = vector.shape_cast %188 : vector<8x128xf32> to vector<1x8x128xf32>
    tpu.vector_store %arg5[%214, %c0_68, %c0_69], %217 {strides = array<i32>} : memref<8x8x128xf32, #tpu.memory_space<vmem>>, vector<1x8x128xf32>,
    %c7_i32_70 = arith.constant 7 : i32
    %218 = arith.subi %c7_i32_70, %c2_i32 : i32
    %219 = arith.index_cast %218 : i32 to index
    %c0_71 = arith.constant 0 : index
    %c0_72 = arith.constant 0 : index
    %220 = vector.load %arg6[%219, %c0_71, %c0_72] : memref<8x8x128xf32, #tpu.memory_space<vmem>>, vector<1x8x128xf32>
    %221 = vector.shape_cast %220 : vector<1x8x128xf32> to vector<8x128xf32>
    %222 = vector.shape_cast %213 : vector<8x128xf32> to vector<1x8x128xf32>
    tpu.vector_store %arg6[%219, %c0_71, %c0_72], %222 {strides = array<i32>} : memref<8x8x128xf32, #tpu.memory_space<vmem>>, vector<1x8x128xf32>,
    %c3_i32 = arith.constant 3 : i32
    %223 = arith.index_cast %c3_i32 : i32 to index
    %c0_73 = arith.constant 0 : index
    %c0_74 = arith.constant 0 : index
    %224 = vector.load %arg1[%223, %c0_73, %c0_74] : memref<8x8x512xf32, #tpu.memory_space<vmem>>, vector<1x8x512xf32>
    %225 = vector.shape_cast %224 : vector<1x8x512xf32> to vector<8x512xf32>
    %c0_75 = arith.constant 0 : index
    %c0_76 = arith.constant 0 : index
    %226 = vector.load %arg3[%c0_75, %c0_76] : memref<128x512xf32, #tpu.memory_space<vmem>>, vector<128x512xf32>
    %cst_77 = arith.constant dense<0.000000e+00> : vector<8x512xf32>
    %227 = tpu.matmul %188, %226, %cst_77 {dimension_numbers = #tpu.dot_dimension_numbers<[1], [0], [0], [1], [0, 0, 1, 1], [], []>} : vector<8x128xf32>, vector<128x512xf32>, vector<8x512xf32> -> vector<8x512xf32>
    %228 = arith.addf %225, %227 : vector<8x512xf32>
    %c7_i32_78 = arith.constant 7 : i32
    %229 = arith.subi %c7_i32_78, %c3_i32 : i32
    %230 = arith.index_cast %229 : i32 to index
    %c0_79 = arith.constant 0 : index
    %c0_80 = arith.constant 0 : index
    %231 = vector.load %arg2[%230, %c0_79, %c0_80] : memref<8x8x512xf32, #tpu.memory_space<vmem>>, vector<1x8x512xf32>
    %232 = vector.shape_cast %231 : vector<1x8x512xf32> to vector<8x512xf32>
    %c0_81 = arith.constant 0 : index
    %c0_82 = arith.constant 0 : index
    %233 = vector.load %arg4[%c0_81, %c0_82] : memref<128x512xf32, #tpu.memory_space<vmem>>, vector<128x512xf32>
    %cst_83 = arith.constant dense<0.000000e+00> : vector<8x512xf32>
    %234 = tpu.matmul %213, %233, %cst_83 {dimension_numbers = #tpu.dot_dimension_numbers<[1], [0], [0], [1], [0, 0, 1, 1], [], []>} : vector<8x128xf32>, vector<128x512xf32>, vector<8x512xf32> -> vector<8x512xf32>
    %235 = arith.addf %232, %234 : vector<8x512xf32>
    %236 = vector.extract_strided_slice %228 {offsets = [0, 0], sizes = [8, 128], strides = [1, 1]} : vector<8x512xf32> to vector<8x128xf32>
    %237 = arith.negf %236 : vector<8x128xf32>
    %238 = math.exp %237 : vector<8x128xf32>
    %cst_84 = arith.constant 1.000000e+00 : f32
    %239 = vector.broadcast %cst_84 : f32 to vector<8x128xf32>
    %240 = arith.addf %239, %238 : vector<8x128xf32>
    %241 = arith.divf %239, %240 : vector<8x128xf32>
    %242 = vector.extract_strided_slice %228 {offsets = [0, 128], sizes = [8, 128], strides = [1, 1]} : vector<8x512xf32> to vector<8x128xf32>
    %243 = arith.negf %242 : vector<8x128xf32>
    %244 = math.exp %243 : vector<8x128xf32>
    %cst_85 = arith.constant 1.000000e+00 : f32
    %245 = vector.broadcast %cst_85 : f32 to vector<8x128xf32>
    %246 = arith.addf %245, %244 : vector<8x128xf32>
    %247 = arith.divf %245, %246 : vector<8x128xf32>
    %248 = vector.extract_strided_slice %228 {offsets = [0, 256], sizes = [8, 128], strides = [1, 1]} : vector<8x512xf32> to vector<8x128xf32>
    %249 = math.tanh %248 : vector<8x128xf32>
    %250 = vector.extract_strided_slice %228 {offsets = [0, 384], sizes = [8, 128], strides = [1, 1]} : vector<8x512xf32> to vector<8x128xf32>
    %251 = arith.negf %250 : vector<8x128xf32>
    %252 = math.exp %251 : vector<8x128xf32>
    %cst_86 = arith.constant 1.000000e+00 : f32
    %253 = vector.broadcast %cst_86 : f32 to vector<8x128xf32>
    %254 = arith.addf %253, %252 : vector<8x128xf32>
    %255 = arith.divf %253, %254 : vector<8x128xf32>
    %256 = arith.mulf %247, %186 : vector<8x128xf32>
    %257 = arith.mulf %241, %249 : vector<8x128xf32>
    %258 = arith.addf %256, %257 : vector<8x128xf32>
    %259 = math.tanh %258 : vector<8x128xf32>
    %260 = arith.mulf %255, %259 : vector<8x128xf32>
    %261 = vector.extract_strided_slice %235 {offsets = [0, 0], sizes = [8, 128], strides = [1, 1]} : vector<8x512xf32> to vector<8x128xf32>
    %262 = arith.negf %261 : vector<8x128xf32>
    %263 = math.exp %262 : vector<8x128xf32>
    %cst_87 = arith.constant 1.000000e+00 : f32
    %264 = vector.broadcast %cst_87 : f32 to vector<8x128xf32>
    %265 = arith.addf %264, %263 : vector<8x128xf32>
    %266 = arith.divf %264, %265 : vector<8x128xf32>
    %267 = vector.extract_strided_slice %235 {offsets = [0, 128], sizes = [8, 128], strides = [1, 1]} : vector<8x512xf32> to vector<8x128xf32>
    %268 = arith.negf %267 : vector<8x128xf32>
    %269 = math.exp %268 : vector<8x128xf32>
    %cst_88 = arith.constant 1.000000e+00 : f32
    %270 = vector.broadcast %cst_88 : f32 to vector<8x128xf32>
    %271 = arith.addf %270, %269 : vector<8x128xf32>
    %272 = arith.divf %270, %271 : vector<8x128xf32>
    %273 = vector.extract_strided_slice %235 {offsets = [0, 256], sizes = [8, 128], strides = [1, 1]} : vector<8x512xf32> to vector<8x128xf32>
    %274 = math.tanh %273 : vector<8x128xf32>
    %275 = vector.extract_strided_slice %235 {offsets = [0, 384], sizes = [8, 128], strides = [1, 1]} : vector<8x512xf32> to vector<8x128xf32>
    %276 = arith.negf %275 : vector<8x128xf32>
    %277 = math.exp %276 : vector<8x128xf32>
    %cst_89 = arith.constant 1.000000e+00 : f32
    %278 = vector.broadcast %cst_89 : f32 to vector<8x128xf32>
    %279 = arith.addf %278, %277 : vector<8x128xf32>
    %280 = arith.divf %278, %279 : vector<8x128xf32>
    %281 = arith.mulf %272, %211 : vector<8x128xf32>
    %282 = arith.mulf %266, %274 : vector<8x128xf32>
    %283 = arith.addf %281, %282 : vector<8x128xf32>
    %284 = math.tanh %283 : vector<8x128xf32>
    %285 = arith.mulf %280, %284 : vector<8x128xf32>
    %286 = arith.index_cast %c3_i32 : i32 to index
    %c0_90 = arith.constant 0 : index
    %c0_91 = arith.constant 0 : index
    %287 = vector.load %arg5[%286, %c0_90, %c0_91] : memref<8x8x128xf32, #tpu.memory_space<vmem>>, vector<1x8x128xf32>
    %288 = vector.shape_cast %287 : vector<1x8x128xf32> to vector<8x128xf32>
    %289 = vector.shape_cast %260 : vector<8x128xf32> to vector<1x8x128xf32>
    tpu.vector_store %arg5[%286, %c0_90, %c0_91], %289 {strides = array<i32>} : memref<8x8x128xf32, #tpu.memory_space<vmem>>, vector<1x8x128xf32>,
    %c7_i32_92 = arith.constant 7 : i32
    %290 = arith.subi %c7_i32_92, %c3_i32 : i32
    %291 = arith.index_cast %290 : i32 to index
    %c0_93 = arith.constant 0 : index
    %c0_94 = arith.constant 0 : index
    %292 = vector.load %arg6[%291, %c0_93, %c0_94] : memref<8x8x128xf32, #tpu.memory_space<vmem>>, vector<1x8x128xf32>
    %293 = vector.shape_cast %292 : vector<1x8x128xf32> to vector<8x128xf32>
    %294 = vector.shape_cast %285 : vector<8x128xf32> to vector<1x8x128xf32>
    tpu.vector_store %arg6[%291, %c0_93, %c0_94], %294 {strides = array<i32>} : memref<8x8x128xf32, #tpu.memory_space<vmem>>, vector<1x8x128xf32>,
    %c4_i32 = arith.constant 4 : i32
    %295 = arith.index_cast %c4_i32 : i32 to index
    %c0_95 = arith.constant 0 : index
    %c0_96 = arith.constant 0 : index
    %296 = vector.load %arg1[%295, %c0_95, %c0_96] : memref<8x8x512xf32, #tpu.memory_space<vmem>>, vector<1x8x512xf32>
    %297 = vector.shape_cast %296 : vector<1x8x512xf32> to vector<8x512xf32>
    %c0_97 = arith.constant 0 : index
    %c0_98 = arith.constant 0 : index
    %298 = vector.load %arg3[%c0_97, %c0_98] : memref<128x512xf32, #tpu.memory_space<vmem>>, vector<128x512xf32>
    %cst_99 = arith.constant dense<0.000000e+00> : vector<8x512xf32>
    %299 = tpu.matmul %260, %298, %cst_99 {dimension_numbers = #tpu.dot_dimension_numbers<[1], [0], [0], [1], [0, 0, 1, 1], [], []>} : vector<8x128xf32>, vector<128x512xf32>, vector<8x512xf32> -> vector<8x512xf32>
    %300 = arith.addf %297, %299 : vector<8x512xf32>
    %c7_i32_100 = arith.constant 7 : i32
    %301 = arith.subi %c7_i32_100, %c4_i32 : i32
    %302 = arith.index_cast %301 : i32 to index
    %c0_101 = arith.constant 0 : index
    %c0_102 = arith.constant 0 : index
    %303 = vector.load %arg2[%302, %c0_101, %c0_102] : memref<8x8x512xf32, #tpu.memory_space<vmem>>, vector<1x8x512xf32>
    %304 = vector.shape_cast %303 : vector<1x8x512xf32> to vector<8x512xf32>
    %c0_103 = arith.constant 0 : index
    %c0_104 = arith.constant 0 : index
    %305 = vector.load %arg4[%c0_103, %c0_104] : memref<128x512xf32, #tpu.memory_space<vmem>>, vector<128x512xf32>
    %cst_105 = arith.constant dense<0.000000e+00> : vector<8x512xf32>
    %306 = tpu.matmul %285, %305, %cst_105 {dimension_numbers = #tpu.dot_dimension_numbers<[1], [0], [0], [1], [0, 0, 1, 1], [], []>} : vector<8x128xf32>, vector<128x512xf32>, vector<8x512xf32> -> vector<8x512xf32>
    %307 = arith.addf %304, %306 : vector<8x512xf32>
    %308 = vector.extract_strided_slice %300 {offsets = [0, 0], sizes = [8, 128], strides = [1, 1]} : vector<8x512xf32> to vector<8x128xf32>
    %309 = arith.negf %308 : vector<8x128xf32>
    %310 = math.exp %309 : vector<8x128xf32>
    %cst_106 = arith.constant 1.000000e+00 : f32
    %311 = vector.broadcast %cst_106 : f32 to vector<8x128xf32>
    %312 = arith.addf %311, %310 : vector<8x128xf32>
    %313 = arith.divf %311, %312 : vector<8x128xf32>
    %314 = vector.extract_strided_slice %300 {offsets = [0, 128], sizes = [8, 128], strides = [1, 1]} : vector<8x512xf32> to vector<8x128xf32>
    %315 = arith.negf %314 : vector<8x128xf32>
    %316 = math.exp %315 : vector<8x128xf32>
    %cst_107 = arith.constant 1.000000e+00 : f32
    %317 = vector.broadcast %cst_107 : f32 to vector<8x128xf32>
    %318 = arith.addf %317, %316 : vector<8x128xf32>
    %319 = arith.divf %317, %318 : vector<8x128xf32>
    %320 = vector.extract_strided_slice %300 {offsets = [0, 256], sizes = [8, 128], strides = [1, 1]} : vector<8x512xf32> to vector<8x128xf32>
    %321 = math.tanh %320 : vector<8x128xf32>
    %322 = vector.extract_strided_slice %300 {offsets = [0, 384], sizes = [8, 128], strides = [1, 1]} : vector<8x512xf32> to vector<8x128xf32>
    %323 = arith.negf %322 : vector<8x128xf32>
    %324 = math.exp %323 : vector<8x128xf32>
    %cst_108 = arith.constant 1.000000e+00 : f32
    %325 = vector.broadcast %cst_108 : f32 to vector<8x128xf32>
    %326 = arith.addf %325, %324 : vector<8x128xf32>
    %327 = arith.divf %325, %326 : vector<8x128xf32>
    %328 = arith.mulf %319, %258 : vector<8x128xf32>
    %329 = arith.mulf %313, %321 : vector<8x128xf32>
    %330 = arith.addf %328, %329 : vector<8x128xf32>
    %331 = math.tanh %330 : vector<8x128xf32>
    %332 = arith.mulf %327, %331 : vector<8x128xf32>
    %333 = vector.extract_strided_slice %307 {offsets = [0, 0], sizes = [8, 128], strides = [1, 1]} : vector<8x512xf32> to vector<8x128xf32>
    %334 = arith.negf %333 : vector<8x128xf32>
    %335 = math.exp %334 : vector<8x128xf32>
    %cst_109 = arith.constant 1.000000e+00 : f32
    %336 = vector.broadcast %cst_109 : f32 to vector<8x128xf32>
    %337 = arith.addf %336, %335 : vector<8x128xf32>
    %338 = arith.divf %336, %337 : vector<8x128xf32>
    %339 = vector.extract_strided_slice %307 {offsets = [0, 128], sizes = [8, 128], strides = [1, 1]} : vector<8x512xf32> to vector<8x128xf32>
    %340 = arith.negf %339 : vector<8x128xf32>
    %341 = math.exp %340 : vector<8x128xf32>
    %cst_110 = arith.constant 1.000000e+00 : f32
    %342 = vector.broadcast %cst_110 : f32 to vector<8x128xf32>
    %343 = arith.addf %342, %341 : vector<8x128xf32>
    %344 = arith.divf %342, %343 : vector<8x128xf32>
    %345 = vector.extract_strided_slice %307 {offsets = [0, 256], sizes = [8, 128], strides = [1, 1]} : vector<8x512xf32> to vector<8x128xf32>
    %346 = math.tanh %345 : vector<8x128xf32>
    %347 = vector.extract_strided_slice %307 {offsets = [0, 384], sizes = [8, 128], strides = [1, 1]} : vector<8x512xf32> to vector<8x128xf32>
    %348 = arith.negf %347 : vector<8x128xf32>
    %349 = math.exp %348 : vector<8x128xf32>
    %cst_111 = arith.constant 1.000000e+00 : f32
    %350 = vector.broadcast %cst_111 : f32 to vector<8x128xf32>
    %351 = arith.addf %350, %349 : vector<8x128xf32>
    %352 = arith.divf %350, %351 : vector<8x128xf32>
    %353 = arith.mulf %344, %283 : vector<8x128xf32>
    %354 = arith.mulf %338, %346 : vector<8x128xf32>
    %355 = arith.addf %353, %354 : vector<8x128xf32>
    %356 = math.tanh %355 : vector<8x128xf32>
    %357 = arith.mulf %352, %356 : vector<8x128xf32>
    %358 = arith.index_cast %c4_i32 : i32 to index
    %c0_112 = arith.constant 0 : index
    %c0_113 = arith.constant 0 : index
    %359 = vector.load %arg5[%358, %c0_112, %c0_113] : memref<8x8x128xf32, #tpu.memory_space<vmem>>, vector<1x8x128xf32>
    %360 = vector.shape_cast %359 : vector<1x8x128xf32> to vector<8x128xf32>
    %361 = vector.shape_cast %332 : vector<8x128xf32> to vector<1x8x128xf32>
    tpu.vector_store %arg5[%358, %c0_112, %c0_113], %361 {strides = array<i32>} : memref<8x8x128xf32, #tpu.memory_space<vmem>>, vector<1x8x128xf32>,
    %c7_i32_114 = arith.constant 7 : i32
    %362 = arith.subi %c7_i32_114, %c4_i32 : i32
    %363 = arith.index_cast %362 : i32 to index
    %c0_115 = arith.constant 0 : index
    %c0_116 = arith.constant 0 : index
    %364 = vector.load %arg6[%363, %c0_115, %c0_116] : memref<8x8x128xf32, #tpu.memory_space<vmem>>, vector<1x8x128xf32>
    %365 = vector.shape_cast %364 : vector<1x8x128xf32> to vector<8x128xf32>
    %366 = vector.shape_cast %357 : vector<8x128xf32> to vector<1x8x128xf32>
    tpu.vector_store %arg6[%363, %c0_115, %c0_116], %366 {strides = array<i32>} : memref<8x8x128xf32, #tpu.memory_space<vmem>>, vector<1x8x128xf32>,
    %c5_i32 = arith.constant 5 : i32
    %367 = arith.index_cast %c5_i32 : i32 to index
    %c0_117 = arith.constant 0 : index
    %c0_118 = arith.constant 0 : index
    %368 = vector.load %arg1[%367, %c0_117, %c0_118] : memref<8x8x512xf32, #tpu.memory_space<vmem>>, vector<1x8x512xf32>
    %369 = vector.shape_cast %368 : vector<1x8x512xf32> to vector<8x512xf32>
    %c0_119 = arith.constant 0 : index
    %c0_120 = arith.constant 0 : index
    %370 = vector.load %arg3[%c0_119, %c0_120] : memref<128x512xf32, #tpu.memory_space<vmem>>, vector<128x512xf32>
    %cst_121 = arith.constant dense<0.000000e+00> : vector<8x512xf32>
    %371 = tpu.matmul %332, %370, %cst_121 {dimension_numbers = #tpu.dot_dimension_numbers<[1], [0], [0], [1], [0, 0, 1, 1], [], []>} : vector<8x128xf32>, vector<128x512xf32>, vector<8x512xf32> -> vector<8x512xf32>
    %372 = arith.addf %369, %371 : vector<8x512xf32>
    %c7_i32_122 = arith.constant 7 : i32
    %373 = arith.subi %c7_i32_122, %c5_i32 : i32
    %374 = arith.index_cast %373 : i32 to index
    %c0_123 = arith.constant 0 : index
    %c0_124 = arith.constant 0 : index
    %375 = vector.load %arg2[%374, %c0_123, %c0_124] : memref<8x8x512xf32, #tpu.memory_space<vmem>>, vector<1x8x512xf32>
    %376 = vector.shape_cast %375 : vector<1x8x512xf32> to vector<8x512xf32>
    %c0_125 = arith.constant 0 : index
    %c0_126 = arith.constant 0 : index
    %377 = vector.load %arg4[%c0_125, %c0_126] : memref<128x512xf32, #tpu.memory_space<vmem>>, vector<128x512xf32>
    %cst_127 = arith.constant dense<0.000000e+00> : vector<8x512xf32>
    %378 = tpu.matmul %357, %377, %cst_127 {dimension_numbers = #tpu.dot_dimension_numbers<[1], [0], [0], [1], [0, 0, 1, 1], [], []>} : vector<8x128xf32>, vector<128x512xf32>, vector<8x512xf32> -> vector<8x512xf32>
    %379 = arith.addf %376, %378 : vector<8x512xf32>
    %380 = vector.extract_strided_slice %372 {offsets = [0, 0], sizes = [8, 128], strides = [1, 1]} : vector<8x512xf32> to vector<8x128xf32>
    %381 = arith.negf %380 : vector<8x128xf32>
    %382 = math.exp %381 : vector<8x128xf32>
    %cst_128 = arith.constant 1.000000e+00 : f32
    %383 = vector.broadcast %cst_128 : f32 to vector<8x128xf32>
    %384 = arith.addf %383, %382 : vector<8x128xf32>
    %385 = arith.divf %383, %384 : vector<8x128xf32>
    %386 = vector.extract_strided_slice %372 {offsets = [0, 128], sizes = [8, 128], strides = [1, 1]} : vector<8x512xf32> to vector<8x128xf32>
    %387 = arith.negf %386 : vector<8x128xf32>
    %388 = math.exp %387 : vector<8x128xf32>
    %cst_129 = arith.constant 1.000000e+00 : f32
    %389 = vector.broadcast %cst_129 : f32 to vector<8x128xf32>
    %390 = arith.addf %389, %388 : vector<8x128xf32>
    %391 = arith.divf %389, %390 : vector<8x128xf32>
    %392 = vector.extract_strided_slice %372 {offsets = [0, 256], sizes = [8, 128], strides = [1, 1]} : vector<8x512xf32> to vector<8x128xf32>
    %393 = math.tanh %392 : vector<8x128xf32>
    %394 = vector.extract_strided_slice %372 {offsets = [0, 384], sizes = [8, 128], strides = [1, 1]} : vector<8x512xf32> to vector<8x128xf32>
    %395 = arith.negf %394 : vector<8x128xf32>
    %396 = math.exp %395 : vector<8x128xf32>
    %cst_130 = arith.constant 1.000000e+00 : f32
    %397 = vector.broadcast %cst_130 : f32 to vector<8x128xf32>
    %398 = arith.addf %397, %396 : vector<8x128xf32>
    %399 = arith.divf %397, %398 : vector<8x128xf32>
    %400 = arith.mulf %391, %330 : vector<8x128xf32>
    %401 = arith.mulf %385, %393 : vector<8x128xf32>
    %402 = arith.addf %400, %401 : vector<8x128xf32>
    %403 = math.tanh %402 : vector<8x128xf32>
    %404 = arith.mulf %399, %403 : vector<8x128xf32>
    %405 = vector.extract_strided_slice %379 {offsets = [0, 0], sizes = [8, 128], strides = [1, 1]} : vector<8x512xf32> to vector<8x128xf32>
    %406 = arith.negf %405 : vector<8x128xf32>
    %407 = math.exp %406 : vector<8x128xf32>
    %cst_131 = arith.constant 1.000000e+00 : f32
    %408 = vector.broadcast %cst_131 : f32 to vector<8x128xf32>
    %409 = arith.addf %408, %407 : vector<8x128xf32>
    %410 = arith.divf %408, %409 : vector<8x128xf32>
    %411 = vector.extract_strided_slice %379 {offsets = [0, 128], sizes = [8, 128], strides = [1, 1]} : vector<8x512xf32> to vector<8x128xf32>
    %412 = arith.negf %411 : vector<8x128xf32>
    %413 = math.exp %412 : vector<8x128xf32>
    %cst_132 = arith.constant 1.000000e+00 : f32
    %414 = vector.broadcast %cst_132 : f32 to vector<8x128xf32>
    %415 = arith.addf %414, %413 : vector<8x128xf32>
    %416 = arith.divf %414, %415 : vector<8x128xf32>
    %417 = vector.extract_strided_slice %379 {offsets = [0, 256], sizes = [8, 128], strides = [1, 1]} : vector<8x512xf32> to vector<8x128xf32>
    %418 = math.tanh %417 : vector<8x128xf32>
    %419 = vector.extract_strided_slice %379 {offsets = [0, 384], sizes = [8, 128], strides = [1, 1]} : vector<8x512xf32> to vector<8x128xf32>
    %420 = arith.negf %419 : vector<8x128xf32>
    %421 = math.exp %420 : vector<8x128xf32>
    %cst_133 = arith.constant 1.000000e+00 : f32
    %422 = vector.broadcast %cst_133 : f32 to vector<8x128xf32>
    %423 = arith.addf %422, %421 : vector<8x128xf32>
    %424 = arith.divf %422, %423 : vector<8x128xf32>
    %425 = arith.mulf %416, %355 : vector<8x128xf32>
    %426 = arith.mulf %410, %418 : vector<8x128xf32>
    %427 = arith.addf %425, %426 : vector<8x128xf32>
    %428 = math.tanh %427 : vector<8x128xf32>
    %429 = arith.mulf %424, %428 : vector<8x128xf32>
    %430 = arith.index_cast %c5_i32 : i32 to index
    %c0_134 = arith.constant 0 : index
    %c0_135 = arith.constant 0 : index
    %431 = vector.load %arg5[%430, %c0_134, %c0_135] : memref<8x8x128xf32, #tpu.memory_space<vmem>>, vector<1x8x128xf32>
    %432 = vector.shape_cast %431 : vector<1x8x128xf32> to vector<8x128xf32>
    %433 = vector.shape_cast %404 : vector<8x128xf32> to vector<1x8x128xf32>
    tpu.vector_store %arg5[%430, %c0_134, %c0_135], %433 {strides = array<i32>} : memref<8x8x128xf32, #tpu.memory_space<vmem>>, vector<1x8x128xf32>,
    %c7_i32_136 = arith.constant 7 : i32
    %434 = arith.subi %c7_i32_136, %c5_i32 : i32
    %435 = arith.index_cast %434 : i32 to index
    %c0_137 = arith.constant 0 : index
    %c0_138 = arith.constant 0 : index
    %436 = vector.load %arg6[%435, %c0_137, %c0_138] : memref<8x8x128xf32, #tpu.memory_space<vmem>>, vector<1x8x128xf32>
    %437 = vector.shape_cast %436 : vector<1x8x128xf32> to vector<8x128xf32>
    %438 = vector.shape_cast %429 : vector<8x128xf32> to vector<1x8x128xf32>
    tpu.vector_store %arg6[%435, %c0_137, %c0_138], %438 {strides = array<i32>} : memref<8x8x128xf32, #tpu.memory_space<vmem>>, vector<1x8x128xf32>,
    %c6_i32 = arith.constant 6 : i32
    %439 = arith.index_cast %c6_i32 : i32 to index
    %c0_139 = arith.constant 0 : index
    %c0_140 = arith.constant 0 : index
    %440 = vector.load %arg1[%439, %c0_139, %c0_140] : memref<8x8x512xf32, #tpu.memory_space<vmem>>, vector<1x8x512xf32>
    %441 = vector.shape_cast %440 : vector<1x8x512xf32> to vector<8x512xf32>
    %c0_141 = arith.constant 0 : index
    %c0_142 = arith.constant 0 : index
    %442 = vector.load %arg3[%c0_141, %c0_142] : memref<128x512xf32, #tpu.memory_space<vmem>>, vector<128x512xf32>
    %cst_143 = arith.constant dense<0.000000e+00> : vector<8x512xf32>
    %443 = tpu.matmul %404, %442, %cst_143 {dimension_numbers = #tpu.dot_dimension_numbers<[1], [0], [0], [1], [0, 0, 1, 1], [], []>} : vector<8x128xf32>, vector<128x512xf32>, vector<8x512xf32> -> vector<8x512xf32>
    %444 = arith.addf %441, %443 : vector<8x512xf32>
    %c7_i32_144 = arith.constant 7 : i32
    %445 = arith.subi %c7_i32_144, %c6_i32 : i32
    %446 = arith.index_cast %445 : i32 to index
    %c0_145 = arith.constant 0 : index
    %c0_146 = arith.constant 0 : index
    %447 = vector.load %arg2[%446, %c0_145, %c0_146] : memref<8x8x512xf32, #tpu.memory_space<vmem>>, vector<1x8x512xf32>
    %448 = vector.shape_cast %447 : vector<1x8x512xf32> to vector<8x512xf32>
    %c0_147 = arith.constant 0 : index
    %c0_148 = arith.constant 0 : index
    %449 = vector.load %arg4[%c0_147, %c0_148] : memref<128x512xf32, #tpu.memory_space<vmem>>, vector<128x512xf32>
    %cst_149 = arith.constant dense<0.000000e+00> : vector<8x512xf32>
    %450 = tpu.matmul %429, %449, %cst_149 {dimension_numbers = #tpu.dot_dimension_numbers<[1], [0], [0], [1], [0, 0, 1, 1], [], []>} : vector<8x128xf32>, vector<128x512xf32>, vector<8x512xf32> -> vector<8x512xf32>
    %451 = arith.addf %448, %450 : vector<8x512xf32>
    %452 = vector.extract_strided_slice %444 {offsets = [0, 0], sizes = [8, 128], strides = [1, 1]} : vector<8x512xf32> to vector<8x128xf32>
    %453 = arith.negf %452 : vector<8x128xf32>
    %454 = math.exp %453 : vector<8x128xf32>
    %cst_150 = arith.constant 1.000000e+00 : f32
    %455 = vector.broadcast %cst_150 : f32 to vector<8x128xf32>
    %456 = arith.addf %455, %454 : vector<8x128xf32>
    %457 = arith.divf %455, %456 : vector<8x128xf32>
    %458 = vector.extract_strided_slice %444 {offsets = [0, 128], sizes = [8, 128], strides = [1, 1]} : vector<8x512xf32> to vector<8x128xf32>
    %459 = arith.negf %458 : vector<8x128xf32>
    %460 = math.exp %459 : vector<8x128xf32>
    %cst_151 = arith.constant 1.000000e+00 : f32
    %461 = vector.broadcast %cst_151 : f32 to vector<8x128xf32>
    %462 = arith.addf %461, %460 : vector<8x128xf32>
    %463 = arith.divf %461, %462 : vector<8x128xf32>
    %464 = vector.extract_strided_slice %444 {offsets = [0, 256], sizes = [8, 128], strides = [1, 1]} : vector<8x512xf32> to vector<8x128xf32>
    %465 = math.tanh %464 : vector<8x128xf32>
    %466 = vector.extract_strided_slice %444 {offsets = [0, 384], sizes = [8, 128], strides = [1, 1]} : vector<8x512xf32> to vector<8x128xf32>
    %467 = arith.negf %466 : vector<8x128xf32>
    %468 = math.exp %467 : vector<8x128xf32>
    %cst_152 = arith.constant 1.000000e+00 : f32
    %469 = vector.broadcast %cst_152 : f32 to vector<8x128xf32>
    %470 = arith.addf %469, %468 : vector<8x128xf32>
    %471 = arith.divf %469, %470 : vector<8x128xf32>
    %472 = arith.mulf %463, %402 : vector<8x128xf32>
    %473 = arith.mulf %457, %465 : vector<8x128xf32>
    %474 = arith.addf %472, %473 : vector<8x128xf32>
    %475 = math.tanh %474 : vector<8x128xf32>
    %476 = arith.mulf %471, %475 : vector<8x128xf32>
    %477 = vector.extract_strided_slice %451 {offsets = [0, 0], sizes = [8, 128], strides = [1, 1]} : vector<8x512xf32> to vector<8x128xf32>
    %478 = arith.negf %477 : vector<8x128xf32>
    %479 = math.exp %478 : vector<8x128xf32>
    %cst_153 = arith.constant 1.000000e+00 : f32
    %480 = vector.broadcast %cst_153 : f32 to vector<8x128xf32>
    %481 = arith.addf %480, %479 : vector<8x128xf32>
    %482 = arith.divf %480, %481 : vector<8x128xf32>
    %483 = vector.extract_strided_slice %451 {offsets = [0, 128], sizes = [8, 128], strides = [1, 1]} : vector<8x512xf32> to vector<8x128xf32>
    %484 = arith.negf %483 : vector<8x128xf32>
    %485 = math.exp %484 : vector<8x128xf32>
    %cst_154 = arith.constant 1.000000e+00 : f32
    %486 = vector.broadcast %cst_154 : f32 to vector<8x128xf32>
    %487 = arith.addf %486, %485 : vector<8x128xf32>
    %488 = arith.divf %486, %487 : vector<8x128xf32>
    %489 = vector.extract_strided_slice %451 {offsets = [0, 256], sizes = [8, 128], strides = [1, 1]} : vector<8x512xf32> to vector<8x128xf32>
    %490 = math.tanh %489 : vector<8x128xf32>
    %491 = vector.extract_strided_slice %451 {offsets = [0, 384], sizes = [8, 128], strides = [1, 1]} : vector<8x512xf32> to vector<8x128xf32>
    %492 = arith.negf %491 : vector<8x128xf32>
    %493 = math.exp %492 : vector<8x128xf32>
    %cst_155 = arith.constant 1.000000e+00 : f32
    %494 = vector.broadcast %cst_155 : f32 to vector<8x128xf32>
    %495 = arith.addf %494, %493 : vector<8x128xf32>
    %496 = arith.divf %494, %495 : vector<8x128xf32>
    %497 = arith.mulf %488, %427 : vector<8x128xf32>
    %498 = arith.mulf %482, %490 : vector<8x128xf32>
    %499 = arith.addf %497, %498 : vector<8x128xf32>
    %500 = math.tanh %499 : vector<8x128xf32>
    %501 = arith.mulf %496, %500 : vector<8x128xf32>
    %502 = arith.index_cast %c6_i32 : i32 to index
    %c0_156 = arith.constant 0 : index
    %c0_157 = arith.constant 0 : index
    %503 = vector.load %arg5[%502, %c0_156, %c0_157] : memref<8x8x128xf32, #tpu.memory_space<vmem>>, vector<1x8x128xf32>
    %504 = vector.shape_cast %503 : vector<1x8x128xf32> to vector<8x128xf32>
    %505 = vector.shape_cast %476 : vector<8x128xf32> to vector<1x8x128xf32>
    tpu.vector_store %arg5[%502, %c0_156, %c0_157], %505 {strides = array<i32>} : memref<8x8x128xf32, #tpu.memory_space<vmem>>, vector<1x8x128xf32>,
    %c7_i32_158 = arith.constant 7 : i32
    %506 = arith.subi %c7_i32_158, %c6_i32 : i32
    %507 = arith.index_cast %506 : i32 to index
    %c0_159 = arith.constant 0 : index
    %c0_160 = arith.constant 0 : index
    %508 = vector.load %arg6[%507, %c0_159, %c0_160] : memref<8x8x128xf32, #tpu.memory_space<vmem>>, vector<1x8x128xf32>
    %509 = vector.shape_cast %508 : vector<1x8x128xf32> to vector<8x128xf32>
    %510 = vector.shape_cast %501 : vector<8x128xf32> to vector<1x8x128xf32>
    tpu.vector_store %arg6[%507, %c0_159, %c0_160], %510 {strides = array<i32>} : memref<8x8x128xf32, #tpu.memory_space<vmem>>, vector<1x8x128xf32>,
    %c7_i32_161 = arith.constant 7 : i32
    %511 = arith.index_cast %c7_i32_161 : i32 to index
    %c0_162 = arith.constant 0 : index
    %c0_163 = arith.constant 0 : index
    %512 = vector.load %arg1[%511, %c0_162, %c0_163] : memref<8x8x512xf32, #tpu.memory_space<vmem>>, vector<1x8x512xf32>
    %513 = vector.shape_cast %512 : vector<1x8x512xf32> to vector<8x512xf32>
    %c0_164 = arith.constant 0 : index
    %c0_165 = arith.constant 0 : index
    %514 = vector.load %arg3[%c0_164, %c0_165] : memref<128x512xf32, #tpu.memory_space<vmem>>, vector<128x512xf32>
    %cst_166 = arith.constant dense<0.000000e+00> : vector<8x512xf32>
    %515 = tpu.matmul %476, %514, %cst_166 {dimension_numbers = #tpu.dot_dimension_numbers<[1], [0], [0], [1], [0, 0, 1, 1], [], []>} : vector<8x128xf32>, vector<128x512xf32>, vector<8x512xf32> -> vector<8x512xf32>
    %516 = arith.addf %513, %515 : vector<8x512xf32>
    %c7_i32_167 = arith.constant 7 : i32
    %517 = arith.subi %c7_i32_167, %c7_i32_161 : i32
    %518 = arith.index_cast %517 : i32 to index
    %c0_168 = arith.constant 0 : index
    %c0_169 = arith.constant 0 : index
    %519 = vector.load %arg2[%518, %c0_168, %c0_169] : memref<8x8x512xf32, #tpu.memory_space<vmem>>, vector<1x8x512xf32>
    %520 = vector.shape_cast %519 : vector<1x8x512xf32> to vector<8x512xf32>
    %c0_170 = arith.constant 0 : index
    %c0_171 = arith.constant 0 : index
    %521 = vector.load %arg4[%c0_170, %c0_171] : memref<128x512xf32, #tpu.memory_space<vmem>>, vector<128x512xf32>
    %cst_172 = arith.constant dense<0.000000e+00> : vector<8x512xf32>
    %522 = tpu.matmul %501, %521, %cst_172 {dimension_numbers = #tpu.dot_dimension_numbers<[1], [0], [0], [1], [0, 0, 1, 1], [], []>} : vector<8x128xf32>, vector<128x512xf32>, vector<8x512xf32> -> vector<8x512xf32>
    %523 = arith.addf %520, %522 : vector<8x512xf32>
    %524 = vector.extract_strided_slice %516 {offsets = [0, 0], sizes = [8, 128], strides = [1, 1]} : vector<8x512xf32> to vector<8x128xf32>
    %525 = arith.negf %524 : vector<8x128xf32>
    %526 = math.exp %525 : vector<8x128xf32>
    %cst_173 = arith.constant 1.000000e+00 : f32
    %527 = vector.broadcast %cst_173 : f32 to vector<8x128xf32>
    %528 = arith.addf %527, %526 : vector<8x128xf32>
    %529 = arith.divf %527, %528 : vector<8x128xf32>
    %530 = vector.extract_strided_slice %516 {offsets = [0, 128], sizes = [8, 128], strides = [1, 1]} : vector<8x512xf32> to vector<8x128xf32>
    %531 = arith.negf %530 : vector<8x128xf32>
    %532 = math.exp %531 : vector<8x128xf32>
    %cst_174 = arith.constant 1.000000e+00 : f32
    %533 = vector.broadcast %cst_174 : f32 to vector<8x128xf32>
    %534 = arith.addf %533, %532 : vector<8x128xf32>
    %535 = arith.divf %533, %534 : vector<8x128xf32>
    %536 = vector.extract_strided_slice %516 {offsets = [0, 256], sizes = [8, 128], strides = [1, 1]} : vector<8x512xf32> to vector<8x128xf32>
    %537 = math.tanh %536 : vector<8x128xf32>
    %538 = vector.extract_strided_slice %516 {offsets = [0, 384], sizes = [8, 128], strides = [1, 1]} : vector<8x512xf32> to vector<8x128xf32>
    %539 = arith.negf %538 : vector<8x128xf32>
    %540 = math.exp %539 : vector<8x128xf32>
    %cst_175 = arith.constant 1.000000e+00 : f32
    %541 = vector.broadcast %cst_175 : f32 to vector<8x128xf32>
    %542 = arith.addf %541, %540 : vector<8x128xf32>
    %543 = arith.divf %541, %542 : vector<8x128xf32>
    %544 = arith.mulf %535, %474 : vector<8x128xf32>
    %545 = arith.mulf %529, %537 : vector<8x128xf32>
    %546 = arith.addf %544, %545 : vector<8x128xf32>
    %547 = math.tanh %546 : vector<8x128xf32>
    %548 = arith.mulf %543, %547 : vector<8x128xf32>
    %549 = vector.extract_strided_slice %523 {offsets = [0, 0], sizes = [8, 128], strides = [1, 1]} : vector<8x512xf32> to vector<8x128xf32>
    %550 = arith.negf %549 : vector<8x128xf32>
    %551 = math.exp %550 : vector<8x128xf32>
    %cst_176 = arith.constant 1.000000e+00 : f32
    %552 = vector.broadcast %cst_176 : f32 to vector<8x128xf32>
    %553 = arith.addf %552, %551 : vector<8x128xf32>
    %554 = arith.divf %552, %553 : vector<8x128xf32>
    %555 = vector.extract_strided_slice %523 {offsets = [0, 128], sizes = [8, 128], strides = [1, 1]} : vector<8x512xf32> to vector<8x128xf32>
    %556 = arith.negf %555 : vector<8x128xf32>
    %557 = math.exp %556 : vector<8x128xf32>
    %cst_177 = arith.constant 1.000000e+00 : f32
    %558 = vector.broadcast %cst_177 : f32 to vector<8x128xf32>
    %559 = arith.addf %558, %557 : vector<8x128xf32>
    %560 = arith.divf %558, %559 : vector<8x128xf32>
    %561 = vector.extract_strided_slice %523 {offsets = [0, 256], sizes = [8, 128], strides = [1, 1]} : vector<8x512xf32> to vector<8x128xf32>
    %562 = math.tanh %561 : vector<8x128xf32>
    %563 = vector.extract_strided_slice %523 {offsets = [0, 384], sizes = [8, 128], strides = [1, 1]} : vector<8x512xf32> to vector<8x128xf32>
    %564 = arith.negf %563 : vector<8x128xf32>
    %565 = math.exp %564 : vector<8x128xf32>
    %cst_178 = arith.constant 1.000000e+00 : f32
    %566 = vector.broadcast %cst_178 : f32 to vector<8x128xf32>
    %567 = arith.addf %566, %565 : vector<8x128xf32>
    %568 = arith.divf %566, %567 : vector<8x128xf32>
    %569 = arith.mulf %560, %499 : vector<8x128xf32>
    %570 = arith.mulf %554, %562 : vector<8x128xf32>
    %571 = arith.addf %569, %570 : vector<8x128xf32>
    %572 = math.tanh %571 : vector<8x128xf32>
    %573 = arith.mulf %568, %572 : vector<8x128xf32>
    %574 = arith.index_cast %c7_i32_161 : i32 to index
    %c0_179 = arith.constant 0 : index
    %c0_180 = arith.constant 0 : index
    %575 = vector.load %arg5[%574, %c0_179, %c0_180] : memref<8x8x128xf32, #tpu.memory_space<vmem>>, vector<1x8x128xf32>
    %576 = vector.shape_cast %575 : vector<1x8x128xf32> to vector<8x128xf32>
    %577 = vector.shape_cast %548 : vector<8x128xf32> to vector<1x8x128xf32>
    tpu.vector_store %arg5[%574, %c0_179, %c0_180], %577 {strides = array<i32>} : memref<8x8x128xf32, #tpu.memory_space<vmem>>, vector<1x8x128xf32>,
    %c7_i32_181 = arith.constant 7 : i32
    %578 = arith.subi %c7_i32_181, %c7_i32_161 : i32
    %579 = arith.index_cast %578 : i32 to index
    %c0_182 = arith.constant 0 : index
    %c0_183 = arith.constant 0 : index
    %580 = vector.load %arg6[%579, %c0_182, %c0_183] : memref<8x8x128xf32, #tpu.memory_space<vmem>>, vector<1x8x128xf32>
    %581 = vector.shape_cast %580 : vector<1x8x128xf32> to vector<8x128xf32>
    %582 = vector.shape_cast %573 : vector<8x128xf32> to vector<1x8x128xf32>
    tpu.vector_store %arg6[%579, %c0_182, %c0_183], %582 {strides = array<i32>} : memref<8x8x128xf32, #tpu.memory_space<vmem>>, vector<1x8x128xf32>,
    %c8_i32 = arith.constant 8 : i32
    %c0_184 = arith.constant 0 : index
    %c0_185 = arith.constant 0 : index
    %583 = vector.load %arg7[%c0_184, %c0_185] : memref<8x128xf32, #tpu.memory_space<vmem>>, vector<8x128xf32>
    tpu.vector_store %arg7[%c0_184, %c0_185], %548 {strides = array<i32>} : memref<8x128xf32, #tpu.memory_space<vmem>>, vector<8x128xf32>,
    %c0_186 = arith.constant 0 : index
    %c0_187 = arith.constant 0 : index
    %584 = vector.load %arg8[%c0_186, %c0_187] : memref<8x128xf32, #tpu.memory_space<vmem>>, vector<8x128xf32>
    tpu.vector_store %arg8[%c0_186, %c0_187], %546 {strides = array<i32>} : memref<8x128xf32, #tpu.memory_space<vmem>>, vector<8x128xf32>,
    %c0_188 = arith.constant 0 : index
    %c0_189 = arith.constant 0 : index
    %585 = vector.load %arg9[%c0_188, %c0_189] : memref<8x128xf32, #tpu.memory_space<vmem>>, vector<8x128xf32>
    tpu.vector_store %arg9[%c0_188, %c0_189], %573 {strides = array<i32>} : memref<8x128xf32, #tpu.memory_space<vmem>>, vector<8x128xf32>,
    %c0_190 = arith.constant 0 : index
    %c0_191 = arith.constant 0 : index
    %586 = vector.load %arg10[%c0_190, %c0_191] : memref<8x128xf32, #tpu.memory_space<vmem>>, vector<8x128xf32>
    tpu.vector_store %arg10[%c0_190, %c0_191], %571 {strides = array<i32>} : memref<8x128xf32, #tpu.memory_space<vmem>>, vector<8x128xf32>,
    return
  }
  func.func @transform_0(%arg0: i32) -> (i32, i32, i32) {
    %c0_i32 = arith.constant 0 : i32
    %c0_i32_0 = arith.constant 0 : i32
    %c0_i32_1 = arith.constant 0 : i32
    return %arg0, %c0_i32, %c0_i32_0 : i32, i32, i32
  }
  func.func @transform_1(%arg0: i32) -> (i32, i32, i32) {
    %c0_i32 = arith.constant 0 : i32
    %0 = arith.subi %c0_i32, %arg0 : i32
    %c0_i32_0 = arith.constant 0 : i32
    %c0_i32_1 = arith.constant 0 : i32
    %c0_i32_2 = arith.constant 0 : i32
    return %0, %c0_i32_0, %c0_i32_1 : i32, i32, i32
  }
  func.func @transform_2(%arg0: i32) -> (i32, i32) {
    %c0_i32 = arith.constant 0 : i32
    %c0_i32_0 = arith.constant 0 : i32
    %c0_i32_1 = arith.constant 0 : i32
    return %c0_i32, %c0_i32_0 : i32, i32
  }
  func.func @transform_3(%arg0: i32) -> (i32, i32) {
    %c0_i32 = arith.constant 0 : i32
    %c0_i32_0 = arith.constant 0 : i32
    %c0_i32_1 = arith.constant 0 : i32
    return %c0_i32, %c0_i32_0 : i32, i32
  }
  func.func @transform_4(%arg0: i32) -> (i32, i32, i32) {
    %c0_i32 = arith.constant 0 : i32
    %c0_i32_0 = arith.constant 0 : i32
    %c0_i32_1 = arith.constant 0 : i32
    return %arg0, %c0_i32, %c0_i32_0 : i32, i32, i32
  }
  func.func @transform_5(%arg0: i32) -> (i32, i32, i32) {
    %c0_i32 = arith.constant 0 : i32
    %0 = arith.subi %c0_i32, %arg0 : i32
    %c0_i32_0 = arith.constant 0 : i32
    %c0_i32_1 = arith.constant 0 : i32
    %c0_i32_2 = arith.constant 0 : i32
    return %0, %c0_i32_0, %c0_i32_1 : i32, i32, i32
  }
}

</mosaic_0001>

<bundles_post_ra>
// kernel: bidirectional_lstm_forward.5
= control target key start
LH: loop header
LB: loop body
LE: loop exit
PB: predicated region body
PF: predicated region fallthrough
CT: control target
= control target key end

     0   :  { %10 = vsyncpa [#allocation3], 0  ;;  %s412_s0 = inlined_call_operand.vmem [shape: f32[64,128], index: 0, kind: input, shape index: {}]   ;;  %s413_s1 = inlined_call_operand.vmem [shape: f32[64,128], index: 1, kind: input, shape index: {}]   ;;  %s414_s2 = inlined_call_operand.hbm [shape: f32[128,128], index: 2, kind: input, shape index: {}]   ;;  %s415_s3 = inlined_call_operand.hbm [shape: f32[128,128], index: 3, kind: input, shape index: {}]   ;;  %s416_s4 = inlined_call_operand.vmem [shape: f32[1,128], index: 4, kind: input, shape index: {}]   ;;  %s417_s5 = inlined_call_operand.vmem [shape: f32[64,128], index: 5, kind: output, shape index: {}]  }
   0x1   :  { %s20_s20 = sshll.u32 %s414_s2, 4  ;;  %s21_s20 = int_to_ptr.hbm [resolvable:$true] %s20_s20 }
   0x2   :  { %11 = vsyncpa [#allocation5], 0  ;;  %s297_s21 = smov [#allocation2]   ;;  %s33_s25 = sshll.u32 %s415_s3, 4  ;;  %s34_s25 = int_to_ptr.hbm [resolvable:$true] %s33_s25 }
   0x3   :  { %s22_s22 = sshll.u32 %s297_s21, 4  ;;  %s298_s26 = smov 128   ;;  %s23_s22 = int_to_ptr.vmem [resolvable:$true] %s22_s22 }
   0x4   :  { %s299_s27 = smov 8   ;;  %s300_s28 = smov [#allocation4]  }
   0x5   :  { %28 = dma.hbm_to_vmem [thread:$0]  %s21_s20, 2048, %s23_s22, [#allocation3], %s298_s26, %s298_s26, %s299_s27  }
   0x6   :  { %s35_s29 = sshll.u32 %s300_s28, 4  ;;  %s36_s29 = int_to_ptr.vmem [resolvable:$true] %s35_s29 }
   0x7   :  { %41 = dma.hbm_to_vmem [thread:$0]  %s34_s25, 2048, %s36_s29, [#allocation5], %s298_s26, %s298_s26, %s299_s27  }
   0x8   :  { %293 = dma.done.wait [#allocation3], 2048  }
   0x9   :  { %294 = vsyncadd [#allocation3], 4294965248 }
   0xa   :  { %295 = dma.done.wait [#allocation5], 2048  }
   0xb   :  { %296 = vsyncadd [#allocation5], 4294965248  ;;  %v99_v0 = vld [vmem:[#allocation4 + $0x78] sm:$0xff]  ;;  %v98_v2 = vld [vmem:[#allocation4 + $0x70] sm:$0xff] }
   0xc   :  { %v75_v1 = vld [vmem:[#allocation2 + $0x78] sm:$0xff]  ;;  %208 = vmatpush.msra.mxu2 %v99_v0  ;;  %v74_v3 = vld [vmem:[#allocation2 + $0x70] sm:$0xff]  ;;  %v97_v4 = vld [vmem:[#allocation4 + $0x68] sm:$0xff]  ;;  %100 = vmatpush.msra.mxu0 %v99_v0 }
   0xd   :  { %224 = vmatpush.msra.mxu3 %v75_v1  ;;  %v73_v5 = vld [vmem:[#allocation2 + $0x68] sm:$0xff]  ;;  %141 = vmatpush.msra.mxu1 %v75_v1  ;;  %v96_v6 = vld [vmem:[#allocation4 + $0x60] sm:$0xff]  ;;  %v95_v8 = vld [vmem:[#allocation4 + $0x58] sm:$0xff] }
   0xe   :  { %209 = vmatpush.msra.mxu2 %v98_v2  ;;  %v72_v7 = vld [vmem:[#allocation2 + $0x60] sm:$0xff]  ;;  %101 = vmatpush.msra.mxu0 %v98_v2  ;;  %v71_v9 = vld [vmem:[#allocation2 + $0x58] sm:$0xff]  ;;  %v94_v10 = vld [vmem:[#allocation4 + $0x50] sm:$0xff] }
   0xf   :  { %225 = vmatpush.msra.mxu3 %v74_v3  ;;  %142 = vmatpush.msra.mxu1 %v74_v3  ;;  %v70_v11 = vld [vmem:[#allocation2 + $0x50] sm:$0xff]  ;;  %v93_v12 = vld [vmem:[#allocation4 + $0x48] sm:$0xff]  ;;  %v92_v14 = vld [vmem:[#allocation4 + $0x40] sm:$0xff] }
  0x10   :  { %210 = vmatpush.msra.mxu2 %v97_v4  ;;  %102 = vmatpush.msra.mxu0 %v97_v4  ;;  %v69_v13 = vld [vmem:[#allocation2 + $0x48] sm:$0xff]  ;;  %v68_v15 = vld [vmem:[#allocation2 + $0x40] sm:$0xff]  ;;  %v91_v16 = vld [vmem:[#allocation4 + $0x38] sm:$0xff] }
  0x11   :  { %226 = vmatpush.msra.mxu3 %v73_v5  ;;  %143 = vmatpush.msra.mxu1 %v73_v5  ;;  %v67_v17 = vld [vmem:[#allocation2 + $0x38] sm:$0xff]  ;;  %v90_v18 = vld [vmem:[#allocation4 + $0x30] sm:$0xff]  ;;  %v89_v20 = vld [vmem:[#allocation4 + $0x28] sm:$0xff] }
  0x12   :  { %211 = vmatpush.msra.mxu2 %v96_v6  ;;  %103 = vmatpush.msra.mxu0 %v96_v6  ;;  %v66_v19 = vld [vmem:[#allocation2 + $0x30] sm:$0xff]  ;;  %v65_v21 = vld [vmem:[#allocation2 + $0x28] sm:$0xff]  ;;  %v88_v22 = vld [vmem:[#allocation4 + $0x20] sm:$0xff] }
  0x13   :  { %227 = vmatpush.msra.mxu3 %v72_v7  ;;  %144 = vmatpush.msra.mxu1 %v72_v7  ;;  %v64_v23 = vld [vmem:[#allocation2 + $0x20] sm:$0xff]  ;;  %v87_v24 = vld [vmem:[#allocation4 + $0x18] sm:$0xff]  ;;  %v86_v26 = vld [vmem:[#allocation4 + $0x10] sm:$0xff] }
  0x14   :  { %212 = vmatpush.msra.mxu2 %v95_v8  ;;  %104 = vmatpush.msra.mxu0 %v95_v8  ;;  %v63_v25 = vld [vmem:[#allocation2 + $0x18] sm:$0xff]  ;;  %v62_v27 = vld [vmem:[#allocation2 + $0x10] sm:$0xff]  ;;  %v85_v28 = vld [vmem:[#allocation4 + $0x8] sm:$0xff] }
  0x15   :  { %228 = vmatpush.msra.mxu3 %v71_v9  ;;  %145 = vmatpush.msra.mxu1 %v71_v9  ;;  %v61_v29 = vld [vmem:[#allocation2 + $0x8] sm:$0xff]  ;;  %v84_v30 = vld [vmem:[#allocation4] sm:$0xff]  ;;  %v82_v40 = vld [vmem:[%s413_s1 + $0x30] sm:$0xff] }
  0x16   :  { %213 = vmatpush.msra.mxu2 %v94_v10  ;;  %105 = vmatpush.msra.mxu0 %v94_v10  ;;  %v60_v31 = vld [vmem:[#allocation2] sm:$0xff]  ;;  %v81_v36 = vld [vmem:[%s413_s1 + $0x28] sm:$0xff]  ;;  %v58_v41 = vld [vmem:[%s412_s0 + $0x30] sm:$0xff] }
  0x17   :  { %229 = vmatpush.msra.mxu3 %v70_v11  ;;  %146 = vmatpush.msra.mxu1 %v70_v11  ;;  %v80_v32 = vld [vmem:[%s413_s1 + $0x20] sm:$0xff]  ;;  %v57_v37 = vld [vmem:[%s412_s0 + $0x28] sm:$0xff]  ;;  %v78_v42 = vld [vmem:[%s413_s1 + $0x10] sm:$0xff] }
  0x18   :  { %214 = vmatpush.msra.mxu2 %v93_v12  ;;  %106 = vmatpush.msra.mxu0 %v93_v12  ;;  %v56_v33 = vld [vmem:[%s412_s0 + $0x20] sm:$0xff]  ;;  %v77_v38 = vld [vmem:[%s413_s1 + $0x8] sm:$0xff]  ;;  %v54_v43 = vld [vmem:[%s412_s0 + $0x10] sm:$0xff] }
  0x19   :  { %230 = vmatpush.msra.mxu3 %v69_v13  ;;  %147 = vmatpush.msra.mxu1 %v69_v13  ;;  %v76_v34 = vld [vmem:[%s413_s1] sm:$0xff]  ;;  %v53_v39 = vld [vmem:[%s412_s0 + $0x8] sm:$0xff]  ;;  %v83_v44 = vld [vmem:[%s413_s1 + $0x38] sm:$0xff] }
  0x1a   :  { %215 = vmatpush.msra.mxu2 %v92_v14  ;;  %107 = vmatpush.msra.mxu0 %v92_v14  ;;  %v52_v35 = vld [vmem:[%s412_s0] sm:$0xff]  ;;  %v59_v45 = vld [vmem:[%s412_s0 + $0x38] sm:$0xff] }
  0x1b   :  { %231 = vmatpush.msra.mxu3 %v68_v15  ;;  %148 = vmatpush.msra.mxu1 %v68_v15  ;;  %v79_v46 = vld [vmem:[%s413_s1 + $0x18] sm:$0xff]  ;;  %v244_v48 = vld [vmem:[%s416_s4] ss:$0 sm:$0xff] }
  0x1c   :  { %216 = vmatpush.msra.mxu2 %v91_v16  ;;  %108 = vmatpush.msra.mxu0 %v91_v16  ;;  %v55_v47 = vld [vmem:[%s412_s0 + $0x18] sm:$0xff] }
  0x1d   :  { %232 = vmatpush.msra.mxu3 %v67_v17  ;;  %149 = vmatpush.msra.mxu1 %v67_v17 }
  0x1e   :  { %217 = vmatpush.msra.mxu2 %v90_v18  ;;  %109 = vmatpush.msra.mxu0 %v90_v18 }
  0x1f   :  { %233 = vmatpush.msra.mxu3 %v66_v19  ;;  %150 = vmatpush.msra.mxu1 %v66_v19 }
  0x20   :  { %218 = vmatpush.msra.mxu2 %v89_v20  ;;  %110 = vmatpush.msra.mxu0 %v89_v20 }
  0x21   :  { %234 = vmatpush.msra.mxu3 %v65_v21  ;;  %151 = vmatpush.msra.mxu1 %v65_v21 }
  0x22   :  { %219 = vmatpush.msra.mxu2 %v88_v22  ;;  %111 = vmatpush.msra.mxu0 %v88_v22 }
  0x23   :  { %235 = vmatpush.msra.mxu3 %v64_v23  ;;  %152 = vmatpush.msra.mxu1 %v64_v23 }
  0x24   :  { %220 = vmatpush.msra.mxu2 %v87_v24  ;;  %112 = vmatpush.msra.mxu0 %v87_v24 }
  0x25   :  { %236 = vmatpush.msra.mxu3 %v63_v25  ;;  %153 = vmatpush.msra.mxu1 %v63_v25 }
  0x26   :  { %221 = vmatpush.msra.mxu2 %v86_v26  ;;  %113 = vmatpush.msra.mxu0 %v86_v26 }
  0x27   :  { %237 = vmatpush.msra.mxu3 %v62_v27  ;;  %154 = vmatpush.msra.mxu1 %v62_v27 }
  0x28   :  { %222 = vmatpush.msra.mxu2 %v85_v28  ;;  %114 = vmatpush.msra.mxu0 %v85_v28 }
  0x29   :  { %238 = vmatpush.msra.mxu3 %v61_v29  ;;  %155 = vmatpush.msra.mxu1 %v61_v29 }
  0x2a   :  { %223 = vmatpush.msra.mxu2 %v84_v30  ;;  %115 = vmatpush.msra.mxu0 %v84_v30 }
  0x2b   :  { %239 = vmatpush.msra.mxu3 %v60_v31  ;;  %128 = vmatmul.f32.vlgmr.msra.gmra.mxu2 %v80_v32 }
  0x2c   :  { %169 = vmatmul.f32.vlgmr.msra.gmra.mxu3 %v56_v33  ;;  %156 = vmatpush.msra.mxu1 %v60_v31 }
  0x2d   :  { %116 = vmatmul.f32.vlgmr.msra.gmra.mxu0 %v76_v34  ;;  %157 = vmatmul.f32.vlgmr.msra.gmra.mxu1 %v52_v35 }
  0x33   :  { %131 = vmatmul.f32.gmra.mxu2 %v81_v36 }
  0x34   :  { %172 = vmatmul.f32.gmra.mxu3 %v57_v37 }
  0x35   :  { %119 = vmatmul.f32.gmra.mxu0 %v77_v38  ;;  %160 = vmatmul.f32.gmra.mxu1 %v53_v39 }
  0x3b   :  { %134 = vmatmul.f32.gmra.mxu2 %v82_v40 }
  0x3c   :  { %175 = vmatmul.f32.gmra.mxu3 %v58_v41 }
  0x3d   :  { %122 = vmatmul.f32.gmra.mxu0 %v78_v42  ;;  %163 = vmatmul.f32.gmra.mxu1 %v54_v43 }
  0x43   :  { %137 = vmatmul.f32.gmra.mxu2 %v83_v44 }
  0x44   :  { %178 = vmatmul.f32.gmra.mxu3 %v59_v45 }
  0x45   :  { %125 = vmatmul.f32.gmra.mxu0 %v79_v46  ;;  %166 = vmatmul.f32.gmra.mxu1 %v55_v47 }
  0xaa   :  { %v117_v49 = vpop.f32.mrf.mxu0  ;;  %v158_v50 = vpop.f32.mrf.mxu1 }
  0xab   :  { %v159_v51 = vadd.f32 %v158_v50, %v117_v49 }
  0xad   :  { %v186_v52 = vadd.f32 %v244_v48, %v159_v51 }
  0xae   :  { %v129_v53 = vpop.f32.mrf.mxu2 }
  0xaf   :  { %v170_v54 = vpop.f32.mrf.mxu3  ;;  %194 = vst [vmem:[%s417_s5] sm:$0xff] %v186_v52 }
  0xb0   :  { %v171_v55 = vadd.f32 %v170_v54, %v129_v53 }
  0xb2   :  { %v190_v56 = vadd.f32 %v244_v48, %v171_v55  ;;  %v120_v57 = vpop.f32.mrf.mxu0  ;;  %v161_v58 = vpop.f32.mrf.mxu1 }
  0xb3   :  { %v162_v59 = vadd.f32 %v161_v58, %v120_v57 }
  0xb4   :  { %198 = vst [vmem:[%s417_s5 + $0x20] sm:$0xff] %v190_v56 }
  0xb5   :  { %v187_v60 = vadd.f32 %v244_v48, %v162_v59 }
  0xb6   :  { %v132_v61 = vpop.f32.mrf.mxu2 }
  0xb7   :  { %v173_v62 = vpop.f32.mrf.mxu3  ;;  %195 = vst [vmem:[%s417_s5 + $0x8] sm:$0xff] %v187_v60 }
  0xb8   :  { %v174_v63 = vadd.f32 %v173_v62, %v132_v61 }
  0xba   :  { %v191_v0 = vadd.f32 %v244_v48, %v174_v63  ;;  %v123_v1 = vpop.f32.mrf.mxu0  ;;  %v164_v2 = vpop.f32.mrf.mxu1 }
  0xbb   :  { %v165_v3 = vadd.f32 %v164_v2, %v123_v1 }
  0xbc   :  { %199 = vst [vmem:[%s417_s5 + $0x28] sm:$0xff] %v191_v0 }
  0xbd   :  { %v188_v4 = vadd.f32 %v244_v48, %v165_v3 }
  0xbe   :  { %v135_v5 = vpop.f32.mrf.mxu2 }
  0xbf   :  { %v176_v6 = vpop.f32.mrf.mxu3  ;;  %196 = vst [vmem:[%s417_s5 + $0x10] sm:$0xff] %v188_v4 }
  0xc0   :  { %v177_v7 = vadd.f32 %v176_v6, %v135_v5 }
  0xc2   :  { %v192_v8 = vadd.f32 %v244_v48, %v177_v7  ;;  %v126_v9 = vpop.f32.mrf.mxu0  ;;  %v167_v10 = vpop.f32.mrf.mxu1 }
  0xc3   :  { %v168_v11 = vadd.f32 %v167_v10, %v126_v9 }
  0xc4   :  { %200 = vst [vmem:[%s417_s5 + $0x30] sm:$0xff] %v192_v8 }
  0xc5   :  { %v189_v12 = vadd.f32 %v244_v48, %v168_v11 }
  0xc6   :  { %v138_v13 = vpop.f32.mrf.mxu2 }
  0xc7   :  { %v179_v14 = vpop.f32.mrf.mxu3  ;;  %197 = vst [vmem:[%s417_s5 + $0x18] sm:$0xff] %v189_v12 }
  0xc8   :  { %v180_v15 = vadd.f32 %v179_v14, %v138_v13 }
  0xca   :  { %v193_v16 = vadd.f32 %v244_v48, %v180_v15 }
  0xcc   :  { %201 = vst [vmem:[%s417_s5 + $0x38] sm:$0xff] %v193_v16 }
  0xcd   :  { %206 = vsyncpa [#allocation3], 1 }
  0xce   :  { %207 = vsyncpa [#allocation5], 1 }

// kernel: bidirectional_lstm_forward.3
= control target key start
LH: loop header
LB: loop body
LE: loop exit
PB: predicated region body
PF: predicated region fallthrough
CT: control target
= control target key end

     0   :  { %12 = vsyncpa [#allocation3], 0  ;;  %s601_s24 = smov [#allocation2]   ;;  %s602_s26 = smov 512   ;;  %s1042_s0 = inlined_call_operand.vmem [shape: f32[64,16], index: 0, kind: input, shape index: {}]   ;;  %s1043_s1 = inlined_call_operand.vmem [shape: f32[16,512], index: 1, kind: input, shape index: {}]   ;;  %s1044_s2 = inlined_call_operand.hbm [shape: f32[16,512], index: 2, kind: input, shape index: {}]   ;;  %s1045_s3 = inlined_call_operand.vmem [shape: f32[1,512], index: 3, kind: input, shape index: {}]   ;;  %s1046_s4 = inlined_call_operand.vmem [shape: f32[1,512], index: 4, kind: input, shape index: {}]   ;;  %s1047_s5 = inlined_call_operand.vmem [shape: f32[64,512], index: 5, kind: output, shape index: {0}]   ;;  %s1048_s6 = inlined_call_operand.vmem [shape: f32[64,512], index: 6, kind: output, shape index: {1}]  }
   0x1   :  { %s21_s23 = sshll.u32 %s1044_s2, 4  ;;  %s23_s25 = sshll.u32 %s601_s24, 4  ;;  %s22_s23 = int_to_ptr.hbm [resolvable:$true] %s21_s23  ;;  %s24_s25 = int_to_ptr.vmem [resolvable:$true] %s23_s25 }
   0x2   :  { %s603_s27 = smov 32  }
   0x3   :  { %29 = dma.hbm_to_vmem [thread:$0]  %s22_s23, 1024, %s24_s25, [#allocation3], %s602_s26, %s602_s26, %s603_s27  }
   0x4   :  { %599 = dma.done.wait [#allocation3], 1024  }
   0x5   :  { %600 = vsyncadd [#allocation3], 4294966272  ;;  %v52_v0 = vld [vmem:[%s1043_s1 + $0x30] sm:$0xff]  ;;  %v53_v1 = vld [vmem:[%s1043_s1 + $0x38] sm:$0xff]  ;;  %vm64_vm0 = vcmask 130048  }
   0x6   :  { %v48_v2 = vld [vmem:[%s1043_s1 + $0x10] sm:$0xff]  ;;  %185 = vmatpush.msra.mxu2 %v52_v0  ;;  %226 = vmatpush.msra.mxu3 %v53_v1  ;;  %v49_v3 = vld [vmem:[%s1043_s1 + $0x18] sm:$0xff]  ;;  %v657_v4 = vld [vmem:[%s1042_s0] sm:$0xff] }
   0x7   :  { %v291_v5 = vld [vmem:[#allocation2 + $0x30] sm:$0xff]  ;;  %v292_v6 = vld [vmem:[#allocation2 + $0x38] sm:$0xff]  ;;  %v50_v7 = vld [vmem:[%s1043_s1 + $0x20] sm:$0xff] }
   0x8   :  { %186 = vmatpush.msra.mxu2 %v48_v2  ;;  %227 = vmatpush.msra.mxu3 %v49_v3  ;;  %v51_v8 = vld [vmem:[%s1043_s1 + $0x28] sm:$0xff]  ;;  %v46_v9 = vld [vmem:[%s1043_s1] sm:$0xff]  ;;  %v287_v11 = vld [vmem:[#allocation2 + $0x10] sm:$0xff] }
   0x9   :  { %524 = vmatmul.msk.f32.vlgmr.msra.gmra.mxu2 %vm64_vm0, %v657_v4  ;;  %532 = vmatmul.msk.f32.vlgmr.msra.gmra.mxu3 %vm64_vm0, %v657_v4  ;;  %v47_v10 = vld [vmem:[%s1043_s1 + $0x8] sm:$0xff]  ;;  %v288_v12 = vld [vmem:[#allocation2 + $0x18] sm:$0xff]  ;;  %v289_v13 = vld [vmem:[#allocation2 + $0x20] sm:$0xff] }
   0xa   :  { %399 = vmatpush.msrb.mxu2 %v291_v5  ;;  %440 = vmatpush.msrb.mxu3 %v292_v6  ;;  %v290_v14 = vld [vmem:[#allocation2 + $0x28] sm:$0xff]  ;;  %v285_v16 = vld [vmem:[#allocation2] sm:$0xff]  ;;  %v40_v18 = vld [vmem:[%s1042_s0 + $0x10] sm:$0xff] }
   0xb   :  { %103 = vmatpush.msra.mxu0 %v50_v7  ;;  %144 = vmatpush.msra.mxu1 %v51_v8  ;;  %v39_v15 = vld [vmem:[%s1042_s0 + $0x8] sm:$0xff]  ;;  %v41_v19 = vld [vmem:[%s1042_s0 + $0x18] sm:$0xff]  ;;  %v42_v20 = vld [vmem:[%s1042_s0 + $0x20] sm:$0xff] }
   0xc   :  { %400 = vmatpush.msrb.mxu2 %v287_v11  ;;  %441 = vmatpush.msrb.mxu3 %v288_v12  ;;  %v286_v17 = vld [vmem:[#allocation2 + $0x8] sm:$0xff]  ;;  %v44_v22 = vld [vmem:[%s1042_s0 + $0x30] sm:$0xff]  ;;  %v45_v23 = vld [vmem:[%s1042_s0 + $0x38] sm:$0xff] }
   0xd   :  { %104 = vmatpush.msra.mxu0 %v46_v9  ;;  %145 = vmatpush.msra.mxu1 %v47_v10  ;;  %v43_v21 = vld [vmem:[%s1042_s0 + $0x28] sm:$0xff]  ;;  %v54_v24 = vld [vmem:[%s1045_s3] sm:$0xf] }
   0xe   :  { %508 = vmatmul.msk.f32.vlgmr.msra.gmra.mxu0 %vm64_vm0, %v657_v4  ;;  %516 = vmatmul.msk.f32.vlgmr.msra.gmra.mxu1 %vm64_vm0, %v657_v4  ;;  %v767_v25 = vperm.slane %v54_v24, 0  ;;  %v769_v26 = vperm.slane %v54_v24, 1  ;;  %v771_v27 = vperm.slane %v54_v24, 2  ;;  %v773_v28 = vperm.slane %v54_v24, 3 }
   0xf   :  { %317 = vmatpush.msrb.mxu0 %v289_v13  ;;  %358 = vmatpush.msrb.mxu1 %v290_v14 }
  0x11   :  { %525 = vmatmul.msk.f32.gmra.mxu2 %vm64_vm0, %v39_v15  ;;  %533 = vmatmul.msk.f32.gmra.mxu3 %vm64_vm0, %v39_v15 }
  0x12   :  { %318 = vmatpush.msrb.mxu0 %v285_v16  ;;  %359 = vmatpush.msrb.mxu1 %v286_v17 }
  0x16   :  { %509 = vmatmul.msk.f32.gmra.mxu0 %vm64_vm0, %v39_v15  ;;  %517 = vmatmul.msk.f32.gmra.mxu1 %vm64_vm0, %v39_v15 }
  0x19   :  { %526 = vmatmul.msk.f32.gmra.mxu2 %vm64_vm0, %v40_v18  ;;  %534 = vmatmul.msk.f32.gmra.mxu3 %vm64_vm0, %v40_v18 }
  0x1e   :  { %510 = vmatmul.msk.f32.gmra.mxu0 %vm64_vm0, %v40_v18  ;;  %518 = vmatmul.msk.f32.gmra.mxu1 %vm64_vm0, %v40_v18 }
  0x21   :  { %527 = vmatmul.msk.f32.gmra.mxu2 %vm64_vm0, %v41_v19  ;;  %535 = vmatmul.msk.f32.gmra.mxu3 %vm64_vm0, %v41_v19 }
  0x26   :  { %511 = vmatmul.msk.f32.gmra.mxu0 %vm64_vm0, %v41_v19  ;;  %519 = vmatmul.msk.f32.gmra.mxu1 %vm64_vm0, %v41_v19 }
  0x29   :  { %528 = vmatmul.msk.f32.gmra.mxu2 %vm64_vm0, %v42_v20  ;;  %536 = vmatmul.msk.f32.gmra.mxu3 %vm64_vm0, %v42_v20 }
  0x2e   :  { %512 = vmatmul.msk.f32.gmra.mxu0 %vm64_vm0, %v42_v20  ;;  %520 = vmatmul.msk.f32.gmra.mxu1 %vm64_vm0, %v42_v20 }
  0x31   :  { %529 = vmatmul.msk.f32.gmra.mxu2 %vm64_vm0, %v43_v21  ;;  %537 = vmatmul.msk.f32.gmra.mxu3 %vm64_vm0, %v43_v21 }
  0x36   :  { %513 = vmatmul.msk.f32.gmra.mxu0 %vm64_vm0, %v43_v21  ;;  %521 = vmatmul.msk.f32.gmra.mxu1 %vm64_vm0, %v43_v21 }
  0x39   :  { %530 = vmatmul.msk.f32.gmra.mxu2 %vm64_vm0, %v44_v22  ;;  %538 = vmatmul.msk.f32.gmra.mxu3 %vm64_vm0, %v44_v22 }
  0x3e   :  { %514 = vmatmul.msk.f32.gmra.mxu0 %vm64_vm0, %v44_v22  ;;  %522 = vmatmul.msk.f32.gmra.mxu1 %vm64_vm0, %v44_v22 }
  0x41   :  { %531 = vmatmul.msk.f32.gmra.mxu2 %vm64_vm0, %v45_v23  ;;  %539 = vmatmul.msk.f32.gmra.mxu3 %vm64_vm0, %v45_v23 }
  0x46   :  { %515 = vmatmul.msk.f32.gmra.mxu0 %vm64_vm0, %v45_v23  ;;  %523 = vmatmul.msk.f32.gmra.mxu1 %vm64_vm0, %v45_v23 }
  0x49   :  { %556 = vmatmul.msk.f32.vlgmr.msrb.gmra.mxu2 %vm64_vm0, %v657_v4  ;;  %564 = vmatmul.msk.f32.vlgmr.msrb.gmra.mxu3 %vm64_vm0, %v657_v4 }
  0x4e   :  { %540 = vmatmul.msk.f32.vlgmr.msrb.gmra.mxu0 %vm64_vm0, %v657_v4  ;;  %548 = vmatmul.msk.f32.vlgmr.msrb.gmra.mxu1 %vm64_vm0, %v657_v4 }
  0x51   :  { %557 = vmatmul.msk.f32.gmra.mxu2 %vm64_vm0, %v39_v15  ;;  %565 = vmatmul.msk.f32.gmra.mxu3 %vm64_vm0, %v39_v15 }
  0x56   :  { %541 = vmatmul.msk.f32.gmra.mxu0 %vm64_vm0, %v39_v15  ;;  %549 = vmatmul.msk.f32.gmra.mxu1 %vm64_vm0, %v39_v15 }
  0x59   :  { %558 = vmatmul.msk.f32.gmra.mxu2 %vm64_vm0, %v40_v18  ;;  %566 = vmatmul.msk.f32.gmra.mxu3 %vm64_vm0, %v40_v18 }
  0x5e   :  { %542 = vmatmul.msk.f32.gmra.mxu0 %vm64_vm0, %v40_v18  ;;  %550 = vmatmul.msk.f32.gmra.mxu1 %vm64_vm0, %v40_v18 }
  0x61   :  { %559 = vmatmul.msk.f32.gmra.mxu2 %vm64_vm0, %v41_v19  ;;  %567 = vmatmul.msk.f32.gmra.mxu3 %vm64_vm0, %v41_v19 }
  0x66   :  { %543 = vmatmul.msk.f32.gmra.mxu0 %vm64_vm0, %v41_v19  ;;  %551 = vmatmul.msk.f32.gmra.mxu1 %vm64_vm0, %v41_v19 }
  0x69   :  { %560 = vmatmul.msk.f32.gmra.mxu2 %vm64_vm0, %v42_v20  ;;  %568 = vmatmul.msk.f32.gmra.mxu3 %vm64_vm0, %v42_v20 }
  0x6e   :  { %544 = vmatmul.msk.f32.gmra.mxu0 %vm64_vm0, %v42_v20  ;;  %552 = vmatmul.msk.f32.gmra.mxu1 %vm64_vm0, %v42_v20 }
  0x71   :  { %561 = vmatmul.msk.f32.gmra.mxu2 %vm64_vm0, %v43_v21  ;;  %569 = vmatmul.msk.f32.gmra.mxu3 %vm64_vm0, %v43_v21 }
  0x76   :  { %545 = vmatmul.msk.f32.gmra.mxu0 %vm64_vm0, %v43_v21  ;;  %553 = vmatmul.msk.f32.gmra.mxu1 %vm64_vm0, %v43_v21 }
  0x79   :  { %562 = vmatmul.msk.f32.gmra.mxu2 %vm64_vm0, %v44_v22  ;;  %570 = vmatmul.msk.f32.gmra.mxu3 %vm64_vm0, %v44_v22 }
  0x7e   :  { %546 = vmatmul.msk.f32.gmra.mxu0 %vm64_vm0, %v44_v22  ;;  %554 = vmatmul.msk.f32.gmra.mxu1 %vm64_vm0, %v44_v22 }
  0x81   :  { %563 = vmatmul.msk.f32.gmra.mxu2 %vm64_vm0, %v45_v23  ;;  %571 = vmatmul.msk.f32.gmra.mxu3 %vm64_vm0, %v45_v23 }
  0x86   :  { %547 = vmatmul.msk.f32.gmra.mxu0 %vm64_vm0, %v45_v23  ;;  %555 = vmatmul.msk.f32.gmra.mxu1 %vm64_vm0, %v45_v23 }
  0x8b   :  { %v106_v29 = vpop.f32.mrf.mxu0  ;;  %v147_v30 = vpop.f32.mrf.mxu1 }
  0x8c   :  { %v107_v31 = vadd.f32 %v106_v29, %v767_v25  ;;  %v148_v32 = vadd.f32 %v147_v30, %v769_v26  ;;  %v188_v33 = vpop.f32.mrf.mxu2  ;;  %v229_v34 = vpop.f32.mrf.mxu3 }
  0x8d   :  { %v189_v35 = vadd.f32 %v188_v33, %v771_v27  ;;  %v230_v36 = vadd.f32 %v229_v34, %v773_v28  ;;  %v293_v33 = vld [vmem:[%s1046_s4] sm:$0xf] }
  0x8e   :  { %253 = vst [vmem:[%s1047_s5] sm:$0xff] %v107_v31 }
  0x8f   :  { %254 = vst [vmem:[%s1047_s5 + $0x8] sm:$0xff] %v148_v32 }
  0x90   :  { %255 = vst [vmem:[%s1047_s5 + $0x10] sm:$0xff] %v189_v35 }
  0x91   :  { %256 = vst [vmem:[%s1047_s5 + $0x18] sm:$0xff] %v230_v36 }
  0x93   :  { %v109_v37 = vpop.f32.mrf.mxu0  ;;  %v150_v38 = vpop.f32.mrf.mxu1 }
  0x94   :  { %v110_v39 = vadd.f32 %v109_v37, %v767_v25  ;;  %v151_v40 = vadd.f32 %v150_v38, %v769_v26  ;;  %v191_v41 = vpop.f32.mrf.mxu2  ;;  %v232_v42 = vpop.f32.mrf.mxu3 }
  0x95   :  { %v192_v43 = vadd.f32 %v191_v41, %v771_v27  ;;  %v233_v44 = vadd.f32 %v232_v42, %v773_v28 }
  0x96   :  { %257 = vst [vmem:[%s1047_s5 + $0x20] sm:$0xff] %v110_v39 }
  0x97   :  { %258 = vst [vmem:[%s1047_s5 + $0x28] sm:$0xff] %v151_v40 }
  0x98   :  { %259 = vst [vmem:[%s1047_s5 + $0x30] sm:$0xff] %v192_v43 }
  0x99   :  { %260 = vst [vmem:[%s1047_s5 + $0x38] sm:$0xff] %v233_v44 }
  0x9b   :  { %v112_v45 = vpop.f32.mrf.mxu0  ;;  %v153_v46 = vpop.f32.mrf.mxu1 }
  0x9c   :  { %v113_v47 = vadd.f32 %v112_v45, %v767_v25  ;;  %v154_v48 = vadd.f32 %v153_v46, %v769_v26  ;;  %v194_v49 = vpop.f32.mrf.mxu2  ;;  %v235_v50 = vpop.f32.mrf.mxu3 }
  0x9d   :  { %v195_v51 = vadd.f32 %v194_v49, %v771_v27  ;;  %v236_v52 = vadd.f32 %v235_v50, %v773_v28 }
  0x9e   :  { %261 = vst [vmem:[%s1047_s5 + $0x40] sm:$0xff] %v113_v47 }
  0x9f   :  { %262 = vst [vmem:[%s1047_s5 + $0x48] sm:$0xff] %v154_v48 }
  0xa0   :  { %263 = vst [vmem:[%s1047_s5 + $0x50] sm:$0xff] %v195_v51 }
  0xa1   :  { %264 = vst [vmem:[%s1047_s5 + $0x58] sm:$0xff] %v236_v52 }
  0xa3   :  { %v115_v53 = vpop.f32.mrf.mxu0  ;;  %v156_v54 = vpop.f32.mrf.mxu1 }
  0xa4   :  { %v116_v55 = vadd.f32 %v115_v53, %v767_v25  ;;  %v157_v56 = vadd.f32 %v156_v54, %v769_v26  ;;  %v197_v57 = vpop.f32.mrf.mxu2  ;;  %v238_v58 = vpop.f32.mrf.mxu3 }
  0xa5   :  { %v198_v59 = vadd.f32 %v197_v57, %v771_v27  ;;  %v239_v60 = vadd.f32 %v238_v58, %v773_v28 }
  0xa6   :  { %265 = vst [vmem:[%s1047_s5 + $0x60] sm:$0xff] %v116_v55 }
  0xa7   :  { %266 = vst [vmem:[%s1047_s5 + $0x68] sm:$0xff] %v157_v56 }
  0xa8   :  { %267 = vst [vmem:[%s1047_s5 + $0x70] sm:$0xff] %v198_v59 }
  0xa9   :  { %268 = vst [vmem:[%s1047_s5 + $0x78] sm:$0xff] %v239_v60 }
  0xab   :  { %v118_v61 = vpop.f32.mrf.mxu0  ;;  %v159_v62 = vpop.f32.mrf.mxu1 }
  0xac   :  { %v119_v63 = vadd.f32 %v118_v61, %v767_v25  ;;  %v160_v0 = vadd.f32 %v159_v62, %v769_v26  ;;  %v200_v1 = vpop.f32.mrf.mxu2  ;;  %v241_v2 = vpop.f32.mrf.mxu3 }
  0xad   :  { %v201_v3 = vadd.f32 %v200_v1, %v771_v27  ;;  %v242_v4 = vadd.f32 %v241_v2, %v773_v28 }
  0xae   :  { %269 = vst [vmem:[%s1047_s5 + $0x80] sm:$0xff] %v119_v63 }
  0xaf   :  { %270 = vst [vmem:[%s1047_s5 + $0x88] sm:$0xff] %v160_v0 }
  0xb0   :  { %271 = vst [vmem:[%s1047_s5 + $0x90] sm:$0xff] %v201_v3 }
  0xb1   :  { %272 = vst [vmem:[%s1047_s5 + $0x98] sm:$0xff] %v242_v4 }
  0xb3   :  { %v121_v5 = vpop.f32.mrf.mxu0  ;;  %v162_v6 = vpop.f32.mrf.mxu1 }
  0xb4   :  { %v122_v7 = vadd.f32 %v121_v5, %v767_v25  ;;  %v163_v8 = vadd.f32 %v162_v6, %v769_v26  ;;  %v203_v9 = vpop.f32.mrf.mxu2  ;;  %v244_v10 = vpop.f32.mrf.mxu3 }
  0xb5   :  { %v204_v11 = vadd.f32 %v203_v9, %v771_v27  ;;  %v245_v12 = vadd.f32 %v244_v10, %v773_v28 }
  0xb6   :  { %273 = vst [vmem:[%s1047_s5 + $0xa0] sm:$0xff] %v122_v7 }
  0xb7   :  { %274 = vst [vmem:[%s1047_s5 + $0xa8] sm:$0xff] %v163_v8 }
  0xb8   :  { %275 = vst [vmem:[%s1047_s5 + $0xb0] sm:$0xff] %v204_v11 }
  0xb9   :  { %276 = vst [vmem:[%s1047_s5 + $0xb8] sm:$0xff] %v245_v12 }
  0xbb   :  { %v124_v13 = vpop.f32.mrf.mxu0  ;;  %v165_v14 = vpop.f32.mrf.mxu1 }
  0xbc   :  { %v125_v15 = vadd.f32 %v124_v13, %v767_v25  ;;  %v166_v16 = vadd.f32 %v165_v14, %v769_v26  ;;  %v206_v17 = vpop.f32.mrf.mxu2  ;;  %v247_v18 = vpop.f32.mrf.mxu3 }
  0xbd   :  { %v207_v19 = vadd.f32 %v206_v17, %v771_v27  ;;  %v248_v20 = vadd.f32 %v247_v18, %v773_v28 }
  0xbe   :  { %277 = vst [vmem:[%s1047_s5 + $0xc0] sm:$0xff] %v125_v15 }
  0xbf   :  { %278 = vst [vmem:[%s1047_s5 + $0xc8] sm:$0xff] %v166_v16 }
  0xc0   :  { %279 = vst [vmem:[%s1047_s5 + $0xd0] sm:$0xff] %v207_v19 }
  0xc1   :  { %280 = vst [vmem:[%s1047_s5 + $0xd8] sm:$0xff] %v248_v20 }
  0xc3   :  { %v127_v21 = vpop.f32.mrf.mxu0  ;;  %v168_v22 = vpop.f32.mrf.mxu1 }
  0xc4   :  { %v128_v23 = vadd.f32 %v127_v21, %v767_v25  ;;  %v169_v24 = vadd.f32 %v168_v22, %v769_v26  ;;  %v209_v29 = vpop.f32.mrf.mxu2  ;;  %v250_v30 = vpop.f32.mrf.mxu3  ;;  %v903_v25 = vperm.slane %v293_v33, 0  ;;  %v905_v26 = vperm.slane %v293_v33, 1 }
  0xc5   :  { %v210_v31 = vadd.f32 %v209_v29, %v771_v27  ;;  %v251_v32 = vadd.f32 %v250_v30, %v773_v28  ;;  %v910_v27 = vperm.slane %v293_v33, 2  ;;  %v912_v28 = vperm.slane %v293_v33, 3 }
  0xc6   :  { %281 = vst [vmem:[%s1047_s5 + $0xe0] sm:$0xff] %v128_v23 }
  0xc7   :  { %282 = vst [vmem:[%s1047_s5 + $0xe8] sm:$0xff] %v169_v24 }
  0xc8   :  { %283 = vst [vmem:[%s1047_s5 + $0xf0] sm:$0xff] %v210_v31 }
  0xc9   :  { %284 = vst [vmem:[%s1047_s5 + $0xf8] sm:$0xff] %v251_v32 }
  0xcb   :  { %v320_v34 = vpop.f32.mrf.mxu0  ;;  %v361_v35 = vpop.f32.mrf.mxu1 }
  0xcc   :  { %v321_v36 = vadd.f32 %v320_v34, %v903_v25  ;;  %v362_v37 = vadd.f32 %v361_v35, %v905_v26  ;;  %v402_v38 = vpop.f32.mrf.mxu2  ;;  %v443_v39 = vpop.f32.mrf.mxu3 }
  0xcd   :  { %v403_v40 = vadd.f32 %v402_v38, %v910_v27  ;;  %v444_v41 = vadd.f32 %v443_v39, %v912_v28 }
  0xce   :  { %467 = vst [vmem:[%s1048_s6] sm:$0xff] %v321_v36 }
  0xcf   :  { %468 = vst [vmem:[%s1048_s6 + $0x8] sm:$0xff] %v362_v37 }
  0xd0   :  { %469 = vst [vmem:[%s1048_s6 + $0x10] sm:$0xff] %v403_v40 }
  0xd1   :  { %470 = vst [vmem:[%s1048_s6 + $0x18] sm:$0xff] %v444_v41 }
  0xd3   :  { %v323_v42 = vpop.f32.mrf.mxu0  ;;  %v364_v43 = vpop.f32.mrf.mxu1 }
  0xd4   :  { %v324_v44 = vadd.f32 %v323_v42, %v903_v25  ;;  %v365_v45 = vadd.f32 %v364_v43, %v905_v26  ;;  %v405_v46 = vpop.f32.mrf.mxu2  ;;  %v446_v47 = vpop.f32.mrf.mxu3 }
  0xd5   :  { %v406_v48 = vadd.f32 %v405_v46, %v910_v27  ;;  %v447_v49 = vadd.f32 %v446_v47, %v912_v28 }
  0xd6   :  { %471 = vst [vmem:[%s1048_s6 + $0x20] sm:$0xff] %v324_v44 }
  0xd7   :  { %472 = vst [vmem:[%s1048_s6 + $0x28] sm:$0xff] %v365_v45 }
  0xd8   :  { %473 = vst [vmem:[%s1048_s6 + $0x30] sm:$0xff] %v406_v48 }
  0xd9   :  { %474 = vst [vmem:[%s1048_s6 + $0x38] sm:$0xff] %v447_v49 }
  0xdb   :  { %v326_v50 = vpop.f32.mrf.mxu0  ;;  %v367_v51 = vpop.f32.mrf.mxu1 }
  0xdc   :  { %v327_v52 = vadd.f32 %v326_v50, %v903_v25  ;;  %v368_v53 = vadd.f32 %v367_v51, %v905_v26  ;;  %v408_v54 = vpop.f32.mrf.mxu2  ;;  %v449_v55 = vpop.f32.mrf.mxu3 }
  0xdd   :  { %v409_v56 = vadd.f32 %v408_v54, %v910_v27  ;;  %v450_v57 = vadd.f32 %v449_v55, %v912_v28 }
  0xde   :  { %475 = vst [vmem:[%s1048_s6 + $0x40] sm:$0xff] %v327_v52 }
  0xdf   :  { %476 = vst [vmem:[%s1048_s6 + $0x48] sm:$0xff] %v368_v53 }
  0xe0   :  { %477 = vst [vmem:[%s1048_s6 + $0x50] sm:$0xff] %v409_v56 }
  0xe1   :  { %478 = vst [vmem:[%s1048_s6 + $0x58] sm:$0xff] %v450_v57 }
  0xe3   :  { %v329_v58 = vpop.f32.mrf.mxu0  ;;  %v370_v59 = vpop.f32.mrf.mxu1 }
  0xe4   :  { %v330_v60 = vadd.f32 %v329_v58, %v903_v25  ;;  %v371_v61 = vadd.f32 %v370_v59, %v905_v26  ;;  %v411_v62 = vpop.f32.mrf.mxu2  ;;  %v452_v63 = vpop.f32.mrf.mxu3 }
  0xe5   :  { %v412_v0 = vadd.f32 %v411_v62, %v910_v27  ;;  %v453_v1 = vadd.f32 %v452_v63, %v912_v28 }
  0xe6   :  { %479 = vst [vmem:[%s1048_s6 + $0x60] sm:$0xff] %v330_v60 }
  0xe7   :  { %480 = vst [vmem:[%s1048_s6 + $0x68] sm:$0xff] %v371_v61 }
  0xe8   :  { %481 = vst [vmem:[%s1048_s6 + $0x70] sm:$0xff] %v412_v0 }
  0xe9   :  { %482 = vst [vmem:[%s1048_s6 + $0x78] sm:$0xff] %v453_v1 }
  0xeb   :  { %v332_v2 = vpop.f32.mrf.mxu0  ;;  %v373_v3 = vpop.f32.mrf.mxu1 }
  0xec   :  { %v333_v4 = vadd.f32 %v332_v2, %v903_v25  ;;  %v374_v5 = vadd.f32 %v373_v3, %v905_v26  ;;  %v414_v6 = vpop.f32.mrf.mxu2  ;;  %v455_v7 = vpop.f32.mrf.mxu3 }
  0xed   :  { %v415_v8 = vadd.f32 %v414_v6, %v910_v27  ;;  %v456_v9 = vadd.f32 %v455_v7, %v912_v28 }
  0xee   :  { %483 = vst [vmem:[%s1048_s6 + $0x80] sm:$0xff] %v333_v4 }
  0xef   :  { %484 = vst [vmem:[%s1048_s6 + $0x88] sm:$0xff] %v374_v5 }
  0xf0   :  { %485 = vst [vmem:[%s1048_s6 + $0x90] sm:$0xff] %v415_v8 }
  0xf1   :  { %486 = vst [vmem:[%s1048_s6 + $0x98] sm:$0xff] %v456_v9 }
  0xf3   :  { %v335_v10 = vpop.f32.mrf.mxu0  ;;  %v376_v11 = vpop.f32.mrf.mxu1 }
  0xf4   :  { %v336_v12 = vadd.f32 %v335_v10, %v903_v25  ;;  %v377_v13 = vadd.f32 %v376_v11, %v905_v26  ;;  %v417_v14 = vpop.f32.mrf.mxu2  ;;  %v458_v15 = vpop.f32.mrf.mxu3 }
  0xf5   :  { %v418_v16 = vadd.f32 %v417_v14, %v910_v27  ;;  %v459_v17 = vadd.f32 %v458_v15, %v912_v28 }
  0xf6   :  { %487 = vst [vmem:[%s1048_s6 + $0xa0] sm:$0xff] %v336_v12 }
  0xf7   :  { %488 = vst [vmem:[%s1048_s6 + $0xa8] sm:$0xff] %v377_v13 }
  0xf8   :  { %489 = vst [vmem:[%s1048_s6 + $0xb0] sm:$0xff] %v418_v16 }
  0xf9   :  { %490 = vst [vmem:[%s1048_s6 + $0xb8] sm:$0xff] %v459_v17 }
  0xfb   :  { %v338_v18 = vpop.f32.mrf.mxu0  ;;  %v379_v19 = vpop.f32.mrf.mxu1 }
  0xfc   :  { %v339_v20 = vadd.f32 %v338_v18, %v903_v25  ;;  %v380_v21 = vadd.f32 %v379_v19, %v905_v26  ;;  %v420_v22 = vpop.f32.mrf.mxu2  ;;  %v461_v23 = vpop.f32.mrf.mxu3 }
  0xfd   :  { %v421_v24 = vadd.f32 %v420_v22, %v910_v27  ;;  %v462_v29 = vadd.f32 %v461_v23, %v912_v28 }
  0xfe   :  { %491 = vst [vmem:[%s1048_s6 + $0xc0] sm:$0xff] %v339_v20 }
  0xff   :  { %492 = vst [vmem:[%s1048_s6 + $0xc8] sm:$0xff] %v380_v21 }
 0x100   :  { %493 = vst [vmem:[%s1048_s6 + $0xd0] sm:$0xff] %v421_v24 }
 0x101   :  { %494 = vst [vmem:[%s1048_s6 + $0xd8] sm:$0xff] %v462_v29 }
 0x103   :  { %v341_v30 = vpop.f32.mrf.mxu0  ;;  %v382_v31 = vpop.f32.mrf.mxu1 }
 0x104   :  { %v342_v32 = vadd.f32 %v341_v30, %v903_v25  ;;  %v383_v33 = vadd.f32 %v382_v31, %v905_v26  ;;  %v423_v34 = vpop.f32.mrf.mxu2  ;;  %v464_v35 = vpop.f32.mrf.mxu3 }
 0x105   :  { %v424_v36 = vadd.f32 %v423_v34, %v910_v27  ;;  %v465_v37 = vadd.f32 %v464_v35, %v912_v28 }
 0x106   :  { %495 = vst [vmem:[%s1048_s6 + $0xe0] sm:$0xff] %v342_v32 }
 0x107   :  { %496 = vst [vmem:[%s1048_s6 + $0xe8] sm:$0xff] %v383_v33 }
 0x108   :  { %497 = vst [vmem:[%s1048_s6 + $0xf0] sm:$0xff] %v424_v36 }
 0x109   :  { %498 = vst [vmem:[%s1048_s6 + $0xf8] sm:$0xff] %v465_v37 }
 0x10a   :  { %507 = vsyncpa [#allocation3], 1 }

// kernel: bidirectional_lstm_forward.4
= control target key start
LH: loop header
LB: loop body
LE: loop exit
PB: predicated region body
PF: predicated region fallthrough
CT: control target
= control target key end

     0   :  { %11 = vsyncpa [#allocation7], 0  ;;  %s6748_s0 = inlined_call_operand.vmem [shape: f32[8,8,512], index: 0, kind: input, shape index: {}]   ;;  %s6749_s1 = inlined_call_operand.vmem [shape: f32[8,8,512], index: 1, kind: input, shape index: {}]   ;;  %s6750_s2 = inlined_call_operand.hbm [shape: f32[128,512], index: 2, kind: input, shape index: {}]   ;;  %s6751_s3 = inlined_call_operand.hbm [shape: f32[128,512], index: 3, kind: input, shape index: {}]   ;;  %s6752_s4 = inlined_call_operand.vmem [shape: f32[8,8,128], index: 4, kind: output, shape index: {0}]   ;;  %s6753_s5 = inlined_call_operand.vmem [shape: f32[8,8,128], index: 5, kind: output, shape index: {1}]  }
   0x1   :  { %s30_s20 = sshll.u32 %s6750_s2, 4  ;;  %s31_s20 = int_to_ptr.hbm [resolvable:$true] %s30_s20 }
   0x2   :  { %12 = vsyncpa [#allocation9], 0  ;;  %s4059_s21 = smov [#allocation6]   ;;  %s43_s25 = sshll.u32 %s6751_s3, 4  ;;  %s44_s25 = int_to_ptr.hbm [resolvable:$true] %s43_s25 }
   0x3   :  { %s32_s22 = sshll.u32 %s4059_s21, 4  ;;  %s4060_s26 = smov 512   ;;  %s33_s22 = int_to_ptr.vmem [resolvable:$true] %s32_s22 }
   0x4   :  { %s4061_s27 = smov 32   ;;  %s4062_s28 = smov [#allocation8]  }
   0x5   :  { %38 = dma.hbm_to_vmem [thread:$0]  %s31_s20, 8192, %s33_s22, [#allocation7], %s4060_s26, %s4060_s26, %s4061_s27  }
   0x6   :  { %s45_s29 = sshll.u32 %s4062_s28, 4  ;;  %s46_s29 = int_to_ptr.vmem [resolvable:$true] %s45_s29 }
   0x7   :  { %51 = dma.hbm_to_vmem [thread:$0]  %s44_s25, 8192, %s46_s29, [#allocation9], %s4060_s26, %s4060_s26, %s4061_s27  }
   0x8   :  { %4055 = dma.done.wait [#allocation7], 8192  }
   0x9   :  { %4056 = vsyncadd [#allocation7], 4294959104 }
   0xa   :  { %4057 = dma.done.wait [#allocation9], 8192  }
   0xb   :  { %4058 = vsyncadd [#allocation9], 4294959104  ;;  %v4100_v0 = vld [vmem:[#allocation6 + $0x1e0] sm:$0xff]  ;;  %v4102_v1 = vld [vmem:[#allocation6 + $0x1e8] sm:$0xff]  ;;  %v6764_v62 = vmov 0.0  }
   0xc   :  { %v4104_v2 = vld [vmem:[#allocation6 + $0x1f8] sm:$0xff]  ;;  %170 = vmatpush.msra.mxu0 %v4100_v0  ;;  %190 = vmatpush.msra.mxu1 %v4102_v1  ;;  %v4108_v3 = vld [vmem:[#allocation6 + $0x1c0] sm:$0xff]  ;;  %v4110_v4 = vld [vmem:[#allocation6 + $0x1c8] sm:$0xff] }
   0xd   :  { %v4112_v5 = vld [vmem:[#allocation6 + $0x1d8] sm:$0xff]  ;;  %230 = vmatpush.msra.mxu3 %v4104_v2  ;;  %v4115_v6 = vld [vmem:[#allocation6 + $0x1a0] sm:$0xff]  ;;  %v4117_v7 = vld [vmem:[#allocation6 + $0x1a8] sm:$0xff] }
   0xe   :  { %171 = vmatpush.msra.mxu0 %v4108_v3  ;;  %191 = vmatpush.msra.mxu1 %v4110_v4  ;;  %v4121_v8 = vld [vmem:[#allocation6 + $0x1b8] sm:$0xff]  ;;  %v4124_v9 = vld [vmem:[#allocation6 + $0x180] sm:$0xff]  ;;  %v4126_v10 = vld [vmem:[#allocation6 + $0x188] sm:$0xff] }
   0xf   :  { %231 = vmatpush.msra.mxu3 %v4112_v5  ;;  %v4130_v11 = vld [vmem:[#allocation6 + $0x198] sm:$0xff]  ;;  %v4133_v12 = vld [vmem:[#allocation6 + $0x160] sm:$0xff]  ;;  %v4135_v13 = vld [vmem:[#allocation6 + $0x168] sm:$0xff] }
  0x10   :  { %172 = vmatpush.msra.mxu0 %v4115_v6  ;;  %192 = vmatpush.msra.mxu1 %v4117_v7  ;;  %v4139_v14 = vld [vmem:[#allocation6 + $0x178] sm:$0xff]  ;;  %v4142_v15 = vld [vmem:[#allocation6 + $0x140] sm:$0xff]  ;;  %v4144_v16 = vld [vmem:[#allocation6 + $0x148] sm:$0xff] }
  0x11   :  { %232 = vmatpush.msra.mxu3 %v4121_v8  ;;  %v4146_v17 = vld [vmem:[#allocation6 + $0x1f0] sm:$0xff]  ;;  %v4150_v18 = vld [vmem:[#allocation6 + $0x158] sm:$0xff]  ;;  %v4155_v20 = vld [vmem:[#allocation6 + $0x120] sm:$0xff] }
  0x12   :  { %173 = vmatpush.msra.mxu0 %v4124_v9  ;;  %193 = vmatpush.msra.mxu1 %v4126_v10  ;;  %v4152_v19 = vld [vmem:[#allocation6 + $0x1d0] sm:$0xff]  ;;  %v4157_v21 = vld [vmem:[#allocation6 + $0x128] sm:$0xff]  ;;  %v4162_v22 = vld [vmem:[#allocation6 + $0x138] sm:$0xff] }
  0x13   :  { %233 = vmatpush.msra.mxu3 %v4130_v11  ;;  %210 = vmatpush.msra.mxu2 %v4146_v17  ;;  %v4164_v23 = vld [vmem:[#allocation6 + $0x1b0] sm:$0xff]  ;;  %v4167_v24 = vld [vmem:[#allocation6 + $0x100] sm:$0xff]  ;;  %v4169_v25 = vld [vmem:[#allocation6 + $0x108] sm:$0xff] }
  0x14   :  { %174 = vmatpush.msra.mxu0 %v4133_v12  ;;  %194 = vmatpush.msra.mxu1 %v4135_v13  ;;  %v4174_v26 = vld [vmem:[#allocation6 + $0x118] sm:$0xff]  ;;  %v4176_v27 = vld [vmem:[#allocation6 + $0x190] sm:$0xff]  ;;  %v4179_v28 = vld [vmem:[#allocation6 + $0xe0] sm:$0xff] }
  0x15   :  { %234 = vmatpush.msra.mxu3 %v4139_v14  ;;  %211 = vmatpush.msra.mxu2 %v4152_v19  ;;  %v4181_v29 = vld [vmem:[#allocation6 + $0xe8] sm:$0xff]  ;;  %v4186_v30 = vld [vmem:[#allocation6 + $0xf8] sm:$0xff]  ;;  %v4188_v31 = vld [vmem:[#allocation6 + $0x170] sm:$0xff] }
  0x16   :  { %175 = vmatpush.msra.mxu0 %v4142_v15  ;;  %195 = vmatpush.msra.mxu1 %v4144_v16  ;;  %v4191_v32 = vld [vmem:[#allocation6 + $0xc0] sm:$0xff]  ;;  %v4193_v33 = vld [vmem:[#allocation6 + $0xc8] sm:$0xff]  ;;  %v4198_v34 = vld [vmem:[#allocation6 + $0xd8] sm:$0xff] }
  0x17   :  { %235 = vmatpush.msra.mxu3 %v4150_v18  ;;  %212 = vmatpush.msra.mxu2 %v4164_v23  ;;  %v4200_v35 = vld [vmem:[#allocation6 + $0x150] sm:$0xff]  ;;  %v4203_v36 = vld [vmem:[#allocation6 + $0xa0] sm:$0xff]  ;;  %v4205_v37 = vld [vmem:[#allocation6 + $0xa8] sm:$0xff] }
  0x18   :  { %176 = vmatpush.msra.mxu0 %v4155_v20  ;;  %196 = vmatpush.msra.mxu1 %v4157_v21  ;;  %v4210_v38 = vld [vmem:[#allocation6 + $0xb8] sm:$0xff]  ;;  %v4212_v39 = vld [vmem:[#allocation6 + $0x130] sm:$0xff]  ;;  %v4215_v40 = vld [vmem:[#allocation6 + $0x80] sm:$0xff] }
  0x19   :  { %236 = vmatpush.msra.mxu3 %v4162_v22  ;;  %213 = vmatpush.msra.mxu2 %v4176_v27  ;;  %v4217_v41 = vld [vmem:[#allocation6 + $0x88] sm:$0xff]  ;;  %v4222_v42 = vld [vmem:[#allocation6 + $0x98] sm:$0xff]  ;;  %v4224_v43 = vld [vmem:[#allocation6 + $0x110] sm:$0xff] }
  0x1a   :  { %177 = vmatpush.msra.mxu0 %v4167_v24  ;;  %197 = vmatpush.msra.mxu1 %v4169_v25  ;;  %v4227_v44 = vld [vmem:[#allocation6 + $0x60] sm:$0xff]  ;;  %v4229_v45 = vld [vmem:[#allocation6 + $0x68] sm:$0xff]  ;;  %v4234_v46 = vld [vmem:[#allocation6 + $0x78] sm:$0xff] }
  0x1b   :  { %237 = vmatpush.msra.mxu3 %v4174_v26  ;;  %214 = vmatpush.msra.mxu2 %v4188_v31  ;;  %v4236_v47 = vld [vmem:[#allocation6 + $0xf0] sm:$0xff]  ;;  %v4239_v48 = vld [vmem:[#allocation6 + $0x40] sm:$0xff]  ;;  %v4241_v49 = vld [vmem:[#allocation6 + $0x48] sm:$0xff] }
  0x1c   :  { %178 = vmatpush.msra.mxu0 %v4179_v28  ;;  %198 = vmatpush.msra.mxu1 %v4181_v29  ;;  %7046 = vst [vmem:[#allocation12_spill] sm:$0xff] %v4236_v47  ;;  %v4246_v50 = vld [vmem:[#allocation6 + $0x58] sm:$0xff]  ;;  %v4248_v51 = vld [vmem:[#allocation6 + $0xd0] sm:$0xff]  ;;  %v4251_v52 = vld [vmem:[#allocation6 + $0x20] sm:$0xff] }
  0x1d   :  { %238 = vmatpush.msra.mxu3 %v4186_v30  ;;  %215 = vmatpush.msra.mxu2 %v4200_v35  ;;  %7047 = vst [vmem:[#allocation13_spill] sm:$0xff] %v4248_v51  ;;  %v4253_v53 = vld [vmem:[#allocation6 + $0x28] sm:$0xff]  ;;  %v4258_v54 = vld [vmem:[#allocation6 + $0x38] sm:$0xff]  ;;  %v4260_v55 = vld [vmem:[#allocation6 + $0xb0] sm:$0xff] }
  0x1e   :  { %179 = vmatpush.msra.mxu0 %v4191_v32  ;;  %199 = vmatpush.msra.mxu1 %v4193_v33  ;;  %7048 = vst [vmem:[#allocation14_spill] sm:$0xff] %v4258_v54  ;;  %v4263_v56 = vld [vmem:[#allocation6] sm:$0xff]  ;;  %v4265_v57 = vld [vmem:[#allocation6 + $0x8] sm:$0xff]  ;;  %v4270_v58 = vld [vmem:[#allocation6 + $0x18] sm:$0xff] }
  0x1f   :  { %239 = vmatpush.msra.mxu3 %v4198_v34  ;;  %216 = vmatpush.msra.mxu2 %v4212_v39  ;;  %7049 = vst [vmem:[#allocation15_spill] sm:$0xff] %v4260_v55  ;;  %v4273_v59 = vld [vmem:[#allocation8 + $0x1e0] sm:$0xff]  ;;  %v4278_v60 = vld [vmem:[#allocation8 + $0x1e8] sm:$0xff]  ;;  %v4280_v61 = vld [vmem:[#allocation8 + $0x1f8] sm:$0xff] }
  0x20   :  { %180 = vmatpush.msra.mxu0 %v4203_v36  ;;  %200 = vmatpush.msra.mxu1 %v4205_v37  ;;  %7050 = vst [vmem:[#allocation16_spill] sm:$0xff] %v4263_v56  ;;  %v4284_v63 = vld [vmem:[#allocation8 + $0x1c0] sm:$0xff] }
  0x21   :  { %240 = vmatpush.msra.mxu3 %v4210_v38  ;;  %217 = vmatpush.msra.mxu2 %v4224_v43  ;;  %7051 = vst [vmem:[#allocation17_spill] sm:$0xff] %v4265_v57 }
  0x22   :  { %181 = vmatpush.msra.mxu0 %v4215_v40  ;;  %201 = vmatpush.msra.mxu1 %v4217_v41  ;;  %7052 = vst [vmem:[#allocation18_spill] sm:$0xff] %v4270_v58 }
  0x23   :  { %241 = vmatpush.msra.mxu3 %v4222_v42  ;;  %218 = vmatpush.msra.mxu2 %v4236_v47  ;;  %7053 = vst [vmem:[#allocation19_spill] sm:$0xff] %v4273_v59  ;;  %v4299_v47 = vld [vmem:[#allocation8 + $0x1a8] sm:$0xff] }
  0x24   :  { %182 = vmatpush.msra.mxu0 %v4227_v44  ;;  %202 = vmatpush.msra.mxu1 %v4229_v45  ;;  %7054 = vst [vmem:[#allocation20_spill] sm:$0xff] %v4278_v60 }
  0x25   :  { %242 = vmatpush.msra.mxu3 %v4234_v46  ;;  %219 = vmatpush.msra.mxu2 %v4248_v51  ;;  %7055 = vst [vmem:[#allocation21_spill] sm:$0xff] %v4280_v61  ;;  %v4290_v51 = vld [vmem:[#allocation8 + $0x1d8] sm:$0xff] }
  0x26   :  { %183 = vmatpush.msra.mxu0 %v4239_v48  ;;  %203 = vmatpush.msra.mxu1 %v4241_v49  ;;  %7056 = vst [vmem:[#allocation22_spill] sm:$0xff] %v4284_v63 }
  0x27   :  { %243 = vmatpush.msra.mxu3 %v4246_v50  ;;  %220 = vmatpush.msra.mxu2 %v4260_v55  ;;  %v4288_v55 = vld [vmem:[#allocation8 + $0x1c8] sm:$0xff]  ;;  %7058 = vst [vmem:[#allocation24_spill] sm:$0xff] %v4290_v51 }
  0x28   :  { %184 = vmatpush.msra.mxu0 %v4251_v52  ;;  %204 = vmatpush.msra.mxu1 %v4253_v53  ;;  %7057 = vst [vmem:[#allocation23_spill] sm:$0xff] %v4288_v55 }
  0x29   :  { %244 = vmatpush.msra.mxu3 %v4258_v54  ;;  %7061 = vst [vmem:[#allocation27_spill] sm:$0xff] %v4299_v47  ;;  %v4388_v54 = vld [vmem:[#allocation8 + $0x1b0] sm:$0xff] }
  0x2a   :  { %185 = vmatpush.msra.mxu0 %v4263_v56  ;;  %205 = vmatpush.msra.mxu1 %v4265_v57  ;;  %v4294_v57 = vld [vmem:[#allocation8 + $0x1a0] sm:$0xff]  ;;  %v4301_v56 = vld [vmem:[#allocation8 + $0x1b8] sm:$0xff]  ;;  %7091 = vst [vmem:[#allocation56_spill] sm:$0xff] %v4388_v54 }
  0x2b   :  { %245 = vmatpush.msra.mxu3 %v4270_v58  ;;  %186 = vmatmul.f32.vlgmr.msra.gmra.mxu0 %v6764_v62  ;;  %7059 = vst [vmem:[#allocation25_spill] sm:$0xff] %v4294_v57  ;;  %v4296_v58 = vld [vmem:[#allocation6 + $0x90] sm:$0xff] }
  0x2c   :  { %206 = vmatmul.f32.vlgmr.msra.gmra.mxu1 %v6764_v62  ;;  %323 = vmatpush.msrb.mxu0 %v4273_v59  ;;  %7060 = vst [vmem:[#allocation26_spill] sm:$0xff] %v4296_v58  ;;  %v4306_v59 = vld [vmem:[#allocation8 + $0x180] sm:$0xff] }
  0x2d   :  { %343 = vmatpush.msrb.mxu1 %v4278_v60  ;;  %383 = vmatpush.msrb.mxu3 %v4280_v61  ;;  %7062 = vst [vmem:[#allocation28_spill] sm:$0xff] %v4301_v56  ;;  %v4308_v60 = vld [vmem:[#allocation6 + $0x70] sm:$0xff]  ;;  %v4312_v61 = vld [vmem:[#allocation8 + $0x188] sm:$0xff] }
  0x2e   :  { %324 = vmatpush.msrb.mxu0 %v4284_v63  ;;  %246 = vmatmul.f32.vlgmr.msra.gmra.mxu3 %v6764_v62  ;;  %7063 = vst [vmem:[#allocation29_spill] sm:$0xff] %v4306_v59  ;;  %v4314_v63 = vld [vmem:[#allocation8 + $0x198] sm:$0xff]  ;;  %v4318_v62 = vld [vmem:[#allocation8 + $0x160] sm:$0xff] }
  0x2f   :  { %344 = vmatpush.msrb.mxu1 %v4288_v55  ;;  %384 = vmatpush.msrb.mxu3 %v4290_v51  ;;  %7064 = vst [vmem:[#allocation30_spill] sm:$0xff] %v4308_v60  ;;  %v4320_v55 = vld [vmem:[#allocation6 + $0x50] sm:$0xff]  ;;  %v4324_v51 = vld [vmem:[#allocation8 + $0x168] sm:$0xff] }
  0x30   :  { %325 = vmatpush.msrb.mxu0 %v4294_v57  ;;  %221 = vmatpush.msra.mxu2 %v4296_v58  ;;  %7065 = vst [vmem:[#allocation31_spill] sm:$0xff] %v4312_v61  ;;  %v4326_v57 = vld [vmem:[#allocation8 + $0x178] sm:$0xff]  ;;  %v4330_v58 = vld [vmem:[#allocation8 + $0x140] sm:$0xff] }
  0x31   :  { %7066 = vst [vmem:[#allocation32_spill] sm:$0xff] %v4314_v63  ;;  %345 = vmatpush.msrb.mxu1 %v4299_v47  ;;  %385 = vmatpush.msrb.mxu3 %v4301_v56  ;;  %v4332_v47 = vld [vmem:[#allocation6 + $0x30] sm:$0xff]  ;;  %v4336_v56 = vld [vmem:[#allocation8 + $0x148] sm:$0xff] }
  0x32   :  { %7067 = vst [vmem:[#allocation33_spill] sm:$0xff] %v4318_v62  ;;  %326 = vmatpush.msrb.mxu0 %v4306_v59  ;;  %222 = vmatpush.msra.mxu2 %v4308_v60  ;;  %v4338_v59 = vld [vmem:[#allocation8 + $0x158] sm:$0xff]  ;;  %v4342_v60 = vld [vmem:[#allocation8 + $0x120] sm:$0xff] }
  0x33   :  { %7068 = vst [vmem:[#allocation34_spill] sm:$0xff] %v4320_v55  ;;  %346 = vmatpush.msrb.mxu1 %v4312_v61  ;;  %386 = vmatpush.msrb.mxu3 %v4314_v63  ;;  %v4344_v61 = vld [vmem:[#allocation6 + $0x10] sm:$0xff]  ;;  %v4348_v63 = vld [vmem:[#allocation8 + $0x128] sm:$0xff] }
  0x34   :  { %7069 = vst [vmem:[#allocation35_spill] sm:$0xff] %v4324_v51  ;;  %327 = vmatpush.msrb.mxu0 %v4318_v62  ;;  %223 = vmatpush.msra.mxu2 %v4320_v55  ;;  %v4350_v62 = vld [vmem:[#allocation8 + $0x138] sm:$0xff]  ;;  %v4354_v55 = vld [vmem:[#allocation8 + $0x100] sm:$0xff] }
  0x35   :  { %7070 = vst [vmem:[#allocation36_spill] sm:$0xff] %v4326_v57  ;;  %347 = vmatpush.msrb.mxu1 %v4324_v51  ;;  %387 = vmatpush.msrb.mxu3 %v4326_v57  ;;  %v4358_v57 = vld [vmem:[#allocation8 + $0x108] sm:$0xff]  ;;  %v4360_v51 = vld [vmem:[#allocation8 + $0x118] sm:$0xff] }
  0x36   :  { %7071 = vst [vmem:[#allocation37_spill] sm:$0xff] %v4330_v58  ;;  %328 = vmatpush.msrb.mxu0 %v4330_v58  ;;  %224 = vmatpush.msra.mxu2 %v4332_v47  ;;  %v4366_v58 = vld [vmem:[#allocation8 + $0xe0] sm:$0xff] }
  0x37   :  { %7072 = vst [vmem:[#allocation38_spill] sm:$0xff] %v4332_v47  ;;  %348 = vmatpush.msrb.mxu1 %v4336_v56  ;;  %388 = vmatpush.msrb.mxu3 %v4338_v59  ;;  %v4364_v47 = vld [vmem:[#allocation8 + $0x1f0] sm:$0xff] }
  0x38   :  { %7073 = vst [vmem:[#allocation39_spill] sm:$0xff] %v4336_v56  ;;  %329 = vmatpush.msrb.mxu0 %v4342_v60  ;;  %225 = vmatpush.msra.mxu2 %v4344_v61  ;;  %v4370_v56 = vld [vmem:[#allocation8 + $0xe8] sm:$0xff] }
  0x39   :  { %7074 = vst [vmem:[#allocation40_spill] sm:$0xff] %v4338_v59  ;;  %349 = vmatpush.msrb.mxu1 %v4348_v63  ;;  %389 = vmatpush.msrb.mxu3 %v4350_v62  ;;  %v7084_v59 = vmov 0.0  }
  0x3a   :  { %7075 = vst [vmem:[#allocation41_spill] sm:$0xff] %v4342_v60  ;;  %330 = vmatpush.msrb.mxu0 %v4354_v55  ;;  %226 = vmatmul.f32.vlgmr.msra.gmra.mxu2 %v7084_v59  ;;  %v4372_v60 = vld [vmem:[#allocation8 + $0xf8] sm:$0xff] }
  0x3b   :  { %7076 = vst [vmem:[#allocation42_spill] sm:$0xff] %v4344_v61  ;;  %350 = vmatpush.msrb.mxu1 %v4358_v57  ;;  %390 = vmatpush.msrb.mxu3 %v4360_v51  ;;  %v4376_v61 = vld [vmem:[#allocation8 + $0x1d0] sm:$0xff] }
  0x3c   :  { %7077 = vst [vmem:[#allocation43_spill] sm:$0xff] %v4348_v63  ;;  %v4378_v63 = vld [vmem:[#allocation8 + $0xc0] sm:$0xff]  ;;  %363 = vmatpush.msrb.mxu2 %v4364_v47  ;;  %331 = vmatpush.msrb.mxu0 %v4366_v58 }
  0x3d   :  { %7078 = vst [vmem:[#allocation44_spill] sm:$0xff] %v4350_v62  ;;  %v4382_v62 = vld [vmem:[#allocation8 + $0xc8] sm:$0xff]  ;;  %351 = vmatpush.msrb.mxu1 %v4370_v56  ;;  %391 = vmatpush.msrb.mxu3 %v4372_v60 }
  0x3e   :  { %7079 = vst [vmem:[#allocation45_spill] sm:$0xff] %v4354_v55  ;;  %v4384_v55 = vld [vmem:[#allocation8 + $0xd8] sm:$0xff]  ;;  %364 = vmatpush.msrb.mxu2 %v4376_v61  ;;  %332 = vmatpush.msrb.mxu0 %v4378_v63 }
  0x3f   :  { %7080 = vst [vmem:[#allocation46_spill] sm:$0xff] %v4358_v57  ;;  %v4390_v57 = vld [vmem:[#allocation8 + $0xa0] sm:$0xff]  ;;  %352 = vmatpush.msrb.mxu1 %v4382_v62  ;;  %392 = vmatpush.msrb.mxu3 %v4384_v55 }
  0x40   :  { %7081 = vst [vmem:[#allocation47_spill] sm:$0xff] %v4360_v51  ;;  %v4394_v51 = vld [vmem:[#allocation8 + $0xa8] sm:$0xff]  ;;  %365 = vmatpush.msrb.mxu2 %v4388_v54  ;;  %333 = vmatpush.msrb.mxu0 %v4390_v57  ;;  %v4420_v54 = vld [vmem:[#allocation8 + $0x78] sm:$0xff] }
  0x41   :  { %7082 = vst [vmem:[#allocation48_spill] sm:$0xff] %v4364_v47  ;;  %v4396_v47 = vld [vmem:[#allocation8 + $0xb8] sm:$0xff]  ;;  %353 = vmatpush.msrb.mxu1 %v4394_v51 }
  0x42   :  { %7083 = vst [vmem:[#allocation49_spill] sm:$0xff] %v4366_v58  ;;  %v4400_v58 = vld [vmem:[#allocation8 + $0x190] sm:$0xff]  ;;  %393 = vmatpush.msrb.mxu3 %v4396_v47 }
  0x43   :  { %7085 = vst [vmem:[#allocation50_spill] sm:$0xff] %v4370_v56  ;;  %v4402_v56 = vld [vmem:[#allocation8 + $0x80] sm:$0xff]  ;;  %366 = vmatpush.msrb.mxu2 %v4400_v58 }
  0x44   :  { %7086 = vst [vmem:[#allocation51_spill] sm:$0xff] %v4372_v60  ;;  %v4406_v60 = vld [vmem:[#allocation8 + $0x88] sm:$0xff]  ;;  %334 = vmatpush.msrb.mxu0 %v4402_v56 }
  0x45   :  { %7087 = vst [vmem:[#allocation52_spill] sm:$0xff] %v4376_v61  ;;  %v4408_v61 = vld [vmem:[#allocation8 + $0x98] sm:$0xff]  ;;  %354 = vmatpush.msrb.mxu1 %v4406_v60 }
  0x46   :  { %7088 = vst [vmem:[#allocation53_spill] sm:$0xff] %v4378_v63  ;;  %v4412_v63 = vld [vmem:[#allocation8 + $0x170] sm:$0xff]  ;;  %394 = vmatpush.msrb.mxu3 %v4408_v61 }
  0x47   :  { %7089 = vst [vmem:[#allocation54_spill] sm:$0xff] %v4382_v62  ;;  %v4414_v62 = vld [vmem:[#allocation8 + $0x60] sm:$0xff]  ;;  %367 = vmatpush.msrb.mxu2 %v4412_v63 }
  0x48   :  { %7090 = vst [vmem:[#allocation55_spill] sm:$0xff] %v4384_v55  ;;  %v4418_v55 = vld [vmem:[#allocation8 + $0x68] sm:$0xff]  ;;  %335 = vmatpush.msrb.mxu0 %v4414_v62  ;;  %395 = vmatpush.msrb.mxu3 %v4420_v54 }
  0x49   :  { %7092 = vst [vmem:[#allocation57_spill] sm:$0xff] %v4390_v57  ;;  %v4424_v57 = vld [vmem:[#allocation8 + $0x150] sm:$0xff]  ;;  %355 = vmatpush.msrb.mxu1 %v4418_v55 }
  0x4a   :  { %7093 = vst [vmem:[#allocation58_spill] sm:$0xff] %v4394_v51  ;;  %v4426_v51 = vld [vmem:[#allocation8 + $0x40] sm:$0xff]  ;;  %368 = vmatpush.msrb.mxu2 %v4424_v57 }
  0x4b   :  { %7094 = vst [vmem:[#allocation59_spill] sm:$0xff] %v4396_v47  ;;  %v4430_v47 = vld [vmem:[#allocation8 + $0x48] sm:$0xff]  ;;  %336 = vmatpush.msrb.mxu0 %v4426_v51 }
  0x4c   :  { %7095 = vst [vmem:[#allocation60_spill] sm:$0xff] %v4400_v58  ;;  %v4432_v58 = vld [vmem:[#allocation8 + $0x58] sm:$0xff]  ;;  %356 = vmatpush.msrb.mxu1 %v4430_v47 }
  0x4d   :  { %7096 = vst [vmem:[#allocation61_spill] sm:$0xff] %v4402_v56  ;;  %v4436_v56 = vld [vmem:[#allocation8 + $0x130] sm:$0xff]  ;;  %396 = vmatpush.msrb.mxu3 %v4432_v58 }
  0x4e   :  { %7097 = vst [vmem:[#allocation62_spill] sm:$0xff] %v4406_v60  ;;  %v4438_v60 = vld [vmem:[#allocation8 + $0x20] sm:$0xff]  ;;  %369 = vmatpush.msrb.mxu2 %v4436_v56 }
  0x4f   :  { %7098 = vst [vmem:[#allocation63_spill] sm:$0xff] %v4408_v61  ;;  %v4442_v61 = vld [vmem:[#allocation8 + $0x28] sm:$0xff]  ;;  %337 = vmatpush.msrb.mxu0 %v4438_v60 }
  0x50   :  { %7099 = vst [vmem:[#allocation64_spill] sm:$0xff] %v4412_v63  ;;  %v4444_v63 = vld [vmem:[#allocation8 + $0x38] sm:$0xff]  ;;  %357 = vmatpush.msrb.mxu1 %v4442_v61 }
  0x51   :  { %7100 = vst [vmem:[#allocation65_spill] sm:$0xff] %v4414_v62  ;;  %v4448_v62 = vld [vmem:[#allocation8 + $0x110] sm:$0xff]  ;;  %397 = vmatpush.msrb.mxu3 %v4444_v63 }
  0x52   :  { %7101 = vst [vmem:[#allocation66_spill] sm:$0xff] %v4418_v55  ;;  %v4450_v55 = vld [vmem:[#allocation8] sm:$0xff]  ;;  %370 = vmatpush.msrb.mxu2 %v4448_v62 }
  0x53   :  { %7102 = vst [vmem:[#allocation67_spill] sm:$0xff] %v4420_v54  ;;  %v4454_v54 = vld [vmem:[#allocation8 + $0x8] sm:$0xff]  ;;  %338 = vmatpush.msrb.mxu0 %v4450_v55 }
  0x54   :  { %7103 = vst [vmem:[#allocation68_spill] sm:$0xff] %v4424_v57  ;;  %v4456_v57 = vld [vmem:[#allocation8 + $0x18] sm:$0xff]  ;;  %358 = vmatpush.msrb.mxu1 %v4454_v54  ;;  %339 = vmatmul.f32.vlgmr.msrb.gmra.mxu0 %v7084_v59 }
  0x55   :  { %7104 = vst [vmem:[#allocation69_spill] sm:$0xff] %v4432_v58  ;;  %v4462_v58 = vld [vmem:[#allocation8 + $0xf0] sm:$0xff]  ;;  %398 = vmatpush.msrb.mxu3 %v4456_v57  ;;  %359 = vmatmul.f32.vlgmr.msrb.gmra.mxu1 %v7084_v59 }
  0x56   :  { %7105 = vst [vmem:[#allocation70_spill] sm:$0xff] %v4438_v60  ;;  %v4468_v60 = vld [vmem:[#allocation8 + $0xd0] sm:$0xff]  ;;  %371 = vmatpush.msrb.mxu2 %v4462_v58  ;;  %399 = vmatmul.f32.vlgmr.msrb.gmra.mxu3 %v7084_v59 }
  0x57   :  { %7106 = vst [vmem:[#allocation71_spill] sm:$0xff] %v4444_v63  ;;  %v4472_v63 = vld [vmem:[#allocation8 + $0xb0] sm:$0xff]  ;;  %605 = vmatpush.msra.mxu0 %v4100_v0  ;;  %625 = vmatpush.msra.mxu1 %v4102_v1 }
  0x58   :  { %7107 = vst [vmem:[#allocation72_spill] sm:$0xff] %v4454_v54  ;;  %372 = vmatpush.msrb.mxu2 %v4468_v60  ;;  %665 = vmatpush.msra.mxu3 %v4104_v2  ;;  %v4484_v54 = vld [vmem:[#allocation8 + $0x70] sm:$0xff] }
  0x59   :  { %7108 = vst [vmem:[#allocation73_spill] sm:$0xff] %v4456_v57  ;;  %v4478_v57 = vld [vmem:[#allocation8 + $0x90] sm:$0xff]  ;;  %606 = vmatpush.msra.mxu0 %v4108_v3  ;;  %626 = vmatpush.msra.mxu1 %v4110_v4  ;;  %v7110_v4 = vld [vmem:[#allocation16_spill] sm:$0xff] }
  0x5a   :  { %373 = vmatpush.msrb.mxu2 %v4472_v63  ;;  %666 = vmatpush.msra.mxu3 %v4112_v5  ;;  %v4490_v0 = vld [vmem:[#allocation8 + $0x50] sm:$0xff]  ;;  %v7111_v5 = vld [vmem:[#allocation12_spill] sm:$0xff] }
  0x5b   :  { %607 = vmatpush.msra.mxu0 %v4115_v6  ;;  %627 = vmatpush.msra.mxu1 %v4117_v7  ;;  %v4496_v1 = vld [vmem:[#allocation8 + $0x30] sm:$0xff]  ;;  %v7112_v6 = vld [vmem:[#allocation17_spill] sm:$0xff] }
  0x5c   :  { %374 = vmatpush.msrb.mxu2 %v4478_v57  ;;  %667 = vmatpush.msra.mxu3 %v4121_v8  ;;  %v4502_v2 = vld [vmem:[#allocation8 + $0x10] sm:$0xff]  ;;  %v7114_v8 = vld [vmem:[#allocation19_spill] sm:$0xff] }
  0x5d   :  { %608 = vmatpush.msra.mxu0 %v4124_v9  ;;  %628 = vmatpush.msra.mxu1 %v4126_v10  ;;  %v7109_v3 = vld [vmem:[#allocation14_spill] sm:$0xff]  ;;  %v7115_v9 = vld [vmem:[#allocation13_spill] sm:$0xff]  ;;  %v7116_v10 = vld [vmem:[#allocation20_spill] sm:$0xff] }
  0x5e   :  { %375 = vmatpush.msrb.mxu2 %v4484_v54  ;;  %668 = vmatpush.msra.mxu3 %v4130_v11  ;;  %v7113_v7 = vld [vmem:[#allocation18_spill] sm:$0xff]  ;;  %v7117_v11 = vld [vmem:[#allocation21_spill] sm:$0xff] }
  0x5f   :  { %609 = vmatpush.msra.mxu0 %v4133_v12  ;;  %629 = vmatpush.msra.mxu1 %v4135_v13  ;;  %v7118_v12 = vld [vmem:[#allocation22_spill] sm:$0xff]  ;;  %v7119_v13 = vld [vmem:[#allocation15_spill] sm:$0xff] }
  0x60   :  { %376 = vmatpush.msrb.mxu2 %v4490_v0  ;;  %669 = vmatpush.msra.mxu3 %v4139_v14  ;;  %v7120_v14 = vld [vmem:[#allocation23_spill] sm:$0xff] }
  0x61   :  { %610 = vmatpush.msra.mxu0 %v4142_v15  ;;  %630 = vmatpush.msra.mxu1 %v4144_v16  ;;  %v7121_v15 = vld [vmem:[#allocation24_spill] sm:$0xff]  ;;  %v7122_v16 = vld [vmem:[#allocation25_spill] sm:$0xff] }
  0x62   :  { %377 = vmatpush.msrb.mxu2 %v4496_v1  ;;  %670 = vmatpush.msra.mxu3 %v4150_v18  ;;  %v7124_v18 = vld [vmem:[#allocation27_spill] sm:$0xff] }
  0x63   :  { %611 = vmatpush.msra.mxu0 %v4155_v20  ;;  %631 = vmatpush.msra.mxu1 %v4157_v21  ;;  %v7126_v20 = vld [vmem:[#allocation29_spill] sm:$0xff]  ;;  %v7127_v21 = vld [vmem:[#allocation30_spill] sm:$0xff] }
  0x64   :  { %378 = vmatpush.msrb.mxu2 %v4502_v2  ;;  %671 = vmatpush.msra.mxu3 %v4162_v22  ;;  %v7128_v22 = vld [vmem:[#allocation31_spill] sm:$0xff] }
  0x65   :  { %379 = vmatmul.f32.vlgmr.msrb.gmra.mxu2 %v7084_v59  ;;  %612 = vmatpush.msra.mxu0 %v4167_v24  ;;  %v7130_v24 = vld [vmem:[#allocation33_spill] sm:$0xff]  ;;  %v7158_v59 = vld [vmem:[#allocation59_spill] sm:$0xff] }
  0x66   :  { %645 = vmatpush.msra.mxu2 %v4146_v17  ;;  %632 = vmatpush.msra.mxu1 %v4169_v25  ;;  %v7123_v17 = vld [vmem:[#allocation26_spill] sm:$0xff] }
  0x67   :  { %672 = vmatpush.msra.mxu3 %v4174_v26  ;;  %613 = vmatpush.msra.mxu0 %v4179_v28  ;;  %v7131_v25 = vld [vmem:[#allocation34_spill] sm:$0xff]  ;;  %v7132_v26 = vld [vmem:[#allocation35_spill] sm:$0xff]  ;;  %v7134_v28 = vld [vmem:[#allocation37_spill] sm:$0xff] }
  0x68   :  { %646 = vmatpush.msra.mxu2 %v4152_v19  ;;  %633 = vmatpush.msra.mxu1 %v4181_v29  ;;  %v7125_v19 = vld [vmem:[#allocation28_spill] sm:$0xff]  ;;  %v7135_v29 = vld [vmem:[#allocation38_spill] sm:$0xff] }
  0x69   :  { %673 = vmatpush.msra.mxu3 %v4186_v30  ;;  %614 = vmatpush.msra.mxu0 %v4191_v32  ;;  %v7136_v30 = vld [vmem:[#allocation39_spill] sm:$0xff]  ;;  %v7138_v32 = vld [vmem:[#allocation41_spill] sm:$0xff] }
  0x6a   :  { %647 = vmatpush.msra.mxu2 %v4164_v23  ;;  %634 = vmatpush.msra.mxu1 %v4193_v33  ;;  %v7129_v23 = vld [vmem:[#allocation32_spill] sm:$0xff]  ;;  %v7139_v33 = vld [vmem:[#allocation42_spill] sm:$0xff] }
  0x6b   :  { %674 = vmatpush.msra.mxu3 %v4198_v34  ;;  %615 = vmatpush.msra.mxu0 %v4203_v36  ;;  %v7140_v34 = vld [vmem:[#allocation43_spill] sm:$0xff]  ;;  %v7142_v36 = vld [vmem:[#allocation44_spill] sm:$0xff] }
  0x6c   :  { %648 = vmatpush.msra.mxu2 %v4176_v27  ;;  %635 = vmatpush.msra.mxu1 %v4205_v37  ;;  %v7133_v27 = vld [vmem:[#allocation36_spill] sm:$0xff]  ;;  %v7143_v37 = vld [vmem:[#allocation45_spill] sm:$0xff] }
  0x6d   :  { %675 = vmatpush.msra.mxu3 %v4210_v38  ;;  %616 = vmatpush.msra.mxu0 %v4215_v40  ;;  %v7144_v38 = vld [vmem:[#allocation46_spill] sm:$0xff]  ;;  %v7146_v40 = vld [vmem:[#allocation47_spill] sm:$0xff] }
  0x6e   :  { %649 = vmatpush.msra.mxu2 %v4188_v31  ;;  %636 = vmatpush.msra.mxu1 %v4217_v41  ;;  %v7137_v31 = vld [vmem:[#allocation40_spill] sm:$0xff]  ;;  %v7147_v41 = vld [vmem:[#allocation49_spill] sm:$0xff] }
  0x6f   :  { %676 = vmatpush.msra.mxu3 %v4222_v42  ;;  %617 = vmatpush.msra.mxu0 %v4227_v44  ;;  %v7148_v42 = vld [vmem:[#allocation50_spill] sm:$0xff]  ;;  %v7150_v44 = vld [vmem:[#allocation51_spill] sm:$0xff] }
  0x70   :  { %650 = vmatpush.msra.mxu2 %v4200_v35  ;;  %637 = vmatpush.msra.mxu1 %v4229_v45  ;;  %v7141_v35 = vld [vmem:[#allocation48_spill] sm:$0xff]  ;;  %v7151_v45 = vld [vmem:[#allocation53_spill] sm:$0xff] }
  0x71   :  { %677 = vmatpush.msra.mxu3 %v4234_v46  ;;  %618 = vmatpush.msra.mxu0 %v4239_v48  ;;  %v7152_v46 = vld [vmem:[#allocation54_spill] sm:$0xff]  ;;  %v7153_v48 = vld [vmem:[#allocation60_spill] sm:$0xff] }
  0x72   :  { %651 = vmatpush.msra.mxu2 %v4212_v39  ;;  %638 = vmatpush.msra.mxu1 %v4241_v49  ;;  %v7145_v39 = vld [vmem:[#allocation52_spill] sm:$0xff]  ;;  %v7154_v49 = vld [vmem:[#allocation55_spill] sm:$0xff] }
  0x73   :  { %678 = vmatpush.msra.mxu3 %v4246_v50  ;;  %619 = vmatpush.msra.mxu0 %v4251_v52  ;;  %v7155_v50 = vld [vmem:[#allocation57_spill] sm:$0xff]  ;;  %v7156_v52 = vld [vmem:[#allocation58_spill] sm:$0xff] }
  0x74   :  { %652 = vmatpush.msra.mxu2 %v4224_v43  ;;  %639 = vmatpush.msra.mxu1 %v4253_v53  ;;  %v7149_v43 = vld [vmem:[#allocation56_spill] sm:$0xff] }
  0x75   :  { %679 = vmatpush.msra.mxu3 %v7109_v3  ;;  %620 = vmatpush.msra.mxu0 %v7110_v4  ;;  %v7157_v53 = vld [vmem:[#allocation64_spill] sm:$0xff]  ;;  %v7159_v3 = vld [vmem:[#allocation61_spill] sm:$0xff]  ;;  %v7160_v4 = vld [vmem:[#allocation62_spill] sm:$0xff] }
  0x76   :  { %653 = vmatpush.msra.mxu2 %v7111_v5  ;;  %640 = vmatpush.msra.mxu1 %v7112_v6  ;;  %v7161_v5 = vld [vmem:[#allocation68_spill] sm:$0xff]  ;;  %v7162_v6 = vld [vmem:[#allocation63_spill] sm:$0xff] }
  0x77   :  { %680 = vmatpush.msra.mxu3 %v7113_v7  ;;  %758 = vmatpush.msrb.mxu0 %v7114_v8  ;;  %v7163_v7 = vld [vmem:[#allocation65_spill] sm:$0xff]  ;;  %v7164_v8 = vld [vmem:[#allocation66_spill] sm:$0xff] }
  0x78   :  { %654 = vmatpush.msra.mxu2 %v7115_v9  ;;  %778 = vmatpush.msrb.mxu1 %v7116_v10  ;;  %v7165_v9 = vld [vmem:[#allocation67_spill] sm:$0xff]  ;;  %v7166_v10 = vld [vmem:[#allocation69_spill] sm:$0xff] }
  0x79   :  { %818 = vmatpush.msrb.mxu3 %v7117_v11  ;;  %759 = vmatpush.msrb.mxu0 %v7118_v12  ;;  %v7167_v11 = vld [vmem:[#allocation70_spill] sm:$0xff]  ;;  %v7168_v12 = vld [vmem:[#allocation71_spill] sm:$0xff] }
  0x7a   :  { %655 = vmatpush.msra.mxu2 %v7119_v13  ;;  %779 = vmatpush.msrb.mxu1 %v7120_v14 }
  0x7b   :  { %819 = vmatpush.msrb.mxu3 %v7121_v15  ;;  %760 = vmatpush.msrb.mxu0 %v7122_v16 }
  0x7c   :  { %656 = vmatpush.msra.mxu2 %v7123_v17  ;;  %780 = vmatpush.msrb.mxu1 %v7124_v18  ;;  %v104_v17 = vld [vmem:[%s6748_s0 + $0x10] sm:$0xff] }
  0x7d   :  { %820 = vmatpush.msrb.mxu3 %v7125_v19  ;;  %761 = vmatpush.msrb.mxu0 %v7126_v20 }
  0x7e   :  { %657 = vmatpush.msra.mxu2 %v7127_v21  ;;  %781 = vmatpush.msrb.mxu1 %v7128_v22 }
  0x7f   :  { %821 = vmatpush.msrb.mxu3 %v7129_v23  ;;  %762 = vmatpush.msrb.mxu0 %v7130_v24 }
  0x80   :  { %658 = vmatpush.msra.mxu2 %v7131_v25  ;;  %782 = vmatpush.msrb.mxu1 %v7132_v26 }
  0x81   :  { %822 = vmatpush.msrb.mxu3 %v7133_v27  ;;  %763 = vmatpush.msrb.mxu0 %v7134_v28 }
  0x82   :  { %659 = vmatpush.msra.mxu2 %v7135_v29  ;;  %783 = vmatpush.msrb.mxu1 %v7136_v30 }
  0x83   :  { %823 = vmatpush.msrb.mxu3 %v7137_v31  ;;  %764 = vmatpush.msrb.mxu0 %v7138_v32 }
  0x84   :  { %660 = vmatpush.msra.mxu2 %v7139_v33  ;;  %784 = vmatpush.msrb.mxu1 %v7140_v34 }
  0x85   :  { %824 = vmatpush.msrb.mxu3 %v7142_v36  ;;  %765 = vmatpush.msrb.mxu0 %v7143_v37 }
  0x86   :  { %798 = vmatpush.msrb.mxu2 %v7141_v35  ;;  %785 = vmatpush.msrb.mxu1 %v7144_v38 }
  0x87   :  { %825 = vmatpush.msrb.mxu3 %v7146_v40  ;;  %766 = vmatpush.msrb.mxu0 %v7147_v41 }
  0x88   :  { %799 = vmatpush.msrb.mxu2 %v7145_v39  ;;  %786 = vmatpush.msrb.mxu1 %v7148_v42 }
  0x89   :  { %826 = vmatpush.msrb.mxu3 %v7150_v44  ;;  %767 = vmatpush.msrb.mxu0 %v7151_v45  ;;  %v3628_v45 = vld [vmem:[%s6749_s1 + $0xe0] sm:$0xff] }
  0x8a   :  { %800 = vmatpush.msrb.mxu2 %v7149_v43  ;;  %787 = vmatpush.msrb.mxu1 %v7152_v46  ;;  %v3629_v46 = vld [vmem:[%s6749_s1 + $0xe8] sm:$0xff] }
  0x8b   :  { %827 = vmatpush.msrb.mxu3 %v7154_v49  ;;  %768 = vmatpush.msrb.mxu0 %v7155_v50 }
  0x8c   :  { %801 = vmatpush.msrb.mxu2 %v7153_v48  ;;  %788 = vmatpush.msrb.mxu1 %v7156_v52 }
  0x8d   :  { %828 = vmatpush.msrb.mxu3 %v7158_v59  ;;  %769 = vmatpush.msrb.mxu0 %v7159_v3 }
  0x8e   :  { %802 = vmatpush.msrb.mxu2 %v7157_v53  ;;  %789 = vmatpush.msrb.mxu1 %v7160_v4 }
  0x8f   :  { %829 = vmatpush.msrb.mxu3 %v7162_v6  ;;  %770 = vmatpush.msrb.mxu0 %v7163_v7 }
  0x90   :  { %803 = vmatpush.msrb.mxu2 %v7161_v5  ;;  %790 = vmatpush.msrb.mxu1 %v7164_v8 }
  0x91   :  { %830 = vmatpush.msrb.mxu3 %v7165_v9  ;;  %771 = vmatpush.msrb.mxu0 %v4426_v51  ;;  %v7170_v51 = vld [vmem:[#allocation73_spill] sm:$0xff] }
  0x92   :  { %804 = vmatpush.msrb.mxu2 %v4436_v56  ;;  %791 = vmatpush.msrb.mxu1 %v4430_v47  ;;  %v7169_v56 = vld [vmem:[#allocation72_spill] sm:$0xff] }
  0x93   :  { %831 = vmatpush.msrb.mxu3 %v7166_v10  ;;  %772 = vmatpush.msrb.mxu0 %v7167_v11  ;;  %v102_v47 = vld [vmem:[%s6748_s0] sm:$0xff]  ;;  %v3631_v11 = vld [vmem:[%s6749_s1 + $0xf8] sm:$0xff] }
  0x94   :  { %805 = vmatpush.msrb.mxu2 %v4448_v62  ;;  %792 = vmatpush.msrb.mxu1 %v4442_v61 }
  0x95   :  { %832 = vmatpush.msrb.mxu3 %v7168_v12  ;;  %773 = vmatpush.msrb.mxu0 %v4450_v55  ;;  %v103_v55 = vld [vmem:[%s6748_s0 + $0x8] sm:$0xff] }
  0x96   :  { %806 = vmatpush.msrb.mxu2 %v4462_v58  ;;  %793 = vmatpush.msrb.mxu1 %v7169_v56 }
  0x97   :  { %833 = vmatpush.msrb.mxu3 %v7170_v51 }
  0x98   :  { %807 = vmatpush.msrb.mxu2 %v4468_v60 }
  0x9a   :  { %808 = vmatpush.msrb.mxu2 %v4472_v63  ;;  %v105_v63 = vld [vmem:[%s6748_s0 + $0x18] sm:$0xff] }
  0x9c   :  { %809 = vmatpush.msrb.mxu2 %v4478_v57 }
  0x9e   :  { %810 = vmatpush.msrb.mxu2 %v4484_v54 }
  0xa0   :  { %811 = vmatpush.msrb.mxu2 %v4490_v0 }
  0xa2   :  { %812 = vmatpush.msrb.mxu2 %v4496_v1 }
  0xa4   :  { %813 = vmatpush.msrb.mxu2 %v4502_v2 }
  0xa8   :  { %v187_v58 = vpop.f32.mrf.mxu0 }
  0xa9   :  { %v250_v60 = vadd.f32 %v187_v58, %v102_v47  ;;  %v207_v61 = vpop.f32.mrf.mxu1 }
  0xaa   :  { %v251_v57 = vadd.f32 %v207_v61, %v103_v55 }
  0xab   :  { %v3632_v62 = vmul.f32 -1.442695, %v250_v60 }
  0xac   :  { %v3633_v54 = vmul.f32 -1.442695, %v251_v57 }
  0xad   :  { %3751 = vpow2.f32 %v3632_v62 }
  0xae   :  { %3753 = vpow2.f32 %v3633_v54 }
  0xb1   :  { %v247_v0 = vpop.f32.mrf.mxu3 }
  0xb2   :  { %v253_v1 = vadd.f32 %v247_v0, %v105_v63 }
  0xb3   :  { %v3752_v2 = vpop.eup %3751 }
  0xb4   :  { %v3754_v13 = vpop.eup %3753  ;;  %v410_v14 = vadd.f32 1.0, %v3752_v2  ;;  %v3634_v15 = vmul.f32 -1.442695, %v253_v1 }
  0xb5   :  { %v429_v16 = vadd.f32 1.0, %v3754_v13  ;;  %v3630_v13 = vld [vmem:[%s6749_s1 + $0xf0] sm:$0xff] }
  0xb6   :  { %3755 = vrcp.f32 %v410_v14  ;;  %vm416_vm0 = vweird.f32 %v410_v14  ;;  %v420_v22 = vand.u32 2147483647, %v410_v14  ;;  %v422_v26 = vand.u32 2147483648, %v410_v14 }
  0xb7   :  { %3757 = vrcp.f32 %v429_v16  ;;  %vm435_vm1 = vweird.f32 %v429_v16  ;;  %v441_v28 = vand.u32 2147483648, %v429_v16  ;;  %v439_v31 = vand.u32 2147483647, %v429_v16 }
  0xb8   :  { %3759 = vpow2.f32 %v3634_v15  ;;  %v423_v34 = vor.u32 1.1754944e-38, %v422_v26  ;;  %vm421_vm5 = vcmp.eq.f32.partialorder %v420_v22, 8.507059e+37 }
  0xb9   :  { %v442_v35 = vor.u32 1.1754944e-38, %v441_v28  ;;  %vm440_vm7 = vcmp.eq.f32.partialorder %v439_v31, 8.507059e+37 }
  0xbc   :  { %v3756_v18 = vpop.eup %3755 }
  0xbd   :  { %v3758_v19 = vpop.eup %3757  ;;  %v412_v20 = vmul.f32 %v3756_v18, %v410_v14  ;;  %v227_v21 = vpop.f32.mrf.mxu2  ;;  %vm417_vm2 = vweird.f32 %v3756_v18 }
  0xbe   :  { %v3760_v23 = vpop.eup %3759  ;;  %v431_v24 = vmul.f32 %v3758_v19, %v429_v16  ;;  %v252_v25 = vadd.f32 %v227_v21, %v104_v17  ;;  %vm436_vm3 = vweird.f32 %v3758_v19  ;;  %vm418_vm4 = vmor %vm416_vm0, %vm417_vm2 }
  0xbf   :  { %v413_v27 = vsub.f32 1.0, %v412_v20  ;;  %v449_v29 = vadd.f32 1.0, %v3760_v23  ;;  %vm437_vm6 = vmor %vm435_vm1, %vm436_vm3 }
  0xc0   :  { %v432_v30 = vsub.f32 1.0, %v431_v24  ;;  %3761 = vtanh.f32 %v252_v25 }
  0xc1   :  { %3763 = vrcp.f32 %v449_v29  ;;  %v414_v32 = vmul.f32 %v3756_v18, %v413_v27  ;;  %vm455_vm8 = vweird.f32 %v449_v29  ;;  %v461_v50 = vand.u32 2147483648, %v449_v29 }
  0xc2   :  { %v433_v33 = vmul.f32 %v3758_v19, %v432_v30  ;;  %v459_v59 = vand.u32 2147483647, %v449_v29 }
  0xc3   :  { %v415_v36 = vadd.f32 %v3756_v18, %v414_v32  ;;  %v462_v10 = vor.u32 1.1754944e-38, %v461_v50 }
  0xc4   :  { %v434_v37 = vadd.f32 %v3758_v19, %v433_v33  ;;  %vm460_vm11 = vcmp.eq.f32.partialorder %v459_v59, 8.507059e+37  ;;  %v4660_v59 = vld [vmem:[#allocation6 + $0x1e8] sm:$0xff] }
  0xc5   :  { %v419_v38 = vsel %vm418_vm4, %v3756_v18, %v415_v36 }
  0xc6   :  { %v3762_v39 = vpop.eup %3761  ;;  %v424_v40 = vsel %vm421_vm5, %v423_v34, %v419_v38  ;;  %v438_v41 = vsel %vm437_vm6, %v3758_v19, %v434_v37 }
  0xc7   :  { %v3764_v42 = vpop.eup %3763  ;;  %v443_v43 = vsel %vm440_vm7, %v442_v35, %v438_v41  ;;  %v466_v44 = vmul.f32 %v3762_v39, %v424_v40 }
  0xc8   :  { %v451_v48 = vmul.f32 %v3764_v42, %v449_v29  ;;  %v465_v49 = vmul.f32 0.0, %v443_v43  ;;  %vm456_vm9 = vweird.f32 %v3764_v42 }
  0xc9   :  { %vm457_vm10 = vmor %vm455_vm8, %vm456_vm9 }
  0xca   :  { %v452_v3 = vsub.f32 1.0, %v451_v48  ;;  %v4640_v4 = vadd.f32 %v466_v44, %v465_v49 }
  0xcc   :  { %v453_v7 = vmul.f32 %v3764_v42, %v452_v3  ;;  %3765 = vtanh.f32 %v4640_v4  ;;  %v4662_v3 = vld [vmem:[#allocation6 + $0x1f0] sm:$0xff] }
  0xce   :  { %v454_v12 = vadd.f32 %v3764_v42, %v453_v7  ;;  %v4672_v7 = vld [vmem:[#allocation6 + $0x1c8] sm:$0xff] }
  0xd0   :  { %v458_v51 = vsel %vm457_vm10, %v3764_v42, %v454_v12  ;;  %v4688_v12 = vld [vmem:[#allocation6 + $0x1b0] sm:$0xff] }
  0xd1   :  { %v340_v52 = vpop.f32.mrf.mxu0  ;;  %v463_v55 = vsel %vm460_vm11, %v462_v10, %v458_v51  ;;  %v4682_v10 = vld [vmem:[#allocation6 + $0x1a0] sm:$0xff] }
  0xd2   :  { %v360_v53 = vpop.f32.mrf.mxu1  ;;  %v403_v5 = vadd.f32 %v3628_v45, %v340_v52  ;;  %v3766_v58 = vpop.eup %3765  ;;  %v4694_v51 = vld [vmem:[#allocation6 + $0x180] sm:$0xff] }
  0xd3   :  { %v404_v6 = vadd.f32 %v3629_v46, %v360_v53  ;;  %v469_v61 = vmul.f32 %v3766_v58, %v463_v55  ;;  %v4658_v53 = vld [vmem:[#allocation6 + $0x1e0] sm:$0xff]  ;;  %v4698_v55 = vld [vmem:[#allocation6 + $0x190] sm:$0xff]  ;;  %v4702_v58 = vld [vmem:[#allocation6 + $0x198] sm:$0xff] }
  0xd4   :  { %v3635_v8 = vmul.f32 -1.442695, %v403_v5  ;;  %v4666_v5 = vld [vmem:[#allocation6 + $0x1f8] sm:$0xff] }
  0xd5   :  { %v3636_v9 = vmul.f32 -1.442695, %v404_v6  ;;  %533 = vst [vmem:[%s6752_s4] sm:$0xff] %v469_v61  ;;  %621 = vmatmul.f32.vlgmr.msra.gmra.mxu0 %v469_v61  ;;  %641 = vmatmul.f32.vlgmr.msra.gmra.mxu1 %v469_v61  ;;  %v4670_v6 = vld [vmem:[#allocation6 + $0x1c0] sm:$0xff] }
  0xd6   :  { %3767 = vpow2.f32 %v3635_v8  ;;  %681 = vmatmul.f32.vlgmr.msra.gmra.mxu3 %v469_v61  ;;  %661 = vmatmul.f32.vlgmr.msra.gmra.mxu2 %v469_v61  ;;  %v4674_v8 = vld [vmem:[#allocation6 + $0x1d0] sm:$0xff]  ;;  %v4708_v61 = vld [vmem:[#allocation6 + $0x168] sm:$0xff] }
  0xd7   :  { %3769 = vpow2.f32 %v3636_v9  ;;  %1041 = vmatpush.msra.mxu0 %v4658_v53  ;;  %1061 = vmatpush.msra.mxu1 %v4660_v59  ;;  %v4678_v9 = vld [vmem:[#allocation6 + $0x1d8] sm:$0xff] }
  0xd8   :  { %1081 = vmatpush.msra.mxu2 %v4662_v3  ;;  %1101 = vmatpush.msra.mxu3 %v4666_v5 }
  0xd9   :  { %v400_v56 = vpop.f32.mrf.mxu3  ;;  %1042 = vmatpush.msra.mxu0 %v4670_v6  ;;  %1062 = vmatpush.msra.mxu1 %v4672_v7 }
  0xda   :  { %v406_v47 = vadd.f32 %v3631_v11, %v400_v56  ;;  %1082 = vmatpush.msra.mxu2 %v4674_v8  ;;  %1102 = vmatpush.msra.mxu3 %v4678_v9  ;;  %v4684_v11 = vld [vmem:[#allocation6 + $0x1a8] sm:$0xff]  ;;  %v4690_v56 = vld [vmem:[#allocation6 + $0x1b8] sm:$0xff] }
  0xdb   :  { %1043 = vmatpush.msra.mxu0 %v4682_v10  ;;  %1063 = vmatpush.msra.mxu1 %v4684_v11 }
  0xdc   :  { %v3637_v60 = vmul.f32 -1.442695, %v406_v47  ;;  %v3768_v57 = vpop.eup %3767  ;;  %1083 = vmatpush.msra.mxu2 %v4688_v12  ;;  %1103 = vmatpush.msra.mxu3 %v4690_v56  ;;  %v4696_v47 = vld [vmem:[#allocation6 + $0x188] sm:$0xff] }
  0xdd   :  { %v3770_v62 = vpop.eup %3769  ;;  %v473_v54 = vadd.f32 1.0, %v3768_v57  ;;  %1044 = vmatpush.msra.mxu0 %v4694_v51  ;;  %1064 = vmatpush.msra.mxu1 %v4696_v47  ;;  %v4710_v57 = vld [vmem:[#allocation6 + $0x170] sm:$0xff] }
  0xde   :  { %3771 = vpow2.f32 %v3637_v60  ;;  %v492_v63 = vadd.f32 1.0, %v3770_v62  ;;  %1084 = vmatpush.msra.mxu2 %v4698_v55  ;;  %1104 = vmatpush.msra.mxu3 %v4702_v58  ;;  %v4706_v60 = vld [vmem:[#allocation6 + $0x160] sm:$0xff]  ;;  %v4714_v62 = vld [vmem:[#allocation6 + $0x178] sm:$0xff] }
  0xdf   :  { %3773 = vrcp.f32 %v473_v54  ;;  %v483_v21 = vand.u32 2147483647, %v473_v54  ;;  %v485_v22 = vand.u32 2147483648, %v473_v54  ;;  %vm479_vm14 = vweird.f32 %v473_v54  ;;  %1045 = vmatpush.msra.mxu0 %v4706_v60  ;;  %1065 = vmatpush.msra.mxu1 %v4708_v61 }
  0xe0   :  { %3775 = vrcp.f32 %v492_v63  ;;  %v504_v23 = vand.u32 2147483648, %v492_v63  ;;  %v502_v26 = vand.u32 2147483647, %v492_v63  ;;  %vm498_vm15 = vweird.f32 %v492_v63  ;;  %1085 = vmatpush.msra.mxu2 %v4710_v57  ;;  %1105 = vmatpush.msra.mxu3 %v4714_v62 }
  0xe1   :  { %v486_v30 = vor.u32 1.1754944e-38, %v485_v22  ;;  %vm484_vm1 = vcmp.eq.f32.partialorder %v483_v21, 8.507059e+37  ;;  %v4756_v21 = vld [vmem:[#allocation6 + $0x118] sm:$0xff]  ;;  %v4760_v22 = vld [vmem:[#allocation6 + $0xe0] sm:$0xff] }
  0xe2   :  { %v505_v32 = vor.u32 1.1754944e-38, %v504_v23  ;;  %vm503_vm3 = vcmp.eq.f32.partialorder %v502_v26, 8.507059e+37  ;;  %v4762_v23 = vld [vmem:[#allocation6 + $0xe8] sm:$0xff] }
  0xe4   :  { %v3772_v0 = vpop.eup %3771 }
  0xe5   :  { %v512_v1 = vadd.f32 1.0, %v3772_v0  ;;  %v3774_v2 = vpop.eup %3773  ;;  %v4722_v0 = vld [vmem:[#allocation6 + $0x150] sm:$0xff] }
  0xe6   :  { %v3776_v14 = vpop.eup %3775  ;;  %v475_v15 = vmul.f32 %v3774_v2, %v473_v54  ;;  %vm480_vm12 = vweird.f32 %v3774_v2  ;;  %v4718_v54 = vld [vmem:[#allocation6 + $0x140] sm:$0xff]  ;;  %1086 = vmatpush.msra.mxu2 %v4722_v0 }
  0xe7   :  { %3777 = vrcp.f32 %v512_v1  ;;  %v494_v16 = vmul.f32 %v3776_v14, %v492_v63  ;;  %vm499_vm13 = vweird.f32 %v3776_v14  ;;  %vm481_vm0 = vmor %vm479_vm14, %vm480_vm12  ;;  %v524_v44 = vand.u32 2147483648, %v512_v1  ;;  %v4720_v63 = vld [vmem:[#allocation6 + $0x148] sm:$0xff]  ;;  %1046 = vmatpush.msra.mxu0 %v4718_v54 }
  0xe8   :  { %v380_v17 = vpop.f32.mrf.mxu2  ;;  %v476_v18 = vsub.f32 1.0, %v475_v15  ;;  %vm500_vm2 = vmor %vm498_vm15, %vm499_vm13  ;;  %vm518_vm5 = vweird.f32 %v512_v1  ;;  %v522_v45 = vand.u32 2147483647, %v512_v1  ;;  %1066 = vmatpush.msra.mxu1 %v4720_v63  ;;  %v4738_v15 = vld [vmem:[#allocation6 + $0x138] sm:$0xff] }
  0xe9   :  { %v405_v19 = vadd.f32 %v3630_v13, %v380_v17  ;;  %v495_v20 = vsub.f32 1.0, %v494_v16  ;;  %v525_v48 = vor.u32 1.1754944e-38, %v524_v44  ;;  %v4732_v13 = vld [vmem:[#allocation6 + $0x128] sm:$0xff]  ;;  %v4742_v16 = vld [vmem:[#allocation6 + $0x100] sm:$0xff]  ;;  %v4803_v44 = vld [vmem:[#allocation6 + $0x90] sm:$0xff] }
  0xea   :  { %v477_v24 = vmul.f32 %v3774_v2, %v476_v18  ;;  %vm523_vm7 = vcmp.eq.f32.partialorder %v522_v45, 8.507059e+37  ;;  %1067 = vmatpush.msra.mxu1 %v4732_v13  ;;  %v4744_v17 = vld [vmem:[#allocation6 + $0x108] sm:$0xff]  ;;  %v4746_v18 = vld [vmem:[#allocation6 + $0x110] sm:$0xff]  ;;  %7180 = vst [vmem:[#allocation22_spill] sm:$0xff] %v4803_v44  ;;  %v4807_v45 = vld [vmem:[#allocation6 + $0x98] sm:$0xff] }
  0xeb   :  { %3779 = vtanh.f32 %v405_v19  ;;  %v496_v25 = vmul.f32 %v3776_v14, %v495_v20  ;;  %v3639_v19 = vld [vmem:[%s6748_s0 + $0x20] sm:$0xff]  ;;  %v3640_v20 = vld [vmem:[%s6748_s0 + $0x28] sm:$0xff]  ;;  %7181 = vst [vmem:[#allocation15_spill] sm:$0xff] %v4807_v45 }
  0xec   :  { %v478_v28 = vadd.f32 %v3774_v2, %v477_v24  ;;  %1068 = vmatpush.msra.mxu1 %v4744_v17  ;;  %v4764_v24 = vld [vmem:[#allocation6 + $0xf0] sm:$0xff] }
  0xed   :  { %v3778_v27 = vpop.eup %3777  ;;  %v497_v31 = vadd.f32 %v3776_v14, %v496_v25 }
  0xee   :  { %v514_v29 = vmul.f32 %v3778_v27, %v512_v1  ;;  %v482_v33 = vsel %vm481_vm0, %v3774_v2, %v478_v28  ;;  %vm519_vm4 = vweird.f32 %v3778_v27  ;;  %v4726_v1 = vld [vmem:[#allocation6 + $0x158] sm:$0xff]  ;;  %v4730_v2 = vld [vmem:[#allocation6 + $0x120] sm:$0xff]  ;;  %1069 = vmatpush.msra.mxu1 %v4762_v23 }
  0xef   :  { %v487_v35 = vsel %vm484_vm1, %v486_v30, %v482_v33  ;;  %v501_v36 = vsel %vm500_vm2, %v3776_v14, %v497_v31  ;;  %vm520_vm6 = vmor %vm518_vm5, %vm519_vm4  ;;  %1106 = vmatpush.msra.mxu3 %v4726_v1  ;;  %v4734_v14 = vld [vmem:[#allocation6 + $0x130] sm:$0xff]  ;;  %1047 = vmatpush.msra.mxu0 %v4730_v2  ;;  %v4772_v30 = vld [vmem:[#allocation6 + $0xc0] sm:$0xff] }
  0xf0   :  { %v515_v34 = vsub.f32 1.0, %v514_v29  ;;  %v506_v38 = vsel %vm503_vm3, %v505_v32, %v501_v36  ;;  %1087 = vmatpush.msra.mxu2 %v4734_v14  ;;  %v4774_v31 = vld [vmem:[#allocation6 + $0xc8] sm:$0xff]  ;;  %v4776_v32 = vld [vmem:[#allocation6 + $0xd0] sm:$0xff]  ;;  %v4780_v33 = vld [vmem:[#allocation6 + $0xd8] sm:$0xff] }
  0xf1   :  { %v3780_v37 = vpop.eup %3779  ;;  %v528_v40 = vmul.f32 0.0, %v506_v38  ;;  %1107 = vmatpush.msra.mxu3 %v4738_v15  ;;  %1048 = vmatpush.msra.mxu0 %v4742_v16  ;;  %7171 = vst [vmem:[#allocation14_spill] sm:$0xff] %v4774_v31  ;;  %v4784_v36 = vld [vmem:[#allocation6 + $0xa0] sm:$0xff]  ;;  %v3642_v38 = vld [vmem:[%s6748_s0 + $0x38] sm:$0xff] }
  0xf2   :  { %v516_v39 = vmul.f32 %v3778_v27, %v515_v34  ;;  %v529_v41 = vmul.f32 %v3780_v37, %v487_v35  ;;  %1088 = vmatpush.msra.mxu2 %v4746_v18  ;;  %7172 = vst [vmem:[#allocation16_spill] sm:$0xff] %v4776_v32  ;;  %1070 = vmatpush.msra.mxu1 %v4774_v31  ;;  %v4786_v37 = vld [vmem:[#allocation6 + $0xa8] sm:$0xff] }
  0xf3   :  { %1108 = vmatpush.msra.mxu3 %v4756_v21  ;;  %1049 = vmatpush.msra.mxu0 %v4760_v22  ;;  %7173 = vst [vmem:[#allocation12_spill] sm:$0xff] %v4780_v33 }
  0xf4   :  { %v4652_v42 = vadd.f32 %v529_v41, %v528_v40  ;;  %v517_v43 = vadd.f32 %v3778_v27, %v516_v39  ;;  %1089 = vmatpush.msra.mxu2 %v4764_v24  ;;  %7174 = vst [vmem:[#allocation17_spill] sm:$0xff] %v4784_v36  ;;  %1071 = vmatpush.msra.mxu1 %v4786_v37  ;;  %v4793_v39 = vld [vmem:[#allocation6 + $0xb0] sm:$0xff]  ;;  %v4795_v40 = vld [vmem:[#allocation6 + $0xb8] sm:$0xff]  ;;  %v4799_v41 = vld [vmem:[#allocation6 + $0x80] sm:$0xff] }
  0xf5   :  { %1050 = vmatpush.msra.mxu0 %v4772_v30  ;;  %7175 = vst [vmem:[#allocation18_spill] sm:$0xff] %v4786_v37 }
  0xf6   :  { %3781 = vtanh.f32 %v4652_v42  ;;  %v521_v46 = vsel %vm520_vm6, %v3778_v27, %v517_v43  ;;  %v4768_v27 = vld [vmem:[#allocation6 + $0xf8] sm:$0xff]  ;;  %1090 = vmatpush.msra.mxu2 %v4776_v32  ;;  %7176 = vst [vmem:[#allocation19_spill] sm:$0xff] %v4793_v39  ;;  %v4801_v43 = vld [vmem:[#allocation6 + $0x88] sm:$0xff] }
  0xf7   :  { %v526_v50 = vsel %vm523_vm7, %v525_v48, %v521_v46  ;;  %1109 = vmatpush.msra.mxu3 %v4768_v27  ;;  %1051 = vmatpush.msra.mxu0 %v4784_v36  ;;  %7177 = vst [vmem:[#allocation13_spill] sm:$0xff] %v4795_v40  ;;  %v4963_v36 = vld [vmem:[#allocation8 + $0x128] sm:$0xff] }
  0xf8   :  { %1091 = vmatpush.msra.mxu2 %v4793_v39  ;;  %7178 = vst [vmem:[#allocation20_spill] sm:$0xff] %v4799_v41  ;;  %1072 = vmatpush.msra.mxu1 %v4801_v43  ;;  %v3644_v32 = vld [vmem:[%s6749_s1 + $0xc8] sm:$0xff] }
  0xf9   :  { %1110 = vmatpush.msra.mxu3 %v4780_v33  ;;  %7179 = vst [vmem:[#allocation21_spill] sm:$0xff] %v4801_v43  ;;  %1052 = vmatpush.msra.mxu0 %v4799_v41  ;;  %v4965_v33 = vld [vmem:[#allocation8 + $0x130] sm:$0xff] }
  0xfa   :  { %1092 = vmatpush.msra.mxu2 %v4803_v44  ;;  %v4895_v44 = vld [vmem:[#allocation8 + $0x1b0] sm:$0xff] }
  0xfb   :  { %1111 = vmatpush.msra.mxu3 %v4795_v40  ;;  %7208 = vst [vmem:[#allocation47_spill] sm:$0xff] %v4895_v44 }
  0xfc   :  { %v3782_v49 = vpop.eup %3781 }
  0xfd   :  { %v532_v52 = vmul.f32 %v3782_v49, %v526_v50  ;;  %1112 = vmatpush.msra.mxu3 %v4807_v45  ;;  %v4811_v49 = vld [vmem:[#allocation6 + $0x60] sm:$0xff]  ;;  %v4814_v50 = vld [vmem:[#allocation6 + $0x68] sm:$0xff] }
  0xfe   :  { %7182 = vst [vmem:[#allocation23_spill] sm:$0xff] %v4811_v49  ;;  %1053 = vmatpush.msra.mxu0 %v4811_v49  ;;  %1073 = vmatpush.msra.mxu1 %v4814_v50  ;;  %v4881_v49 = vld [vmem:[#allocation8 + $0x1d0] sm:$0xff] }
  0xff   :  { %3638 = vst [vmem:[%s6753_s5 + $0x38] sm:$0xff] %v532_v52  ;;  %774 = vmatmul.f32.vlgmr.msrb.gmra.mxu0 %v532_v52  ;;  %794 = vmatmul.f32.vlgmr.msrb.gmra.mxu1 %v532_v52 }
 0x100   :  { %814 = vmatmul.f32.vlgmr.msrb.gmra.mxu2 %v532_v52  ;;  %834 = vmatmul.f32.vlgmr.msrb.gmra.mxu3 %v532_v52  ;;  %7183 = vst [vmem:[#allocation24_spill] sm:$0xff] %v4814_v50  ;;  %v4816_v52 = vld [vmem:[#allocation6 + $0x70] sm:$0xff] }
 0x101   :  { %7184 = vst [vmem:[#allocation25_spill] sm:$0xff] %v4816_v52  ;;  %1093 = vmatpush.msra.mxu2 %v4816_v52  ;;  %v4840_v52 = vld [vmem:[#allocation6 + $0x30] sm:$0xff] }
 0x102   :  { %7192 = vst [vmem:[#allocation33_spill] sm:$0xff] %v4840_v52 }
 0x103   :  { %7204 = vst [vmem:[#allocation44_spill] sm:$0xff] %v4881_v49 }
 0x152   :  { %v622_v25 = vpop.f32.mrf.mxu0  ;;  %v642_v26 = vpop.f32.mrf.mxu1 }
 0x153   :  { %v685_v28 = vadd.f32 %v3639_v19, %v622_v25  ;;  %v686_v29 = vadd.f32 %v3640_v20, %v642_v26  ;;  %v4818_v19 = vld [vmem:[#allocation6 + $0x78] sm:$0xff]  ;;  %v4822_v25 = vld [vmem:[#allocation6 + $0x40] sm:$0xff]  ;;  %v4824_v26 = vld [vmem:[#allocation6 + $0x48] sm:$0xff] }
 0x154   :  { %7185 = vst [vmem:[#allocation26_spill] sm:$0xff] %v4818_v19  ;;  %1113 = vmatpush.msra.mxu3 %v4818_v19  ;;  %1054 = vmatpush.msra.mxu0 %v4822_v25  ;;  %v4879_v19 = vld [vmem:[#allocation8 + $0x1c8] sm:$0xff] }
 0x155   :  { %v3647_v34 = vmul.f32 -1.442695, %v685_v28  ;;  %v3648_v35 = vmul.f32 -1.442695, %v686_v29  ;;  %7186 = vst [vmem:[#allocation27_spill] sm:$0xff] %v4822_v25  ;;  %v4826_v28 = vld [vmem:[#allocation6 + $0x50] sm:$0xff]  ;;  %1074 = vmatpush.msra.mxu1 %v4824_v26 }
 0x156   :  { %7187 = vst [vmem:[#allocation28_spill] sm:$0xff] %v4824_v26  ;;  %1094 = vmatpush.msra.mxu2 %v4826_v28  ;;  %v4846_v25 = vld [vmem:[#allocation6 + $0x38] sm:$0xff] }
 0x157   :  { %3783 = vpow2.f32 %v3647_v34  ;;  %7188 = vst [vmem:[#allocation29_spill] sm:$0xff] %v4826_v28  ;;  %v4830_v34 = vld [vmem:[#allocation6 + $0x58] sm:$0xff]  ;;  %v4855_v28 = vld [vmem:[#allocation6 + $0x10] sm:$0xff] }
 0x158   :  { %3785 = vpow2.f32 %v3648_v35  ;;  %7189 = vst [vmem:[#allocation30_spill] sm:$0xff] %v4830_v34  ;;  %1114 = vmatpush.msra.mxu3 %v4830_v34  ;;  %1095 = vmatpush.msra.mxu2 %v4840_v52  ;;  %v4864_v34 = vld [vmem:[#allocation8 + $0x1e8] sm:$0xff]  ;;  %v3641_v52 = vld [vmem:[%s6748_s0 + $0x30] sm:$0xff]  ;;  %v4873_v26 = vld [vmem:[#allocation8 + $0x1f8] sm:$0xff] }
 0x159   :  { %v682_v46 = vpop.f32.mrf.mxu3  ;;  %7193 = vst [vmem:[#allocation34_spill] sm:$0xff] %v4846_v25 }
 0x15a   :  { %v688_v48 = vadd.f32 %v3642_v38, %v682_v46  ;;  %v4836_v46 = vld [vmem:[#allocation6 + $0x20] sm:$0xff]  ;;  %7196 = vst [vmem:[#allocation37_spill] sm:$0xff] %v4855_v28  ;;  %1115 = vmatpush.msra.mxu3 %v4846_v25  ;;  %1096 = vmatpush.msra.mxu2 %v4855_v28  ;;  %v662_v25 = vpop.f32.mrf.mxu2  ;;  %v4885_v28 = vld [vmem:[#allocation8 + $0x1d8] sm:$0xff] }
 0x15b   :  { %7190 = vst [vmem:[#allocation31_spill] sm:$0xff] %v4836_v46  ;;  %1055 = vmatpush.msra.mxu0 %v4836_v46  ;;  %v4862_v46 = vld [vmem:[#allocation8 + $0x1e0] sm:$0xff]  ;;  %v687_v41 = vadd.f32 %v3641_v52, %v662_v25  ;;  %v4912_v52 = vld [vmem:[#allocation8 + $0x188] sm:$0xff]  ;;  %v4914_v25 = vld [vmem:[#allocation8 + $0x190] sm:$0xff] }
 0x15c   :  { %v3649_v20 = vmul.f32 -1.442695, %v688_v48  ;;  %v4838_v48 = vld [vmem:[#allocation6 + $0x28] sm:$0xff]  ;;  %7198 = vst [vmem:[#allocation39_spill] sm:$0xff] %v4862_v46 }
 0x15d   :  { %v3784_v29 = vpop.eup %3783  ;;  %7191 = vst [vmem:[#allocation32_spill] sm:$0xff] %v4838_v48  ;;  %1075 = vmatpush.msra.mxu1 %v4838_v48  ;;  %v4871_v48 = vld [vmem:[#allocation8 + $0x1f0] sm:$0xff] }
 0x15e   :  { %v3786_v35 = vpop.eup %3785  ;;  %v4832_v38 = vadd.f32 1.0, %v3784_v29  ;;  %3787 = vpow2.f32 %v3649_v20  ;;  %v4851_v20 = vld [vmem:[#allocation6] sm:$0xff]  ;;  %v4853_v29 = vld [vmem:[#allocation6 + $0x8] sm:$0xff]  ;;  %7199 = vst [vmem:[#allocation40_spill] sm:$0xff] %v4864_v34  ;;  %1234 = vmatpush.msrb.mxu2 %v4871_v48 }
 0x15f   :  { %v4842_v50 = vadd.f32 1.0, %v3786_v35  ;;  %7194 = vst [vmem:[#allocation35_spill] sm:$0xff] %v4851_v20  ;;  %1056 = vmatpush.msra.mxu0 %v4851_v20  ;;  %v4860_v35 = vld [vmem:[#allocation6 + $0x18] sm:$0xff]  ;;  %1076 = vmatpush.msra.mxu1 %v4853_v29  ;;  %v4877_v20 = vld [vmem:[#allocation8 + $0x1c0] sm:$0xff] }
 0x160   :  { %3789 = vrcp.f32 %v4832_v38  ;;  %7195 = vst [vmem:[#allocation36_spill] sm:$0xff] %v4853_v29  ;;  %1116 = vmatpush.msra.mxu3 %v4860_v35  ;;  %1235 = vmatpush.msrb.mxu2 %v4881_v49  ;;  %vm851_vm8 = vweird.f32 %v4832_v38  ;;  %v857_v39 = vand.u32 2147483648, %v4832_v38 }
 0x161   :  { %3791 = vrcp.f32 %v4842_v50  ;;  %7197 = vst [vmem:[#allocation38_spill] sm:$0xff] %v4860_v35  ;;  %1194 = vmatpush.msrb.mxu0 %v4862_v46  ;;  %1214 = vmatpush.msrb.mxu1 %v4864_v34  ;;  %v4891_v46 = vld [vmem:[#allocation8 + $0x1a0] sm:$0xff]  ;;  %v4893_v35 = vld [vmem:[#allocation8 + $0x1a8] sm:$0xff]  ;;  %vm870_vm10 = vweird.f32 %v4842_v50 }
 0x162   :  { %7200 = vst [vmem:[#allocation41_spill] sm:$0xff] %v4871_v48  ;;  %1254 = vmatpush.msrb.mxu3 %v4873_v26  ;;  %v4901_v48 = vld [vmem:[#allocation8 + $0x1b8] sm:$0xff]  ;;  %1236 = vmatpush.msrb.mxu2 %v4895_v44  ;;  %v4932_v44 = vld [vmem:[#allocation8 + $0x170] sm:$0xff] }
 0x163   :  { %7201 = vst [vmem:[#allocation42_spill] sm:$0xff] %v4873_v26  ;;  %1195 = vmatpush.msrb.mxu0 %v4877_v20  ;;  %1215 = vmatpush.msrb.mxu1 %v4879_v19  ;;  %v4910_v26 = vld [vmem:[#allocation8 + $0x180] sm:$0xff] }
 0x164   :  { %7202 = vst [vmem:[#allocation43_spill] sm:$0xff] %v4877_v20  ;;  %v3788_v45 = vpop.eup %3787  ;;  %1255 = vmatpush.msrb.mxu3 %v4885_v28  ;;  %1237 = vmatpush.msrb.mxu2 %v4914_v25 }
 0x165   :  { %7203 = vst [vmem:[#allocation48_spill] sm:$0xff] %v4879_v19  ;;  %v4887_v29 = vadd.f32 1.0, %v3788_v45  ;;  %1196 = vmatpush.msrb.mxu0 %v4891_v46  ;;  %1216 = vmatpush.msrb.mxu1 %v4893_v35  ;;  %v4920_v19 = vld [vmem:[#allocation8 + $0x198] sm:$0xff] }
 0x166   :  { %7205 = vst [vmem:[#allocation45_spill] sm:$0xff] %v4885_v28  ;;  %v4897_v43 = vpop.eup %3789  ;;  %1256 = vmatpush.msrb.mxu3 %v4901_v48  ;;  %v4926_v28 = vld [vmem:[#allocation8 + $0x168] sm:$0xff]  ;;  %1238 = vmatpush.msrb.mxu2 %v4932_v44 }
 0x167   :  { %7206 = vst [vmem:[#allocation46_spill] sm:$0xff] %v4891_v46  ;;  %v4903_v45 = vpop.eup %3791  ;;  %v847_v20 = vmul.f32 %v4897_v43, %v4832_v38  ;;  %3793 = vrcp.f32 %v4887_v29  ;;  %1197 = vmatpush.msrb.mxu0 %v4910_v26  ;;  %v4924_v46 = vld [vmem:[#allocation8 + $0x160] sm:$0xff]  ;;  %1217 = vmatpush.msrb.mxu1 %v4912_v52  ;;  %vm852_vm9 = vweird.f32 %v4897_v43  ;;  %vm890_vm0 = vweird.f32 %v4887_v29 }
 0x168   :  { %7207 = vst [vmem:[#allocation52_spill] sm:$0xff] %v4893_v35  ;;  %v866_v49 = vmul.f32 %v4903_v45, %v4842_v50  ;;  %3795 = vtanh.f32 %v687_v41  ;;  %1257 = vmatpush.msrb.mxu3 %v4920_v19  ;;  %v4942_v41 = vld [vmem:[#allocation8 + $0x140] sm:$0xff]  ;;  %vm871_vm11 = vweird.f32 %v4903_v45  ;;  %vm4973_vm12 = vmor %vm851_vm8, %vm852_vm9 }
 0x169   :  { %7209 = vst [vmem:[#allocation49_spill] sm:$0xff] %v4901_v48  ;;  %v848_v34 = vsub.f32 1.0, %v847_v20  ;;  %v4934_v20 = vld [vmem:[#allocation8 + $0x178] sm:$0xff]  ;;  %1198 = vmatpush.msrb.mxu0 %v4924_v46  ;;  %1218 = vmatpush.msrb.mxu1 %v4926_v28  ;;  %vm4986_vm13 = vmor %vm870_vm10, %vm871_vm11 }
 0x16a   :  { %7210 = vst [vmem:[#allocation50_spill] sm:$0xff] %v4910_v26  ;;  %v867_v40 = vsub.f32 1.0, %v866_v49  ;;  %v876_v26 = vand.u32 2147483648, %v4842_v50  ;;  %v855_v49 = vand.u32 2147483647, %v4832_v38  ;;  %1258 = vmatpush.msrb.mxu3 %v4934_v20 }
 0x16b   :  { %7211 = vst [vmem:[#allocation56_spill] sm:$0xff] %v4912_v52  ;;  %v849_v48 = vmul.f32 %v4897_v43, %v848_v34  ;;  %v4944_v52 = vld [vmem:[#allocation8 + $0x148] sm:$0xff]  ;;  %v874_v34 = vand.u32 2147483647, %v4842_v50  ;;  %1199 = vmatpush.msrb.mxu0 %v4942_v41 }
 0x16c   :  { %7212 = vst [vmem:[#allocation51_spill] sm:$0xff] %v4914_v25  ;;  %v4946_v25 = vld [vmem:[#allocation8 + $0x150] sm:$0xff]  ;;  %v868_v35 = vmul.f32 %v4903_v45, %v867_v40  ;;  %v4961_v40 = vld [vmem:[#allocation8 + $0x120] sm:$0xff]  ;;  %1219 = vmatpush.msrb.mxu1 %v4944_v52  ;;  %v877_v38 = vor.u32 1.1754944e-38, %v876_v26  ;;  %vm856_vm14 = vcmp.eq.f32.partialorder %v855_v49, 8.507059e+37 }
 0x16d   :  { %7213 = vst [vmem:[#allocation53_spill] sm:$0xff] %v4920_v19  ;;  %v4954_v19 = vld [vmem:[#allocation8 + $0x158] sm:$0xff]  ;;  %v850_v37 = vadd.f32 %v4897_v43, %v849_v48  ;;  %v858_v48 = vor.u32 1.1754944e-38, %v857_v39  ;;  %1239 = vmatpush.msrb.mxu2 %v4946_v25  ;;  %1200 = vmatpush.msrb.mxu0 %v4961_v40  ;;  %vm875_vm15 = vcmp.eq.f32.partialorder %v874_v34, 8.507059e+37 }
 0x16e   :  { %7214 = vst [vmem:[#allocation54_spill] sm:$0xff] %v4924_v46  ;;  %v4956_v46 = vpop.eup %3793  ;;  %1259 = vmatpush.msrb.mxu3 %v4954_v19  ;;  %1220 = vmatpush.msrb.mxu1 %v4963_v36 }
 0x16f   :  { %7215 = vst [vmem:[#allocation60_spill] sm:$0xff] %v4926_v28  ;;  %v886_v28 = vmul.f32 %v4956_v46, %v4887_v29  ;;  %v854_v39 = vsel %vm4973_vm12, %v4897_v43, %v850_v37  ;;  %v3643_v37 = vld [vmem:[%s6749_s1 + $0xc0] sm:$0xff]  ;;  %1240 = vmatpush.msrb.mxu2 %v4965_v33  ;;  %v5007_v43 = vld [vmem:[#allocation8 + $0x110] sm:$0xff]  ;;  %vm891_vm1 = vweird.f32 %v4956_v46 }
 0x170   :  { %7216 = vst [vmem:[#allocation55_spill] sm:$0xff] %v4932_v44  ;;  %v859_v31 = vsel %vm856_vm14, %v858_v48, %v854_v39  ;;  %v5009_v44 = vld [vmem:[#allocation8 + $0x118] sm:$0xff]  ;;  %vm5072_vm2 = vmor %vm890_vm0, %vm891_vm1 }
 0x171   :  { %7217 = vst [vmem:[#allocation57_spill] sm:$0xff] %v4934_v20  ;;  %v4980_v20 = vld [vmem:[#allocation8 + $0x138] sm:$0xff]  ;;  %v887_v50 = vsub.f32 1.0, %v886_v28  ;;  %1241 = vmatpush.msrb.mxu2 %v5007_v43 }
 0x172   :  { %7218 = vst [vmem:[#allocation58_spill] sm:$0xff] %v4942_v41  ;;  %v869_v41 = vadd.f32 %v4903_v45, %v868_v35  ;;  %v4995_v35 = vld [vmem:[#allocation8 + $0x100] sm:$0xff]  ;;  %1260 = vmatpush.msrb.mxu3 %v4980_v20 }
 0x173   :  { %7219 = vst [vmem:[#allocation64_spill] sm:$0xff] %v4944_v52  ;;  %v3796_v52 = vpop.eup %3795  ;;  %1201 = vmatpush.msrb.mxu0 %v4995_v35  ;;  %v888_v34 = vmul.f32 %v4956_v46, %v887_v50 }
 0x174   :  { %7220 = vst [vmem:[#allocation59_spill] sm:$0xff] %v4946_v25  ;;  %v4997_v25 = vld [vmem:[#allocation8 + $0x108] sm:$0xff]  ;;  %v873_v26 = vsel %vm4986_vm13, %v4903_v45, %v869_v41  ;;  %v901_v28 = vmul.f32 %v3796_v52, %v859_v31  ;;  %v5016_v45 = vld [vmem:[#allocation8 + $0xe0] sm:$0xff]  ;;  %v5024_v31 = vld [vmem:[#allocation8 + $0xf0] sm:$0xff]  ;;  %1261 = vmatpush.msrb.mxu3 %v5009_v44 }
 0x175   :  { %7225 = vst [vmem:[#allocation61_spill] sm:$0xff] %v4995_v35  ;;  %v878_v49 = vsel %vm875_vm15, %v877_v38, %v873_v26  ;;  %v5018_v41 = vld [vmem:[#allocation8 + $0xe8] sm:$0xff]  ;;  %1221 = vmatpush.msrb.mxu1 %v4997_v25  ;;  %v5026_v52 = vld [vmem:[#allocation8 + $0xf8] sm:$0xff]  ;;  %1202 = vmatpush.msrb.mxu0 %v5016_v45  ;;  %v5030_v26 = vld [vmem:[#allocation8 + $0xc0] sm:$0xff] }
 0x176   :  { %7226 = vst [vmem:[#allocation62_spill] sm:$0xff] %v4997_v25  ;;  %v900_v48 = vmul.f32 %v878_v49, %v4640_v4  ;;  %v5032_v35 = vld [vmem:[#allocation8 + $0xc8] sm:$0xff]  ;;  %v5039_v25 = vld [vmem:[#allocation8 + $0xd8] sm:$0xff]  ;;  %1242 = vmatpush.msrb.mxu2 %v5024_v31  ;;  %1262 = vmatpush.msrb.mxu3 %v5026_v52 }
 0x177   :  { %7227 = vst [vmem:[#allocation68_spill] sm:$0xff] %v5007_v43  ;;  %1222 = vmatpush.msrb.mxu1 %v5018_v41  ;;  %v5037_v43 = vld [vmem:[#allocation8 + $0xd0] sm:$0xff]  ;;  %1203 = vmatpush.msrb.mxu0 %v5030_v26 }
 0x178   :  { %7228 = vst [vmem:[#allocation63_spill] sm:$0xff] %v5009_v44  ;;  %v5034_v50 = vadd.f32 %v901_v28, %v900_v48  ;;  %v889_v44 = vadd.f32 %v4956_v46, %v888_v34  ;;  %v5049_v28 = vld [vmem:[#allocation8 + $0xa8] sm:$0xff]  ;;  %v3646_v34 = vld [vmem:[%s6749_s1 + $0xd8] sm:$0xff]  ;;  %1243 = vmatpush.msrb.mxu2 %v5037_v43  ;;  %1263 = vmatpush.msrb.mxu3 %v5039_v25 }
 0x179   :  { %7229 = vst [vmem:[#allocation65_spill] sm:$0xff] %v5016_v45  ;;  %v896_v45 = vand.u32 2147483648, %v4887_v29  ;;  %1223 = vmatpush.msrb.mxu1 %v5032_v35 }
 0x17a   :  { %7230 = vst [vmem:[#allocation66_spill] sm:$0xff] %v5026_v52  ;;  %3797 = vtanh.f32 %v5034_v50  ;;  %v894_v52 = vand.u32 2147483647, %v4887_v29  ;;  %v5087_v29 = vld [vmem:[#allocation8 + $0x60] sm:$0xff] }
 0x17b   :  { %7231 = vst [vmem:[#allocation67_spill] sm:$0xff] %v5030_v26  ;;  %1224 = vmatpush.msrb.mxu1 %v5049_v28 }
 0x17c   :  { %v775_v38 = vpop.f32.mrf.mxu0  ;;  %v795_v39 = vpop.f32.mrf.mxu1  ;;  %7232 = vst [vmem:[#allocation69_spill] sm:$0xff] %v5032_v35  ;;  %v893_v35 = vsel %vm5072_vm2, %v4956_v46, %v889_v44  ;;  %vm895_vm3 = vcmp.eq.f32.partialorder %v894_v52, 8.507059e+37  ;;  %v5099_v46 = vld [vmem:[#allocation8 + $0x40] sm:$0xff]  ;;  %v5101_v44 = vld [vmem:[#allocation8 + $0x48] sm:$0xff] }
 0x17d   :  { %7233 = vst [vmem:[#allocation70_spill] sm:$0xff] %v5034_v50  ;;  %v838_v4 = vadd.f32 %v3643_v37, %v775_v38  ;;  %v839_v49 = vadd.f32 %v3644_v32, %v795_v39  ;;  %v5047_v37 = vld [vmem:[#allocation8 + $0xa0] sm:$0xff]  ;;  %v5054_v38 = vld [vmem:[#allocation8 + $0xb0] sm:$0xff]  ;;  %v5056_v39 = vld [vmem:[#allocation8 + $0xb8] sm:$0xff] }
 0x17e   :  { %7234 = vst [vmem:[#allocation71_spill] sm:$0xff] %v5037_v43  ;;  %1204 = vmatpush.msrb.mxu0 %v5047_v37  ;;  %v5078_v43 = vld [vmem:[#allocation8 + $0x90] sm:$0xff]  ;;  %1244 = vmatpush.msrb.mxu2 %v5054_v38 }
 0x17f   :  { %7235 = vst [vmem:[#allocation72_spill] sm:$0xff] %v5039_v25  ;;  %v3650_v32 = vmul.f32 -1.442695, %v838_v4  ;;  %v3651_v48 = vmul.f32 -1.442695, %v839_v49  ;;  %v5064_v4 = vld [vmem:[#allocation8 + $0x80] sm:$0xff]  ;;  %1264 = vmatpush.msrb.mxu3 %v5056_v39 }
 0x180   :  { %7236 = vst [vmem:[#allocation73_spill] sm:$0xff] %v5047_v37  ;;  %v5066_v49 = vld [vmem:[#allocation8 + $0x88] sm:$0xff]  ;;  %v5080_v25 = vld [vmem:[#allocation8 + $0x98] sm:$0xff]  ;;  %v897_v37 = vor.u32 1.1754944e-38, %v896_v45  ;;  %1205 = vmatpush.msrb.mxu0 %v5064_v4  ;;  %1245 = vmatpush.msrb.mxu2 %v5078_v43  ;;  %v3798_v45 = vpop.eup %3797 }
 0x181   :  { %7237 = vst [vmem:[#allocation74_spill] sm:$0xff] %v5049_v28  ;;  %3799 = vpow2.f32 %v3650_v32  ;;  %v5089_v32 = vld [vmem:[#allocation8 + $0x68] sm:$0xff]  ;;  %1225 = vmatpush.msrb.mxu1 %v5066_v49  ;;  %v5093_v28 = vld [vmem:[#allocation8 + $0x70] sm:$0xff]  ;;  %1265 = vmatpush.msrb.mxu3 %v5080_v25 }
 0x182   :  { %7238 = vst [vmem:[#allocation75_spill] sm:$0xff] %v5056_v39  ;;  %3801 = vpow2.f32 %v3651_v48  ;;  %v5095_v48 = vld [vmem:[#allocation8 + $0x78] sm:$0xff]  ;;  %v898_v39 = vsel %vm895_vm3, %v897_v37, %v893_v35  ;;  %1206 = vmatpush.msrb.mxu0 %v5087_v29  ;;  %1246 = vmatpush.msrb.mxu2 %v5093_v28 }
 0x183   :  { %7239 = vst [vmem:[#allocation76_spill] sm:$0xff] %v5064_v4  ;;  %v835_v26 = vpop.f32.mrf.mxu3  ;;  %1226 = vmatpush.msrb.mxu1 %v5089_v32  ;;  %v904_v4 = vmul.f32 %v3798_v45, %v898_v39  ;;  %1266 = vmatpush.msrb.mxu3 %v5095_v48  ;;  %v5118_v39 = vld [vmem:[#allocation8 + $0x20] sm:$0xff] }
 0x184   :  { %7240 = vst [vmem:[#allocation77_spill] sm:$0xff] %v5066_v49  ;;  %v841_v50 = vadd.f32 %v3646_v34, %v835_v26  ;;  %1207 = vmatpush.msrb.mxu0 %v5099_v46  ;;  %v5109_v26 = vld [vmem:[#allocation8 + $0x50] sm:$0xff]  ;;  %v5111_v34 = vld [vmem:[#allocation8 + $0x58] sm:$0xff] }
 0x185   :  { %7243 = vst [vmem:[#allocation78_spill] sm:$0xff] %v5099_v46  ;;  %1227 = vmatpush.msrb.mxu1 %v5101_v44  ;;  %1057 = vmatmul.f32.vlgmr.msra.gmra.mxu0 %v904_v4  ;;  %v5126_v46 = vld [vmem:[#allocation8 + $0x38] sm:$0xff] }
 0x186   :  { %7244 = vst [vmem:[#allocation79_spill] sm:$0xff] %v5101_v44  ;;  %v3652_v49 = vmul.f32 -1.442695, %v841_v50  ;;  %1077 = vmatmul.f32.vlgmr.msra.gmra.mxu1 %v904_v4  ;;  %v5120_v50 = vld [vmem:[#allocation8 + $0x28] sm:$0xff]  ;;  %1097 = vmatmul.f32.vlgmr.msra.gmra.mxu2 %v904_v4  ;;  %v5124_v44 = vld [vmem:[#allocation8 + $0x30] sm:$0xff] }
 0x187   :  { %v3800_v52 = vpop.eup %3799  ;;  %7245 = vst [vmem:[#allocation80_spill] sm:$0xff] %v5109_v26  ;;  %1117 = vmatmul.f32.vlgmr.msra.gmra.mxu3 %v904_v4  ;;  %1247 = vmatpush.msrb.mxu2 %v5109_v26  ;;  %v815_v26 = vpop.f32.mrf.mxu2 }
 0x188   :  { %7246 = vst [vmem:[#allocation81_spill] sm:$0xff] %v5111_v34  ;;  %v3802_v35 = vpop.eup %3801  ;;  %v5113_v37 = vadd.f32 1.0, %v3800_v52  ;;  %3803 = vpow2.f32 %v3652_v49  ;;  %1267 = vmatpush.msrb.mxu3 %v5111_v34  ;;  %v5131_v49 = vld [vmem:[#allocation8] sm:$0xff]  ;;  %v5133_v52 = vld [vmem:[#allocation8 + $0x8] sm:$0xff]  ;;  %1208 = vmatpush.msrb.mxu0 %v5118_v39  ;;  %v3645_v34 = vld [vmem:[%s6749_s1 + $0xd0] sm:$0xff] }
 0x189   :  { %3653 = vst [vmem:[%s6752_s4 + $0x8] sm:$0xff] %v904_v4  ;;  %v5122_v45 = vadd.f32 1.0, %v3802_v35  ;;  %1228 = vmatpush.msrb.mxu1 %v5120_v50  ;;  %v5138_v4 = vld [vmem:[#allocation8 + $0x10] sm:$0xff]  ;;  %v5140_v35 = vld [vmem:[#allocation8 + $0x18] sm:$0xff]  ;;  %1248 = vmatpush.msrb.mxu2 %v5124_v44 }
 0x18a   :  { %7247 = vst [vmem:[#allocation82_spill] sm:$0xff] %v5118_v39  ;;  %3805 = vrcp.f32 %v5113_v37  ;;  %1268 = vmatpush.msrb.mxu3 %v5126_v46  ;;  %1209 = vmatpush.msrb.mxu0 %v5131_v49  ;;  %vm914_vm6 = vweird.f32 %v5113_v37 }
 0x18b   :  { %7248 = vst [vmem:[#allocation83_spill] sm:$0xff] %v5120_v50  ;;  %3807 = vrcp.f32 %v5122_v45  ;;  %1229 = vmatpush.msrb.mxu1 %v5133_v52  ;;  %1249 = vmatpush.msrb.mxu2 %v5138_v4  ;;  %vm933_vm7 = vweird.f32 %v5122_v45 }
 0x18c   :  { %7249 = vst [vmem:[#allocation84_spill] sm:$0xff] %v5124_v44  ;;  %1269 = vmatpush.msrb.mxu3 %v5140_v35  ;;  %1477 = vmatpush.msra.mxu0 %v4658_v53  ;;  %v840_v44 = vadd.f32 %v3645_v34, %v815_v26  ;;  %v7262_v26 = vld [vmem:[#allocation22_spill] sm:$0xff]  ;;  %v7263_v34 = vld [vmem:[#allocation15_spill] sm:$0xff] }
 0x18d   :  { %7250 = vst [vmem:[#allocation85_spill] sm:$0xff] %v5126_v46  ;;  %1497 = vmatpush.msra.mxu1 %v4660_v59  ;;  %1517 = vmatpush.msra.mxu2 %v4662_v3  ;;  %v920_v3 = vand.u32 2147483648, %v5113_v37 }
 0x18e   :  { %7251 = vst [vmem:[#allocation86_spill] sm:$0xff] %v5131_v49  ;;  %v3804_v39 = vpop.eup %3803  ;;  %1537 = vmatpush.msra.mxu3 %v4666_v5  ;;  %1478 = vmatpush.msra.mxu0 %v4670_v6  ;;  %v939_v5 = vand.u32 2147483648, %v5122_v45 }
 0x18f   :  { %7252 = vst [vmem:[#allocation87_spill] sm:$0xff] %v5133_v52  ;;  %v5151_v50 = vadd.f32 1.0, %v3804_v39  ;;  %1498 = vmatpush.msra.mxu1 %v4672_v7  ;;  %1518 = vmatpush.msra.mxu2 %v4674_v8  ;;  %v918_v7 = vand.u32 2147483647, %v5113_v37 }
 0x190   :  { %v3806_v46 = vpop.eup %3805  ;;  %1538 = vmatpush.msra.mxu3 %v4678_v9  ;;  %1479 = vmatpush.msra.mxu0 %v4682_v10  ;;  %v937_v9 = vand.u32 2147483647, %v5122_v45 }
 0x191   :  { %v3808_v49 = vpop.eup %3807  ;;  %v910_v52 = vmul.f32 %v3806_v46, %v5113_v37  ;;  %3809 = vrcp.f32 %v5151_v50  ;;  %1499 = vmatpush.msra.mxu1 %v4684_v11  ;;  %1519 = vmatpush.msra.mxu2 %v4688_v12  ;;  %vm915_vm4 = vweird.f32 %v3806_v46  ;;  %v921_v12 = vor.u32 1.1754944e-38, %v920_v3  ;;  %v7271_v3 = vld [vmem:[#allocation30_spill] sm:$0xff] }
 0x192   :  { %v929_v39 = vmul.f32 %v3808_v49, %v5122_v45  ;;  %3811 = vtanh.f32 %v840_v44  ;;  %1539 = vmatpush.msra.mxu3 %v4690_v56  ;;  %1480 = vmatpush.msra.mxu0 %v4694_v51  ;;  %vm934_vm5 = vweird.f32 %v3808_v49  ;;  %vm916_vm8 = vmor %vm914_vm6, %vm915_vm4  ;;  %vm919_vm10 = vcmp.eq.f32.partialorder %v918_v7, 8.507059e+37  ;;  %v7265_v45 = vld [vmem:[#allocation24_spill] sm:$0xff]  ;;  %v7274_v7 = vld [vmem:[#allocation33_spill] sm:$0xff] }
 0x193   :  { %v911_v53 = vsub.f32 1.0, %v910_v52  ;;  %1500 = vmatpush.msra.mxu1 %v4696_v47  ;;  %1520 = vmatpush.msra.mxu2 %v4698_v55  ;;  %vm935_vm9 = vmor %vm933_vm7, %vm934_vm5  ;;  %v940_v47 = vor.u32 1.1754944e-38, %v939_v5  ;;  %vm938_vm11 = vcmp.eq.f32.partialorder %v937_v9, 8.507059e+37  ;;  %vm953_vm13 = vweird.f32 %v5151_v50  ;;  %v7267_v52 = vld [vmem:[#allocation26_spill] sm:$0xff]  ;;  %v7272_v5 = vld [vmem:[#allocation31_spill] sm:$0xff] }
 0x194   :  { %v930_v59 = vsub.f32 1.0, %v929_v39  ;;  %1540 = vmatpush.msra.mxu3 %v4702_v58  ;;  %1481 = vmatpush.msra.mxu0 %v4706_v60  ;;  %v7268_v39 = vld [vmem:[#allocation27_spill] sm:$0xff] }
 0x195   :  { %v912_v6 = vmul.f32 %v3806_v46, %v911_v53  ;;  %1501 = vmatpush.msra.mxu1 %v4708_v61  ;;  %1521 = vmatpush.msra.mxu2 %v4710_v57  ;;  %v7269_v53 = vld [vmem:[#allocation28_spill] sm:$0xff]  ;;  %v7276_v9 = vld [vmem:[#allocation35_spill] sm:$0xff] }
 0x196   :  { %v931_v8 = vmul.f32 %v3808_v49, %v930_v59  ;;  %1541 = vmatpush.msra.mxu3 %v4714_v62  ;;  %1482 = vmatpush.msra.mxu0 %v4718_v54  ;;  %v7270_v59 = vld [vmem:[#allocation29_spill] sm:$0xff] }
 0x197   :  { %v5176_v10 = vpop.eup %3809  ;;  %v913_v11 = vadd.f32 %v3806_v46, %v912_v6  ;;  %1502 = vmatpush.msra.mxu1 %v4720_v63  ;;  %1522 = vmatpush.msra.mxu2 %v4722_v0  ;;  %v959_v0 = vand.u32 2147483648, %v5151_v50  ;;  %v7273_v6 = vld [vmem:[#allocation32_spill] sm:$0xff] }
 0x198   :  { %v932_v56 = vadd.f32 %v3808_v49, %v931_v8  ;;  %v949_v51 = vmul.f32 %v5176_v10, %v5151_v50  ;;  %v3812_v58 = vpop.eup %3811  ;;  %1542 = vmatpush.msra.mxu3 %v4726_v1  ;;  %1483 = vmatpush.msra.mxu0 %v4730_v2  ;;  %vm954_vm12 = vweird.f32 %v5176_v10  ;;  %v957_v1 = vand.u32 2147483647, %v5151_v50  ;;  %v7253_v2 = vld [vmem:[#allocation14_spill] sm:$0xff]  ;;  %v7264_v50 = vld [vmem:[#allocation23_spill] sm:$0xff] }
 0x199   :  { %v917_v55 = vsel %vm916_vm8, %v3806_v46, %v913_v11  ;;  %1503 = vmatpush.msra.mxu1 %v4732_v13  ;;  %1523 = vmatpush.msra.mxu2 %v4734_v14  ;;  %vm955_vm14 = vmor %vm953_vm13, %vm954_vm12  ;;  %v7254_v13 = vld [vmem:[#allocation16_spill] sm:$0xff]  ;;  %v7275_v8 = vld [vmem:[#allocation34_spill] sm:$0xff] }
 0x19a   :  { %v922_v60 = vsel %vm919_vm10, %v921_v12, %v917_v55  ;;  %v936_v61 = vsel %vm935_vm9, %v3808_v49, %v932_v56  ;;  %v950_v44 = vsub.f32 1.0, %v949_v51  ;;  %1543 = vmatpush.msra.mxu3 %v4738_v15  ;;  %1484 = vmatpush.msra.mxu0 %v4742_v16  ;;  %v7255_v14 = vld [vmem:[#allocation12_spill] sm:$0xff]  ;;  %v7256_v16 = vld [vmem:[#allocation17_spill] sm:$0xff]  ;;  %vm958_vm15 = vcmp.eq.f32.partialorder %v957_v1, 8.507059e+37  ;;  %v7279_v12 = vld [vmem:[#allocation38_spill] sm:$0xff] }
 0x19b   :  { %v941_v57 = vsel %vm938_vm11, %v940_v47, %v936_v61  ;;  %v964_v62 = vmul.f32 %v3812_v58, %v922_v60  ;;  %1504 = vmatpush.msra.mxu1 %v4744_v17  ;;  %1524 = vmatpush.msra.mxu2 %v4746_v18  ;;  %v7257_v17 = vld [vmem:[#allocation18_spill] sm:$0xff]  ;;  %v960_v18 = vor.u32 1.1754944e-38, %v959_v0  ;;  %v7266_v49 = vld [vmem:[#allocation25_spill] sm:$0xff]  ;;  %v7280_v56 = vld [vmem:[#allocation39_spill] sm:$0xff] }
 0x19c   :  { %v963_v46 = vmul.f32 %v941_v57, %v4652_v42  ;;  %v951_v54 = vmul.f32 %v5176_v10, %v950_v44  ;;  %1544 = vmatpush.msra.mxu3 %v4756_v21  ;;  %1485 = vmatpush.msra.mxu0 %v4760_v22  ;;  %v7258_v21 = vld [vmem:[#allocation19_spill] sm:$0xff]  ;;  %v7259_v22 = vld [vmem:[#allocation13_spill] sm:$0xff]  ;;  %v7281_v51 = vld [vmem:[#allocation40_spill] sm:$0xff] }
 0x19d   :  { %1505 = vmatpush.msra.mxu1 %v4762_v23  ;;  %1525 = vmatpush.msra.mxu2 %v4764_v24  ;;  %v7260_v23 = vld [vmem:[#allocation20_spill] sm:$0xff]  ;;  %v7261_v24 = vld [vmem:[#allocation21_spill] sm:$0xff]  ;;  %v7283_v55 = vld [vmem:[#allocation42_spill] sm:$0xff] }
 0x19e   :  { %v5200_v63 = vadd.f32 %v964_v62, %v963_v46  ;;  %v952_v42 = vadd.f32 %v5176_v10, %v951_v54  ;;  %1545 = vmatpush.msra.mxu3 %v4768_v27  ;;  %1486 = vmatpush.msra.mxu0 %v4772_v30  ;;  %v7278_v11 = vld [vmem:[#allocation37_spill] sm:$0xff]  ;;  %v7284_v58 = vld [vmem:[#allocation43_spill] sm:$0xff]  ;;  %v7285_v60 = vld [vmem:[#allocation48_spill] sm:$0xff] }
 0x19f   :  { %1506 = vmatpush.msra.mxu1 %v7253_v2  ;;  %1526 = vmatpush.msra.mxu2 %v7254_v13  ;;  %v7282_v47 = vld [vmem:[#allocation41_spill] sm:$0xff]  ;;  %v7286_v61 = vld [vmem:[#allocation44_spill] sm:$0xff]  ;;  %v7288_v57 = vld [vmem:[#allocation46_spill] sm:$0xff] }
 0x1a0   :  { %3813 = vtanh.f32 %v5200_v63  ;;  %1546 = vmatpush.msra.mxu3 %v7255_v14  ;;  %v956_v15 = vsel %vm955_vm14, %v5176_v10, %v952_v42  ;;  %1487 = vmatpush.msra.mxu0 %v7256_v16  ;;  %v7277_v10 = vld [vmem:[#allocation36_spill] sm:$0xff]  ;;  %v7287_v44 = vld [vmem:[#allocation45_spill] sm:$0xff]  ;;  %v7290_v46 = vld [vmem:[#allocation47_spill] sm:$0xff] }
 0x1a1   :  { %1507 = vmatpush.msra.mxu1 %v7257_v17  ;;  %1527 = vmatpush.msra.mxu2 %v7258_v21  ;;  %v961_v30 = vsel %vm958_vm15, %v960_v18, %v956_v15  ;;  %v7289_v62 = vld [vmem:[#allocation52_spill] sm:$0xff]  ;;  %v7291_v54 = vld [vmem:[#allocation49_spill] sm:$0xff]  ;;  %v7292_v42 = vld [vmem:[#allocation50_spill] sm:$0xff] }
 0x1a2   :  { %1547 = vmatpush.msra.mxu3 %v7259_v22  ;;  %1488 = vmatpush.msra.mxu0 %v7260_v23  ;;  %v7293_v0 = vld [vmem:[#allocation56_spill] sm:$0xff]  ;;  %v7294_v1 = vld [vmem:[#allocation51_spill] sm:$0xff]  ;;  %v7295_v2 = vld [vmem:[#allocation53_spill] sm:$0xff] }
 0x1a3   :  { %1508 = vmatpush.msra.mxu1 %v7261_v24  ;;  %1528 = vmatpush.msra.mxu2 %v7262_v26  ;;  %v7296_v13 = vld [vmem:[#allocation54_spill] sm:$0xff]  ;;  %v7297_v14 = vld [vmem:[#allocation60_spill] sm:$0xff]  ;;  %v7298_v15 = vld [vmem:[#allocation55_spill] sm:$0xff] }
 0x1a4   :  { %1548 = vmatpush.msra.mxu3 %v7263_v34  ;;  %1489 = vmatpush.msra.mxu0 %v7264_v50  ;;  %v7299_v16 = vld [vmem:[#allocation57_spill] sm:$0xff]  ;;  %v7300_v17 = vld [vmem:[#allocation58_spill] sm:$0xff]  ;;  %v7301_v18 = vld [vmem:[#allocation64_spill] sm:$0xff] }
 0x1a5   :  { %1509 = vmatpush.msra.mxu1 %v7265_v45  ;;  %1529 = vmatpush.msra.mxu2 %v7266_v49  ;;  %v7302_v21 = vld [vmem:[#allocation59_spill] sm:$0xff]  ;;  %v7303_v22 = vld [vmem:[#allocation61_spill] sm:$0xff]  ;;  %v7304_v23 = vld [vmem:[#allocation62_spill] sm:$0xff] }
 0x1a6   :  { %v3814_v27 = vpop.eup %3813  ;;  %1549 = vmatpush.msra.mxu3 %v7267_v52  ;;  %1490 = vmatpush.msra.mxu0 %v7268_v39  ;;  %v7305_v24 = vld [vmem:[#allocation68_spill] sm:$0xff]  ;;  %v7313_v26 = vld [vmem:[#allocation73_spill] sm:$0xff]  ;;  %v7314_v34 = vld [vmem:[#allocation74_spill] sm:$0xff] }
 0x1a7   :  { %v967_v37 = vmul.f32 %v3814_v27, %v961_v30  ;;  %1510 = vmatpush.msra.mxu1 %v7269_v53  ;;  %1530 = vmatpush.msra.mxu2 %v7270_v59  ;;  %v7306_v27 = vld [vmem:[#allocation63_spill] sm:$0xff]  ;;  %v7307_v30 = vld [vmem:[#allocation65_spill] sm:$0xff]  ;;  %v7318_v50 = vld [vmem:[#allocation78_spill] sm:$0xff] }
 0x1a8   :  { %1550 = vmatpush.msra.mxu3 %v7271_v3  ;;  %1491 = vmatpush.msra.mxu0 %v7272_v5  ;;  %v7320_v45 = vld [vmem:[#allocation80_spill] sm:$0xff]  ;;  %v7321_v49 = vld [vmem:[#allocation81_spill] sm:$0xff]  ;;  %v7322_v52 = vld [vmem:[#allocation82_spill] sm:$0xff] }
 0x1a9   :  { %3654 = vst [vmem:[%s6753_s5 + $0x30] sm:$0xff] %v967_v37  ;;  %1210 = vmatmul.f32.vlgmr.msrb.gmra.mxu0 %v967_v37  ;;  %1230 = vmatmul.f32.vlgmr.msrb.gmra.mxu1 %v967_v37  ;;  %v3656_v39 = vld [vmem:[%s6748_s0 + $0x48] sm:$0xff] }
 0x1aa   :  { %1250 = vmatmul.f32.vlgmr.msrb.gmra.mxu2 %v967_v37  ;;  %1270 = vmatmul.f32.vlgmr.msrb.gmra.mxu3 %v967_v37  ;;  %v7315_v37 = vld [vmem:[#allocation75_spill] sm:$0xff] }
 0x1ab   :  { %1511 = vmatpush.msra.mxu1 %v7273_v6  ;;  %1531 = vmatpush.msra.mxu2 %v7274_v7 }
 0x1ac   :  { %1551 = vmatpush.msra.mxu3 %v7275_v8  ;;  %1492 = vmatpush.msra.mxu0 %v7276_v9 }
 0x1ad   :  { %1512 = vmatpush.msra.mxu1 %v7277_v10  ;;  %1532 = vmatpush.msra.mxu2 %v7278_v11 }
 0x1ae   :  { %1552 = vmatpush.msra.mxu3 %v7279_v12  ;;  %1630 = vmatpush.msrb.mxu0 %v7280_v56 }
 0x1af   :  { %1650 = vmatpush.msrb.mxu1 %v7281_v51  ;;  %1670 = vmatpush.msrb.mxu2 %v7282_v47  ;;  %v3657_v51 = vld [vmem:[%s6748_s0 + $0x50] sm:$0xff] }
 0x1b0   :  { %1690 = vmatpush.msrb.mxu3 %v7283_v55  ;;  %1631 = vmatpush.msrb.mxu0 %v7284_v58 }
 0x1b1   :  { %1651 = vmatpush.msrb.mxu1 %v7285_v60  ;;  %1671 = vmatpush.msrb.mxu2 %v7286_v61 }
 0x1b2   :  { %1691 = vmatpush.msrb.mxu3 %v7287_v44  ;;  %1632 = vmatpush.msrb.mxu0 %v7288_v57 }
 0x1b3   :  { %1652 = vmatpush.msrb.mxu1 %v7289_v62  ;;  %1672 = vmatpush.msrb.mxu2 %v7290_v46 }
 0x1b4   :  { %1692 = vmatpush.msrb.mxu3 %v7291_v54  ;;  %1633 = vmatpush.msrb.mxu0 %v7292_v42 }
 0x1b5   :  { %1653 = vmatpush.msrb.mxu1 %v7293_v0  ;;  %1673 = vmatpush.msrb.mxu2 %v7294_v1 }
 0x1b6   :  { %1693 = vmatpush.msrb.mxu3 %v7295_v2  ;;  %1634 = vmatpush.msrb.mxu0 %v7296_v13 }
 0x1b7   :  { %1654 = vmatpush.msrb.mxu1 %v7297_v14  ;;  %1674 = vmatpush.msrb.mxu2 %v7298_v15 }
 0x1b8   :  { %1694 = vmatpush.msrb.mxu3 %v7299_v16  ;;  %1635 = vmatpush.msrb.mxu0 %v7300_v17 }
 0x1b9   :  { %1655 = vmatpush.msrb.mxu1 %v7301_v18  ;;  %1675 = vmatpush.msrb.mxu2 %v7302_v21 }
 0x1ba   :  { %1695 = vmatpush.msrb.mxu3 %v4954_v19  ;;  %1636 = vmatpush.msrb.mxu0 %v4961_v40  ;;  %v7308_v19 = vld [vmem:[#allocation66_spill] sm:$0xff]  ;;  %v7312_v40 = vld [vmem:[#allocation72_spill] sm:$0xff] }
 0x1bb   :  { %1656 = vmatpush.msrb.mxu1 %v4963_v36  ;;  %1676 = vmatpush.msrb.mxu2 %v4965_v33  ;;  %v7309_v36 = vld [vmem:[#allocation67_spill] sm:$0xff]  ;;  %v7310_v33 = vld [vmem:[#allocation69_spill] sm:$0xff] }
 0x1bc   :  { %1696 = vmatpush.msrb.mxu3 %v4980_v20  ;;  %1637 = vmatpush.msrb.mxu0 %v7303_v22  ;;  %v7311_v20 = vld [vmem:[#allocation71_spill] sm:$0xff] }
 0x1bd   :  { %1657 = vmatpush.msrb.mxu1 %v7304_v23  ;;  %1677 = vmatpush.msrb.mxu2 %v7305_v24 }
 0x1be   :  { %1697 = vmatpush.msrb.mxu3 %v7306_v27  ;;  %1638 = vmatpush.msrb.mxu0 %v7307_v30 }
 0x1bf   :  { %1658 = vmatpush.msrb.mxu1 %v5018_v41  ;;  %1678 = vmatpush.msrb.mxu2 %v5024_v31  ;;  %v7316_v41 = vld [vmem:[#allocation76_spill] sm:$0xff]  ;;  %v7317_v31 = vld [vmem:[#allocation77_spill] sm:$0xff] }
 0x1c0   :  { %1698 = vmatpush.msrb.mxu3 %v7308_v19  ;;  %1639 = vmatpush.msrb.mxu0 %v7309_v36 }
 0x1c1   :  { %1659 = vmatpush.msrb.mxu1 %v7310_v33  ;;  %1679 = vmatpush.msrb.mxu2 %v7311_v20  ;;  %v3659_v20 = vld [vmem:[%s6749_s1 + $0xa0] sm:$0xff] }
 0x1c2   :  { %1699 = vmatpush.msrb.mxu3 %v7312_v40  ;;  %1640 = vmatpush.msrb.mxu0 %v7313_v26  ;;  %v3660_v40 = vld [vmem:[%s6749_s1 + $0xa8] sm:$0xff]  ;;  %v7328_v26 = vld [vmem:[#allocation70_spill] sm:$0xff] }
 0x1c3   :  { %1660 = vmatpush.msrb.mxu1 %v7314_v34  ;;  %1680 = vmatpush.msrb.mxu2 %v5054_v38  ;;  %v7319_v38 = vld [vmem:[#allocation79_spill] sm:$0xff] }
 0x1c4   :  { %1700 = vmatpush.msrb.mxu3 %v7315_v37  ;;  %1641 = vmatpush.msrb.mxu0 %v7316_v41 }
 0x1c5   :  { %1661 = vmatpush.msrb.mxu1 %v7317_v31  ;;  %1681 = vmatpush.msrb.mxu2 %v5078_v43  ;;  %v7323_v43 = vld [vmem:[#allocation83_spill] sm:$0xff] }
 0x1c6   :  { %1701 = vmatpush.msrb.mxu3 %v5080_v25  ;;  %1642 = vmatpush.msrb.mxu0 %v5087_v29  ;;  %v7324_v25 = vld [vmem:[#allocation84_spill] sm:$0xff]  ;;  %v7325_v29 = vld [vmem:[#allocation85_spill] sm:$0xff] }
 0x1c7   :  { %1662 = vmatpush.msrb.mxu1 %v5089_v32  ;;  %1682 = vmatpush.msrb.mxu2 %v5093_v28  ;;  %v7326_v32 = vld [vmem:[#allocation86_spill] sm:$0xff]  ;;  %v7327_v28 = vld [vmem:[#allocation87_spill] sm:$0xff] }
 0x1c8   :  { %1702 = vmatpush.msrb.mxu3 %v5095_v48  ;;  %1643 = vmatpush.msrb.mxu0 %v7318_v50  ;;  %v3655_v48 = vld [vmem:[%s6748_s0 + $0x40] sm:$0xff] }
 0x1c9   :  { %1663 = vmatpush.msrb.mxu1 %v7319_v38  ;;  %1683 = vmatpush.msrb.mxu2 %v7320_v45 }
 0x1ca   :  { %1703 = vmatpush.msrb.mxu3 %v7321_v49  ;;  %1644 = vmatpush.msrb.mxu0 %v7322_v52 }
 0x1cb   :  { %1664 = vmatpush.msrb.mxu1 %v7323_v43  ;;  %1684 = vmatpush.msrb.mxu2 %v7324_v25 }
 0x1cc   :  { %1704 = vmatpush.msrb.mxu3 %v7325_v29  ;;  %1645 = vmatpush.msrb.mxu0 %v7326_v32  ;;  %v3662_v32 = vld [vmem:[%s6749_s1 + $0xb8] sm:$0xff] }
 0x1cd   :  { %1665 = vmatpush.msrb.mxu1 %v7327_v28  ;;  %1685 = vmatpush.msrb.mxu2 %v5138_v4  ;;  %v3658_v4 = vld [vmem:[%s6748_s0 + $0x58] sm:$0xff] }
 0x1ce   :  { %1705 = vmatpush.msrb.mxu3 %v5140_v35 }
 0x202   :  { %v1058_v53 = vpop.f32.mrf.mxu0 }
 0x203   :  { %v1078_v59 = vpop.f32.mrf.mxu1  ;;  %v1121_v3 = vadd.f32 %v3655_v48, %v1058_v53 }
 0x204   :  { %v1122_v5 = vadd.f32 %v3656_v39, %v1078_v59 }
 0x205   :  { %v3663_v6 = vmul.f32 -1.442695, %v1121_v3 }
 0x206   :  { %v3664_v7 = vmul.f32 -1.442695, %v1122_v5 }
 0x207   :  { %3815 = vpow2.f32 %v3663_v6 }
 0x208   :  { %3817 = vpow2.f32 %v3664_v7 }
 0x209   :  { %v1098_v47 = vpop.f32.mrf.mxu2 }
 0x20a   :  { %v1118_v35 = vpop.f32.mrf.mxu3  ;;  %v1123_v61 = vadd.f32 %v3657_v51, %v1098_v47 }
 0x20b   :  { %v1124_v8 = vadd.f32 %v3658_v4, %v1118_v35 }
 0x20d   :  { %v3665_v9 = vmul.f32 -1.442695, %v1124_v8  ;;  %v3816_v10 = vpop.eup %3815 }
 0x20e   :  { %v3818_v11 = vpop.eup %3817  ;;  %v1281_v12 = vadd.f32 1.0, %v3816_v10 }
 0x20f   :  { %3819 = vpow2.f32 %v3665_v9  ;;  %v1300_v56 = vadd.f32 1.0, %v3818_v11  ;;  %v3661_v9 = vld [vmem:[%s6749_s1 + $0xb0] sm:$0xff] }
 0x210   :  { %3821 = vrcp.f32 %v1281_v12  ;;  %v1293_v42 = vand.u32 2147483648, %v1281_v12  ;;  %v1291_v2 = vand.u32 2147483647, %v1281_v12  ;;  %vm1287_vm2 = vweird.f32 %v1281_v12 }
 0x211   :  { %3823 = vrcp.f32 %v1300_v56  ;;  %v1312_v0 = vand.u32 2147483648, %v1300_v56  ;;  %v1310_v14 = vand.u32 2147483647, %v1300_v56  ;;  %vm1306_vm3 = vweird.f32 %v1300_v56 }
 0x212   :  { %v1294_v17 = vor.u32 1.1754944e-38, %v1293_v42  ;;  %vm1292_vm6 = vcmp.eq.f32.partialorder %v1291_v2, 8.507059e+37 }
 0x213   :  { %v1313_v22 = vor.u32 1.1754944e-38, %v1312_v0  ;;  %vm1311_vm7 = vcmp.eq.f32.partialorder %v1310_v14, 8.507059e+37 }
 0x215   :  { %v3820_v55 = vpop.eup %3819 }
 0x216   :  { %v1320_v58 = vadd.f32 1.0, %v3820_v55  ;;  %v3822_v60 = vpop.eup %3821 }
 0x217   :  { %v3824_v44 = vpop.eup %3823  ;;  %v1283_v57 = vmul.f32 %v3822_v60, %v1281_v12  ;;  %vm1288_vm0 = vweird.f32 %v3822_v60 }
 0x218   :  { %3825 = vrcp.f32 %v1320_v58  ;;  %v1302_v62 = vmul.f32 %v3824_v44, %v1300_v56  ;;  %vm1307_vm1 = vweird.f32 %v3824_v44  ;;  %vm1289_vm4 = vmor %vm1287_vm2, %vm1288_vm0  ;;  %v1332_v52 = vand.u32 2147483648, %v1320_v58 }
 0x219   :  { %v1284_v46 = vsub.f32 1.0, %v1283_v57  ;;  %3827 = vtanh.f32 %v1123_v61  ;;  %vm1308_vm5 = vmor %vm1306_vm3, %vm1307_vm1  ;;  %vm1326_vm9 = vweird.f32 %v1320_v58  ;;  %v1330_v29 = vand.u32 2147483647, %v1320_v58 }
 0x21a   :  { %v1303_v54 = vsub.f32 1.0, %v1302_v62  ;;  %v1333_v48 = vor.u32 1.1754944e-38, %v1332_v52  ;;  %v5362_v52 = vld [vmem:[#allocation6 + $0x1c8] sm:$0xff] }
 0x21b   :  { %v1285_v1 = vmul.f32 %v3822_v60, %v1284_v46  ;;  %vm1331_vm11 = vcmp.eq.f32.partialorder %v1330_v29, 8.507059e+37  ;;  %v5372_v29 = vld [vmem:[#allocation6 + $0x1a0] sm:$0xff] }
 0x21c   :  { %v1304_v13 = vmul.f32 %v3824_v44, %v1303_v54 }
 0x21d   :  { %v1286_v16 = vadd.f32 %v3822_v60, %v1285_v1 }
 0x21e   :  { %v3826_v15 = vpop.eup %3825  ;;  %v1305_v18 = vadd.f32 %v3824_v44, %v1304_v13 }
 0x21f   :  { %v1322_v21 = vmul.f32 %v3826_v15, %v1320_v58  ;;  %v1290_v23 = vsel %vm1289_vm4, %v3822_v60, %v1286_v16  ;;  %v3828_v24 = vpop.eup %3827  ;;  %vm1327_vm8 = vweird.f32 %v3826_v15 }
 0x220   :  { %v1295_v27 = vsel %vm1292_vm6, %v1294_v17, %v1290_v23  ;;  %v1309_v30 = vsel %vm1308_vm5, %v3824_v44, %v1305_v18  ;;  %vm1328_vm10 = vmor %vm1326_vm9, %vm1327_vm8 }
 0x221   :  { %v1323_v19 = vsub.f32 1.0, %v1322_v21  ;;  %v1314_v36 = vsel %vm1311_vm7, %v1313_v22, %v1309_v30  ;;  %v1337_v33 = vmul.f32 %v3828_v24, %v1295_v27 }
 0x222   :  { %v1336_v34 = vmul.f32 %v1314_v36, %v7328_v26 }
 0x223   :  { %v1324_v37 = vmul.f32 %v3826_v15, %v1323_v19 }
 0x224   :  { %v5329_v50 = vadd.f32 %v1337_v33, %v1336_v34 }
 0x225   :  { %v1325_v49 = vadd.f32 %v3826_v15, %v1324_v37 }
 0x226   :  { %v1211_v41 = vpop.f32.mrf.mxu0  ;;  %v1231_v31 = vpop.f32.mrf.mxu1  ;;  %3829 = vtanh.f32 %v5329_v50 }
 0x227   :  { %v1274_v38 = vadd.f32 %v3659_v20, %v1211_v41  ;;  %v1275_v45 = vadd.f32 %v3660_v40, %v1231_v31  ;;  %v1329_v28 = vsel %vm1328_vm10, %v3826_v15, %v1325_v49  ;;  %v5350_v31 = vld [vmem:[#allocation6 + $0x1e8] sm:$0xff]  ;;  %v5360_v49 = vld [vmem:[#allocation6 + $0x1c0] sm:$0xff] }
 0x228   :  { %v1334_v3 = vsel %vm1331_vm11, %v1333_v48, %v1329_v28  ;;  %v5376_v28 = vld [vmem:[#allocation6 + $0x1b0] sm:$0xff]  ;;  %v5380_v48 = vld [vmem:[#allocation6 + $0x1b8] sm:$0xff] }
 0x229   :  { %v3666_v43 = vmul.f32 -1.442695, %v1274_v38  ;;  %v3667_v25 = vmul.f32 -1.442695, %v1275_v45  ;;  %v5352_v38 = vld [vmem:[#allocation6 + $0x1f0] sm:$0xff]  ;;  %v5356_v45 = vld [vmem:[#allocation6 + $0x1f8] sm:$0xff] }
 0x22b   :  { %3831 = vpow2.f32 %v3666_v43  ;;  %v5364_v43 = vld [vmem:[#allocation6 + $0x1d0] sm:$0xff] }
 0x22c   :  { %3833 = vpow2.f32 %v3667_v25  ;;  %v3830_v59 = vpop.eup %3829  ;;  %v5368_v25 = vld [vmem:[#allocation6 + $0x1d8] sm:$0xff] }
 0x22d   :  { %v1271_v39 = vpop.f32.mrf.mxu3  ;;  %v1340_v6 = vmul.f32 %v3830_v59, %v1334_v3  ;;  %v1251_v10 = vpop.f32.mrf.mxu2  ;;  %v5388_v59 = vld [vmem:[#allocation6 + $0x190] sm:$0xff]  ;;  %v5392_v3 = vld [vmem:[#allocation6 + $0x198] sm:$0xff] }
 0x22e   :  { %v1277_v53 = vadd.f32 %v3662_v32, %v1271_v39  ;;  %v1276_v51 = vadd.f32 %v3661_v9, %v1251_v10  ;;  %v5374_v32 = vld [vmem:[#allocation6 + $0x1a8] sm:$0xff]  ;;  %v5384_v39 = vld [vmem:[#allocation6 + $0x180] sm:$0xff]  ;;  %v5412_v9 = vld [vmem:[#allocation6 + $0x150] sm:$0xff] }
 0x22f   :  { %3669 = vst [vmem:[%s6752_s4 + $0x10] sm:$0xff] %v1340_v6  ;;  %1493 = vmatmul.f32.vlgmr.msra.gmra.mxu0 %v1340_v6  ;;  %1513 = vmatmul.f32.vlgmr.msra.gmra.mxu1 %v1340_v6  ;;  %v5416_v10 = vld [vmem:[#allocation6 + $0x158] sm:$0xff] }
 0x230   :  { %v3668_v5 = vmul.f32 -1.442695, %v1277_v53  ;;  %1533 = vmatmul.f32.vlgmr.msra.gmra.mxu2 %v1340_v6  ;;  %1553 = vmatmul.f32.vlgmr.msra.gmra.mxu3 %v1340_v6  ;;  %v5386_v53 = vld [vmem:[#allocation6 + $0x188] sm:$0xff] }
 0x231   :  { %v3832_v7 = vpop.eup %3831  ;;  %1933 = vmatpush.msra.mxu1 %v5350_v31  ;;  %1953 = vmatpush.msra.mxu2 %v5352_v38  ;;  %v5398_v6 = vld [vmem:[#allocation6 + $0x168] sm:$0xff] }
 0x232   :  { %v3834_v4 = vpop.eup %3833  ;;  %v1344_v35 = vadd.f32 1.0, %v3832_v7  ;;  %3835 = vpow2.f32 %v3668_v5  ;;  %1973 = vmatpush.msra.mxu3 %v5356_v45  ;;  %v5396_v5 = vld [vmem:[#allocation6 + $0x160] sm:$0xff]  ;;  %v5400_v7 = vld [vmem:[#allocation6 + $0x170] sm:$0xff] }
 0x233   :  { %v1363_v8 = vadd.f32 1.0, %v3834_v4  ;;  %1934 = vmatpush.msra.mxu1 %v5362_v52  ;;  %1954 = vmatpush.msra.mxu2 %v5364_v43  ;;  %v5404_v4 = vld [vmem:[#allocation6 + $0x178] sm:$0xff] }
 0x234   :  { %3837 = vrcp.f32 %v1344_v35  ;;  %v1356_v44 = vand.u32 2147483648, %v1344_v35  ;;  %v1354_v46 = vand.u32 2147483647, %v1344_v35  ;;  %vm1350_vm14 = vweird.f32 %v1344_v35  ;;  %1974 = vmatpush.msra.mxu3 %v5368_v25 }
 0x235   :  { %3839 = vrcp.f32 %v1363_v8  ;;  %v1375_v57 = vand.u32 2147483648, %v1363_v8  ;;  %v1373_v42 = vand.u32 2147483647, %v1363_v8  ;;  %vm1369_vm15 = vweird.f32 %v1363_v8  ;;  %1935 = vmatpush.msra.mxu1 %v5374_v32  ;;  %1955 = vmatpush.msra.mxu2 %v5376_v28 }
 0x236   :  { %v1357_v2 = vor.u32 1.1754944e-38, %v1356_v44  ;;  %vm1355_vm2 = vcmp.eq.f32.partialorder %v1354_v46, 8.507059e+37  ;;  %1975 = vmatpush.msra.mxu3 %v5380_v48  ;;  %v5446_v44 = vld [vmem:[#allocation6 + $0x118] sm:$0xff]  ;;  %v5454_v46 = vld [vmem:[#allocation6 + $0xf0] sm:$0xff] }
 0x237   :  { %v1376_v15 = vor.u32 1.1754944e-38, %v1375_v57  ;;  %vm1374_vm3 = vcmp.eq.f32.partialorder %v1373_v42, 8.507059e+37  ;;  %1936 = vmatpush.msra.mxu1 %v5386_v53  ;;  %1956 = vmatpush.msra.mxu2 %v5388_v59  ;;  %v5450_v57 = vld [vmem:[#allocation6 + $0xe0] sm:$0xff] }
 0x238   :  { %v3836_v11 = vpop.eup %3835  ;;  %1976 = vmatpush.msra.mxu3 %v5392_v3 }
 0x239   :  { %v1383_v12 = vadd.f32 1.0, %v3836_v11  ;;  %1937 = vmatpush.msra.mxu1 %v5398_v6  ;;  %1957 = vmatpush.msra.mxu2 %v5400_v7  ;;  %v5420_v11 = vld [vmem:[#allocation6 + $0x120] sm:$0xff] }
 0x23a   :  { %v3838_v56 = vpop.eup %3837  ;;  %1977 = vmatpush.msra.mxu3 %v5404_v4 }
 0x23b   :  { %v3840_v47 = vpop.eup %3839  ;;  %v1346_v55 = vmul.f32 %v3838_v56, %v1344_v35  ;;  %3841 = vrcp.f32 %v1383_v12  ;;  %vm1351_vm12 = vweird.f32 %v3838_v56  ;;  %v1395_v33 = vand.u32 2147483648, %v1383_v12  ;;  %v5408_v35 = vld [vmem:[#allocation6 + $0x140] sm:$0xff]  ;;  %1958 = vmatpush.msra.mxu2 %v5412_v9 }
 0x23c   :  { %v1365_v58 = vmul.f32 %v3840_v47, %v1363_v8  ;;  %3843 = vtanh.f32 %v1276_v51  ;;  %vm1370_vm13 = vweird.f32 %v3840_v47  ;;  %vm1352_vm0 = vmor %vm1350_vm14, %vm1351_vm12  ;;  %vm1389_vm5 = vweird.f32 %v1383_v12  ;;  %v5410_v8 = vld [vmem:[#allocation6 + $0x148] sm:$0xff]  ;;  %1978 = vmatpush.msra.mxu3 %v5416_v10  ;;  %v5428_v51 = vld [vmem:[#allocation6 + $0x138] sm:$0xff] }
 0x23d   :  { %v1347_v60 = vsub.f32 1.0, %v1346_v55  ;;  %vm1371_vm1 = vmor %vm1369_vm15, %vm1370_vm13  ;;  %v1393_v20 = vand.u32 2147483647, %v1383_v12  ;;  %v1396_v26 = vor.u32 1.1754944e-38, %v1395_v33  ;;  %1938 = vmatpush.msra.mxu1 %v5410_v8  ;;  %v5434_v55 = vld [vmem:[#allocation6 + $0x108] sm:$0xff]  ;;  %v5493_v33 = vld [vmem:[#allocation6 + $0x90] sm:$0xff] }
 0x23e   :  { %v1366_v61 = vsub.f32 1.0, %v1365_v58  ;;  %1979 = vmatpush.msra.mxu3 %v5428_v51  ;;  %v5436_v58 = vld [vmem:[#allocation6 + $0x110] sm:$0xff]  ;;  %7338 = vst [vmem:[#allocation22_spill] sm:$0xff] %v5493_v33 }
 0x23f   :  { %v1348_v62 = vmul.f32 %v3838_v56, %v1347_v60  ;;  %vm1394_vm7 = vcmp.eq.f32.partialorder %v1393_v20, 8.507059e+37  ;;  %v3671_v60 = vld [vmem:[%s6748_s0 + $0x60] sm:$0xff]  ;;  %v5497_v20 = vld [vmem:[#allocation6 + $0x98] sm:$0xff] }
 0x240   :  { %v1367_v54 = vmul.f32 %v3840_v47, %v1366_v61  ;;  %v3672_v61 = vld [vmem:[%s6748_s0 + $0x68] sm:$0xff]  ;;  %1980 = vmatpush.msra.mxu3 %v5446_v44  ;;  %7339 = vst [vmem:[#allocation15_spill] sm:$0xff] %v5497_v20 }
 0x241   :  { %v3842_v0 = vpop.eup %3841  ;;  %v1349_v1 = vadd.f32 %v3838_v56, %v1348_v62  ;;  %v5452_v62 = vld [vmem:[#allocation6 + $0xe8] sm:$0xff] }
 0x242   :  { %v1368_v13 = vadd.f32 %v3840_v47, %v1367_v54  ;;  %v1385_v14 = vmul.f32 %v3842_v0, %v1383_v12  ;;  %v3844_v17 = vpop.eup %3843  ;;  %vm1390_vm4 = vweird.f32 %v3842_v0  ;;  %v5422_v12 = vld [vmem:[#allocation6 + $0x128] sm:$0xff] }
 0x243   :  { %v1353_v16 = vsel %vm1352_vm0, %v3838_v56, %v1349_v1  ;;  %vm1391_vm6 = vmor %vm1389_vm5, %vm1390_vm4  ;;  %v5424_v56 = vld [vmem:[#allocation6 + $0x130] sm:$0xff]  ;;  %1939 = vmatpush.msra.mxu1 %v5422_v12 }
 0x244   :  { %v1358_v18 = vsel %vm1355_vm2, %v1357_v2, %v1353_v16  ;;  %v1372_v21 = vsel %vm1371_vm1, %v3840_v47, %v1368_v13  ;;  %v1386_v22 = vsub.f32 1.0, %v1385_v14  ;;  %1959 = vmatpush.msra.mxu2 %v5424_v56  ;;  %v5432_v47 = vld [vmem:[#allocation6 + $0x100] sm:$0xff]  ;;  %v5464_v14 = vld [vmem:[#allocation6 + $0xc8] sm:$0xff]  ;;  %v5470_v16 = vld [vmem:[#allocation6 + $0xd8] sm:$0xff] }
 0x245   :  { %v1377_v23 = vsel %vm1374_vm3, %v1376_v15, %v1372_v21  ;;  %v1400_v24 = vmul.f32 %v3844_v17, %v1358_v18  ;;  %1940 = vmatpush.msra.mxu1 %v5434_v55  ;;  %v5462_v13 = vld [vmem:[#allocation6 + $0xc0] sm:$0xff]  ;;  %7329 = vst [vmem:[#allocation14_spill] sm:$0xff] %v5464_v14  ;;  %v5466_v15 = vld [vmem:[#allocation6 + $0xd0] sm:$0xff] }
 0x246   :  { %v1399_v27 = vmul.f32 %v1377_v23, %v5200_v63  ;;  %v1387_v30 = vmul.f32 %v3842_v0, %v1386_v22  ;;  %v5348_v63 = vld [vmem:[#allocation6 + $0x1e0] sm:$0xff]  ;;  %1960 = vmatpush.msra.mxu2 %v5436_v58  ;;  %7330 = vst [vmem:[#allocation16_spill] sm:$0xff] %v5466_v15  ;;  %v5476_v22 = vld [vmem:[#allocation6 + $0xa8] sm:$0xff]  ;;  %v3674_v23 = vld [vmem:[%s6748_s0 + $0x78] sm:$0xff] }
 0x247   :  { %1913 = vmatpush.msra.mxu0 %v5348_v63  ;;  %1941 = vmatpush.msra.mxu1 %v5452_v62  ;;  %7331 = vst [vmem:[#allocation12_spill] sm:$0xff] %v5470_v16  ;;  %v5474_v21 = vld [vmem:[#allocation6 + $0xa0] sm:$0xff] }
 0x248   :  { %v5342_v19 = vadd.f32 %v1400_v24, %v1399_v27  ;;  %v1388_v36 = vadd.f32 %v3842_v0, %v1387_v30  ;;  %1961 = vmatpush.msra.mxu2 %v5454_v46  ;;  %7332 = vst [vmem:[#allocation17_spill] sm:$0xff] %v5474_v21  ;;  %v5483_v24 = vld [vmem:[#allocation6 + $0xb0] sm:$0xff]  ;;  %v5485_v27 = vld [vmem:[#allocation6 + $0xb8] sm:$0xff]  ;;  %v5489_v30 = vld [vmem:[#allocation6 + $0x80] sm:$0xff] }
 0x249   :  { %1914 = vmatpush.msra.mxu0 %v5360_v49  ;;  %1942 = vmatpush.msra.mxu1 %v5464_v14  ;;  %7333 = vst [vmem:[#allocation18_spill] sm:$0xff] %v5476_v22 }
 0x24a   :  { %3845 = vtanh.f32 %v5342_v19  ;;  %v1392_v40 = vsel %vm1391_vm6, %v3842_v0, %v1388_v36  ;;  %v5458_v0 = vld [vmem:[#allocation6 + $0xf8] sm:$0xff]  ;;  %1962 = vmatpush.msra.mxu2 %v5466_v15  ;;  %7334 = vst [vmem:[#allocation19_spill] sm:$0xff] %v5483_v24  ;;  %v5491_v36 = vld [vmem:[#allocation6 + $0x88] sm:$0xff] }
 0x24b   :  { %v1397_v37 = vsel %vm1394_vm7, %v1396_v26, %v1392_v40  ;;  %1915 = vmatpush.msra.mxu0 %v5372_v29  ;;  %1981 = vmatpush.msra.mxu3 %v5458_v0  ;;  %7335 = vst [vmem:[#allocation13_spill] sm:$0xff] %v5485_v27 }
 0x24c   :  { %1943 = vmatpush.msra.mxu1 %v5476_v22  ;;  %1963 = vmatpush.msra.mxu2 %v5483_v24  ;;  %7336 = vst [vmem:[#allocation20_spill] sm:$0xff] %v5489_v30  ;;  %v5642_v22 = vld [vmem:[#allocation8 + $0x158] sm:$0xff] }
 0x24d   :  { %1916 = vmatpush.msra.mxu0 %v5384_v39  ;;  %1982 = vmatpush.msra.mxu3 %v5470_v16  ;;  %7337 = vst [vmem:[#allocation21_spill] sm:$0xff] %v5491_v36  ;;  %v5654_v16 = vld [vmem:[#allocation8 + $0x130] sm:$0xff] }
 0x24e   :  { %1944 = vmatpush.msra.mxu1 %v5491_v36  ;;  %1964 = vmatpush.msra.mxu2 %v5493_v33  ;;  %v5585_v33 = vld [vmem:[#allocation8 + $0x1b0] sm:$0xff] }
 0x24f   :  { %1917 = vmatpush.msra.mxu0 %v5396_v5  ;;  %1983 = vmatpush.msra.mxu3 %v5485_v27  ;;  %7366 = vst [vmem:[#allocation47_spill] sm:$0xff] %v5585_v33 }
 0x250   :  { %v3846_v34 = vpop.eup %3845 }
 0x251   :  { %v1403_v41 = vmul.f32 %v3846_v34, %v1397_v37  ;;  %1918 = vmatpush.msra.mxu0 %v5408_v35  ;;  %1984 = vmatpush.msra.mxu3 %v5497_v20  ;;  %v5501_v34 = vld [vmem:[#allocation6 + $0x60] sm:$0xff]  ;;  %v5504_v37 = vld [vmem:[#allocation6 + $0x68] sm:$0xff] }
 0x252   :  { %7340 = vst [vmem:[#allocation23_spill] sm:$0xff] %v5501_v34  ;;  %1945 = vmatpush.msra.mxu1 %v5504_v37 }
 0x253   :  { %3670 = vst [vmem:[%s6753_s5 + $0x28] sm:$0xff] %v1403_v41  ;;  %1646 = vmatmul.f32.vlgmr.msrb.gmra.mxu0 %v1403_v41  ;;  %1666 = vmatmul.f32.vlgmr.msrb.gmra.mxu1 %v1403_v41 }
 0x254   :  { %1686 = vmatmul.f32.vlgmr.msrb.gmra.mxu2 %v1403_v41  ;;  %1706 = vmatmul.f32.vlgmr.msrb.gmra.mxu3 %v1403_v41  ;;  %7341 = vst [vmem:[#allocation24_spill] sm:$0xff] %v5504_v37  ;;  %v5506_v41 = vld [vmem:[#allocation6 + $0x70] sm:$0xff] }
 0x255   :  { %1919 = vmatpush.msra.mxu0 %v5420_v11  ;;  %7342 = vst [vmem:[#allocation25_spill] sm:$0xff] %v5506_v41  ;;  %1965 = vmatpush.msra.mxu2 %v5506_v41  ;;  %v5530_v41 = vld [vmem:[#allocation6 + $0x30] sm:$0xff] }
 0x256   :  { %7350 = vst [vmem:[#allocation33_spill] sm:$0xff] %v5530_v41 }
 0x257   :  { %1920 = vmatpush.msra.mxu0 %v5432_v47 }
 0x259   :  { %1921 = vmatpush.msra.mxu0 %v5450_v57 }
 0x25b   :  { %1922 = vmatpush.msra.mxu0 %v5462_v13 }
 0x25d   :  { %1923 = vmatpush.msra.mxu0 %v5474_v21  ;;  %v5652_v21 = vld [vmem:[#allocation8 + $0x128] sm:$0xff] }
 0x25f   :  { %1924 = vmatpush.msra.mxu0 %v5489_v30 }
 0x261   :  { %1925 = vmatpush.msra.mxu0 %v5501_v34  ;;  %v5571_v34 = vld [vmem:[#allocation8 + $0x1d0] sm:$0xff] }
 0x262   :  { %7362 = vst [vmem:[#allocation44_spill] sm:$0xff] %v5571_v34 }
 0x2ac   :  { %v1494_v54 = vpop.f32.mrf.mxu0  ;;  %v1514_v42 = vpop.f32.mrf.mxu1 }
 0x2ad   :  { %v1557_v1 = vadd.f32 %v3671_v60, %v1494_v54  ;;  %v1558_v2 = vadd.f32 %v3672_v61, %v1514_v42  ;;  %v5508_v60 = vld [vmem:[#allocation6 + $0x78] sm:$0xff]  ;;  %v5512_v54 = vld [vmem:[#allocation6 + $0x40] sm:$0xff]  ;;  %v5514_v42 = vld [vmem:[#allocation6 + $0x48] sm:$0xff] }
 0x2ae   :  { %7343 = vst [vmem:[#allocation26_spill] sm:$0xff] %v5508_v60  ;;  %1985 = vmatpush.msra.mxu3 %v5508_v60  ;;  %1926 = vmatpush.msra.mxu0 %v5512_v54  ;;  %v5569_v60 = vld [vmem:[#allocation8 + $0x1c8] sm:$0xff] }
 0x2af   :  { %v3679_v17 = vmul.f32 -1.442695, %v1557_v1  ;;  %v3680_v18 = vmul.f32 -1.442695, %v1558_v2  ;;  %7344 = vst [vmem:[#allocation27_spill] sm:$0xff] %v5512_v54  ;;  %v5516_v1 = vld [vmem:[#allocation6 + $0x50] sm:$0xff]  ;;  %1946 = vmatpush.msra.mxu1 %v5514_v42 }
 0x2b0   :  { %7345 = vst [vmem:[#allocation28_spill] sm:$0xff] %v5514_v42  ;;  %1966 = vmatpush.msra.mxu2 %v5516_v1  ;;  %v5536_v54 = vld [vmem:[#allocation6 + $0x38] sm:$0xff] }
 0x2b1   :  { %3847 = vpow2.f32 %v3679_v17  ;;  %7346 = vst [vmem:[#allocation29_spill] sm:$0xff] %v5516_v1  ;;  %v5520_v17 = vld [vmem:[#allocation6 + $0x58] sm:$0xff]  ;;  %v5545_v1 = vld [vmem:[#allocation6 + $0x10] sm:$0xff] }
 0x2b2   :  { %3849 = vpow2.f32 %v3680_v18  ;;  %7347 = vst [vmem:[#allocation30_spill] sm:$0xff] %v5520_v17  ;;  %1986 = vmatpush.msra.mxu3 %v5520_v17  ;;  %1967 = vmatpush.msra.mxu2 %v5530_v41  ;;  %v5554_v17 = vld [vmem:[#allocation8 + $0x1e8] sm:$0xff]  ;;  %v3673_v41 = vld [vmem:[%s6748_s0 + $0x70] sm:$0xff]  ;;  %v5563_v42 = vld [vmem:[#allocation8 + $0x1f8] sm:$0xff] }
 0x2b3   :  { %v1554_v40 = vpop.f32.mrf.mxu3  ;;  %7351 = vst [vmem:[#allocation34_spill] sm:$0xff] %v5536_v54 }
 0x2b4   :  { %v1560_v26 = vadd.f32 %v3674_v23, %v1554_v40  ;;  %v5526_v40 = vld [vmem:[#allocation6 + $0x20] sm:$0xff]  ;;  %7354 = vst [vmem:[#allocation37_spill] sm:$0xff] %v5545_v1  ;;  %1987 = vmatpush.msra.mxu3 %v5536_v54  ;;  %1968 = vmatpush.msra.mxu2 %v5545_v1  ;;  %v1534_v54 = vpop.f32.mrf.mxu2  ;;  %v5575_v1 = vld [vmem:[#allocation8 + $0x1d8] sm:$0xff] }
 0x2b5   :  { %7348 = vst [vmem:[#allocation31_spill] sm:$0xff] %v5526_v40  ;;  %1927 = vmatpush.msra.mxu0 %v5526_v40  ;;  %v5552_v40 = vld [vmem:[#allocation8 + $0x1e0] sm:$0xff]  ;;  %v1559_v30 = vadd.f32 %v3673_v41, %v1534_v54  ;;  %v5602_v41 = vld [vmem:[#allocation8 + $0x188] sm:$0xff]  ;;  %v5604_v54 = vld [vmem:[#allocation8 + $0x190] sm:$0xff] }
 0x2b6   :  { %v3681_v61 = vmul.f32 -1.442695, %v1560_v26  ;;  %v5528_v26 = vld [vmem:[#allocation6 + $0x28] sm:$0xff]  ;;  %7356 = vst [vmem:[#allocation39_spill] sm:$0xff] %v5552_v40 }
 0x2b7   :  { %v3848_v2 = vpop.eup %3847  ;;  %7349 = vst [vmem:[#allocation32_spill] sm:$0xff] %v5528_v26  ;;  %1947 = vmatpush.msra.mxu1 %v5528_v26  ;;  %v5561_v26 = vld [vmem:[#allocation8 + $0x1f0] sm:$0xff] }
 0x2b8   :  { %v3850_v18 = vpop.eup %3849  ;;  %v5522_v23 = vadd.f32 1.0, %v3848_v2  ;;  %3851 = vpow2.f32 %v3681_v61  ;;  %v5541_v61 = vld [vmem:[#allocation6] sm:$0xff]  ;;  %v5543_v2 = vld [vmem:[#allocation6 + $0x8] sm:$0xff]  ;;  %7357 = vst [vmem:[#allocation40_spill] sm:$0xff] %v5554_v17  ;;  %2106 = vmatpush.msrb.mxu2 %v5561_v26 }
 0x2b9   :  { %v5532_v37 = vadd.f32 1.0, %v3850_v18  ;;  %7352 = vst [vmem:[#allocation35_spill] sm:$0xff] %v5541_v61  ;;  %1928 = vmatpush.msra.mxu0 %v5541_v61  ;;  %v5550_v18 = vld [vmem:[#allocation6 + $0x18] sm:$0xff]  ;;  %1948 = vmatpush.msra.mxu1 %v5543_v2  ;;  %v5567_v61 = vld [vmem:[#allocation8 + $0x1c0] sm:$0xff] }
 0x2ba   :  { %3853 = vrcp.f32 %v5522_v23  ;;  %7353 = vst [vmem:[#allocation36_spill] sm:$0xff] %v5543_v2  ;;  %1988 = vmatpush.msra.mxu3 %v5550_v18  ;;  %2107 = vmatpush.msrb.mxu2 %v5571_v34  ;;  %v1729_v24 = vand.u32 2147483648, %v5522_v23  ;;  %vm1723_vm10 = vweird.f32 %v5522_v23 }
 0x2bb   :  { %3855 = vrcp.f32 %v5532_v37  ;;  %7355 = vst [vmem:[#allocation38_spill] sm:$0xff] %v5550_v18  ;;  %2066 = vmatpush.msrb.mxu0 %v5552_v40  ;;  %2086 = vmatpush.msrb.mxu1 %v5554_v17  ;;  %v5581_v40 = vld [vmem:[#allocation8 + $0x1a0] sm:$0xff]  ;;  %v5583_v18 = vld [vmem:[#allocation8 + $0x1a8] sm:$0xff]  ;;  %vm1742_vm11 = vweird.f32 %v5532_v37 }
 0x2bc   :  { %7358 = vst [vmem:[#allocation41_spill] sm:$0xff] %v5561_v26  ;;  %2126 = vmatpush.msrb.mxu3 %v5563_v42  ;;  %v5591_v26 = vld [vmem:[#allocation8 + $0x1b8] sm:$0xff]  ;;  %2108 = vmatpush.msrb.mxu2 %v5585_v33  ;;  %v5621_v33 = vld [vmem:[#allocation8 + $0x170] sm:$0xff] }
 0x2bd   :  { %7359 = vst [vmem:[#allocation42_spill] sm:$0xff] %v5563_v42  ;;  %2067 = vmatpush.msrb.mxu0 %v5567_v61  ;;  %2087 = vmatpush.msrb.mxu1 %v5569_v60  ;;  %v5600_v42 = vld [vmem:[#allocation8 + $0x180] sm:$0xff] }
 0x2be   :  { %7360 = vst [vmem:[#allocation43_spill] sm:$0xff] %v5567_v61  ;;  %v3852_v20 = vpop.eup %3851  ;;  %2127 = vmatpush.msrb.mxu3 %v5575_v1  ;;  %2109 = vmatpush.msrb.mxu2 %v5604_v54 }
 0x2bf   :  { %7361 = vst [vmem:[#allocation48_spill] sm:$0xff] %v5569_v60  ;;  %v5577_v2 = vadd.f32 1.0, %v3852_v20  ;;  %2068 = vmatpush.msrb.mxu0 %v5581_v40  ;;  %2088 = vmatpush.msrb.mxu1 %v5583_v18  ;;  %v5610_v60 = vld [vmem:[#allocation8 + $0x198] sm:$0xff] }
 0x2c0   :  { %7363 = vst [vmem:[#allocation45_spill] sm:$0xff] %v5575_v1  ;;  %v5587_v36 = vpop.eup %3853  ;;  %2128 = vmatpush.msrb.mxu3 %v5591_v26  ;;  %v5616_v1 = vld [vmem:[#allocation8 + $0x168] sm:$0xff]  ;;  %2110 = vmatpush.msrb.mxu2 %v5621_v33 }
 0x2c1   :  { %7364 = vst [vmem:[#allocation46_spill] sm:$0xff] %v5581_v40  ;;  %v5593_v20 = vpop.eup %3855  ;;  %v1719_v61 = vmul.f32 %v5587_v36, %v5522_v23  ;;  %3857 = vrcp.f32 %v5577_v2  ;;  %2069 = vmatpush.msrb.mxu0 %v5600_v42  ;;  %v5614_v40 = vld [vmem:[#allocation8 + $0x160] sm:$0xff]  ;;  %2089 = vmatpush.msrb.mxu1 %v5602_v41  ;;  %vm1724_vm8 = vweird.f32 %v5587_v36  ;;  %vm1762_vm1 = vweird.f32 %v5577_v2 }
 0x2c2   :  { %7365 = vst [vmem:[#allocation52_spill] sm:$0xff] %v5583_v18  ;;  %v1738_v34 = vmul.f32 %v5593_v20, %v5532_v37  ;;  %3859 = vtanh.f32 %v1559_v30  ;;  %v5623_v18 = vld [vmem:[#allocation8 + $0x178] sm:$0xff]  ;;  %2129 = vmatpush.msrb.mxu3 %v5610_v60  ;;  %v5631_v30 = vld [vmem:[#allocation8 + $0x140] sm:$0xff]  ;;  %vm1743_vm9 = vweird.f32 %v5593_v20  ;;  %vm5659_vm12 = vmor %vm1723_vm10, %vm1724_vm8 }
 0x2c3   :  { %7367 = vst [vmem:[#allocation49_spill] sm:$0xff] %v5591_v26  ;;  %v1720_v17 = vsub.f32 1.0, %v1719_v61  ;;  %v1748_v61 = vand.u32 2147483648, %v5532_v37  ;;  %v1727_v26 = vand.u32 2147483647, %v5522_v23  ;;  %2070 = vmatpush.msrb.mxu0 %v5614_v40  ;;  %2090 = vmatpush.msrb.mxu1 %v5616_v1  ;;  %vm5672_vm13 = vmor %vm1742_vm11, %vm1743_vm9 }
 0x2c4   :  { %7368 = vst [vmem:[#allocation50_spill] sm:$0xff] %v5600_v42  ;;  %v1739_v27 = vsub.f32 1.0, %v1738_v34  ;;  %v5633_v34 = vld [vmem:[#allocation8 + $0x148] sm:$0xff]  ;;  %2130 = vmatpush.msrb.mxu3 %v5623_v18 }
 0x2c5   :  { %7369 = vst [vmem:[#allocation56_spill] sm:$0xff] %v5602_v41  ;;  %v1721_v42 = vmul.f32 %v5587_v36, %v1720_v17  ;;  %v1746_v17 = vand.u32 2147483647, %v5532_v37  ;;  %2071 = vmatpush.msrb.mxu0 %v5631_v30  ;;  %2091 = vmatpush.msrb.mxu1 %v5633_v34  ;;  %vm1728_vm14 = vcmp.eq.f32.partialorder %v1727_v26, 8.507059e+37 }
 0x2c6   :  { %7370 = vst [vmem:[#allocation51_spill] sm:$0xff] %v5604_v54  ;;  %v5635_v54 = vld [vmem:[#allocation8 + $0x150] sm:$0xff]  ;;  %v1740_v41 = vmul.f32 %v5593_v20, %v1739_v27  ;;  %v5650_v27 = vld [vmem:[#allocation8 + $0x120] sm:$0xff]  ;;  %2131 = vmatpush.msrb.mxu3 %v5642_v22 }
 0x2c7   :  { %7371 = vst [vmem:[#allocation53_spill] sm:$0xff] %v5610_v60  ;;  %v5644_v60 = vpop.eup %3857  ;;  %2111 = vmatpush.msrb.mxu2 %v5635_v54  ;;  %2072 = vmatpush.msrb.mxu0 %v5650_v27  ;;  %vm1747_vm15 = vcmp.eq.f32.partialorder %v1746_v17, 8.507059e+37  ;;  %v5704_v17 = vld [vmem:[#allocation8 + $0xe8] sm:$0xff] }
 0x2c8   :  { %7372 = vst [vmem:[#allocation54_spill] sm:$0xff] %v5614_v40  ;;  %v1722_v40 = vadd.f32 %v5587_v36, %v1721_v42  ;;  %v1730_v42 = vor.u32 1.1754944e-38, %v1729_v24  ;;  %v1741_v23 = vadd.f32 %v5593_v20, %v1740_v41  ;;  %v5681_v41 = vld [vmem:[#allocation8 + $0x100] sm:$0xff]  ;;  %2092 = vmatpush.msrb.mxu1 %v5652_v21  ;;  %vm1763_vm0 = vweird.f32 %v5644_v60 }
 0x2c9   :  { %7373 = vst [vmem:[#allocation60_spill] sm:$0xff] %v5616_v1  ;;  %v1749_v1 = vor.u32 1.1754944e-38, %v1748_v61  ;;  %2112 = vmatpush.msrb.mxu2 %v5654_v16  ;;  %2073 = vmatpush.msrb.mxu0 %v5681_v41  ;;  %vm5756_vm2 = vmor %vm1762_vm1, %vm1763_vm0 }
 0x2ca   :  { %7374 = vst [vmem:[#allocation55_spill] sm:$0xff] %v5621_v33  ;;  %v1726_v24 = vsel %vm5659_vm12, %v5587_v36, %v1722_v40  ;;  %v1745_v14 = vsel %vm5672_vm13, %v5593_v20, %v1741_v23  ;;  %v3675_v36 = vld [vmem:[%s6749_s1 + $0x80] sm:$0xff]  ;;  %v5693_v33 = vld [vmem:[#allocation8 + $0x110] sm:$0xff]  ;;  %v5695_v40 = vld [vmem:[#allocation8 + $0x118] sm:$0xff] }
 0x2cb   :  { %7375 = vst [vmem:[#allocation57_spill] sm:$0xff] %v5623_v18  ;;  %v5668_v18 = vld [vmem:[#allocation8 + $0x138] sm:$0xff]  ;;  %v1731_v15 = vsel %vm1728_vm14, %v1730_v42, %v1726_v24  ;;  %v1750_v26 = vsel %vm1747_vm15, %v1749_v1, %v1745_v14  ;;  %v3676_v20 = vld [vmem:[%s6749_s1 + $0x88] sm:$0xff]  ;;  %2113 = vmatpush.msrb.mxu2 %v5693_v33  ;;  %v5710_v14 = vld [vmem:[#allocation8 + $0xf0] sm:$0xff] }
 0x2cc   :  { %7376 = vst [vmem:[#allocation58_spill] sm:$0xff] %v5631_v30  ;;  %v1758_v30 = vmul.f32 %v5644_v60, %v5577_v2  ;;  %2132 = vmatpush.msrb.mxu3 %v5668_v18  ;;  %v1772_v23 = vmul.f32 %v1750_v26, %v5329_v50  ;;  %v5716_v24 = vld [vmem:[#allocation8 + $0xc0] sm:$0xff] }
 0x2cd   :  { %7377 = vst [vmem:[#allocation64_spill] sm:$0xff] %v5633_v34  ;;  %v3860_v34 = vpop.eup %3859  ;;  %2114 = vmatpush.msrb.mxu2 %v5710_v14 }
 0x2ce   :  { %7378 = vst [vmem:[#allocation59_spill] sm:$0xff] %v5635_v54  ;;  %v5683_v54 = vld [vmem:[#allocation8 + $0x108] sm:$0xff]  ;;  %v1759_v61 = vsub.f32 1.0, %v1758_v30  ;;  %v1773_v42 = vmul.f32 %v3860_v34, %v1731_v15  ;;  %v5702_v30 = vld [vmem:[#allocation8 + $0xe0] sm:$0xff]  ;;  %v5712_v15 = vld [vmem:[#allocation8 + $0xf8] sm:$0xff]  ;;  %2133 = vmatpush.msrb.mxu3 %v5695_v40 }
 0x2cf   :  { %7383 = vst [vmem:[#allocation61_spill] sm:$0xff] %v5681_v41  ;;  %2093 = vmatpush.msrb.mxu1 %v5683_v54  ;;  %2074 = vmatpush.msrb.mxu0 %v5702_v30  ;;  %v5718_v41 = vld [vmem:[#allocation8 + $0xc8] sm:$0xff] }
 0x2d0   :  { %7384 = vst [vmem:[#allocation62_spill] sm:$0xff] %v5683_v54  ;;  %v1760_v37 = vmul.f32 %v5644_v60, %v1759_v61  ;;  %v1647_v1 = vpop.f32.mrf.mxu0  ;;  %v1667_v34 = vpop.f32.mrf.mxu1  ;;  %v5720_v50 = vadd.f32 %v1773_v42, %v1772_v23  ;;  %v5725_v54 = vld [vmem:[#allocation8 + $0xd8] sm:$0xff]  ;;  %2134 = vmatpush.msrb.mxu3 %v5712_v15  ;;  %v5732_v42 = vld [vmem:[#allocation8 + $0xa0] sm:$0xff] }
 0x2d1   :  { %7385 = vst [vmem:[#allocation68_spill] sm:$0xff] %v5693_v33  ;;  %v1710_v61 = vadd.f32 %v3675_v36, %v1647_v1  ;;  %v1711_v26 = vadd.f32 %v3676_v20, %v1667_v34  ;;  %2094 = vmatpush.msrb.mxu1 %v5704_v17  ;;  %v5723_v33 = vld [vmem:[#allocation8 + $0xd0] sm:$0xff]  ;;  %v5734_v36 = vld [vmem:[#allocation8 + $0xa8] sm:$0xff]  ;;  %2075 = vmatpush.msrb.mxu0 %v5716_v24  ;;  %v5741_v34 = vld [vmem:[#allocation8 + $0xb8] sm:$0xff] }
 0x2d2   :  { %7386 = vst [vmem:[#allocation63_spill] sm:$0xff] %v5695_v40  ;;  %v1768_v40 = vand.u32 2147483648, %v5577_v2  ;;  %3861 = vtanh.f32 %v5720_v50  ;;  %v5739_v1 = vld [vmem:[#allocation8 + $0xb0] sm:$0xff]  ;;  %2115 = vmatpush.msrb.mxu2 %v5723_v33  ;;  %2135 = vmatpush.msrb.mxu3 %v5725_v54 }
 0x2d3   :  { %7387 = vst [vmem:[#allocation65_spill] sm:$0xff] %v5702_v30  ;;  %v1761_v30 = vadd.f32 %v5644_v60, %v1760_v37  ;;  %v3682_v20 = vmul.f32 -1.442695, %v1710_v61  ;;  %v3683_v23 = vmul.f32 -1.442695, %v1711_v26  ;;  %2095 = vmatpush.msrb.mxu1 %v5718_v41  ;;  %v3678_v37 = vld [vmem:[%s6749_s1 + $0x98] sm:$0xff]  ;;  %2076 = vmatpush.msrb.mxu0 %v5732_v42 }
 0x2d4   :  { %7388 = vst [vmem:[#allocation66_spill] sm:$0xff] %v5712_v15  ;;  %v1766_v15 = vand.u32 2147483647, %v5577_v2  ;;  %v5750_v61 = vld [vmem:[#allocation8 + $0x80] sm:$0xff]  ;;  %v5752_v26 = vld [vmem:[#allocation8 + $0x88] sm:$0xff]  ;;  %v5762_v2 = vld [vmem:[#allocation8 + $0x90] sm:$0xff]  ;;  %2116 = vmatpush.msrb.mxu2 %v5739_v1  ;;  %2136 = vmatpush.msrb.mxu3 %v5741_v34 }
 0x2d5   :  { %7389 = vst [vmem:[#allocation67_spill] sm:$0xff] %v5716_v24  ;;  %3863 = vpow2.f32 %v3682_v20  ;;  %2096 = vmatpush.msrb.mxu1 %v5734_v36  ;;  %v5773_v20 = vld [vmem:[#allocation8 + $0x68] sm:$0xff]  ;;  %2077 = vmatpush.msrb.mxu0 %v5750_v61 }
 0x2d6   :  { %7390 = vst [vmem:[#allocation69_spill] sm:$0xff] %v5718_v41  ;;  %3865 = vpow2.f32 %v3683_v23  ;;  %v5771_v41 = vld [vmem:[#allocation8 + $0x60] sm:$0xff]  ;;  %v5779_v23 = vld [vmem:[#allocation8 + $0x78] sm:$0xff]  ;;  %vm1767_vm3 = vcmp.eq.f32.partialorder %v1766_v15, 8.507059e+37  ;;  %2117 = vmatpush.msrb.mxu2 %v5762_v2 }
 0x2d7   :  { %7391 = vst [vmem:[#allocation71_spill] sm:$0xff] %v5720_v50  ;;  %v1707_v24 = vpop.f32.mrf.mxu3  ;;  %2097 = vmatpush.msrb.mxu1 %v5752_v26  ;;  %2078 = vmatpush.msrb.mxu0 %v5771_v41 }
 0x2d8   :  { %7392 = vst [vmem:[#allocation72_spill] sm:$0xff] %v5723_v33  ;;  %v5764_v33 = vld [vmem:[#allocation8 + $0x98] sm:$0xff]  ;;  %v1713_v50 = vadd.f32 %v3678_v37, %v1707_v24  ;;  %v5793_v24 = vld [vmem:[#allocation8 + $0x50] sm:$0xff] }
 0x2d9   :  { %7393 = vst [vmem:[#allocation73_spill] sm:$0xff] %v5725_v54  ;;  %v1765_v54 = vsel %vm5756_vm2, %v5644_v60, %v1761_v30  ;;  %2137 = vmatpush.msrb.mxu3 %v5764_v33  ;;  %v5783_v60 = vld [vmem:[#allocation8 + $0x40] sm:$0xff]  ;;  %v5785_v30 = vld [vmem:[#allocation8 + $0x48] sm:$0xff]  ;;  %2098 = vmatpush.msrb.mxu1 %v5773_v20  ;;  %v5795_v37 = vld [vmem:[#allocation8 + $0x58] sm:$0xff] }
 0x2da   :  { %7394 = vst [vmem:[#allocation74_spill] sm:$0xff] %v5732_v42  ;;  %v1769_v42 = vor.u32 1.1754944e-38, %v1768_v40  ;;  %v3862_v40 = vpop.eup %3861  ;;  %2079 = vmatpush.msrb.mxu0 %v5783_v60 }
 0x2db   :  { %7395 = vst [vmem:[#allocation75_spill] sm:$0xff] %v5734_v36  ;;  %v5777_v36 = vld [vmem:[#allocation8 + $0x70] sm:$0xff]  ;;  %2138 = vmatpush.msrb.mxu3 %v5779_v23  ;;  %v3864_v15 = vpop.eup %3863  ;;  %2099 = vmatpush.msrb.mxu1 %v5785_v30 }
 0x2dc   :  { %7396 = vst [vmem:[#allocation76_spill] sm:$0xff] %v5741_v34  ;;  %v1770_v34 = vsel %vm1767_vm3, %v1769_v42, %v1765_v54  ;;  %2118 = vmatpush.msrb.mxu2 %v5777_v36  ;;  %v3866_v54 = vpop.eup %3865  ;;  %v5797_v42 = vadd.f32 1.0, %v3864_v15  ;;  %v5817_v15 = vld [vmem:[#allocation8 + $0x8] sm:$0xff] }
 0x2dd   :  { %7397 = vst [vmem:[#allocation77_spill] sm:$0xff] %v5750_v61  ;;  %v1776_v61 = vmul.f32 %v3862_v40, %v1770_v34  ;;  %v5802_v34 = vld [vmem:[#allocation8 + $0x20] sm:$0xff]  ;;  %v5806_v40 = vadd.f32 1.0, %v3866_v54  ;;  %2139 = vmatpush.msrb.mxu3 %v5795_v37  ;;  %v5824_v54 = vld [vmem:[#allocation8 + $0x18] sm:$0xff] }
 0x2de   :  { %7398 = vst [vmem:[#allocation78_spill] sm:$0xff] %v5752_v26  ;;  %v3684_v26 = vmul.f32 -1.442695, %v1713_v50  ;;  %v5804_v50 = vld [vmem:[#allocation8 + $0x28] sm:$0xff]  ;;  %2119 = vmatpush.msrb.mxu2 %v5793_v24  ;;  %2080 = vmatpush.msrb.mxu0 %v5802_v34  ;;  %vm1786_vm6 = vweird.f32 %v5797_v42 }
 0x2df   :  { %7401 = vst [vmem:[#allocation79_spill] sm:$0xff] %v5783_v60  ;;  %1929 = vmatmul.f32.vlgmr.msra.gmra.mxu0 %v1776_v61  ;;  %1949 = vmatmul.f32.vlgmr.msra.gmra.mxu1 %v1776_v61  ;;  %v5810_v60 = vld [vmem:[#allocation8 + $0x38] sm:$0xff]  ;;  %vm1805_vm7 = vweird.f32 %v5806_v40 }
 0x2e0   :  { %7402 = vst [vmem:[#allocation80_spill] sm:$0xff] %v5785_v30  ;;  %3867 = vpow2.f32 %v3684_v26  ;;  %1969 = vmatmul.f32.vlgmr.msra.gmra.mxu2 %v1776_v61  ;;  %1989 = vmatmul.f32.vlgmr.msra.gmra.mxu3 %v1776_v61  ;;  %v5808_v30 = vld [vmem:[#allocation8 + $0x30] sm:$0xff]  ;;  %v5815_v26 = vld [vmem:[#allocation8] sm:$0xff] }
 0x2e1   :  { %7403 = vst [vmem:[#allocation81_spill] sm:$0xff] %v5793_v24  ;;  %3869 = vrcp.f32 %v5797_v42  ;;  %2100 = vmatpush.msrb.mxu1 %v5804_v50  ;;  %2120 = vmatpush.msrb.mxu2 %v5808_v30  ;;  %v1687_v24 = vpop.f32.mrf.mxu2 }
 0x2e2   :  { %7404 = vst [vmem:[#allocation82_spill] sm:$0xff] %v5795_v37  ;;  %3871 = vrcp.f32 %v5806_v40  ;;  %2140 = vmatpush.msrb.mxu3 %v5810_v60  ;;  %v3677_v37 = vld [vmem:[%s6749_s1 + $0x90] sm:$0xff]  ;;  %2081 = vmatpush.msrb.mxu0 %v5815_v26 }
 0x2e3   :  { %3685 = vst [vmem:[%s6752_s4 + $0x18] sm:$0xff] %v1776_v61  ;;  %v5822_v61 = vld [vmem:[#allocation8 + $0x10] sm:$0xff]  ;;  %2101 = vmatpush.msrb.mxu1 %v5817_v15 }
 0x2e4   :  { %7405 = vst [vmem:[#allocation83_spill] sm:$0xff] %v5802_v34  ;;  %2121 = vmatpush.msrb.mxu2 %v5822_v61  ;;  %2141 = vmatpush.msrb.mxu3 %v5824_v54 }
 0x2e5   :  { %7406 = vst [vmem:[#allocation84_spill] sm:$0xff] %v5804_v50  ;;  %2349 = vmatpush.msra.mxu0 %v5348_v63  ;;  %2369 = vmatpush.msra.mxu1 %v5350_v31 }
 0x2e6   :  { %7407 = vst [vmem:[#allocation85_spill] sm:$0xff] %v5808_v30  ;;  %v3868_v34 = vpop.eup %3867  ;;  %v1712_v30 = vadd.f32 %v3677_v37, %v1687_v24  ;;  %2389 = vmatpush.msra.mxu2 %v5352_v38  ;;  %2409 = vmatpush.msra.mxu3 %v5356_v45  ;;  %v1792_v38 = vand.u32 2147483648, %v5797_v42  ;;  %v1811_v45 = vand.u32 2147483648, %v5806_v40  ;;  %v7420_v24 = vld [vmem:[#allocation22_spill] sm:$0xff]  ;;  %v7421_v37 = vld [vmem:[#allocation15_spill] sm:$0xff] }
 0x2e7   :  { %7408 = vst [vmem:[#allocation86_spill] sm:$0xff] %v5810_v60  ;;  %v5835_v50 = vadd.f32 1.0, %v3868_v34  ;;  %v3870_v60 = vpop.eup %3869  ;;  %2350 = vmatpush.msra.mxu0 %v5360_v49  ;;  %2370 = vmatpush.msra.mxu1 %v5362_v52  ;;  %v1790_v52 = vand.u32 2147483647, %v5797_v42 }
 0x2e8   :  { %7409 = vst [vmem:[#allocation87_spill] sm:$0xff] %v5815_v26  ;;  %v3872_v26 = vpop.eup %3871  ;;  %2390 = vmatpush.msra.mxu2 %v5364_v43  ;;  %2410 = vmatpush.msra.mxu3 %v5368_v25  ;;  %vm1787_vm4 = vweird.f32 %v3870_v60  ;;  %v1809_v25 = vand.u32 2147483647, %v5806_v40 }
 0x2e9   :  { %7410 = vst [vmem:[#allocation70_spill] sm:$0xff] %v5817_v15  ;;  %v1782_v15 = vmul.f32 %v3870_v60, %v5797_v42  ;;  %3873 = vrcp.f32 %v5835_v50  ;;  %v1801_v34 = vmul.f32 %v3872_v26, %v5806_v40  ;;  %2351 = vmatpush.msra.mxu0 %v5372_v29  ;;  %2371 = vmatpush.msra.mxu1 %v5374_v32  ;;  %vm1806_vm5 = vweird.f32 %v3872_v26  ;;  %vm1788_vm8 = vmor %vm1786_vm6, %vm1787_vm4  ;;  %v7423_v40 = vld [vmem:[#allocation24_spill] sm:$0xff] }
 0x2ea   :  { %3875 = vtanh.f32 %v1712_v30  ;;  %2391 = vmatpush.msra.mxu2 %v5376_v28  ;;  %2411 = vmatpush.msra.mxu3 %v5380_v48  ;;  %v1793_v28 = vor.u32 1.1754944e-38, %v1792_v38  ;;  %vm1807_vm9 = vmor %vm1805_vm7, %vm1806_vm5  ;;  %vm1791_vm10 = vcmp.eq.f32.partialorder %v1790_v52, 8.507059e+37  ;;  %vm1810_vm11 = vcmp.eq.f32.partialorder %v1809_v25, 8.507059e+37  ;;  %v7429_v38 = vld [vmem:[#allocation30_spill] sm:$0xff]  ;;  %v7432_v52 = vld [vmem:[#allocation33_spill] sm:$0xff] }
 0x2eb   :  { %v1783_v63 = vsub.f32 1.0, %v1782_v15  ;;  %v1802_v31 = vsub.f32 1.0, %v1801_v34  ;;  %2352 = vmatpush.msra.mxu0 %v5384_v39  ;;  %2372 = vmatpush.msra.mxu1 %v5386_v53  ;;  %v1812_v53 = vor.u32 1.1754944e-38, %v1811_v45  ;;  %vm1825_vm13 = vweird.f32 %v5835_v50  ;;  %v7425_v15 = vld [vmem:[#allocation26_spill] sm:$0xff]  ;;  %v7426_v34 = vld [vmem:[#allocation27_spill] sm:$0xff] }
 0x2ec   :  { %2392 = vmatpush.msra.mxu2 %v5388_v59  ;;  %2412 = vmatpush.msra.mxu3 %v5392_v3  ;;  %v7430_v45 = vld [vmem:[#allocation31_spill] sm:$0xff] }
 0x2ed   :  { %v1784_v49 = vmul.f32 %v3870_v60, %v1783_v63  ;;  %v1803_v43 = vmul.f32 %v3872_v26, %v1802_v31  ;;  %2353 = vmatpush.msra.mxu0 %v5396_v5  ;;  %2373 = vmatpush.msra.mxu1 %v5398_v6  ;;  %v7427_v63 = vld [vmem:[#allocation28_spill] sm:$0xff]  ;;  %v7428_v31 = vld [vmem:[#allocation29_spill] sm:$0xff]  ;;  %v7434_v25 = vld [vmem:[#allocation35_spill] sm:$0xff] }
 0x2ee   :  { %2393 = vmatpush.msra.mxu2 %v5400_v7  ;;  %2413 = vmatpush.msra.mxu3 %v5404_v4 }
 0x2ef   :  { %v5860_v29 = vpop.eup %3873  ;;  %v1785_v32 = vadd.f32 %v3870_v60, %v1784_v49  ;;  %v1804_v48 = vadd.f32 %v3872_v26, %v1803_v43  ;;  %2354 = vmatpush.msra.mxu0 %v5408_v35  ;;  %2374 = vmatpush.msra.mxu1 %v5410_v8  ;;  %v7431_v49 = vld [vmem:[#allocation32_spill] sm:$0xff]  ;;  %v7433_v43 = vld [vmem:[#allocation34_spill] sm:$0xff] }
 0x2f0   :  { %v1821_v39 = vmul.f32 %v5860_v29, %v5835_v50  ;;  %v3876_v3 = vpop.eup %3875  ;;  %2394 = vmatpush.msra.mxu2 %v5412_v9  ;;  %2414 = vmatpush.msra.mxu3 %v5416_v10  ;;  %vm1826_vm12 = vweird.f32 %v5860_v29  ;;  %v1831_v9 = vand.u32 2147483648, %v5835_v50  ;;  %v1829_v10 = vand.u32 2147483647, %v5835_v50  ;;  %v7422_v50 = vld [vmem:[#allocation23_spill] sm:$0xff] }
 0x2f1   :  { %v1789_v59 = vsel %vm1788_vm8, %v3870_v60, %v1785_v32  ;;  %v1808_v6 = vsel %vm1807_vm9, %v3872_v26, %v1804_v48  ;;  %2355 = vmatpush.msra.mxu0 %v5420_v11  ;;  %2375 = vmatpush.msra.mxu1 %v5422_v12  ;;  %v7411_v11 = vld [vmem:[#allocation14_spill] sm:$0xff]  ;;  %vm1827_vm14 = vmor %vm1825_vm13, %vm1826_vm12  ;;  %v7412_v12 = vld [vmem:[#allocation16_spill] sm:$0xff] }
 0x2f2   :  { %v1794_v5 = vsel %vm1791_vm10, %v1793_v28, %v1789_v59  ;;  %v1822_v30 = vsub.f32 1.0, %v1821_v39  ;;  %v1813_v7 = vsel %vm1810_vm11, %v1812_v53, %v1808_v6  ;;  %2395 = vmatpush.msra.mxu2 %v5424_v56  ;;  %2415 = vmatpush.msra.mxu3 %v5428_v51  ;;  %v7413_v56 = vld [vmem:[#allocation12_spill] sm:$0xff]  ;;  %vm1830_vm15 = vcmp.eq.f32.partialorder %v1829_v10, 8.507059e+37  ;;  %v7424_v26 = vld [vmem:[#allocation25_spill] sm:$0xff]  ;;  %v7437_v28 = vld [vmem:[#allocation38_spill] sm:$0xff] }
 0x2f3   :  { %v1836_v4 = vmul.f32 %v3876_v3, %v1794_v5  ;;  %v1835_v60 = vmul.f32 %v1813_v7, %v5342_v19  ;;  %2356 = vmatpush.msra.mxu0 %v5432_v47  ;;  %2376 = vmatpush.msra.mxu1 %v5434_v55  ;;  %v7414_v47 = vld [vmem:[#allocation17_spill] sm:$0xff]  ;;  %v7415_v55 = vld [vmem:[#allocation18_spill] sm:$0xff]  ;;  %v7438_v48 = vld [vmem:[#allocation39_spill] sm:$0xff] }
 0x2f4   :  { %v1823_v35 = vmul.f32 %v5860_v29, %v1822_v30  ;;  %2396 = vmatpush.msra.mxu2 %v5436_v58  ;;  %2416 = vmatpush.msra.mxu3 %v5446_v44  ;;  %v1832_v58 = vor.u32 1.1754944e-38, %v1831_v9  ;;  %v7416_v44 = vld [vmem:[#allocation19_spill] sm:$0xff]  ;;  %v7436_v32 = vld [vmem:[#allocation37_spill] sm:$0xff]  ;;  %v7439_v39 = vld [vmem:[#allocation40_spill] sm:$0xff] }
 0x2f5   :  { %v5884_v8 = vadd.f32 %v1836_v4, %v1835_v60  ;;  %2357 = vmatpush.msra.mxu0 %v5450_v57  ;;  %2377 = vmatpush.msra.mxu1 %v5452_v62  ;;  %v7417_v57 = vld [vmem:[#allocation13_spill] sm:$0xff]  ;;  %v7418_v62 = vld [vmem:[#allocation20_spill] sm:$0xff]  ;;  %v7441_v59 = vld [vmem:[#allocation42_spill] sm:$0xff] }
 0x2f6   :  { %v1824_v19 = vadd.f32 %v5860_v29, %v1823_v35  ;;  %2397 = vmatpush.msra.mxu2 %v5454_v46  ;;  %2417 = vmatpush.msra.mxu3 %v5458_v0  ;;  %v7419_v46 = vld [vmem:[#allocation21_spill] sm:$0xff]  ;;  %v7442_v3 = vld [vmem:[#allocation43_spill] sm:$0xff]  ;;  %v7443_v5 = vld [vmem:[#allocation48_spill] sm:$0xff] }
 0x2f7   :  { %3877 = vtanh.f32 %v5884_v8  ;;  %2358 = vmatpush.msra.mxu0 %v5462_v13  ;;  %2378 = vmatpush.msra.mxu1 %v7411_v11  ;;  %v7440_v53 = vld [vmem:[#allocation41_spill] sm:$0xff]  ;;  %v7444_v6 = vld [vmem:[#allocation44_spill] sm:$0xff]  ;;  %v7446_v7 = vld [vmem:[#allocation46_spill] sm:$0xff] }
 0x2f8   :  { %2398 = vmatpush.msra.mxu2 %v7412_v12  ;;  %2418 = vmatpush.msra.mxu3 %v7413_v56  ;;  %v1828_v51 = vsel %vm1827_vm14, %v5860_v29, %v1824_v19  ;;  %v7435_v29 = vld [vmem:[#allocation36_spill] sm:$0xff]  ;;  %v7445_v30 = vld [vmem:[#allocation45_spill] sm:$0xff]  ;;  %v7448_v60 = vld [vmem:[#allocation47_spill] sm:$0xff] }
 0x2f9   :  { %2359 = vmatpush.msra.mxu0 %v7414_v47  ;;  %2379 = vmatpush.msra.mxu1 %v7415_v55  ;;  %v1833_v13 = vsel %vm1830_vm15, %v1832_v58, %v1828_v51  ;;  %v7447_v4 = vld [vmem:[#allocation52_spill] sm:$0xff]  ;;  %v7449_v35 = vld [vmem:[#allocation49_spill] sm:$0xff]  ;;  %v7450_v19 = vld [vmem:[#allocation50_spill] sm:$0xff] }
 0x2fa   :  { %2399 = vmatpush.msra.mxu2 %v7416_v44  ;;  %2419 = vmatpush.msra.mxu3 %v7417_v57  ;;  %v7451_v9 = vld [vmem:[#allocation56_spill] sm:$0xff]  ;;  %v7452_v10 = vld [vmem:[#allocation51_spill] sm:$0xff]  ;;  %v7453_v11 = vld [vmem:[#allocation53_spill] sm:$0xff] }
 0x2fb   :  { %2360 = vmatpush.msra.mxu0 %v7418_v62  ;;  %2380 = vmatpush.msra.mxu1 %v7419_v46  ;;  %v7454_v12 = vld [vmem:[#allocation54_spill] sm:$0xff]  ;;  %v7455_v56 = vld [vmem:[#allocation60_spill] sm:$0xff]  ;;  %v7456_v51 = vld [vmem:[#allocation55_spill] sm:$0xff] }
 0x2fc   :  { %2400 = vmatpush.msra.mxu2 %v7420_v24  ;;  %2420 = vmatpush.msra.mxu3 %v7421_v37  ;;  %v7457_v47 = vld [vmem:[#allocation57_spill] sm:$0xff]  ;;  %v7458_v55 = vld [vmem:[#allocation58_spill] sm:$0xff]  ;;  %v7459_v58 = vld [vmem:[#allocation64_spill] sm:$0xff] }
 0x2fd   :  { %v3878_v0 = vpop.eup %3877  ;;  %2361 = vmatpush.msra.mxu0 %v7422_v50  ;;  %2381 = vmatpush.msra.mxu1 %v7423_v40  ;;  %v7460_v44 = vld [vmem:[#allocation59_spill] sm:$0xff]  ;;  %v7461_v57 = vld [vmem:[#allocation61_spill] sm:$0xff]  ;;  %v7462_v62 = vld [vmem:[#allocation62_spill] sm:$0xff] }
 0x2fe   :  { %v1839_v42 = vmul.f32 %v3878_v0, %v1833_v13  ;;  %2401 = vmatpush.msra.mxu2 %v7424_v26  ;;  %2421 = vmatpush.msra.mxu3 %v7425_v15  ;;  %v7463_v46 = vld [vmem:[#allocation68_spill] sm:$0xff]  ;;  %v7464_v0 = vld [vmem:[#allocation63_spill] sm:$0xff]  ;;  %v7465_v13 = vld [vmem:[#allocation65_spill] sm:$0xff] }
 0x2ff   :  { %2362 = vmatpush.msra.mxu0 %v7426_v34  ;;  %2382 = vmatpush.msra.mxu1 %v7427_v63  ;;  %v7471_v24 = vld [vmem:[#allocation74_spill] sm:$0xff]  ;;  %v7472_v37 = vld [vmem:[#allocation75_spill] sm:$0xff]  ;;  %v7478_v40 = vld [vmem:[#allocation81_spill] sm:$0xff] }
 0x300   :  { %3686 = vst [vmem:[%s6753_s5 + $0x20] sm:$0xff] %v1839_v42  ;;  %2082 = vmatmul.f32.vlgmr.msrb.gmra.mxu0 %v1839_v42  ;;  %2102 = vmatmul.f32.vlgmr.msrb.gmra.mxu1 %v1839_v42  ;;  %v7476_v50 = vld [vmem:[#allocation79_spill] sm:$0xff]  ;;  %v7479_v26 = vld [vmem:[#allocation82_spill] sm:$0xff]  ;;  %v3688_v34 = vld [vmem:[%s6748_s0 + $0x88] sm:$0xff] }
 0x301   :  { %2122 = vmatmul.f32.vlgmr.msrb.gmra.mxu2 %v1839_v42  ;;  %2142 = vmatmul.f32.vlgmr.msrb.gmra.mxu3 %v1839_v42  ;;  %v7473_v42 = vld [vmem:[#allocation76_spill] sm:$0xff]  ;;  %v7480_v15 = vld [vmem:[#allocation83_spill] sm:$0xff] }
 0x302   :  { %2402 = vmatpush.msra.mxu2 %v7428_v31  ;;  %2422 = vmatpush.msra.mxu3 %v7429_v38 }
 0x303   :  { %2363 = vmatpush.msra.mxu0 %v7430_v45  ;;  %2383 = vmatpush.msra.mxu1 %v7431_v49 }
 0x304   :  { %2403 = vmatpush.msra.mxu2 %v7432_v52  ;;  %2423 = vmatpush.msra.mxu3 %v7433_v43 }
 0x305   :  { %2364 = vmatpush.msra.mxu0 %v7434_v25  ;;  %2384 = vmatpush.msra.mxu1 %v7435_v29 }
 0x306   :  { %2404 = vmatpush.msra.mxu2 %v7436_v32  ;;  %2424 = vmatpush.msra.mxu3 %v7437_v28 }
 0x307   :  { %2502 = vmatpush.msrb.mxu0 %v7438_v48  ;;  %2522 = vmatpush.msrb.mxu1 %v7439_v39  ;;  %v3689_v39 = vld [vmem:[%s6748_s0 + $0x90] sm:$0xff] }
 0x308   :  { %2542 = vmatpush.msrb.mxu2 %v7440_v53  ;;  %2562 = vmatpush.msrb.mxu3 %v7441_v59 }
 0x309   :  { %2503 = vmatpush.msrb.mxu0 %v7442_v3  ;;  %2523 = vmatpush.msrb.mxu1 %v7443_v5 }
 0x30a   :  { %2543 = vmatpush.msrb.mxu2 %v7444_v6  ;;  %2563 = vmatpush.msrb.mxu3 %v7445_v30 }
 0x30b   :  { %2504 = vmatpush.msrb.mxu0 %v7446_v7  ;;  %2524 = vmatpush.msrb.mxu1 %v7447_v4 }
 0x30c   :  { %2544 = vmatpush.msrb.mxu2 %v7448_v60  ;;  %2564 = vmatpush.msrb.mxu3 %v7449_v35 }
 0x30d   :  { %2505 = vmatpush.msrb.mxu0 %v7450_v19  ;;  %2525 = vmatpush.msrb.mxu1 %v7451_v9 }
 0x30e   :  { %2545 = vmatpush.msrb.mxu2 %v7452_v10  ;;  %2565 = vmatpush.msrb.mxu3 %v7453_v11 }
 0x30f   :  { %2506 = vmatpush.msrb.mxu0 %v7454_v12  ;;  %2526 = vmatpush.msrb.mxu1 %v7455_v56 }
 0x310   :  { %2546 = vmatpush.msrb.mxu2 %v7456_v51  ;;  %2566 = vmatpush.msrb.mxu3 %v7457_v47 }
 0x311   :  { %2507 = vmatpush.msrb.mxu0 %v7458_v55  ;;  %2527 = vmatpush.msrb.mxu1 %v7459_v58 }
 0x312   :  { %2547 = vmatpush.msrb.mxu2 %v7460_v44  ;;  %2567 = vmatpush.msrb.mxu3 %v5642_v22  ;;  %v7466_v22 = vld [vmem:[#allocation66_spill] sm:$0xff] }
 0x313   :  { %2508 = vmatpush.msrb.mxu0 %v5650_v27  ;;  %2528 = vmatpush.msrb.mxu1 %v5652_v21  ;;  %v7467_v21 = vld [vmem:[#allocation67_spill] sm:$0xff]  ;;  %v7470_v27 = vld [vmem:[#allocation73_spill] sm:$0xff] }
 0x314   :  { %2548 = vmatpush.msrb.mxu2 %v5654_v16  ;;  %2568 = vmatpush.msrb.mxu3 %v5668_v18  ;;  %v7468_v16 = vld [vmem:[#allocation69_spill] sm:$0xff]  ;;  %v7469_v18 = vld [vmem:[#allocation72_spill] sm:$0xff] }
 0x315   :  { %2509 = vmatpush.msrb.mxu0 %v7461_v57  ;;  %2529 = vmatpush.msrb.mxu1 %v7462_v62 }
 0x316   :  { %2549 = vmatpush.msrb.mxu2 %v7463_v46  ;;  %2569 = vmatpush.msrb.mxu3 %v7464_v0 }
 0x317   :  { %2510 = vmatpush.msrb.mxu0 %v7465_v13  ;;  %2530 = vmatpush.msrb.mxu1 %v5704_v17  ;;  %v7474_v17 = vld [vmem:[#allocation77_spill] sm:$0xff] }
 0x318   :  { %2550 = vmatpush.msrb.mxu2 %v5710_v14  ;;  %2570 = vmatpush.msrb.mxu3 %v7466_v22  ;;  %v7475_v14 = vld [vmem:[#allocation78_spill] sm:$0xff] }
 0x319   :  { %2511 = vmatpush.msrb.mxu0 %v7467_v21  ;;  %2531 = vmatpush.msrb.mxu1 %v7468_v16 }
 0x31a   :  { %2551 = vmatpush.msrb.mxu2 %v7469_v18  ;;  %2571 = vmatpush.msrb.mxu3 %v7470_v27  ;;  %v3691_v18 = vld [vmem:[%s6749_s1 + $0x60] sm:$0xff]  ;;  %v3692_v27 = vld [vmem:[%s6749_s1 + $0x68] sm:$0xff] }
 0x31b   :  { %2512 = vmatpush.msrb.mxu0 %v7471_v24  ;;  %2532 = vmatpush.msrb.mxu1 %v7472_v37  ;;  %v7486_v24 = vld [vmem:[#allocation71_spill] sm:$0xff] }
 0x31c   :  { %2552 = vmatpush.msrb.mxu2 %v5739_v1  ;;  %2572 = vmatpush.msrb.mxu3 %v7473_v42  ;;  %v7477_v1 = vld [vmem:[#allocation80_spill] sm:$0xff] }
 0x31d   :  { %2513 = vmatpush.msrb.mxu0 %v7474_v17  ;;  %2533 = vmatpush.msrb.mxu1 %v7475_v14 }
 0x31e   :  { %2553 = vmatpush.msrb.mxu2 %v5762_v2  ;;  %2573 = vmatpush.msrb.mxu3 %v5764_v33  ;;  %v7481_v2 = vld [vmem:[#allocation84_spill] sm:$0xff]  ;;  %v7482_v33 = vld [vmem:[#allocation85_spill] sm:$0xff] }
 0x31f   :  { %2514 = vmatpush.msrb.mxu0 %v5771_v41  ;;  %2534 = vmatpush.msrb.mxu1 %v5773_v20  ;;  %v7483_v41 = vld [vmem:[#allocation86_spill] sm:$0xff]  ;;  %v7484_v20 = vld [vmem:[#allocation87_spill] sm:$0xff] }
 0x320   :  { %2554 = vmatpush.msrb.mxu2 %v5777_v36  ;;  %2574 = vmatpush.msrb.mxu3 %v5779_v23  ;;  %v7485_v36 = vld [vmem:[#allocation70_spill] sm:$0xff]  ;;  %v3687_v23 = vld [vmem:[%s6748_s0 + $0x80] sm:$0xff] }
 0x321   :  { %2515 = vmatpush.msrb.mxu0 %v7476_v50  ;;  %2535 = vmatpush.msrb.mxu1 %v7477_v1 }
 0x322   :  { %2555 = vmatpush.msrb.mxu2 %v7478_v40  ;;  %2575 = vmatpush.msrb.mxu3 %v7479_v26 }
 0x323   :  { %2516 = vmatpush.msrb.mxu0 %v7480_v15  ;;  %2536 = vmatpush.msrb.mxu1 %v7481_v2 }
 0x324   :  { %2556 = vmatpush.msrb.mxu2 %v7482_v33  ;;  %2576 = vmatpush.msrb.mxu3 %v7483_v41 }
 0x325   :  { %2517 = vmatpush.msrb.mxu0 %v7484_v20  ;;  %2537 = vmatpush.msrb.mxu1 %v7485_v36  ;;  %v3694_v20 = vld [vmem:[%s6749_s1 + $0x78] sm:$0xff] }
 0x326   :  { %2557 = vmatpush.msrb.mxu2 %v5822_v61  ;;  %2577 = vmatpush.msrb.mxu3 %v5824_v54  ;;  %v3690_v61 = vld [vmem:[%s6748_s0 + $0x98] sm:$0xff] }
 0x35c   :  { %v1930_v63 = vpop.f32.mrf.mxu0  ;;  %v1950_v31 = vpop.f32.mrf.mxu1 }
 0x35d   :  { %v1993_v38 = vadd.f32 %v3687_v23, %v1930_v63  ;;  %v1994_v45 = vadd.f32 %v3688_v34, %v1950_v31 }
 0x35f   :  { %v3695_v49 = vmul.f32 -1.442695, %v1993_v38  ;;  %v3696_v52 = vmul.f32 -1.442695, %v1994_v45 }
 0x361   :  { %3879 = vpow2.f32 %v3695_v49 }
 0x362   :  { %3881 = vpow2.f32 %v3696_v52 }
 0x363   :  { %v1990_v54 = vpop.f32.mrf.mxu3  ;;  %v1970_v53 = vpop.f32.mrf.mxu2 }
 0x364   :  { %v1996_v43 = vadd.f32 %v3690_v61, %v1990_v54  ;;  %v1995_v6 = vadd.f32 %v3689_v39, %v1970_v53 }
 0x366   :  { %v3697_v25 = vmul.f32 -1.442695, %v1996_v43 }
 0x367   :  { %v3880_v29 = vpop.eup %3879 }
 0x368   :  { %v3882_v32 = vpop.eup %3881  ;;  %v2153_v28 = vadd.f32 1.0, %v3880_v29  ;;  %3883 = vpow2.f32 %v3697_v25  ;;  %v3693_v25 = vld [vmem:[%s6749_s1 + $0x70] sm:$0xff] }
 0x369   :  { %v2172_v48 = vadd.f32 1.0, %v3882_v32 }
 0x36a   :  { %3885 = vrcp.f32 %v2153_v28  ;;  %v2165_v19 = vand.u32 2147483648, %v2153_v28  ;;  %v2163_v11 = vand.u32 2147483647, %v2153_v28  ;;  %vm2159_vm2 = vweird.f32 %v2153_v28 }
 0x36b   :  { %3887 = vrcp.f32 %v2172_v48  ;;  %v2184_v9 = vand.u32 2147483648, %v2172_v48  ;;  %v2182_v56 = vand.u32 2147483647, %v2172_v48  ;;  %vm2178_vm3 = vweird.f32 %v2172_v48 }
 0x36c   :  { %v2166_v55 = vor.u32 1.1754944e-38, %v2165_v19  ;;  %vm2164_vm6 = vcmp.eq.f32.partialorder %v2163_v11, 8.507059e+37 }
 0x36d   :  { %v2185_v57 = vor.u32 1.1754944e-38, %v2184_v9  ;;  %vm2183_vm7 = vcmp.eq.f32.partialorder %v2182_v56, 8.507059e+37 }
 0x36e   :  { %v3884_v59 = vpop.eup %3883 }
 0x36f   :  { %v2192_v3 = vadd.f32 1.0, %v3884_v59 }
 0x370   :  { %v3886_v5 = vpop.eup %3885 }
 0x371   :  { %v3888_v30 = vpop.eup %3887  ;;  %v2155_v7 = vmul.f32 %v3886_v5, %v2153_v28  ;;  %3889 = vrcp.f32 %v2192_v3  ;;  %vm2160_vm0 = vweird.f32 %v3886_v5  ;;  %v2204_v15 = vand.u32 2147483648, %v2192_v3 }
 0x372   :  { %v2174_v4 = vmul.f32 %v3888_v30, %v2172_v48  ;;  %3891 = vtanh.f32 %v1995_v6  ;;  %vm2179_vm1 = vweird.f32 %v3888_v30  ;;  %vm2161_vm4 = vmor %vm2159_vm2, %vm2160_vm0  ;;  %vm2198_vm9 = vweird.f32 %v2192_v3 }
 0x373   :  { %v2156_v60 = vsub.f32 1.0, %v2155_v7  ;;  %vm2180_vm5 = vmor %vm2178_vm3, %vm2179_vm1  ;;  %v2202_v41 = vand.u32 2147483647, %v2192_v3  ;;  %v2205_v23 = vor.u32 1.1754944e-38, %v2204_v15  ;;  %v6046_v15 = vld [vmem:[#allocation6 + $0x1c8] sm:$0xff] }
 0x374   :  { %v2175_v35 = vsub.f32 1.0, %v2174_v4 }
 0x375   :  { %v2157_v10 = vmul.f32 %v3886_v5, %v2156_v60  ;;  %vm2203_vm11 = vcmp.eq.f32.partialorder %v2202_v41, 8.507059e+37  ;;  %v6056_v41 = vld [vmem:[#allocation6 + $0x1a0] sm:$0xff] }
 0x376   :  { %v2176_v12 = vmul.f32 %v3888_v30, %v2175_v35 }
 0x377   :  { %v3890_v51 = vpop.eup %3889  ;;  %v2158_v47 = vadd.f32 %v3886_v5, %v2157_v10 }
 0x378   :  { %v2177_v58 = vadd.f32 %v3888_v30, %v2176_v12  ;;  %v2194_v44 = vmul.f32 %v3890_v51, %v2192_v3  ;;  %v3892_v46 = vpop.eup %3891  ;;  %vm2199_vm8 = vweird.f32 %v3890_v51 }
 0x379   :  { %v2162_v62 = vsel %vm2161_vm4, %v3886_v5, %v2158_v47  ;;  %vm2200_vm10 = vmor %vm2198_vm9, %vm2199_vm8 }
 0x37a   :  { %v2167_v0 = vsel %vm2164_vm6, %v2166_v55, %v2162_v62  ;;  %v2181_v13 = vsel %vm2180_vm5, %v3888_v30, %v2177_v58  ;;  %v2195_v22 = vsub.f32 1.0, %v2194_v44 }
 0x37b   :  { %v2186_v21 = vsel %vm2183_vm7, %v2185_v57, %v2181_v13  ;;  %v2209_v16 = vmul.f32 %v3892_v46, %v2167_v0 }
 0x37c   :  { %v2208_v37 = vmul.f32 %v2186_v21, %v7486_v24  ;;  %v2196_v42 = vmul.f32 %v3890_v51, %v2195_v22 }
 0x37d   :  { %v2083_v17 = vpop.f32.mrf.mxu0  ;;  %v2103_v14 = vpop.f32.mrf.mxu1 }
 0x37e   :  { %v6013_v50 = vadd.f32 %v2209_v16, %v2208_v37  ;;  %v2146_v1 = vadd.f32 %v3691_v18, %v2083_v17  ;;  %v2147_v40 = vadd.f32 %v3692_v27, %v2103_v14  ;;  %v2197_v26 = vadd.f32 %v3890_v51, %v2196_v42  ;;  %v6034_v14 = vld [vmem:[#allocation6 + $0x1e8] sm:$0xff] }
 0x380   :  { %3893 = vtanh.f32 %v6013_v50  ;;  %v3698_v2 = vmul.f32 -1.442695, %v2146_v1  ;;  %v3699_v33 = vmul.f32 -1.442695, %v2147_v40  ;;  %v2201_v36 = vsel %vm2200_vm10, %v3890_v51, %v2197_v26  ;;  %v6036_v1 = vld [vmem:[#allocation6 + $0x1f0] sm:$0xff]  ;;  %v6040_v40 = vld [vmem:[#allocation6 + $0x1f8] sm:$0xff] }
 0x381   :  { %v2206_v38 = vsel %vm2203_vm11, %v2205_v23, %v2201_v36  ;;  %v6044_v26 = vld [vmem:[#allocation6 + $0x1c0] sm:$0xff]  ;;  %v6060_v36 = vld [vmem:[#allocation6 + $0x1b0] sm:$0xff]  ;;  %v6064_v23 = vld [vmem:[#allocation6 + $0x1b8] sm:$0xff] }
 0x382   :  { %3895 = vpow2.f32 %v3698_v2  ;;  %v6048_v2 = vld [vmem:[#allocation6 + $0x1d0] sm:$0xff] }
 0x383   :  { %3897 = vpow2.f32 %v3699_v33  ;;  %v6052_v33 = vld [vmem:[#allocation6 + $0x1d8] sm:$0xff] }
 0x384   :  { %v2143_v34 = vpop.f32.mrf.mxu3  ;;  %v2123_v29 = vpop.f32.mrf.mxu2 }
 0x385   :  { %v2149_v63 = vadd.f32 %v3694_v20, %v2143_v34  ;;  %v2148_v39 = vadd.f32 %v3693_v25, %v2123_v29  ;;  %v6058_v20 = vld [vmem:[#allocation6 + $0x1a8] sm:$0xff]  ;;  %v6068_v34 = vld [vmem:[#allocation6 + $0x180] sm:$0xff]  ;;  %v6096_v25 = vld [vmem:[#allocation6 + $0x150] sm:$0xff] }
 0x386   :  { %v3894_v31 = vpop.eup %3893  ;;  %v6100_v29 = vld [vmem:[#allocation6 + $0x158] sm:$0xff] }
 0x387   :  { %v3700_v45 = vmul.f32 -1.442695, %v2149_v63  ;;  %v2212_v49 = vmul.f32 %v3894_v31, %v2206_v38  ;;  %v6070_v63 = vld [vmem:[#allocation6 + $0x188] sm:$0xff]  ;;  %v6072_v31 = vld [vmem:[#allocation6 + $0x190] sm:$0xff]  ;;  %v6076_v38 = vld [vmem:[#allocation6 + $0x198] sm:$0xff] }
 0x388   :  { %v3896_v52 = vpop.eup %3895 }
 0x389   :  { %v3898_v61 = vpop.eup %3897  ;;  %v2216_v54 = vadd.f32 1.0, %v3896_v52  ;;  %3899 = vpow2.f32 %v3700_v45  ;;  %3701 = vst [vmem:[%s6752_s4 + $0x20] sm:$0xff] %v2212_v49  ;;  %2365 = vmatmul.f32.vlgmr.msra.gmra.mxu0 %v2212_v49  ;;  %2385 = vmatmul.f32.vlgmr.msra.gmra.mxu1 %v2212_v49  ;;  %v6080_v45 = vld [vmem:[#allocation6 + $0x160] sm:$0xff]  ;;  %v6084_v52 = vld [vmem:[#allocation6 + $0x170] sm:$0xff] }
 0x38a   :  { %v2235_v43 = vadd.f32 1.0, %v3898_v61  ;;  %2405 = vmatmul.f32.vlgmr.msra.gmra.mxu2 %v2212_v49  ;;  %2425 = vmatmul.f32.vlgmr.msra.gmra.mxu3 %v2212_v49  ;;  %v6082_v49 = vld [vmem:[#allocation6 + $0x168] sm:$0xff]  ;;  %v6088_v61 = vld [vmem:[#allocation6 + $0x178] sm:$0xff] }
 0x38b   :  { %3901 = vrcp.f32 %v2216_v54  ;;  %v2228_v30 = vand.u32 2147483648, %v2216_v54  ;;  %v2226_v60 = vand.u32 2147483647, %v2216_v54  ;;  %vm2222_vm14 = vweird.f32 %v2216_v54  ;;  %2805 = vmatpush.msra.mxu1 %v6034_v14  ;;  %2825 = vmatpush.msra.mxu2 %v6036_v1 }
 0x38c   :  { %3903 = vrcp.f32 %v2235_v43  ;;  %v2247_v7 = vand.u32 2147483648, %v2235_v43  ;;  %v2245_v19 = vand.u32 2147483647, %v2235_v43  ;;  %vm2241_vm15 = vweird.f32 %v2235_v43  ;;  %2845 = vmatpush.msra.mxu3 %v6040_v40 }
 0x38d   :  { %v2229_v11 = vor.u32 1.1754944e-38, %v2228_v30  ;;  %vm2227_vm2 = vcmp.eq.f32.partialorder %v2226_v60, 8.507059e+37  ;;  %2806 = vmatpush.msra.mxu1 %v6046_v15  ;;  %2826 = vmatpush.msra.mxu2 %v6048_v2  ;;  %v6130_v30 = vld [vmem:[#allocation6 + $0x118] sm:$0xff]  ;;  %v6138_v60 = vld [vmem:[#allocation6 + $0xf0] sm:$0xff] }
 0x38e   :  { %v2248_v51 = vor.u32 1.1754944e-38, %v2247_v7  ;;  %vm2246_vm3 = vcmp.eq.f32.partialorder %v2245_v19, 8.507059e+37  ;;  %2846 = vmatpush.msra.mxu3 %v6052_v33  ;;  %v6134_v7 = vld [vmem:[#allocation6 + $0xe0] sm:$0xff] }
 0x38f   :  { %v3900_v32 = vpop.eup %3899  ;;  %2807 = vmatpush.msra.mxu1 %v6058_v20  ;;  %2827 = vmatpush.msra.mxu2 %v6060_v36 }
 0x390   :  { %v2255_v28 = vadd.f32 1.0, %v3900_v32  ;;  %2847 = vmatpush.msra.mxu3 %v6064_v23  ;;  %v6104_v32 = vld [vmem:[#allocation6 + $0x120] sm:$0xff] }
 0x391   :  { %v3902_v48 = vpop.eup %3901  ;;  %2808 = vmatpush.msra.mxu1 %v6070_v63  ;;  %2828 = vmatpush.msra.mxu2 %v6072_v31 }
 0x392   :  { %v3904_v53 = vpop.eup %3903  ;;  %v2218_v59 = vmul.f32 %v3902_v48, %v2216_v54  ;;  %3905 = vrcp.f32 %v2255_v28  ;;  %vm2223_vm12 = vweird.f32 %v3902_v48  ;;  %v2267_v16 = vand.u32 2147483648, %v2255_v28  ;;  %2848 = vmatpush.msra.mxu3 %v6076_v38  ;;  %v6092_v54 = vld [vmem:[#allocation6 + $0x140] sm:$0xff] }
 0x393   :  { %v2237_v3 = vmul.f32 %v3904_v53, %v2235_v43  ;;  %3907 = vtanh.f32 %v2148_v39  ;;  %vm2242_vm13 = vweird.f32 %v3904_v53  ;;  %vm2224_vm0 = vmor %vm2222_vm14, %vm2223_vm12  ;;  %vm2261_vm5 = vweird.f32 %v2255_v28  ;;  %2809 = vmatpush.msra.mxu1 %v6082_v49  ;;  %2829 = vmatpush.msra.mxu2 %v6084_v52  ;;  %v6094_v43 = vld [vmem:[#allocation6 + $0x148] sm:$0xff]  ;;  %v6112_v39 = vld [vmem:[#allocation6 + $0x138] sm:$0xff] }
 0x394   :  { %v2219_v5 = vsub.f32 1.0, %v2218_v59  ;;  %vm2243_vm1 = vmor %vm2241_vm15, %vm2242_vm13  ;;  %v2265_v18 = vand.u32 2147483647, %v2255_v28  ;;  %v2268_v24 = vor.u32 1.1754944e-38, %v2267_v16  ;;  %2849 = vmatpush.msra.mxu3 %v6088_v61  ;;  %v6118_v59 = vld [vmem:[#allocation6 + $0x108] sm:$0xff]  ;;  %v6177_v16 = vld [vmem:[#allocation6 + $0x90] sm:$0xff] }
 0x395   :  { %v2238_v6 = vsub.f32 1.0, %v2237_v3  ;;  %2810 = vmatpush.msra.mxu1 %v6094_v43  ;;  %2830 = vmatpush.msra.mxu2 %v6096_v25  ;;  %v6120_v3 = vld [vmem:[#allocation6 + $0x110] sm:$0xff]  ;;  %7496 = vst [vmem:[#allocation22_spill] sm:$0xff] %v6177_v16 }
 0x396   :  { %v2220_v4 = vmul.f32 %v3902_v48, %v2219_v5  ;;  %vm2266_vm7 = vcmp.eq.f32.partialorder %v2265_v18, 8.507059e+37  ;;  %2850 = vmatpush.msra.mxu3 %v6100_v29  ;;  %v3703_v5 = vld [vmem:[%s6748_s0 + $0xa0] sm:$0xff]  ;;  %v6181_v18 = vld [vmem:[#allocation6 + $0x98] sm:$0xff] }
 0x397   :  { %v2239_v35 = vmul.f32 %v3904_v53, %v2238_v6  ;;  %v3704_v6 = vld [vmem:[%s6748_s0 + $0xa8] sm:$0xff]  ;;  %7497 = vst [vmem:[#allocation15_spill] sm:$0xff] %v6181_v18 }
 0x398   :  { %v3906_v9 = vpop.eup %3905  ;;  %v2221_v10 = vadd.f32 %v3902_v48, %v2220_v4  ;;  %2851 = vmatpush.msra.mxu3 %v6112_v39  ;;  %v6136_v4 = vld [vmem:[#allocation6 + $0xe8] sm:$0xff] }
 0x399   :  { %v2240_v12 = vadd.f32 %v3904_v53, %v2239_v35  ;;  %v2257_v56 = vmul.f32 %v3906_v9, %v2255_v28  ;;  %v3908_v55 = vpop.eup %3907  ;;  %vm2262_vm4 = vweird.f32 %v3906_v9  ;;  %v6106_v28 = vld [vmem:[#allocation6 + $0x128] sm:$0xff] }
 0x39a   :  { %v2225_v47 = vsel %vm2224_vm0, %v3902_v48, %v2221_v10  ;;  %vm2263_vm6 = vmor %vm2261_vm5, %vm2262_vm4  ;;  %v6108_v48 = vld [vmem:[#allocation6 + $0x130] sm:$0xff]  ;;  %2811 = vmatpush.msra.mxu1 %v6106_v28  ;;  %2852 = vmatpush.msra.mxu3 %v6130_v30 }
 0x39b   :  { %v2230_v58 = vsel %vm2227_vm2, %v2229_v11, %v2225_v47  ;;  %v2244_v44 = vsel %vm2243_vm1, %v3904_v53, %v2240_v12  ;;  %v2258_v57 = vsub.f32 1.0, %v2257_v56  ;;  %2831 = vmatpush.msra.mxu2 %v6108_v48  ;;  %v6116_v53 = vld [vmem:[#allocation6 + $0x100] sm:$0xff]  ;;  %v6148_v56 = vld [vmem:[#allocation6 + $0xc8] sm:$0xff]  ;;  %v6154_v47 = vld [vmem:[#allocation6 + $0xd8] sm:$0xff] }
 0x39c   :  { %v2249_v62 = vsel %vm2246_vm3, %v2248_v51, %v2244_v44  ;;  %v2272_v46 = vmul.f32 %v3908_v55, %v2230_v58  ;;  %2812 = vmatpush.msra.mxu1 %v6118_v59  ;;  %v6146_v12 = vld [vmem:[#allocation6 + $0xc0] sm:$0xff]  ;;  %7487 = vst [vmem:[#allocation14_spill] sm:$0xff] %v6148_v56  ;;  %v6150_v51 = vld [vmem:[#allocation6 + $0xd0] sm:$0xff] }
 0x39d   :  { %v2271_v0 = vmul.f32 %v2249_v62, %v5884_v8  ;;  %v2259_v13 = vmul.f32 %v3906_v9, %v2258_v57  ;;  %v6032_v8 = vld [vmem:[#allocation6 + $0x1e0] sm:$0xff]  ;;  %2832 = vmatpush.msra.mxu2 %v6120_v3  ;;  %7488 = vst [vmem:[#allocation16_spill] sm:$0xff] %v6150_v51  ;;  %v6160_v57 = vld [vmem:[#allocation6 + $0xa8] sm:$0xff]  ;;  %v3706_v62 = vld [vmem:[%s6748_s0 + $0xb8] sm:$0xff] }
 0x39e   :  { %2785 = vmatpush.msra.mxu0 %v6032_v8  ;;  %2813 = vmatpush.msra.mxu1 %v6136_v4  ;;  %7489 = vst [vmem:[#allocation12_spill] sm:$0xff] %v6154_v47  ;;  %v6158_v44 = vld [vmem:[#allocation6 + $0xa0] sm:$0xff] }
 0x39f   :  { %v6026_v22 = vadd.f32 %v2272_v46, %v2271_v0  ;;  %v2260_v21 = vadd.f32 %v3906_v9, %v2259_v13  ;;  %2833 = vmatpush.msra.mxu2 %v6138_v60  ;;  %7490 = vst [vmem:[#allocation17_spill] sm:$0xff] %v6158_v44  ;;  %v6167_v46 = vld [vmem:[#allocation6 + $0xb0] sm:$0xff]  ;;  %v6169_v0 = vld [vmem:[#allocation6 + $0xb8] sm:$0xff]  ;;  %v6173_v13 = vld [vmem:[#allocation6 + $0x80] sm:$0xff] }
 0x3a0   :  { %2786 = vmatpush.msra.mxu0 %v6044_v26  ;;  %2814 = vmatpush.msra.mxu1 %v6148_v56  ;;  %7491 = vst [vmem:[#allocation18_spill] sm:$0xff] %v6160_v57 }
 0x3a1   :  { %3909 = vtanh.f32 %v6026_v22  ;;  %v2264_v27 = vsel %vm2263_vm6, %v3906_v9, %v2260_v21  ;;  %v6142_v9 = vld [vmem:[#allocation6 + $0xf8] sm:$0xff]  ;;  %2834 = vmatpush.msra.mxu2 %v6150_v51  ;;  %7492 = vst [vmem:[#allocation19_spill] sm:$0xff] %v6167_v46  ;;  %v6175_v21 = vld [vmem:[#allocation6 + $0x88] sm:$0xff] }
 0x3a2   :  { %v2269_v42 = vsel %vm2266_vm7, %v2268_v24, %v2264_v27  ;;  %2787 = vmatpush.msra.mxu0 %v6056_v41  ;;  %2853 = vmatpush.msra.mxu3 %v6142_v9  ;;  %7493 = vst [vmem:[#allocation13_spill] sm:$0xff] %v6169_v0 }
 0x3a3   :  { %2815 = vmatpush.msra.mxu1 %v6160_v57  ;;  %2835 = vmatpush.msra.mxu2 %v6167_v46  ;;  %7494 = vst [vmem:[#allocation20_spill] sm:$0xff] %v6173_v13  ;;  %v6326_v57 = vld [vmem:[#allocation8 + $0x158] sm:$0xff] }
 0x3a4   :  { %2788 = vmatpush.msra.mxu0 %v6068_v34  ;;  %2854 = vmatpush.msra.mxu3 %v6154_v47  ;;  %7495 = vst [vmem:[#allocation21_spill] sm:$0xff] %v6175_v21  ;;  %v6338_v47 = vld [vmem:[#allocation8 + $0x130] sm:$0xff] }
 0x3a5   :  { %2816 = vmatpush.msra.mxu1 %v6175_v21  ;;  %2836 = vmatpush.msra.mxu2 %v6177_v16  ;;  %v6269_v16 = vld [vmem:[#allocation8 + $0x1b0] sm:$0xff] }
 0x3a6   :  { %2789 = vmatpush.msra.mxu0 %v6080_v45  ;;  %2855 = vmatpush.msra.mxu3 %v6169_v0  ;;  %7524 = vst [vmem:[#allocation47_spill] sm:$0xff] %v6269_v16 }
 0x3a7   :  { %v3910_v37 = vpop.eup %3909 }
 0x3a8   :  { %v2275_v17 = vmul.f32 %v3910_v37, %v2269_v42  ;;  %2790 = vmatpush.msra.mxu0 %v6092_v54  ;;  %2856 = vmatpush.msra.mxu3 %v6181_v18  ;;  %v6185_v37 = vld [vmem:[#allocation6 + $0x60] sm:$0xff]  ;;  %v6188_v42 = vld [vmem:[#allocation6 + $0x68] sm:$0xff] }
 0x3a9   :  { %7498 = vst [vmem:[#allocation23_spill] sm:$0xff] %v6185_v37  ;;  %2817 = vmatpush.msra.mxu1 %v6188_v42 }
 0x3aa   :  { %3702 = vst [vmem:[%s6753_s5 + $0x18] sm:$0xff] %v2275_v17  ;;  %2518 = vmatmul.f32.vlgmr.msrb.gmra.mxu0 %v2275_v17  ;;  %2538 = vmatmul.f32.vlgmr.msrb.gmra.mxu1 %v2275_v17 }
 0x3ab   :  { %2558 = vmatmul.f32.vlgmr.msrb.gmra.mxu2 %v2275_v17  ;;  %2578 = vmatmul.f32.vlgmr.msrb.gmra.mxu3 %v2275_v17  ;;  %7499 = vst [vmem:[#allocation24_spill] sm:$0xff] %v6188_v42  ;;  %v6190_v17 = vld [vmem:[#allocation6 + $0x70] sm:$0xff] }
 0x3ac   :  { %2791 = vmatpush.msra.mxu0 %v6104_v32  ;;  %7500 = vst [vmem:[#allocation25_spill] sm:$0xff] %v6190_v17  ;;  %2837 = vmatpush.msra.mxu2 %v6190_v17  ;;  %v6214_v17 = vld [vmem:[#allocation6 + $0x30] sm:$0xff] }
 0x3ad   :  { %7508 = vst [vmem:[#allocation33_spill] sm:$0xff] %v6214_v17 }
 0x3ae   :  { %2792 = vmatpush.msra.mxu0 %v6116_v53 }
 0x3b0   :  { %2793 = vmatpush.msra.mxu0 %v6134_v7 }
 0x3b2   :  { %2794 = vmatpush.msra.mxu0 %v6146_v12 }
 0x3b4   :  { %2795 = vmatpush.msra.mxu0 %v6158_v44  ;;  %v6336_v44 = vld [vmem:[#allocation8 + $0x128] sm:$0xff] }
 0x3b6   :  { %2796 = vmatpush.msra.mxu0 %v6173_v13 }
 0x3b8   :  { %2797 = vmatpush.msra.mxu0 %v6185_v37  ;;  %v6255_v37 = vld [vmem:[#allocation8 + $0x1d0] sm:$0xff] }
 0x3b9   :  { %7520 = vst [vmem:[#allocation44_spill] sm:$0xff] %v6255_v37 }
 0x406   :  { %v2366_v35 = vpop.f32.mrf.mxu0  ;;  %v2386_v19 = vpop.f32.mrf.mxu1 }
 0x407   :  { %v2429_v10 = vadd.f32 %v3703_v5, %v2366_v35  ;;  %v2430_v11 = vadd.f32 %v3704_v6, %v2386_v19  ;;  %v6192_v5 = vld [vmem:[#allocation6 + $0x78] sm:$0xff]  ;;  %v6196_v35 = vld [vmem:[#allocation6 + $0x40] sm:$0xff]  ;;  %v6198_v19 = vld [vmem:[#allocation6 + $0x48] sm:$0xff] }
 0x408   :  { %7501 = vst [vmem:[#allocation26_spill] sm:$0xff] %v6192_v5  ;;  %2857 = vmatpush.msra.mxu3 %v6192_v5  ;;  %2798 = vmatpush.msra.mxu0 %v6196_v35  ;;  %v6253_v5 = vld [vmem:[#allocation8 + $0x1c8] sm:$0xff] }
 0x409   :  { %v3711_v55 = vmul.f32 -1.442695, %v2429_v10  ;;  %v3712_v58 = vmul.f32 -1.442695, %v2430_v11  ;;  %7502 = vst [vmem:[#allocation27_spill] sm:$0xff] %v6196_v35  ;;  %v6200_v10 = vld [vmem:[#allocation6 + $0x50] sm:$0xff]  ;;  %2818 = vmatpush.msra.mxu1 %v6198_v19 }
 0x40a   :  { %7503 = vst [vmem:[#allocation28_spill] sm:$0xff] %v6198_v19  ;;  %2838 = vmatpush.msra.mxu2 %v6200_v10  ;;  %v6220_v35 = vld [vmem:[#allocation6 + $0x38] sm:$0xff] }
 0x40b   :  { %3911 = vpow2.f32 %v3711_v55  ;;  %7504 = vst [vmem:[#allocation29_spill] sm:$0xff] %v6200_v10  ;;  %v6204_v55 = vld [vmem:[#allocation6 + $0x58] sm:$0xff]  ;;  %v6229_v10 = vld [vmem:[#allocation6 + $0x10] sm:$0xff] }
 0x40c   :  { %3913 = vpow2.f32 %v3712_v58  ;;  %7505 = vst [vmem:[#allocation30_spill] sm:$0xff] %v6204_v55  ;;  %2858 = vmatpush.msra.mxu3 %v6204_v55  ;;  %2839 = vmatpush.msra.mxu2 %v6214_v17  ;;  %v6238_v55 = vld [vmem:[#allocation8 + $0x1e8] sm:$0xff]  ;;  %v3705_v17 = vld [vmem:[%s6748_s0 + $0xb0] sm:$0xff]  ;;  %v6247_v19 = vld [vmem:[#allocation8 + $0x1f8] sm:$0xff] }
 0x40d   :  { %v2426_v27 = vpop.f32.mrf.mxu3  ;;  %7509 = vst [vmem:[#allocation34_spill] sm:$0xff] %v6220_v35 }
 0x40e   :  { %v2432_v24 = vadd.f32 %v3706_v62, %v2426_v27  ;;  %v6210_v27 = vld [vmem:[#allocation6 + $0x20] sm:$0xff]  ;;  %7512 = vst [vmem:[#allocation37_spill] sm:$0xff] %v6229_v10  ;;  %2859 = vmatpush.msra.mxu3 %v6220_v35  ;;  %2840 = vmatpush.msra.mxu2 %v6229_v10  ;;  %v2406_v35 = vpop.f32.mrf.mxu2  ;;  %v6259_v10 = vld [vmem:[#allocation8 + $0x1d8] sm:$0xff] }
 0x40f   :  { %7506 = vst [vmem:[#allocation31_spill] sm:$0xff] %v6210_v27  ;;  %2799 = vmatpush.msra.mxu0 %v6210_v27  ;;  %v6236_v27 = vld [vmem:[#allocation8 + $0x1e0] sm:$0xff]  ;;  %v2431_v13 = vadd.f32 %v3705_v17, %v2406_v35  ;;  %v6286_v17 = vld [vmem:[#allocation8 + $0x188] sm:$0xff]  ;;  %v6288_v35 = vld [vmem:[#allocation8 + $0x190] sm:$0xff] }
 0x410   :  { %v3713_v6 = vmul.f32 -1.442695, %v2432_v24  ;;  %v6212_v24 = vld [vmem:[#allocation6 + $0x28] sm:$0xff]  ;;  %7514 = vst [vmem:[#allocation39_spill] sm:$0xff] %v6236_v27 }
 0x411   :  { %v3912_v11 = vpop.eup %3911  ;;  %7507 = vst [vmem:[#allocation32_spill] sm:$0xff] %v6212_v24  ;;  %2819 = vmatpush.msra.mxu1 %v6212_v24  ;;  %v6245_v24 = vld [vmem:[#allocation8 + $0x1f0] sm:$0xff] }
 0x412   :  { %v3914_v58 = vpop.eup %3913  ;;  %v6206_v62 = vadd.f32 1.0, %v3912_v11  ;;  %3915 = vpow2.f32 %v3713_v6  ;;  %v6225_v6 = vld [vmem:[#allocation6] sm:$0xff]  ;;  %v6227_v11 = vld [vmem:[#allocation6 + $0x8] sm:$0xff]  ;;  %7515 = vst [vmem:[#allocation40_spill] sm:$0xff] %v6238_v55  ;;  %2978 = vmatpush.msrb.mxu2 %v6245_v24 }
 0x413   :  { %v6216_v42 = vadd.f32 1.0, %v3914_v58  ;;  %7510 = vst [vmem:[#allocation35_spill] sm:$0xff] %v6225_v6  ;;  %2800 = vmatpush.msra.mxu0 %v6225_v6  ;;  %v6234_v58 = vld [vmem:[#allocation6 + $0x18] sm:$0xff]  ;;  %2820 = vmatpush.msra.mxu1 %v6227_v11  ;;  %v6251_v6 = vld [vmem:[#allocation8 + $0x1c0] sm:$0xff] }
 0x414   :  { %3917 = vrcp.f32 %v6206_v62  ;;  %7511 = vst [vmem:[#allocation36_spill] sm:$0xff] %v6227_v11  ;;  %2860 = vmatpush.msra.mxu3 %v6234_v58  ;;  %2979 = vmatpush.msrb.mxu2 %v6255_v37  ;;  %v2601_v46 = vand.u32 2147483648, %v6206_v62  ;;  %vm2595_vm10 = vweird.f32 %v6206_v62 }
 0x415   :  { %3919 = vrcp.f32 %v6216_v42  ;;  %7513 = vst [vmem:[#allocation38_spill] sm:$0xff] %v6234_v58  ;;  %2938 = vmatpush.msrb.mxu0 %v6236_v27  ;;  %2958 = vmatpush.msrb.mxu1 %v6238_v55  ;;  %v6265_v27 = vld [vmem:[#allocation8 + $0x1a0] sm:$0xff]  ;;  %v6267_v58 = vld [vmem:[#allocation8 + $0x1a8] sm:$0xff]  ;;  %vm2614_vm11 = vweird.f32 %v6216_v42 }
 0x416   :  { %7516 = vst [vmem:[#allocation41_spill] sm:$0xff] %v6245_v24  ;;  %2998 = vmatpush.msrb.mxu3 %v6247_v19  ;;  %v6275_v24 = vld [vmem:[#allocation8 + $0x1b8] sm:$0xff]  ;;  %2980 = vmatpush.msrb.mxu2 %v6269_v16  ;;  %v6305_v16 = vld [vmem:[#allocation8 + $0x170] sm:$0xff] }
 0x417   :  { %7517 = vst [vmem:[#allocation42_spill] sm:$0xff] %v6247_v19  ;;  %2939 = vmatpush.msrb.mxu0 %v6251_v6  ;;  %2959 = vmatpush.msrb.mxu1 %v6253_v5  ;;  %v6284_v19 = vld [vmem:[#allocation8 + $0x180] sm:$0xff] }
 0x418   :  { %7518 = vst [vmem:[#allocation43_spill] sm:$0xff] %v6251_v6  ;;  %v3916_v18 = vpop.eup %3915  ;;  %2999 = vmatpush.msrb.mxu3 %v6259_v10  ;;  %2981 = vmatpush.msrb.mxu2 %v6288_v35 }
 0x419   :  { %7519 = vst [vmem:[#allocation48_spill] sm:$0xff] %v6253_v5  ;;  %v6261_v11 = vadd.f32 1.0, %v3916_v18  ;;  %2940 = vmatpush.msrb.mxu0 %v6265_v27  ;;  %2960 = vmatpush.msrb.mxu1 %v6267_v58  ;;  %v6294_v5 = vld [vmem:[#allocation8 + $0x198] sm:$0xff] }
 0x41a   :  { %7521 = vst [vmem:[#allocation45_spill] sm:$0xff] %v6259_v10  ;;  %v6271_v21 = vpop.eup %3917  ;;  %3000 = vmatpush.msrb.mxu3 %v6275_v24  ;;  %v6300_v10 = vld [vmem:[#allocation8 + $0x168] sm:$0xff]  ;;  %2982 = vmatpush.msrb.mxu2 %v6305_v16 }
 0x41b   :  { %7522 = vst [vmem:[#allocation46_spill] sm:$0xff] %v6265_v27  ;;  %v6277_v18 = vpop.eup %3919  ;;  %v2591_v6 = vmul.f32 %v6271_v21, %v6206_v62  ;;  %3921 = vrcp.f32 %v6261_v11  ;;  %2941 = vmatpush.msrb.mxu0 %v6284_v19  ;;  %v6298_v27 = vld [vmem:[#allocation8 + $0x160] sm:$0xff]  ;;  %2961 = vmatpush.msrb.mxu1 %v6286_v17  ;;  %vm2596_vm8 = vweird.f32 %v6271_v21  ;;  %vm2634_vm1 = vweird.f32 %v6261_v11 }
 0x41c   :  { %7523 = vst [vmem:[#allocation52_spill] sm:$0xff] %v6267_v58  ;;  %v2610_v37 = vmul.f32 %v6277_v18, %v6216_v42  ;;  %3923 = vtanh.f32 %v2431_v13  ;;  %v6307_v58 = vld [vmem:[#allocation8 + $0x178] sm:$0xff]  ;;  %3001 = vmatpush.msrb.mxu3 %v6294_v5  ;;  %v6315_v13 = vld [vmem:[#allocation8 + $0x140] sm:$0xff]  ;;  %vm2615_vm9 = vweird.f32 %v6277_v18  ;;  %vm6343_vm12 = vmor %vm2595_vm10, %vm2596_vm8 }
 0x41d   :  { %7525 = vst [vmem:[#allocation49_spill] sm:$0xff] %v6275_v24  ;;  %v2592_v55 = vsub.f32 1.0, %v2591_v6  ;;  %v2620_v6 = vand.u32 2147483648, %v6216_v42  ;;  %v2599_v24 = vand.u32 2147483647, %v6206_v62  ;;  %2942 = vmatpush.msrb.mxu0 %v6298_v27  ;;  %2962 = vmatpush.msrb.mxu1 %v6300_v10  ;;  %vm6356_vm13 = vmor %vm2614_vm11, %vm2615_vm9 }
 0x41e   :  { %7526 = vst [vmem:[#allocation50_spill] sm:$0xff] %v6284_v19  ;;  %v2611_v0 = vsub.f32 1.0, %v2610_v37  ;;  %v6317_v37 = vld [vmem:[#allocation8 + $0x148] sm:$0xff]  ;;  %3002 = vmatpush.msrb.mxu3 %v6307_v58 }
 0x41f   :  { %7527 = vst [vmem:[#allocation56_spill] sm:$0xff] %v6286_v17  ;;  %v2593_v19 = vmul.f32 %v6271_v21, %v2592_v55  ;;  %v2618_v55 = vand.u32 2147483647, %v6216_v42  ;;  %2943 = vmatpush.msrb.mxu0 %v6315_v13  ;;  %2963 = vmatpush.msrb.mxu1 %v6317_v37  ;;  %vm2600_vm14 = vcmp.eq.f32.partialorder %v2599_v24, 8.507059e+37 }
 0x420   :  { %7528 = vst [vmem:[#allocation51_spill] sm:$0xff] %v6288_v35  ;;  %v6319_v35 = vld [vmem:[#allocation8 + $0x150] sm:$0xff]  ;;  %v2612_v17 = vmul.f32 %v6277_v18, %v2611_v0  ;;  %v6334_v0 = vld [vmem:[#allocation8 + $0x120] sm:$0xff]  ;;  %3003 = vmatpush.msrb.mxu3 %v6326_v57 }
 0x421   :  { %7529 = vst [vmem:[#allocation53_spill] sm:$0xff] %v6294_v5  ;;  %v6328_v5 = vpop.eup %3921  ;;  %2983 = vmatpush.msrb.mxu2 %v6319_v35  ;;  %2944 = vmatpush.msrb.mxu0 %v6334_v0  ;;  %vm2619_vm15 = vcmp.eq.f32.partialorder %v2618_v55, 8.507059e+37  ;;  %v6388_v55 = vld [vmem:[#allocation8 + $0xe8] sm:$0xff] }
 0x422   :  { %7530 = vst [vmem:[#allocation54_spill] sm:$0xff] %v6298_v27  ;;  %v2594_v27 = vadd.f32 %v6271_v21, %v2593_v19  ;;  %v2602_v19 = vor.u32 1.1754944e-38, %v2601_v46  ;;  %v2613_v62 = vadd.f32 %v6277_v18, %v2612_v17  ;;  %v6365_v17 = vld [vmem:[#allocation8 + $0x100] sm:$0xff]  ;;  %2964 = vmatpush.msrb.mxu1 %v6336_v44  ;;  %vm2635_vm0 = vweird.f32 %v6328_v5 }
 0x423   :  { %7531 = vst [vmem:[#allocation60_spill] sm:$0xff] %v6300_v10  ;;  %v2621_v10 = vor.u32 1.1754944e-38, %v2620_v6  ;;  %2984 = vmatpush.msrb.mxu2 %v6338_v47  ;;  %2945 = vmatpush.msrb.mxu0 %v6365_v17  ;;  %vm6440_vm2 = vmor %vm2634_vm1, %vm2635_vm0 }
 0x424   :  { %7532 = vst [vmem:[#allocation55_spill] sm:$0xff] %v6305_v16  ;;  %v2598_v46 = vsel %vm6343_vm12, %v6271_v21, %v2594_v27  ;;  %v2617_v56 = vsel %vm6356_vm13, %v6277_v18, %v2613_v62  ;;  %v3707_v21 = vld [vmem:[%s6749_s1 + $0x40] sm:$0xff]  ;;  %v6377_v16 = vld [vmem:[#allocation8 + $0x110] sm:$0xff]  ;;  %v6379_v27 = vld [vmem:[#allocation8 + $0x118] sm:$0xff] }
 0x425   :  { %7533 = vst [vmem:[#allocation57_spill] sm:$0xff] %v6307_v58  ;;  %v6352_v58 = vld [vmem:[#allocation8 + $0x138] sm:$0xff]  ;;  %v2603_v51 = vsel %vm2600_vm14, %v2602_v19, %v2598_v46  ;;  %v2622_v24 = vsel %vm2619_vm15, %v2621_v10, %v2617_v56  ;;  %v3708_v18 = vld [vmem:[%s6749_s1 + $0x48] sm:$0xff]  ;;  %2985 = vmatpush.msrb.mxu2 %v6377_v16  ;;  %v6394_v56 = vld [vmem:[#allocation8 + $0xf0] sm:$0xff] }
 0x426   :  { %7534 = vst [vmem:[#allocation58_spill] sm:$0xff] %v6315_v13  ;;  %v2630_v13 = vmul.f32 %v6328_v5, %v6261_v11  ;;  %3004 = vmatpush.msrb.mxu3 %v6352_v58  ;;  %v2644_v62 = vmul.f32 %v2622_v24, %v6013_v50  ;;  %v6400_v46 = vld [vmem:[#allocation8 + $0xc0] sm:$0xff] }
 0x427   :  { %7535 = vst [vmem:[#allocation64_spill] sm:$0xff] %v6317_v37  ;;  %v3924_v37 = vpop.eup %3923  ;;  %v2519_v10 = vpop.f32.mrf.mxu0  ;;  %2986 = vmatpush.msrb.mxu2 %v6394_v56 }
 0x428   :  { %7536 = vst [vmem:[#allocation59_spill] sm:$0xff] %v6319_v35  ;;  %v6367_v35 = vld [vmem:[#allocation8 + $0x108] sm:$0xff]  ;;  %v2631_v6 = vsub.f32 1.0, %v2630_v13  ;;  %v2645_v19 = vmul.f32 %v3924_v37, %v2603_v51  ;;  %v6386_v13 = vld [vmem:[#allocation8 + $0xe0] sm:$0xff]  ;;  %v6396_v51 = vld [vmem:[#allocation8 + $0xf8] sm:$0xff]  ;;  %v2539_v37 = vpop.f32.mrf.mxu1  ;;  %3005 = vmatpush.msrb.mxu3 %v6379_v27 }
 0x429   :  { %7541 = vst [vmem:[#allocation61_spill] sm:$0xff] %v6365_v17  ;;  %2965 = vmatpush.msrb.mxu1 %v6367_v35  ;;  %2946 = vmatpush.msrb.mxu0 %v6386_v13  ;;  %v6402_v17 = vld [vmem:[#allocation8 + $0xc8] sm:$0xff]  ;;  %v2583_v24 = vadd.f32 %v3708_v18, %v2539_v37  ;;  %v6425_v37 = vld [vmem:[#allocation8 + $0xb8] sm:$0xff] }
 0x42a   :  { %7542 = vst [vmem:[#allocation62_spill] sm:$0xff] %v6367_v35  ;;  %v2632_v42 = vmul.f32 %v6328_v5, %v2631_v6  ;;  %v6404_v50 = vadd.f32 %v2645_v19, %v2644_v62  ;;  %v2582_v6 = vadd.f32 %v3707_v21, %v2519_v10  ;;  %v6409_v35 = vld [vmem:[#allocation8 + $0xd8] sm:$0xff]  ;;  %3006 = vmatpush.msrb.mxu3 %v6396_v51  ;;  %v6416_v19 = vld [vmem:[#allocation8 + $0xa0] sm:$0xff]  ;;  %v6418_v21 = vld [vmem:[#allocation8 + $0xa8] sm:$0xff] }
 0x42b   :  { %7543 = vst [vmem:[#allocation68_spill] sm:$0xff] %v6377_v16  ;;  %2966 = vmatpush.msrb.mxu1 %v6388_v55  ;;  %v6407_v16 = vld [vmem:[#allocation8 + $0xd0] sm:$0xff]  ;;  %v3715_v62 = vmul.f32 -1.442695, %v2583_v24  ;;  %2947 = vmatpush.msrb.mxu0 %v6400_v46  ;;  %v6436_v24 = vld [vmem:[#allocation8 + $0x88] sm:$0xff] }
 0x42c   :  { %7544 = vst [vmem:[#allocation63_spill] sm:$0xff] %v6379_v27  ;;  %v2640_v27 = vand.u32 2147483648, %v6261_v11  ;;  %3925 = vtanh.f32 %v6404_v50  ;;  %v3714_v18 = vmul.f32 -1.442695, %v2582_v6  ;;  %v6423_v10 = vld [vmem:[#allocation8 + $0xb0] sm:$0xff]  ;;  %2987 = vmatpush.msrb.mxu2 %v6407_v16  ;;  %3007 = vmatpush.msrb.mxu3 %v6409_v35  ;;  %v6434_v6 = vld [vmem:[#allocation8 + $0x80] sm:$0xff] }
 0x42d   :  { %7545 = vst [vmem:[#allocation65_spill] sm:$0xff] %v6386_v13  ;;  %v2633_v13 = vadd.f32 %v6328_v5, %v2632_v42  ;;  %2967 = vmatpush.msrb.mxu1 %v6402_v17  ;;  %v3710_v42 = vld [vmem:[%s6749_s1 + $0x58] sm:$0xff]  ;;  %2948 = vmatpush.msrb.mxu0 %v6416_v19 }
 0x42e   :  { %7546 = vst [vmem:[#allocation66_spill] sm:$0xff] %v6396_v51  ;;  %v2638_v51 = vand.u32 2147483647, %v6261_v11  ;;  %3927 = vpow2.f32 %v3714_v18  ;;  %v6446_v11 = vld [vmem:[#allocation8 + $0x90] sm:$0xff]  ;;  %2988 = vmatpush.msrb.mxu2 %v6423_v10  ;;  %3008 = vmatpush.msrb.mxu3 %v6425_v37  ;;  %v6457_v18 = vld [vmem:[#allocation8 + $0x68] sm:$0xff] }
 0x42f   :  { %7547 = vst [vmem:[#allocation67_spill] sm:$0xff] %v6400_v46  ;;  %2968 = vmatpush.msrb.mxu1 %v6418_v21  ;;  %3929 = vpow2.f32 %v3715_v62  ;;  %v2579_v46 = vpop.f32.mrf.mxu3  ;;  %2949 = vmatpush.msrb.mxu0 %v6434_v6  ;;  %v6463_v62 = vld [vmem:[#allocation8 + $0x78] sm:$0xff] }
 0x430   :  { %7548 = vst [vmem:[#allocation69_spill] sm:$0xff] %v6402_v17  ;;  %v6455_v17 = vld [vmem:[#allocation8 + $0x60] sm:$0xff]  ;;  %vm2639_vm3 = vcmp.eq.f32.partialorder %v2638_v51, 8.507059e+37  ;;  %2989 = vmatpush.msrb.mxu2 %v6446_v11 }
 0x431   :  { %7549 = vst [vmem:[#allocation72_spill] sm:$0xff] %v6404_v50  ;;  %2969 = vmatpush.msrb.mxu1 %v6436_v24  ;;  %v2585_v50 = vadd.f32 %v3710_v42, %v2579_v46  ;;  %2950 = vmatpush.msrb.mxu0 %v6455_v17  ;;  %v6477_v46 = vld [vmem:[#allocation8 + $0x50] sm:$0xff]  ;;  %v6479_v42 = vld [vmem:[#allocation8 + $0x58] sm:$0xff] }
 0x432   :  { %7550 = vst [vmem:[#allocation73_spill] sm:$0xff] %v6407_v16  ;;  %v6448_v16 = vld [vmem:[#allocation8 + $0x98] sm:$0xff] }
 0x433   :  { %7551 = vst [vmem:[#allocation74_spill] sm:$0xff] %v6409_v35  ;;  %v2637_v35 = vsel %vm6440_vm2, %v6328_v5, %v2633_v13  ;;  %3009 = vmatpush.msrb.mxu3 %v6448_v16  ;;  %v6467_v5 = vld [vmem:[#allocation8 + $0x40] sm:$0xff]  ;;  %v6469_v13 = vld [vmem:[#allocation8 + $0x48] sm:$0xff]  ;;  %2970 = vmatpush.msrb.mxu1 %v6457_v18 }
 0x434   :  { %7552 = vst [vmem:[#allocation75_spill] sm:$0xff] %v6416_v19  ;;  %v2641_v19 = vor.u32 1.1754944e-38, %v2640_v27  ;;  %v3926_v27 = vpop.eup %3925  ;;  %2951 = vmatpush.msrb.mxu0 %v6467_v5 }
 0x435   :  { %7553 = vst [vmem:[#allocation76_spill] sm:$0xff] %v6418_v21  ;;  %v6461_v21 = vld [vmem:[#allocation8 + $0x70] sm:$0xff]  ;;  %3010 = vmatpush.msrb.mxu3 %v6463_v62  ;;  %v3928_v51 = vpop.eup %3927  ;;  %2971 = vmatpush.msrb.mxu1 %v6469_v13 }
 0x436   :  { %7554 = vst [vmem:[#allocation77_spill] sm:$0xff] %v6425_v37  ;;  %v2642_v37 = vsel %vm2639_vm3, %v2641_v19, %v2637_v35  ;;  %2990 = vmatpush.msrb.mxu2 %v6461_v21  ;;  %v3930_v35 = vpop.eup %3929  ;;  %v6481_v19 = vadd.f32 1.0, %v3928_v51  ;;  %v6501_v51 = vld [vmem:[#allocation8 + $0x8] sm:$0xff] }
 0x437   :  { %7555 = vst [vmem:[#allocation78_spill] sm:$0xff] %v6434_v6  ;;  %v2648_v6 = vmul.f32 %v3926_v27, %v2642_v37  ;;  %v6486_v37 = vld [vmem:[#allocation8 + $0x20] sm:$0xff]  ;;  %v6490_v27 = vadd.f32 1.0, %v3930_v35  ;;  %3011 = vmatpush.msrb.mxu3 %v6479_v42  ;;  %v6508_v35 = vld [vmem:[#allocation8 + $0x18] sm:$0xff] }
 0x438   :  { %7556 = vst [vmem:[#allocation79_spill] sm:$0xff] %v6436_v24  ;;  %v3716_v24 = vmul.f32 -1.442695, %v2585_v50  ;;  %v6488_v50 = vld [vmem:[#allocation8 + $0x28] sm:$0xff]  ;;  %2991 = vmatpush.msrb.mxu2 %v6477_v46  ;;  %2952 = vmatpush.msrb.mxu0 %v6486_v37  ;;  %vm2658_vm6 = vweird.f32 %v6481_v19 }
 0x439   :  { %7559 = vst [vmem:[#allocation80_spill] sm:$0xff] %v6467_v5  ;;  %2801 = vmatmul.f32.vlgmr.msra.gmra.mxu0 %v2648_v6  ;;  %2821 = vmatmul.f32.vlgmr.msra.gmra.mxu1 %v2648_v6  ;;  %v6494_v5 = vld [vmem:[#allocation8 + $0x38] sm:$0xff]  ;;  %vm2677_vm7 = vweird.f32 %v6490_v27 }
 0x43a   :  { %7560 = vst [vmem:[#allocation81_spill] sm:$0xff] %v6469_v13  ;;  %3931 = vpow2.f32 %v3716_v24  ;;  %2841 = vmatmul.f32.vlgmr.msra.gmra.mxu2 %v2648_v6  ;;  %2861 = vmatmul.f32.vlgmr.msra.gmra.mxu3 %v2648_v6  ;;  %v6492_v13 = vld [vmem:[#allocation8 + $0x30] sm:$0xff]  ;;  %v6499_v24 = vld [vmem:[#allocation8] sm:$0xff] }
 0x43b   :  { %7561 = vst [vmem:[#allocation82_spill] sm:$0xff] %v6477_v46  ;;  %3933 = vrcp.f32 %v6481_v19  ;;  %2972 = vmatpush.msrb.mxu1 %v6488_v50  ;;  %2992 = vmatpush.msrb.mxu2 %v6492_v13  ;;  %v2559_v46 = vpop.f32.mrf.mxu2 }
 0x43c   :  { %7562 = vst [vmem:[#allocation83_spill] sm:$0xff] %v6479_v42  ;;  %3935 = vrcp.f32 %v6490_v27  ;;  %3012 = vmatpush.msrb.mxu3 %v6494_v5  ;;  %v3709_v42 = vld [vmem:[%s6749_s1 + $0x50] sm:$0xff]  ;;  %2953 = vmatpush.msrb.mxu0 %v6499_v24 }
 0x43d   :  { %3717 = vst [vmem:[%s6752_s4 + $0x28] sm:$0xff] %v2648_v6  ;;  %v6506_v6 = vld [vmem:[#allocation8 + $0x10] sm:$0xff]  ;;  %2973 = vmatpush.msrb.mxu1 %v6501_v51 }
 0x43e   :  { %7563 = vst [vmem:[#allocation84_spill] sm:$0xff] %v6486_v37  ;;  %2993 = vmatpush.msrb.mxu2 %v6506_v6  ;;  %3013 = vmatpush.msrb.mxu3 %v6508_v35 }
 0x43f   :  { %7564 = vst [vmem:[#allocation85_spill] sm:$0xff] %v6488_v50  ;;  %3221 = vmatpush.msra.mxu0 %v6032_v8  ;;  %3241 = vmatpush.msra.mxu1 %v6034_v14 }
 0x440   :  { %7565 = vst [vmem:[#allocation86_spill] sm:$0xff] %v6492_v13  ;;  %v3932_v37 = vpop.eup %3931  ;;  %v2584_v13 = vadd.f32 %v3709_v42, %v2559_v46  ;;  %3261 = vmatpush.msra.mxu2 %v6036_v1  ;;  %3281 = vmatpush.msra.mxu3 %v6040_v40  ;;  %v2664_v1 = vand.u32 2147483648, %v6481_v19  ;;  %v2683_v40 = vand.u32 2147483648, %v6490_v27  ;;  %v7578_v46 = vld [vmem:[#allocation22_spill] sm:$0xff]  ;;  %v7579_v42 = vld [vmem:[#allocation15_spill] sm:$0xff] }
 0x441   :  { %7566 = vst [vmem:[#allocation87_spill] sm:$0xff] %v6494_v5  ;;  %v6519_v50 = vadd.f32 1.0, %v3932_v37  ;;  %v3934_v5 = vpop.eup %3933  ;;  %3222 = vmatpush.msra.mxu0 %v6044_v26  ;;  %3242 = vmatpush.msra.mxu1 %v6046_v15  ;;  %v2662_v15 = vand.u32 2147483647, %v6481_v19 }
 0x442   :  { %7567 = vst [vmem:[#allocation70_spill] sm:$0xff] %v6499_v24  ;;  %v3936_v24 = vpop.eup %3935  ;;  %3262 = vmatpush.msra.mxu2 %v6048_v2  ;;  %3282 = vmatpush.msra.mxu3 %v6052_v33  ;;  %vm2659_vm4 = vweird.f32 %v3934_v5  ;;  %v2681_v33 = vand.u32 2147483647, %v6490_v27 }
 0x443   :  { %7568 = vst [vmem:[#allocation71_spill] sm:$0xff] %v6501_v51  ;;  %v2654_v51 = vmul.f32 %v3934_v5, %v6481_v19  ;;  %3937 = vrcp.f32 %v6519_v50  ;;  %v2673_v37 = vmul.f32 %v3936_v24, %v6490_v27  ;;  %3223 = vmatpush.msra.mxu0 %v6056_v41  ;;  %3243 = vmatpush.msra.mxu1 %v6058_v20  ;;  %vm2678_vm5 = vweird.f32 %v3936_v24  ;;  %vm2660_vm8 = vmor %vm2658_vm6, %vm2659_vm4  ;;  %v7581_v27 = vld [vmem:[#allocation24_spill] sm:$0xff] }
 0x444   :  { %3939 = vtanh.f32 %v2584_v13  ;;  %3263 = vmatpush.msra.mxu2 %v6060_v36  ;;  %3283 = vmatpush.msra.mxu3 %v6064_v23  ;;  %v2665_v36 = vor.u32 1.1754944e-38, %v2664_v1  ;;  %vm2679_vm9 = vmor %vm2677_vm7, %vm2678_vm5  ;;  %vm2663_vm10 = vcmp.eq.f32.partialorder %v2662_v15, 8.507059e+37  ;;  %vm2682_vm11 = vcmp.eq.f32.partialorder %v2681_v33, 8.507059e+37  ;;  %v7587_v1 = vld [vmem:[#allocation30_spill] sm:$0xff]  ;;  %v7590_v15 = vld [vmem:[#allocation33_spill] sm:$0xff] }
 0x445   :  { %v2655_v8 = vsub.f32 1.0, %v2654_v51  ;;  %v2674_v14 = vsub.f32 1.0, %v2673_v37  ;;  %3224 = vmatpush.msra.mxu0 %v6068_v34  ;;  %3244 = vmatpush.msra.mxu1 %v6070_v63  ;;  %v2684_v63 = vor.u32 1.1754944e-38, %v2683_v40  ;;  %vm2697_vm13 = vweird.f32 %v6519_v50  ;;  %v7583_v51 = vld [vmem:[#allocation26_spill] sm:$0xff]  ;;  %v7584_v37 = vld [vmem:[#allocation27_spill] sm:$0xff] }
 0x446   :  { %3264 = vmatpush.msra.mxu2 %v6072_v31  ;;  %3284 = vmatpush.msra.mxu3 %v6076_v38  ;;  %v7588_v40 = vld [vmem:[#allocation31_spill] sm:$0xff] }
 0x447   :  { %v2656_v26 = vmul.f32 %v3934_v5, %v2655_v8  ;;  %v2675_v2 = vmul.f32 %v3936_v24, %v2674_v14  ;;  %3225 = vmatpush.msra.mxu0 %v6080_v45  ;;  %3245 = vmatpush.msra.mxu1 %v6082_v49  ;;  %v7585_v8 = vld [vmem:[#allocation28_spill] sm:$0xff]  ;;  %v7586_v14 = vld [vmem:[#allocation29_spill] sm:$0xff]  ;;  %v7592_v33 = vld [vmem:[#allocation35_spill] sm:$0xff] }
 0x448   :  { %3265 = vmatpush.msra.mxu2 %v6084_v52  ;;  %3285 = vmatpush.msra.mxu3 %v6088_v61 }
 0x449   :  { %v6544_v41 = vpop.eup %3937  ;;  %v2657_v20 = vadd.f32 %v3934_v5, %v2656_v26  ;;  %v2676_v23 = vadd.f32 %v3936_v24, %v2675_v2  ;;  %3226 = vmatpush.msra.mxu0 %v6092_v54  ;;  %3246 = vmatpush.msra.mxu1 %v6094_v43  ;;  %v7589_v26 = vld [vmem:[#allocation32_spill] sm:$0xff]  ;;  %v7591_v2 = vld [vmem:[#allocation34_spill] sm:$0xff] }
 0x44a   :  { %v2693_v34 = vmul.f32 %v6544_v41, %v6519_v50  ;;  %v3940_v38 = vpop.eup %3939  ;;  %3266 = vmatpush.msra.mxu2 %v6096_v25  ;;  %3286 = vmatpush.msra.mxu3 %v6100_v29  ;;  %vm2698_vm12 = vweird.f32 %v6544_v41  ;;  %v2703_v25 = vand.u32 2147483648, %v6519_v50  ;;  %v2701_v29 = vand.u32 2147483647, %v6519_v50  ;;  %v7580_v50 = vld [vmem:[#allocation23_spill] sm:$0xff] }
 0x44b   :  { %v2661_v31 = vsel %vm2660_vm8, %v3934_v5, %v2657_v20  ;;  %v2680_v49 = vsel %vm2679_vm9, %v3936_v24, %v2676_v23  ;;  %3227 = vmatpush.msra.mxu0 %v6104_v32  ;;  %3247 = vmatpush.msra.mxu1 %v6106_v28  ;;  %v7569_v32 = vld [vmem:[#allocation14_spill] sm:$0xff]  ;;  %vm2699_vm14 = vmor %vm2697_vm13, %vm2698_vm12  ;;  %v7570_v28 = vld [vmem:[#allocation16_spill] sm:$0xff] }
 0x44c   :  { %v2666_v45 = vsel %vm2663_vm10, %v2665_v36, %v2661_v31  ;;  %v2694_v13 = vsub.f32 1.0, %v2693_v34  ;;  %v2685_v52 = vsel %vm2682_vm11, %v2684_v63, %v2680_v49  ;;  %3267 = vmatpush.msra.mxu2 %v6108_v48  ;;  %3287 = vmatpush.msra.mxu3 %v6112_v39  ;;  %v7571_v48 = vld [vmem:[#allocation12_spill] sm:$0xff]  ;;  %vm2702_vm15 = vcmp.eq.f32.partialorder %v2701_v29, 8.507059e+37  ;;  %v7582_v24 = vld [vmem:[#allocation25_spill] sm:$0xff]  ;;  %v7595_v36 = vld [vmem:[#allocation38_spill] sm:$0xff] }
 0x44d   :  { %v2708_v61 = vmul.f32 %v3940_v38, %v2666_v45  ;;  %v2707_v5 = vmul.f32 %v2685_v52, %v6026_v22  ;;  %3228 = vmatpush.msra.mxu0 %v6116_v53  ;;  %3248 = vmatpush.msra.mxu1 %v6118_v59  ;;  %v7572_v53 = vld [vmem:[#allocation17_spill] sm:$0xff]  ;;  %v7573_v59 = vld [vmem:[#allocation18_spill] sm:$0xff]  ;;  %v7596_v23 = vld [vmem:[#allocation39_spill] sm:$0xff] }
 0x44e   :  { %v2695_v54 = vmul.f32 %v6544_v41, %v2694_v13  ;;  %3268 = vmatpush.msra.mxu2 %v6120_v3  ;;  %3288 = vmatpush.msra.mxu3 %v6130_v30  ;;  %v2704_v3 = vor.u32 1.1754944e-38, %v2703_v25  ;;  %v7574_v30 = vld [vmem:[#allocation19_spill] sm:$0xff]  ;;  %v7594_v20 = vld [vmem:[#allocation37_spill] sm:$0xff]  ;;  %v7597_v34 = vld [vmem:[#allocation40_spill] sm:$0xff] }
 0x44f   :  { %v6568_v43 = vadd.f32 %v2708_v61, %v2707_v5  ;;  %3229 = vmatpush.msra.mxu0 %v6134_v7  ;;  %3249 = vmatpush.msra.mxu1 %v6136_v4  ;;  %v7575_v7 = vld [vmem:[#allocation13_spill] sm:$0xff]  ;;  %v7576_v4 = vld [vmem:[#allocation20_spill] sm:$0xff]  ;;  %v7599_v31 = vld [vmem:[#allocation42_spill] sm:$0xff] }
 0x450   :  { %v2696_v22 = vadd.f32 %v6544_v41, %v2695_v54  ;;  %3269 = vmatpush.msra.mxu2 %v6138_v60  ;;  %3289 = vmatpush.msra.mxu3 %v6142_v9  ;;  %v7577_v60 = vld [vmem:[#allocation21_spill] sm:$0xff]  ;;  %v7600_v38 = vld [vmem:[#allocation43_spill] sm:$0xff]  ;;  %v7601_v45 = vld [vmem:[#allocation48_spill] sm:$0xff] }
 0x451   :  { %3941 = vtanh.f32 %v6568_v43  ;;  %3230 = vmatpush.msra.mxu0 %v6146_v12  ;;  %3250 = vmatpush.msra.mxu1 %v7569_v32  ;;  %v7598_v63 = vld [vmem:[#allocation41_spill] sm:$0xff]  ;;  %v7602_v49 = vld [vmem:[#allocation44_spill] sm:$0xff]  ;;  %v7604_v52 = vld [vmem:[#allocation46_spill] sm:$0xff] }
 0x452   :  { %3270 = vmatpush.msra.mxu2 %v7570_v28  ;;  %3290 = vmatpush.msra.mxu3 %v7571_v48  ;;  %v2700_v39 = vsel %vm2699_vm14, %v6544_v41, %v2696_v22  ;;  %v7593_v41 = vld [vmem:[#allocation36_spill] sm:$0xff]  ;;  %v7603_v13 = vld [vmem:[#allocation45_spill] sm:$0xff]  ;;  %v7606_v5 = vld [vmem:[#allocation47_spill] sm:$0xff] }
 0x453   :  { %3231 = vmatpush.msra.mxu0 %v7572_v53  ;;  %3251 = vmatpush.msra.mxu1 %v7573_v59  ;;  %v2705_v12 = vsel %vm2702_vm15, %v2704_v3, %v2700_v39  ;;  %v7605_v61 = vld [vmem:[#allocation52_spill] sm:$0xff]  ;;  %v7607_v54 = vld [vmem:[#allocation49_spill] sm:$0xff]  ;;  %v7608_v22 = vld [vmem:[#allocation50_spill] sm:$0xff] }
 0x454   :  { %3271 = vmatpush.msra.mxu2 %v7574_v30  ;;  %3291 = vmatpush.msra.mxu3 %v7575_v7  ;;  %v7609_v25 = vld [vmem:[#allocation56_spill] sm:$0xff]  ;;  %v7610_v29 = vld [vmem:[#allocation51_spill] sm:$0xff]  ;;  %v7611_v32 = vld [vmem:[#allocation53_spill] sm:$0xff] }
 0x455   :  { %3232 = vmatpush.msra.mxu0 %v7576_v4  ;;  %3252 = vmatpush.msra.mxu1 %v7577_v60  ;;  %v7612_v28 = vld [vmem:[#allocation54_spill] sm:$0xff]  ;;  %v7613_v48 = vld [vmem:[#allocation60_spill] sm:$0xff]  ;;  %v7614_v39 = vld [vmem:[#allocation55_spill] sm:$0xff] }
 0x456   :  { %3272 = vmatpush.msra.mxu2 %v7578_v46  ;;  %3292 = vmatpush.msra.mxu3 %v7579_v42  ;;  %v7615_v53 = vld [vmem:[#allocation57_spill] sm:$0xff]  ;;  %v7616_v59 = vld [vmem:[#allocation58_spill] sm:$0xff]  ;;  %v7617_v3 = vld [vmem:[#allocation64_spill] sm:$0xff] }
 0x457   :  { %v3942_v9 = vpop.eup %3941  ;;  %3233 = vmatpush.msra.mxu0 %v7580_v50  ;;  %3253 = vmatpush.msra.mxu1 %v7581_v27  ;;  %v7618_v30 = vld [vmem:[#allocation59_spill] sm:$0xff]  ;;  %v7619_v7 = vld [vmem:[#allocation61_spill] sm:$0xff]  ;;  %v7620_v4 = vld [vmem:[#allocation62_spill] sm:$0xff] }
 0x458   :  { %v2711_v19 = vmul.f32 %v3942_v9, %v2705_v12  ;;  %3273 = vmatpush.msra.mxu2 %v7582_v24  ;;  %3293 = vmatpush.msra.mxu3 %v7583_v51  ;;  %v7621_v60 = vld [vmem:[#allocation68_spill] sm:$0xff]  ;;  %v7622_v9 = vld [vmem:[#allocation63_spill] sm:$0xff]  ;;  %v7623_v12 = vld [vmem:[#allocation65_spill] sm:$0xff] }
 0x459   :  { %3234 = vmatpush.msra.mxu0 %v7584_v37  ;;  %3254 = vmatpush.msra.mxu1 %v7585_v8  ;;  %v7629_v46 = vld [vmem:[#allocation75_spill] sm:$0xff]  ;;  %v7630_v42 = vld [vmem:[#allocation76_spill] sm:$0xff]  ;;  %v7636_v27 = vld [vmem:[#allocation82_spill] sm:$0xff] }
 0x45a   :  { %3718 = vst [vmem:[%s6753_s5 + $0x10] sm:$0xff] %v2711_v19  ;;  %2954 = vmatmul.f32.vlgmr.msrb.gmra.mxu0 %v2711_v19  ;;  %2974 = vmatmul.f32.vlgmr.msrb.gmra.mxu1 %v2711_v19  ;;  %v7634_v50 = vld [vmem:[#allocation80_spill] sm:$0xff]  ;;  %v7637_v24 = vld [vmem:[#allocation83_spill] sm:$0xff]  ;;  %v3720_v37 = vld [vmem:[%s6748_s0 + $0xc8] sm:$0xff] }
 0x45b   :  { %2994 = vmatmul.f32.vlgmr.msrb.gmra.mxu2 %v2711_v19  ;;  %3014 = vmatmul.f32.vlgmr.msrb.gmra.mxu3 %v2711_v19  ;;  %v7631_v19 = vld [vmem:[#allocation77_spill] sm:$0xff]  ;;  %v7638_v51 = vld [vmem:[#allocation84_spill] sm:$0xff] }
 0x45c   :  { %3274 = vmatpush.msra.mxu2 %v7586_v14  ;;  %3294 = vmatpush.msra.mxu3 %v7587_v1 }
 0x45d   :  { %3235 = vmatpush.msra.mxu0 %v7588_v40  ;;  %3255 = vmatpush.msra.mxu1 %v7589_v26 }
 0x45e   :  { %3275 = vmatpush.msra.mxu2 %v7590_v15  ;;  %3295 = vmatpush.msra.mxu3 %v7591_v2 }
 0x45f   :  { %3236 = vmatpush.msra.mxu0 %v7592_v33  ;;  %3256 = vmatpush.msra.mxu1 %v7593_v41 }
 0x460   :  { %3276 = vmatpush.msra.mxu2 %v7594_v20  ;;  %3296 = vmatpush.msra.mxu3 %v7595_v36 }
 0x461   :  { %3373 = vmatpush.msrb.mxu0 %v7596_v23  ;;  %3393 = vmatpush.msrb.mxu1 %v7597_v34  ;;  %v3721_v34 = vld [vmem:[%s6748_s0 + $0xd0] sm:$0xff] }
 0x462   :  { %3413 = vmatpush.msrb.mxu2 %v7598_v63  ;;  %3433 = vmatpush.msrb.mxu3 %v7599_v31 }
 0x463   :  { %3374 = vmatpush.msrb.mxu0 %v7600_v38  ;;  %3394 = vmatpush.msrb.mxu1 %v7601_v45 }
 0x464   :  { %3414 = vmatpush.msrb.mxu2 %v7602_v49  ;;  %3434 = vmatpush.msrb.mxu3 %v7603_v13 }
 0x465   :  { %3375 = vmatpush.msrb.mxu0 %v7604_v52  ;;  %3395 = vmatpush.msrb.mxu1 %v7605_v61 }
 0x466   :  { %3415 = vmatpush.msrb.mxu2 %v7606_v5  ;;  %3435 = vmatpush.msrb.mxu3 %v7607_v54 }
 0x467   :  { %3376 = vmatpush.msrb.mxu0 %v7608_v22  ;;  %3396 = vmatpush.msrb.mxu1 %v7609_v25 }
 0x468   :  { %3416 = vmatpush.msrb.mxu2 %v7610_v29  ;;  %3436 = vmatpush.msrb.mxu3 %v7611_v32 }
 0x469   :  { %3377 = vmatpush.msrb.mxu0 %v7612_v28  ;;  %3397 = vmatpush.msrb.mxu1 %v7613_v48 }
 0x46a   :  { %3417 = vmatpush.msrb.mxu2 %v7614_v39  ;;  %3437 = vmatpush.msrb.mxu3 %v7615_v53 }
 0x46b   :  { %3378 = vmatpush.msrb.mxu0 %v7616_v59  ;;  %3398 = vmatpush.msrb.mxu1 %v7617_v3 }
 0x46c   :  { %3418 = vmatpush.msrb.mxu2 %v7618_v30  ;;  %3438 = vmatpush.msrb.mxu3 %v6326_v57  ;;  %v7624_v57 = vld [vmem:[#allocation66_spill] sm:$0xff] }
 0x46d   :  { %3379 = vmatpush.msrb.mxu0 %v6334_v0  ;;  %3399 = vmatpush.msrb.mxu1 %v6336_v44  ;;  %v7625_v44 = vld [vmem:[#allocation67_spill] sm:$0xff]  ;;  %v7628_v0 = vld [vmem:[#allocation74_spill] sm:$0xff] }
 0x46e   :  { %3419 = vmatpush.msrb.mxu2 %v6338_v47  ;;  %3439 = vmatpush.msrb.mxu3 %v6352_v58  ;;  %v7626_v47 = vld [vmem:[#allocation69_spill] sm:$0xff] }
 0x46f   :  { %3380 = vmatpush.msrb.mxu0 %v7619_v7  ;;  %3400 = vmatpush.msrb.mxu1 %v7620_v4  ;;  %v7627_v58 = vld [vmem:[#allocation73_spill] sm:$0xff] }
 0x470   :  { %3420 = vmatpush.msrb.mxu2 %v7621_v60  ;;  %3440 = vmatpush.msrb.mxu3 %v7622_v9 }
 0x471   :  { %3381 = vmatpush.msrb.mxu0 %v7623_v12  ;;  %3401 = vmatpush.msrb.mxu1 %v6388_v55  ;;  %v7632_v55 = vld [vmem:[#allocation78_spill] sm:$0xff] }
 0x472   :  { %3421 = vmatpush.msrb.mxu2 %v6394_v56  ;;  %3441 = vmatpush.msrb.mxu3 %v7624_v57  ;;  %v7633_v56 = vld [vmem:[#allocation79_spill] sm:$0xff] }
 0x473   :  { %3382 = vmatpush.msrb.mxu0 %v7625_v44  ;;  %3402 = vmatpush.msrb.mxu1 %v7626_v47 }
 0x474   :  { %3422 = vmatpush.msrb.mxu2 %v7627_v58  ;;  %3442 = vmatpush.msrb.mxu3 %v7628_v0  ;;  %v3723_v58 = vld [vmem:[%s6749_s1 + $0x20] sm:$0xff]  ;;  %v3724_v0 = vld [vmem:[%s6749_s1 + $0x28] sm:$0xff] }
 0x475   :  { %3383 = vmatpush.msrb.mxu0 %v7629_v46  ;;  %3403 = vmatpush.msrb.mxu1 %v7630_v42  ;;  %v7644_v46 = vld [vmem:[#allocation72_spill] sm:$0xff] }
 0x476   :  { %3423 = vmatpush.msrb.mxu2 %v6423_v10  ;;  %3443 = vmatpush.msrb.mxu3 %v7631_v19  ;;  %v7635_v10 = vld [vmem:[#allocation81_spill] sm:$0xff] }
 0x477   :  { %3384 = vmatpush.msrb.mxu0 %v7632_v55  ;;  %3404 = vmatpush.msrb.mxu1 %v7633_v56 }
 0x478   :  { %3424 = vmatpush.msrb.mxu2 %v6446_v11  ;;  %3444 = vmatpush.msrb.mxu3 %v6448_v16  ;;  %v7639_v11 = vld [vmem:[#allocation85_spill] sm:$0xff]  ;;  %v7640_v16 = vld [vmem:[#allocation86_spill] sm:$0xff] }
 0x479   :  { %3385 = vmatpush.msrb.mxu0 %v6455_v17  ;;  %3405 = vmatpush.msrb.mxu1 %v6457_v18  ;;  %v7641_v17 = vld [vmem:[#allocation87_spill] sm:$0xff]  ;;  %v7642_v18 = vld [vmem:[#allocation70_spill] sm:$0xff] }
 0x47a   :  { %3425 = vmatpush.msrb.mxu2 %v6461_v21  ;;  %3445 = vmatpush.msrb.mxu3 %v6463_v62  ;;  %v7643_v21 = vld [vmem:[#allocation71_spill] sm:$0xff]  ;;  %v3719_v62 = vld [vmem:[%s6748_s0 + $0xc0] sm:$0xff] }
 0x47b   :  { %3386 = vmatpush.msrb.mxu0 %v7634_v50  ;;  %3406 = vmatpush.msrb.mxu1 %v7635_v10 }
 0x47c   :  { %3426 = vmatpush.msrb.mxu2 %v7636_v27  ;;  %3446 = vmatpush.msrb.mxu3 %v7637_v24 }
 0x47d   :  { %3387 = vmatpush.msrb.mxu0 %v7638_v51  ;;  %3407 = vmatpush.msrb.mxu1 %v7639_v11 }
 0x47e   :  { %3427 = vmatpush.msrb.mxu2 %v7640_v16  ;;  %3447 = vmatpush.msrb.mxu3 %v7641_v17 }
 0x47f   :  { %3388 = vmatpush.msrb.mxu0 %v7642_v18  ;;  %3408 = vmatpush.msrb.mxu1 %v7643_v21  ;;  %v3726_v18 = vld [vmem:[%s6749_s1 + $0x38] sm:$0xff] }
 0x480   :  { %3428 = vmatpush.msrb.mxu2 %v6506_v6  ;;  %3448 = vmatpush.msrb.mxu3 %v6508_v35  ;;  %v3722_v6 = vld [vmem:[%s6748_s0 + $0xd8] sm:$0xff] }
 0x4b6   :  { %v2802_v8 = vpop.f32.mrf.mxu0  ;;  %v2822_v14 = vpop.f32.mrf.mxu1 }
 0x4b7   :  { %v2865_v1 = vadd.f32 %v3719_v62, %v2802_v8  ;;  %v2866_v40 = vadd.f32 %v3720_v37, %v2822_v14 }
 0x4b9   :  { %v3727_v26 = vmul.f32 -1.442695, %v2865_v1  ;;  %v3728_v15 = vmul.f32 -1.442695, %v2866_v40 }
 0x4bb   :  { %3943 = vpow2.f32 %v3727_v26 }
 0x4bc   :  { %3945 = vpow2.f32 %v3728_v15 }
 0x4bd   :  { %v2862_v35 = vpop.f32.mrf.mxu3  ;;  %v2842_v63 = vpop.f32.mrf.mxu2 }
 0x4be   :  { %v2868_v2 = vadd.f32 %v3722_v6, %v2862_v35  ;;  %v2867_v49 = vadd.f32 %v3721_v34, %v2842_v63 }
 0x4c0   :  { %v3729_v33 = vmul.f32 -1.442695, %v2868_v2 }
 0x4c1   :  { %v3944_v41 = vpop.eup %3943 }
 0x4c2   :  { %v3946_v20 = vpop.eup %3945  ;;  %v3025_v36 = vadd.f32 1.0, %v3944_v41  ;;  %3947 = vpow2.f32 %v3729_v33  ;;  %v3725_v33 = vld [vmem:[%s6749_s1 + $0x30] sm:$0xff] }
 0x4c3   :  { %v3044_v23 = vadd.f32 1.0, %v3946_v20 }
 0x4c4   :  { %3949 = vrcp.f32 %v3025_v36  ;;  %v3037_v22 = vand.u32 2147483648, %v3025_v36  ;;  %v3035_v32 = vand.u32 2147483647, %v3025_v36  ;;  %vm3031_vm2 = vweird.f32 %v3025_v36 }
 0x4c5   :  { %3951 = vrcp.f32 %v3044_v23  ;;  %v3056_v25 = vand.u32 2147483648, %v3044_v23  ;;  %v3054_v48 = vand.u32 2147483647, %v3044_v23  ;;  %vm3050_vm3 = vweird.f32 %v3044_v23 }
 0x4c6   :  { %v3038_v59 = vor.u32 1.1754944e-38, %v3037_v22  ;;  %vm3036_vm6 = vcmp.eq.f32.partialorder %v3035_v32, 8.507059e+37 }
 0x4c7   :  { %v3057_v7 = vor.u32 1.1754944e-38, %v3056_v25  ;;  %vm3055_vm7 = vcmp.eq.f32.partialorder %v3054_v48, 8.507059e+37 }
 0x4c8   :  { %v3948_v31 = vpop.eup %3947 }
 0x4c9   :  { %v3064_v38 = vadd.f32 1.0, %v3948_v31 }
 0x4ca   :  { %v3950_v45 = vpop.eup %3949 }
 0x4cb   :  { %v3952_v13 = vpop.eup %3951  ;;  %v3027_v52 = vmul.f32 %v3950_v45, %v3025_v36  ;;  %3953 = vrcp.f32 %v3064_v38  ;;  %vm3032_vm0 = vweird.f32 %v3950_v45  ;;  %v3076_v51 = vand.u32 2147483648, %v3064_v38 }
 0x4cc   :  { %v3046_v61 = vmul.f32 %v3952_v13, %v3044_v23  ;;  %3955 = vtanh.f32 %v2867_v49  ;;  %vm3051_vm1 = vweird.f32 %v3952_v13  ;;  %vm3033_vm4 = vmor %vm3031_vm2, %vm3032_vm0  ;;  %vm3070_vm9 = vweird.f32 %v3064_v38 }
 0x4cd   :  { %v3028_v5 = vsub.f32 1.0, %v3027_v52  ;;  %vm3052_vm5 = vmor %vm3050_vm3, %vm3051_vm1  ;;  %v3074_v17 = vand.u32 2147483647, %v3064_v38  ;;  %v3077_v62 = vor.u32 1.1754944e-38, %v3076_v51 }
 0x4ce   :  { %v3047_v54 = vsub.f32 1.0, %v3046_v61 }
 0x4cf   :  { %v3029_v29 = vmul.f32 %v3950_v45, %v3028_v5  ;;  %vm3075_vm11 = vcmp.eq.f32.partialorder %v3074_v17, 8.507059e+37  ;;  %v3738_v17 = vld [vmem:[%s6748_s0 + $0xf8] sm:$0xff] }
 0x4d0   :  { %v3048_v28 = vmul.f32 %v3952_v13, %v3047_v54 }
 0x4d1   :  { %v3954_v39 = vpop.eup %3953  ;;  %v3030_v53 = vadd.f32 %v3950_v45, %v3029_v29 }
 0x4d2   :  { %v3049_v3 = vadd.f32 %v3952_v13, %v3048_v28  ;;  %v3066_v30 = vmul.f32 %v3954_v39, %v3064_v38  ;;  %v3956_v60 = vpop.eup %3955  ;;  %vm3071_vm8 = vweird.f32 %v3954_v39 }
 0x4d3   :  { %v3034_v4 = vsel %vm3033_vm4, %v3950_v45, %v3030_v53  ;;  %vm3072_vm10 = vmor %vm3070_vm9, %vm3071_vm8 }
 0x4d4   :  { %v3039_v9 = vsel %vm3036_vm6, %v3038_v59, %v3034_v4  ;;  %v3053_v12 = vsel %vm3052_vm5, %v3952_v13, %v3049_v3  ;;  %v3067_v57 = vsub.f32 1.0, %v3066_v30 }
 0x4d5   :  { %v3058_v44 = vsel %vm3055_vm7, %v3057_v7, %v3053_v12  ;;  %v3081_v47 = vmul.f32 %v3956_v60, %v3039_v9 }
 0x4d6   :  { %v3080_v42 = vmul.f32 %v3058_v44, %v7644_v46  ;;  %v3068_v19 = vmul.f32 %v3954_v39, %v3067_v57 }
 0x4d7   :  { %v2955_v55 = vpop.f32.mrf.mxu0  ;;  %v2975_v56 = vpop.f32.mrf.mxu1 }
 0x4d8   :  { %v6697_v50 = vadd.f32 %v3081_v47, %v3080_v42  ;;  %v3018_v10 = vadd.f32 %v3723_v58, %v2955_v55  ;;  %v3019_v27 = vadd.f32 %v3724_v0, %v2975_v56  ;;  %v3069_v24 = vadd.f32 %v3954_v39, %v3068_v19  ;;  %v3736_v56 = vld [vmem:[%s6748_s0 + $0xe8] sm:$0xff] }
 0x4da   :  { %3957 = vtanh.f32 %v6697_v50  ;;  %v3730_v11 = vmul.f32 -1.442695, %v3018_v10  ;;  %v3731_v16 = vmul.f32 -1.442695, %v3019_v27  ;;  %v3073_v21 = vsel %vm3072_vm10, %v3954_v39, %v3069_v24 }
 0x4db   :  { %v3078_v1 = vsel %vm3075_vm11, %v3077_v62, %v3073_v21 }
 0x4dc   :  { %3959 = vpow2.f32 %v3730_v11 }
 0x4dd   :  { %3961 = vpow2.f32 %v3731_v16 }
 0x4de   :  { %v3015_v37 = vpop.f32.mrf.mxu3  ;;  %v2995_v41 = vpop.f32.mrf.mxu2 }
 0x4df   :  { %v3021_v8 = vadd.f32 %v3726_v18, %v3015_v37  ;;  %v3020_v34 = vadd.f32 %v3725_v33, %v2995_v41 }
 0x4e0   :  { %v3958_v14 = vpop.eup %3957 }
 0x4e1   :  { %v3732_v40 = vmul.f32 -1.442695, %v3021_v8  ;;  %v3084_v26 = vmul.f32 %v3958_v14, %v3078_v1 }
 0x4e2   :  { %v3960_v15 = vpop.eup %3959 }
 0x4e3   :  { %v3962_v6 = vpop.eup %3961  ;;  %v3088_v35 = vadd.f32 1.0, %v3960_v15  ;;  %3963 = vpow2.f32 %v3732_v40  ;;  %3733 = vst [vmem:[%s6752_s4 + $0x30] sm:$0xff] %v3084_v26  ;;  %3237 = vmatmul.f32.vlgmr.msra.gmra.mxu0 %v3084_v26  ;;  %3257 = vmatmul.f32.vlgmr.msra.gmra.mxu1 %v3084_v26  ;;  %v3737_v40 = vld [vmem:[%s6748_s0 + $0xf0] sm:$0xff] }
 0x4e4   :  { %v3107_v2 = vadd.f32 1.0, %v3962_v6  ;;  %3277 = vmatmul.f32.vlgmr.msra.gmra.mxu2 %v3084_v26  ;;  %3297 = vmatmul.f32.vlgmr.msra.gmra.mxu3 %v3084_v26 }
 0x4e5   :  { %3965 = vrcp.f32 %v3088_v35  ;;  %v3100_v13 = vand.u32 2147483648, %v3088_v35  ;;  %v3098_v5 = vand.u32 2147483647, %v3088_v35  ;;  %vm3094_vm14 = vweird.f32 %v3088_v35 }
 0x4e6   :  { %3967 = vrcp.f32 %v3107_v2  ;;  %v3119_v52 = vand.u32 2147483648, %v3107_v2  ;;  %v3117_v22 = vand.u32 2147483647, %v3107_v2  ;;  %vm3113_vm15 = vweird.f32 %v3107_v2 }
 0x4e7   :  { %v3101_v32 = vor.u32 1.1754944e-38, %v3100_v13  ;;  %vm3099_vm2 = vcmp.eq.f32.partialorder %v3098_v5, 8.507059e+37 }
 0x4e8   :  { %v3120_v39 = vor.u32 1.1754944e-38, %v3119_v52  ;;  %vm3118_vm3 = vcmp.eq.f32.partialorder %v3117_v22, 8.507059e+37 }
 0x4e9   :  { %v3964_v20 = vpop.eup %3963 }
 0x4ea   :  { %v3127_v36 = vadd.f32 1.0, %v3964_v20 }
 0x4eb   :  { %v3966_v23 = vpop.eup %3965 }
 0x4ec   :  { %v3968_v63 = vpop.eup %3967  ;;  %v3090_v31 = vmul.f32 %v3966_v23, %v3088_v35  ;;  %3969 = vrcp.f32 %v3127_v36  ;;  %vm3095_vm12 = vweird.f32 %v3966_v23  ;;  %v3139_v47 = vand.u32 2147483648, %v3127_v36 }
 0x4ed   :  { %v3109_v38 = vmul.f32 %v3968_v63, %v3107_v2  ;;  %3971 = vtanh.f32 %v3020_v34  ;;  %vm3114_vm13 = vweird.f32 %v3968_v63  ;;  %vm3096_vm0 = vmor %vm3094_vm14, %vm3095_vm12  ;;  %vm3133_vm5 = vweird.f32 %v3127_v36 }
 0x4ee   :  { %v3091_v45 = vsub.f32 1.0, %v3090_v31  ;;  %vm3115_vm1 = vmor %vm3113_vm15, %vm3114_vm13  ;;  %v3137_v58 = vand.u32 2147483647, %v3127_v36  ;;  %v3140_v46 = vor.u32 1.1754944e-38, %v3139_v47 }
 0x4ef   :  { %v3110_v49 = vsub.f32 1.0, %v3109_v38 }
 0x4f0   :  { %v3092_v61 = vmul.f32 %v3966_v23, %v3091_v45  ;;  %vm3138_vm7 = vcmp.eq.f32.partialorder %v3137_v58, 8.507059e+37 }
 0x4f1   :  { %v3111_v54 = vmul.f32 %v3968_v63, %v3110_v49 }
 0x4f2   :  { %v3970_v25 = vpop.eup %3969  ;;  %v3093_v29 = vadd.f32 %v3966_v23, %v3092_v61 }
 0x4f3   :  { %v3112_v28 = vadd.f32 %v3968_v63, %v3111_v54  ;;  %v3129_v48 = vmul.f32 %v3970_v25, %v3127_v36  ;;  %v3972_v59 = vpop.eup %3971  ;;  %vm3134_vm4 = vweird.f32 %v3970_v25 }
 0x4f4   :  { %v3097_v53 = vsel %vm3096_vm0, %v3966_v23, %v3093_v29  ;;  %vm3135_vm6 = vmor %vm3133_vm5, %vm3134_vm4 }
 0x4f5   :  { %v3102_v3 = vsel %vm3099_vm2, %v3101_v32, %v3097_v53  ;;  %v3116_v30 = vsel %vm3115_vm1, %v3968_v63, %v3112_v28  ;;  %v3130_v7 = vsub.f32 1.0, %v3129_v48 }
 0x4f6   :  { %v3121_v4 = vsel %vm3118_vm3, %v3120_v39, %v3116_v30  ;;  %v3144_v60 = vmul.f32 %v3972_v59, %v3102_v3  ;;  %v3305_v59 = vld [vmem:[%s6749_s1] sm:$0xff]  ;;  %v3306_v3 = vld [vmem:[%s6749_s1 + $0x8] sm:$0xff] }
 0x4f7   :  { %v3143_v9 = vmul.f32 %v3121_v4, %v6568_v43  ;;  %v3131_v12 = vmul.f32 %v3970_v25, %v3130_v7  ;;  %v3735_v43 = vld [vmem:[%s6748_s0 + $0xe0] sm:$0xff] }
 0x4f9   :  { %v6710_v57 = vadd.f32 %v3144_v60, %v3143_v9  ;;  %v3132_v44 = vadd.f32 %v3970_v25, %v3131_v12 }
 0x4fb   :  { %3973 = vtanh.f32 %v6710_v57  ;;  %v3136_v0 = vsel %vm3135_vm6, %v3970_v25, %v3132_v44 }
 0x4fc   :  { %v3141_v19 = vsel %vm3138_vm7, %v3140_v46, %v3136_v0 }
 0x501   :  { %v3974_v42 = vpop.eup %3973 }
 0x502   :  { %v3147_v55 = vmul.f32 %v3974_v42, %v3141_v19 }
 0x504   :  { %3734 = vst [vmem:[%s6753_s5 + $0x8] sm:$0xff] %v3147_v55  ;;  %3389 = vmatmul.f32.vlgmr.msrb.gmra.mxu0 %v3147_v55  ;;  %3409 = vmatmul.f32.vlgmr.msrb.gmra.mxu1 %v3147_v55 }
 0x505   :  { %3429 = vmatmul.f32.vlgmr.msrb.gmra.mxu2 %v3147_v55  ;;  %3449 = vmatmul.f32.vlgmr.msrb.gmra.mxu3 %v3147_v55 }
 0x560   :  { %v3238_v10 = vpop.f32.mrf.mxu0  ;;  %v3258_v27 = vpop.f32.mrf.mxu1 }
 0x561   :  { %v3301_v24 = vadd.f32 %v3735_v43, %v3238_v10  ;;  %v3302_v51 = vadd.f32 %v3736_v56, %v3258_v27 }
 0x563   :  { %v3739_v11 = vmul.f32 -1.442695, %v3301_v24  ;;  %v3740_v16 = vmul.f32 -1.442695, %v3302_v51 }
 0x565   :  { %3975 = vpow2.f32 %v3739_v11 }
 0x566   :  { %3977 = vpow2.f32 %v3740_v16 }
 0x567   :  { %v3298_v18 = vpop.f32.mrf.mxu3  ;;  %v3278_v26 = vpop.f32.mrf.mxu2 }
 0x568   :  { %v3304_v21 = vadd.f32 %v3738_v17, %v3298_v18  ;;  %v3303_v2 = vadd.f32 %v3737_v40, %v3278_v26 }
 0x56a   :  { %v3741_v62 = vmul.f32 -1.442695, %v3304_v21  ;;  %v3307_v21 = vld [vmem:[%s6749_s1 + $0x10] sm:$0xff] }
 0x56b   :  { %v3976_v37 = vpop.eup %3975 }
 0x56c   :  { %v3978_v8 = vpop.eup %3977  ;;  %v3460_v14 = vadd.f32 1.0, %v3976_v37  ;;  %3979 = vpow2.f32 %v3741_v62 }
 0x56d   :  { %v3479_v1 = vadd.f32 1.0, %v3978_v8 }
 0x56e   :  { %3981 = vrcp.f32 %v3460_v14  ;;  %v3472_v34 = vand.u32 2147483648, %v3460_v14  ;;  %v3470_v38 = vand.u32 2147483647, %v3460_v14  ;;  %vm3466_vm10 = vweird.f32 %v3460_v14 }
 0x56f   :  { %3983 = vrcp.f32 %v3479_v1  ;;  %v3491_v63 = vand.u32 2147483648, %v3479_v1  ;;  %v3489_v49 = vand.u32 2147483647, %v3479_v1  ;;  %vm3485_vm11 = vweird.f32 %v3479_v1 }
 0x570   :  { %v3473_v61 = vor.u32 1.1754944e-38, %v3472_v34  ;;  %vm3471_vm14 = vcmp.eq.f32.partialorder %v3470_v38, 8.507059e+37 }
 0x571   :  { %v3492_v22 = vor.u32 1.1754944e-38, %v3491_v63  ;;  %vm3490_vm15 = vcmp.eq.f32.partialorder %v3489_v49, 8.507059e+37 }
 0x572   :  { %v3980_v15 = vpop.eup %3979 }
 0x573   :  { %v3499_v6 = vadd.f32 1.0, %v3980_v15 }
 0x574   :  { %v3982_v35 = vpop.eup %3981 }
 0x575   :  { %v3984_v33 = vpop.eup %3983  ;;  %v3462_v41 = vmul.f32 %v3982_v35, %v3460_v14  ;;  %3985 = vrcp.f32 %v3499_v6  ;;  %vm3467_vm8 = vweird.f32 %v3982_v35  ;;  %v3511_v58 = vand.u32 2147483648, %v3499_v6 }
 0x576   :  { %v3481_v20 = vmul.f32 %v3984_v33, %v3479_v1  ;;  %3987 = vtanh.f32 %v3303_v2  ;;  %vm3486_vm9 = vweird.f32 %v3984_v33  ;;  %vm3468_vm12 = vmor %vm3466_vm10, %vm3467_vm8  ;;  %vm3505_vm1 = vweird.f32 %v3499_v6 }
 0x577   :  { %v3463_v36 = vsub.f32 1.0, %v3462_v41  ;;  %vm3487_vm13 = vmor %vm3485_vm11, %vm3486_vm9  ;;  %v3509_v42 = vand.u32 2147483647, %v3499_v6  ;;  %v3512_v55 = vor.u32 1.1754944e-38, %v3511_v58 }
 0x578   :  { %v3482_v23 = vsub.f32 1.0, %v3481_v20 }
 0x579   :  { %v3464_v31 = vmul.f32 %v3982_v35, %v3463_v36  ;;  %vm3510_vm3 = vcmp.eq.f32.partialorder %v3509_v42, 8.507059e+37 }
 0x57a   :  { %v3483_v45 = vmul.f32 %v3984_v33, %v3482_v23 }
 0x57b   :  { %v3986_v13 = vpop.eup %3985  ;;  %v3465_v52 = vadd.f32 %v3982_v35, %v3464_v31 }
 0x57c   :  { %v3484_v5 = vadd.f32 %v3984_v33, %v3483_v45  ;;  %v3501_v54 = vmul.f32 %v3986_v13, %v3499_v6  ;;  %v3988_v29 = vpop.eup %3987  ;;  %vm3506_vm0 = vweird.f32 %v3986_v13 }
 0x57d   :  { %v3469_v25 = vsel %vm3468_vm12, %v3982_v35, %v3465_v52  ;;  %vm3507_vm2 = vmor %vm3505_vm1, %vm3506_vm0 }
 0x57e   :  { %v3474_v32 = vsel %vm3471_vm14, %v3473_v61, %v3469_v25  ;;  %v3488_v28 = vsel %vm3487_vm13, %v3984_v33, %v3484_v5  ;;  %v3502_v48 = vsub.f32 1.0, %v3501_v54 }
 0x57f   :  { %v3493_v39 = vsel %vm3490_vm15, %v3492_v22, %v3488_v28  ;;  %v3516_v53 = vmul.f32 %v3988_v29, %v3474_v32 }
 0x580   :  { %v3515_v30 = vmul.f32 %v3493_v39, %v6697_v50  ;;  %v3503_v7 = vmul.f32 %v3986_v13, %v3502_v48  ;;  %v3308_v50 = vld [vmem:[%s6749_s1 + $0x18] sm:$0xff] }
 0x581   :  { %v3390_v4 = vpop.f32.mrf.mxu0  ;;  %v3410_v60 = vpop.f32.mrf.mxu1 }
 0x582   :  { %v3517_v9 = vadd.f32 %v3516_v53, %v3515_v30  ;;  %v3453_v12 = vadd.f32 %v3390_v4, %v3305_v59  ;;  %v3454_v44 = vadd.f32 %v3410_v60, %v3306_v3  ;;  %v3504_v47 = vadd.f32 %v3986_v13, %v3503_v7 }
 0x584   :  { %3989 = vtanh.f32 %v3517_v9  ;;  %v3742_v0 = vmul.f32 -1.442695, %v3453_v12  ;;  %v3743_v46 = vmul.f32 -1.442695, %v3454_v44  ;;  %v3508_v19 = vsel %vm3507_vm2, %v3986_v13, %v3504_v47 }
 0x585   :  { %v3513_v27 = vsel %vm3510_vm3, %v3512_v55, %v3508_v19 }
 0x586   :  { %3991 = vpow2.f32 %v3742_v0 }
 0x587   :  { %3993 = vpow2.f32 %v3743_v46 }
 0x588   :  { %v3450_v43 = vpop.f32.mrf.mxu3  ;;  %v3430_v62 = vpop.f32.mrf.mxu2 }
 0x589   :  { %v3456_v56 = vadd.f32 %v3450_v43, %v3308_v50  ;;  %v3455_v1 = vadd.f32 %v3430_v62, %v3307_v21 }
 0x58a   :  { %v3990_v10 = vpop.eup %3989 }
 0x58b   :  { %v3519_v24 = vmul.f32 %v3990_v10, %v3513_v27  ;;  %v3744_v51 = vmul.f32 -1.442695, %v3456_v56 }
 0x58c   :  { %v3992_v11 = vpop.eup %3991 }
 0x58d   :  { %v3994_v16 = vpop.eup %3993  ;;  %3745 = vst [vmem:[%s6752_s4 + $0x38] sm:$0xff] %v3519_v24  ;;  %v3523_v17 = vadd.f32 1.0, %v3992_v11  ;;  %3995 = vpow2.f32 %v3744_v51 }
 0x58e   :  { %v3542_v18 = vadd.f32 1.0, %v3994_v16 }
 0x58f   :  { %3997 = vrcp.f32 %v3523_v17  ;;  %v3535_v2 = vand.u32 2147483648, %v3523_v17  ;;  %v3533_v20 = vand.u32 2147483647, %v3523_v17  ;;  %vm3529_vm6 = vweird.f32 %v3523_v17 }
 0x590   :  { %3999 = vrcp.f32 %v3542_v18  ;;  %v3554_v33 = vand.u32 2147483648, %v3542_v18  ;;  %v3552_v23 = vand.u32 2147483647, %v3542_v18  ;;  %vm3548_vm7 = vweird.f32 %v3542_v18 }
 0x591   :  { %v3536_v31 = vor.u32 1.1754944e-38, %v3535_v2  ;;  %vm3534_vm10 = vcmp.eq.f32.partialorder %v3533_v20, 8.507059e+37 }
 0x592   :  { %v3555_v49 = vor.u32 1.1754944e-38, %v3554_v33  ;;  %vm3553_vm11 = vcmp.eq.f32.partialorder %v3552_v23, 8.507059e+37 }
 0x593   :  { %v3996_v37 = vpop.eup %3995 }
 0x594   :  { %v3562_v8 = vadd.f32 1.0, %v3996_v37 }
 0x595   :  { %v3998_v14 = vpop.eup %3997 }
 0x596   :  { %v4000_v40 = vpop.eup %3999  ;;  %v3525_v26 = vmul.f32 %v3998_v14, %v3523_v17  ;;  %4001 = vrcp.f32 %v3562_v8  ;;  %vm3530_vm4 = vweird.f32 %v3998_v14  ;;  %v3574_v39 = vand.u32 2147483648, %v3562_v8 }
 0x597   :  { %v3544_v15 = vmul.f32 %v4000_v40, %v3542_v18  ;;  %4003 = vtanh.f32 %v3455_v1  ;;  %vm3549_vm5 = vweird.f32 %v4000_v40  ;;  %vm3531_vm8 = vmor %vm3529_vm6, %vm3530_vm4  ;;  %vm3568_vm13 = vweird.f32 %v3562_v8 }
 0x598   :  { %v3526_v6 = vsub.f32 1.0, %v3525_v26  ;;  %vm3550_vm9 = vmor %vm3548_vm7, %vm3549_vm5  ;;  %v3572_v53 = vand.u32 2147483647, %v3562_v8  ;;  %v3575_v3 = vor.u32 1.1754944e-38, %v3574_v39 }
 0x599   :  { %v3545_v35 = vsub.f32 1.0, %v3544_v15 }
 0x59a   :  { %v3527_v41 = vmul.f32 %v3998_v14, %v3526_v6  ;;  %vm3573_vm15 = vcmp.eq.f32.partialorder %v3572_v53, 8.507059e+37 }
 0x59b   :  { %v3546_v36 = vmul.f32 %v4000_v40, %v3545_v35 }
 0x59c   :  { %v4002_v34 = vpop.eup %4001  ;;  %v3528_v63 = vadd.f32 %v3998_v14, %v3527_v41 }
 0x59d   :  { %v3547_v38 = vadd.f32 %v4000_v40, %v3546_v36  ;;  %v3564_v45 = vmul.f32 %v4002_v34, %v3562_v8  ;;  %v4004_v52 = vpop.eup %4003  ;;  %vm3569_vm12 = vweird.f32 %v4002_v34 }
 0x59e   :  { %v3532_v13 = vsel %vm3531_vm8, %v3998_v14, %v3528_v63  ;;  %vm3570_vm14 = vmor %vm3568_vm13, %vm3569_vm12 }
 0x59f   :  { %v3537_v61 = vsel %vm3534_vm10, %v3536_v31, %v3532_v13  ;;  %v3551_v5 = vsel %vm3550_vm9, %v4000_v40, %v3547_v38  ;;  %v3565_v54 = vsub.f32 1.0, %v3564_v45 }
 0x5a0   :  { %v3556_v22 = vsel %vm3553_vm11, %v3555_v49, %v3551_v5  ;;  %v3579_v25 = vmul.f32 %v4004_v52, %v3537_v61 }
 0x5a1   :  { %v3578_v29 = vmul.f32 %v3556_v22, %v6710_v57  ;;  %v3566_v32 = vmul.f32 %v4002_v34, %v3565_v54 }
 0x5a3   :  { %v3580_v28 = vadd.f32 %v3579_v25, %v3578_v29  ;;  %v3567_v48 = vadd.f32 %v4002_v34, %v3566_v32 }
 0x5a5   :  { %4005 = vtanh.f32 %v3580_v28  ;;  %v3571_v59 = vsel %vm3570_vm14, %v4002_v34, %v3567_v48 }
 0x5a6   :  { %v3576_v7 = vsel %vm3573_vm15, %v3575_v3, %v3571_v59 }
 0x5ab   :  { %v4006_v30 = vpop.eup %4005 }
 0x5ac   :  { %v3582_v4 = vmul.f32 %v4006_v30, %v3576_v7 }
 0x5ae   :  { %3585 = vst [vmem:[%s6753_s5] sm:$0xff] %v3582_v4 }
 0x5af   :  { %3612 = vsyncpa [#allocation7], 1 }
 0x5b0   :  { %3613 = vsyncpa [#allocation9], 1 }

</bundles_post_ra>
